<compile_context>
chip_gen: v7x
topology: tpu7x:2x2x1
jax: 0.10.0
libtpu: 0.0.40
codegen_flags: <defaults>
</compile_context>

<pallas_src>
import functools
import numpy as np

import jax
import jax.numpy as jnp
from jax.experimental import pallas as pl
from jax.experimental.pallas import tpu as pltpu  # noqa: F401  (TPU backend assumed)

# ---------------- hyper-parameters (small, consistent with the module __init__) -------------
D_MODEL       = 32    # ATTENTION_HIDDEN_SIZE
N_LAYERS      = 1     # NUM_LAYERS
N_HEADS       = 2     # NUM_HEADS
D_HIDDEN      = 64    # DIM_FF
MAX_SEQ_LEN   = 8     # MAX_SEQ_LEN
D_EMBD_MELODY = 16    # metadata['d_embd_melody']
D_EMBD_STYLE  = 12    # metadata['d_embd_style']
D_EMBD_PERF   = 24    # metadata['d_embd_performance']
BATCH         = 2
HEAD_DIM      = D_MODEL // N_HEADS
ATTN_SCALE    = 1.0 / float(np.sqrt(HEAD_DIM))


# ---------------------------------- fused forward kernel ------------------------------------
def _fused_forward_kernel(treedef, n_params, B, S, *refs):
    """Single fused kernel: whole MusicTransformerAutoencoder forward, all VMEM-resident."""
    mel_ref, sty_ref, perf_ref, dec_ref = refs[0:4]
    param_refs = refs[4:4 + n_params]
    out_ref = refs[4 + n_params]
    p = jax.tree_util.tree_unflatten(treedef, list(param_refs))

    D = D_MODEL

    # Per-head lane masks (avoid lane-dim slicing / reshape / transpose inside the kernel).
    lane = jax.lax.broadcasted_iota(jnp.int32, (1, D), 1)
    head_masks = [((lane >= h * HEAD_DIM) & (lane < (h + 1) * HEAD_DIM)).astype(jnp.float32)
                  for h in range(N_HEADS)]

    def linear(x, lp, relu=False):
        y = jnp.dot(x, lp["w"][...], preferred_element_type=jnp.float32) + lp["b"][...]
        return jnp.maximum(y, 0.0) if relu else y

    def layer_norm(x, lp):
        mu = jnp.mean(x, axis=-1, keepdims=True)
        var = jnp.mean((x - mu) ** 2, axis=-1, keepdims=True)
        return (x - mu) * jax.lax.rsqrt(var + 1e-5) * lp["g"][...] + lp["b"][...]

    def mha(x_q, x_kv, ap, mask):
        """Multi-head attention; heads selected via lane masks, merged via summation."""
        q = linear(x_q, ap["q"])    # (B*S, D)
        k = linear(x_kv, ap["k"])   # (B*S, D)
        v = linear(x_kv, ap["v"])   # (B*S, D)
        rows = []
        for b in range(B):
            qb = q[b * S:(b + 1) * S, :]
            kb = k[b * S:(b + 1) * S, :]
            vb = v[b * S:(b + 1) * S, :]
            ob = jnp.zeros((S, D), jnp.float32)
            for hm in head_masks:
                # (q ⊙ m_h) k^T == q_h k_h^T  (other lanes contribute zero)
                s = jax.lax.dot_general(qb * hm, kb, (((1,), (1,)), ((), ())),
                                        preferred_element_type=jnp.float32) * ATTN_SCALE
                if mask is not None:
                    s = s + mask
                mrow = jnp.max(s, axis=-1, keepdims=True)
                e = jnp.exp(s - mrow)
                pr = e / jnp.sum(e, axis=-1, keepdims=True)
                # p_h @ (v ⊙ m_h) lands only on head-h lanes; summing heads == concat of heads.
                ob = ob + jnp.dot(pr, vb * hm, preferred_element_type=jnp.float32)
            rows.append(ob)
        o = jnp.concatenate(rows, axis=0) if B > 1 else rows[0]
        return linear(o, ap["o"])

    def encoder_layer(x, lp):
        a = mha(x, x, lp["attn"], None)
        x = layer_norm(x + a, lp["ln1"])
        f = linear(x, lp["ff1"], relu=True)
        f = linear(f, lp["ff2"])
        return layer_norm(x + f, lp["ln2"])

    def decoder_layer(x, mem, lp, self_mask):
        a = mha(x, x, lp["self_attn"], self_mask)
        x = layer_norm(x + a, lp["ln1"])
        a = mha(x, mem, lp["cross_attn"], None)
        x = layer_norm(x + a, lp["ln2"])
        f = linear(x, lp["ff1"], relu=True)
        f = linear(f, lp["ff2"])
        return layer_norm(x + f, lp["ln3"])

    # --- token encoders + positional encoding (dropout is identity in eval) ---
    pe = p["pe"][...]                                            # (S, D)
    pe_full = jnp.concatenate([pe for _ in range(B)], axis=0) if B > 1 else pe  # (B*S, D)

    streams = []
    for x_ref, tp in zip((mel_ref, sty_ref, perf_ref, dec_ref), p["tok"]):
        streams.append(linear(x_ref[...], tp) + pe_full)

    # --- three transformer encoders on (melody, style, performance) ---
    # TODO(synk): on v7x the three independent encoder streams could be split across the two
    # TensorCores (grid/core_map over streams); no benefit on single-TC v5e/v6e, so keep fused.
    for i in range(3):
        x = streams[i]
        for lp in p["encoders"][i]:
            x = encoder_layer(x, lp)
        streams[i] = x

    # --- mean-pool performance stream over seq (keepdim) and broadcast back over seq ---
    pooled_rows = []
    for b in range(B):
        pb = jnp.mean(streams[2][b * S:(b + 1) * S, :], axis=0, keepdims=True)   # (1, D)
        pooled_rows.append(pb + jnp.zeros((S, D), jnp.float32))                  # (S, D)
    pooled_full = jnp.concatenate(pooled_rows, axis=0) if B > 1 else pooled_rows[0]

    # alpha == 1 (default) -> second_perf blending branch inactive, matching the reference.
    encoder_output = streams[0] + streams[1] + pooled_full

    # --- decoder: causal self-attn + cross-attn to encoder_output ---
    cmask = p["causal_mask"][...]
    x = streams[3]
    for lp in p["decoder"]:
        x = decoder_layer(x, encoder_output, lp, cmask)

    # --- output head: LayerNorm -> Linear(d_model -> d_embd_performance) -> Softmax(dim=-1) ---
    y = linear(layer_norm(x, p["out_ln"]), p["out_proj"])
    mrow = jnp.max(y, axis=-1, keepdims=True)
    e = jnp.exp(y - mrow)
    out_ref[...] = e / jnp.sum(e, axis=-1, keepdims=True)


# ---------------------------------- wrapper (one pallas_call) -------------------------------
def music_transformer_forward(params, melody, style, performance, decoder_input):
    B, S, _ = melody.shape
    # We run with seq == max_seq_len, so the pad / key_padding_mask branch is inactive.
    # TODO(synk): padding + key_padding_mask branch (seq < max_seq_len) not implemented.
    flat, treedef = jax.tree_util.tree_flatten(params)
    n_params = len(flat)

    kernel = functools.partial(_fused_forward_kernel, treedef, n_params, B, S)

    out2d = pl.pallas_call(
        kernel,
        out_shape=jax.ShapeDtypeStruct((B * S, D_EMBD_PERF), jnp.float32),
    )(
        melody.reshape(B * S, -1),
        style.reshape(B * S, -1),
        performance.reshape(B * S, -1),
        decoder_input.reshape(B * S, -1),
        *flat,
    )
    return out2d.reshape(B, S, D_EMBD_PERF)


# ---------------------------------- parameter init ------------------------------------------
def sinusoidal_pe(max_len, d_model):
    pos = np.arange(max_len)[:, None].astype(np.float32)
    div = np.exp(np.arange(0, d_model, 2).astype(np.float32) * (-np.log(10000.0) / d_model))
    pe = np.zeros((max_len, d_model), np.float32)
    pe[:, 0::2] = np.sin(pos * div)
    pe[:, 1::2] = np.cos(pos * div)
    return jnp.asarray(pe)


def _init_linear(key, d_in, d_out, scale=0.05):
    return {"w": scale * jax.random.normal(key, (d_in, d_out), jnp.float32),
            "b": jnp.zeros((1, d_out), jnp.float32)}


def _init_ln(d):
    return {"g": jnp.ones((1, d), jnp.float32), "b": jnp.zeros((1, d), jnp.float32)}


def _init_mha(key, d):
    kq, kk, kv, ko = jax.random.split(key, 4)
    return {"q": _init_linear(kq, d, d), "k": _init_linear(kk, d, d),
            "v": _init_linear(kv, d, d), "o": _init_linear(ko, d, d)}


def _init_encoder_layer(key, d, dff):
    ka, k1, k2 = jax.random.split(key, 3)
    return {"attn": _init_mha(ka, d), "ln1": _init_ln(d),
            "ff1": _init_linear(k1, d, dff), "ff2": _init_linear(k2, dff, d),
            "ln2": _init_ln(d)}


def _init_decoder_layer(key, d, dff):
    ka, kc, k1, k2 = jax.random.split(key, 4)
    return {"self_attn": _init_mha(ka, d), "ln1": _init_ln(d),
            "cross_attn": _init_mha(kc, d), "ln2": _init_ln(d),
            "ff1": _init_linear(k1, d, dff), "ff2": _init_linear(k2, dff, d),
            "ln3": _init_ln(d)}


def causal_mask(size):
    # torch.triu(ones, 1).masked_fill(==1, -inf): use a large finite negative for robustness.
    m = np.triu(np.ones((size, size), np.float32), 1)
    return jnp.asarray(np.where(m == 1.0, -1e9, 0.0).astype(np.float32))


def init_params(key):
    keys = jax.random.split(key, 10)
    tok_dims = (D_EMBD_MELODY, D_EMBD_STYLE, D_EMBD_PERF, D_EMBD_PERF)
    return {
        "tok": [_init_linear(keys[i], d, D_MODEL) for i, d in enumerate(tok_dims)],
        "pe": sinusoidal_pe(MAX_SEQ_LEN, D_MODEL),
        "encoders": [
            [_init_encoder_layer(jax.random.fold_in(keys[4 + e], l), D_MODEL, D_HIDDEN)
             for l in range(N_LAYERS)]
            for e in range(3)
        ],
        "decoder": [_init_decoder_layer(jax.random.fold_in(keys[8], l), D_MODEL, D_HIDDEN)
                    for l in range(N_LAYERS)],
        "out_ln": _init_ln(D_MODEL),
        "out_proj": _init_linear(keys[9], D_MODEL, D_EMBD_PERF),
        "causal_mask": causal_mask(MAX_SEQ_LEN),
    }


# --------------------------------------- main ------------------------------------------------
if __name__ == "__main__":
    key = jax.random.PRNGKey(0)
    km, ks, kp, kd, kw = jax.random.split(key, 5)
    melody        = jax.random.normal(km, (BATCH, MAX_SEQ_LEN, D_EMBD_MELODY), jnp.float32)
    style         = jax.random.normal(ks, (BATCH, MAX_SEQ_LEN, D_EMBD_STYLE), jnp.float32)
    performance   = jax.random.normal(kp, (BATCH, MAX_SEQ_LEN, D_EMBD_PERF), jnp.float32)
    decoder_input = jax.random.normal(kd, (BATCH, MAX_SEQ_LEN, D_EMBD_PERF), jnp.float32)

    params = init_params(kw)

    out = jax.jit(music_transformer_forward)(params, melody, style, performance, decoder_input)
    out = jax.block_until_ready(out)

    assert out.shape == (BATCH, MAX_SEQ_LEN, D_EMBD_PERF)
    assert bool(jnp.all(jnp.isfinite(out)))
    # final Softmax(dim=-1): rows must sum to 1
    assert bool(jnp.allclose(jnp.sum(out, axis=-1), 1.0, atol=1e-4))
    print("KERNEL_OK")
</pallas_src>

<mosaic_0001>
module attributes {stable_mosaic.version = 11 : i64} {
  func.func @_fused_forward_kernel(%arg0: memref<16x16xf32, #tpu.memory_space<vmem>>, %arg1: memref<16x12xf32, #tpu.memory_space<vmem>>, %arg2: memref<16x24xf32, #tpu.memory_space<vmem>>, %arg3: memref<16x24xf32, #tpu.memory_space<vmem>>, %arg4: memref<8x8xf32, #tpu.memory_space<vmem>>, %arg5: memref<1x32xf32, #tpu.memory_space<vmem>>, %arg6: memref<32x32xf32, #tpu.memory_space<vmem>>, %arg7: memref<1x32xf32, #tpu.memory_space<vmem>>, %arg8: memref<32x32xf32, #tpu.memory_space<vmem>>, %arg9: memref<1x32xf32, #tpu.memory_space<vmem>>, %arg10: memref<32x32xf32, #tpu.memory_space<vmem>>, %arg11: memref<1x32xf32, #tpu.memory_space<vmem>>, %arg12: memref<32x32xf32, #tpu.memory_space<vmem>>, %arg13: memref<1x64xf32, #tpu.memory_space<vmem>>, %arg14: memref<32x64xf32, #tpu.memory_space<vmem>>, %arg15: memref<1x32xf32, #tpu.memory_space<vmem>>, %arg16: memref<64x32xf32, #tpu.memory_space<vmem>>, %arg17: memref<1x32xf32, #tpu.memory_space<vmem>>, %arg18: memref<1x32xf32, #tpu.memory_space<vmem>>, %arg19: memref<1x32xf32, #tpu.memory_space<vmem>>, %arg20: memref<1x32xf32, #tpu.memory_space<vmem>>, %arg21: memref<1x32xf32, #tpu.memory_space<vmem>>, %arg22: memref<1x32xf32, #tpu.memory_space<vmem>>, %arg23: memref<1x32xf32, #tpu.memory_space<vmem>>, %arg24: memref<32x32xf32, #tpu.memory_space<vmem>>, %arg25: memref<1x32xf32, #tpu.memory_space<vmem>>, %arg26: memref<32x32xf32, #tpu.memory_space<vmem>>, %arg27: memref<1x32xf32, #tpu.memory_space<vmem>>, %arg28: memref<32x32xf32, #tpu.memory_space<vmem>>, %arg29: memref<1x32xf32, #tpu.memory_space<vmem>>, %arg30: memref<32x32xf32, #tpu.memory_space<vmem>>, %arg31: memref<1x32xf32, #tpu.memory_space<vmem>>, %arg32: memref<32x32xf32, #tpu.memory_space<vmem>>, %arg33: memref<1x32xf32, #tpu.memory_space<vmem>>, %arg34: memref<32x32xf32, #tpu.memory_space<vmem>>, %arg35: memref<1x32xf32, #tpu.memory_space<vmem>>, %arg36: memref<32x32xf32, #tpu.memory_space<vmem>>, %arg37: memref<1x32xf32, #tpu.memory_space<vmem>>, %arg38: memref<32x32xf32, #tpu.memory_space<vmem>>, %arg39: memref<1x64xf32, #tpu.memory_space<vmem>>, %arg40: memref<32x64xf32, #tpu.memory_space<vmem>>, %arg41: memref<1x32xf32, #tpu.memory_space<vmem>>, %arg42: memref<64x32xf32, #tpu.memory_space<vmem>>, %arg43: memref<1x32xf32, #tpu.memory_space<vmem>>, %arg44: memref<1x32xf32, #tpu.memory_space<vmem>>, %arg45: memref<1x32xf32, #tpu.memory_space<vmem>>, %arg46: memref<1x32xf32, #tpu.memory_space<vmem>>, %arg47: memref<1x32xf32, #tpu.memory_space<vmem>>, %arg48: memref<32x32xf32, #tpu.memory_space<vmem>>, %arg49: memref<1x32xf32, #tpu.memory_space<vmem>>, %arg50: memref<32x32xf32, #tpu.memory_space<vmem>>, %arg51: memref<1x32xf32, #tpu.memory_space<vmem>>, %arg52: memref<32x32xf32, #tpu.memory_space<vmem>>, %arg53: memref<1x32xf32, #tpu.memory_space<vmem>>, %arg54: memref<32x32xf32, #tpu.memory_space<vmem>>, %arg55: memref<1x64xf32, #tpu.memory_space<vmem>>, %arg56: memref<32x64xf32, #tpu.memory_space<vmem>>, %arg57: memref<1x32xf32, #tpu.memory_space<vmem>>, %arg58: memref<64x32xf32, #tpu.memory_space<vmem>>, %arg59: memref<1x32xf32, #tpu.memory_space<vmem>>, %arg60: memref<1x32xf32, #tpu.memory_space<vmem>>, %arg61: memref<1x32xf32, #tpu.memory_space<vmem>>, %arg62: memref<1x32xf32, #tpu.memory_space<vmem>>, %arg63: memref<1x32xf32, #tpu.memory_space<vmem>>, %arg64: memref<32x32xf32, #tpu.memory_space<vmem>>, %arg65: memref<1x32xf32, #tpu.memory_space<vmem>>, %arg66: memref<32x32xf32, #tpu.memory_space<vmem>>, %arg67: memref<1x32xf32, #tpu.memory_space<vmem>>, %arg68: memref<32x32xf32, #tpu.memory_space<vmem>>, %arg69: memref<1x32xf32, #tpu.memory_space<vmem>>, %arg70: memref<32x32xf32, #tpu.memory_space<vmem>>, %arg71: memref<1x64xf32, #tpu.memory_space<vmem>>, %arg72: memref<32x64xf32, #tpu.memory_space<vmem>>, %arg73: memref<1x32xf32, #tpu.memory_space<vmem>>, %arg74: memref<64x32xf32, #tpu.memory_space<vmem>>, %arg75: memref<1x32xf32, #tpu.memory_space<vmem>>, %arg76: memref<1x32xf32, #tpu.memory_space<vmem>>, %arg77: memref<1x32xf32, #tpu.memory_space<vmem>>, %arg78: memref<1x32xf32, #tpu.memory_space<vmem>>, %arg79: memref<1x32xf32, #tpu.memory_space<vmem>>, %arg80: memref<1x32xf32, #tpu.memory_space<vmem>>, %arg81: memref<1x24xf32, #tpu.memory_space<vmem>>, %arg82: memref<32x24xf32, #tpu.memory_space<vmem>>, %arg83: memref<8x32xf32, #tpu.memory_space<vmem>>, %arg84: memref<1x32xf32, #tpu.memory_space<vmem>>, %arg85: memref<16x32xf32, #tpu.memory_space<vmem>>, %arg86: memref<1x32xf32, #tpu.memory_space<vmem>>, %arg87: memref<12x32xf32, #tpu.memory_space<vmem>>, %arg88: memref<1x32xf32, #tpu.memory_space<vmem>>, %arg89: memref<24x32xf32, #tpu.memory_space<vmem>>, %arg90: memref<1x32xf32, #tpu.memory_space<vmem>>, %arg91: memref<24x32xf32, #tpu.memory_space<vmem>>, %arg92: memref<16x24xf32, #tpu.memory_space<vmem>>) attributes {dimension_semantics = [], scalar_prefetch = 0 : i64, scratch_operands = 0 : i64, tpu.core_type = #tpu.core_type<tc>} {
    %0 = tpu.iota {dimensions = array<i32: 1>} : vector<1x32xi32>
    %c0_i32 = arith.constant 0 : i32
    %1 = vector.broadcast %c0_i32 : i32 to vector<1x32xi32>
    %2 = arith.cmpi sge, %0, %1 : vector<1x32xi32>
    %c16_i32 = arith.constant 16 : i32
    %3 = vector.broadcast %c16_i32 : i32 to vector<1x32xi32>
    %4 = arith.cmpi slt, %0, %3 : vector<1x32xi32>
    %5 = arith.andi %2, %4 : vector<1x32xi1>
    %6 = arith.extui %5 : vector<1x32xi1> to vector<1x32xi32>
    %7 = arith.sitofp %6 : vector<1x32xi32> to vector<1x32xf32>
    %c16_i32_0 = arith.constant 16 : i32
    %8 = vector.broadcast %c16_i32_0 : i32 to vector<1x32xi32>
    %9 = arith.cmpi sge, %0, %8 : vector<1x32xi32>
    %c32_i32 = arith.constant 32 : i32
    %10 = vector.broadcast %c32_i32 : i32 to vector<1x32xi32>
    %11 = arith.cmpi slt, %0, %10 : vector<1x32xi32>
    %12 = arith.andi %9, %11 : vector<1x32xi1>
    %13 = arith.extui %12 : vector<1x32xi1> to vector<1x32xi32>
    %14 = arith.sitofp %13 : vector<1x32xi32> to vector<1x32xf32>
    %c0 = arith.constant 0 : index
    %c0_1 = arith.constant 0 : index
    %15 = vector.load %arg83[%c0, %c0_1] : memref<8x32xf32, #tpu.memory_space<vmem>>, vector<8x32xf32>
    %16 = tpu.concatenate %15, %15 in 0 : vector<8x32xf32>, vector<8x32xf32> -> vector<16x32xf32>
    %c0_2 = arith.constant 0 : index
    %c0_3 = arith.constant 0 : index
    %17 = vector.load %arg0[%c0_2, %c0_3] : memref<16x16xf32, #tpu.memory_space<vmem>>, vector<16x16xf32>
    %c0_4 = arith.constant 0 : index
    %c0_5 = arith.constant 0 : index
    %18 = vector.load %arg85[%c0_4, %c0_5] : memref<16x32xf32, #tpu.memory_space<vmem>>, vector<16x32xf32>
    %cst = arith.constant dense<0.000000e+00> : vector<16x32xf32>
    %19 = tpu.matmul %17, %18, %cst {dimension_numbers = #tpu.dot_dimension_numbers<[1], [0], [0], [1], [0, 0, 1, 1], [], []>} : vector<16x16xf32>, vector<16x32xf32>, vector<16x32xf32> -> vector<16x32xf32>
    %c0_6 = arith.constant 0 : index
    %c0_7 = arith.constant 0 : index
    %20 = vector.load %arg84[%c0_6, %c0_7] : memref<1x32xf32, #tpu.memory_space<vmem>>, vector<1x32xf32>
    %21 = vector.broadcast %20 : vector<1x32xf32> to vector<16x32xf32>
    %22 = arith.addf %19, %21 : vector<16x32xf32>
    %23 = arith.addf %22, %16 : vector<16x32xf32>
    %c0_8 = arith.constant 0 : index
    %c0_9 = arith.constant 0 : index
    %24 = vector.load %arg1[%c0_8, %c0_9] : memref<16x12xf32, #tpu.memory_space<vmem>>, vector<16x12xf32>
    %c0_10 = arith.constant 0 : index
    %c0_11 = arith.constant 0 : index
    %25 = vector.load %arg87[%c0_10, %c0_11] : memref<12x32xf32, #tpu.memory_space<vmem>>, vector<12x32xf32>
    %cst_12 = arith.constant dense<0.000000e+00> : vector<16x32xf32>
    %26 = tpu.matmul %24, %25, %cst_12 {dimension_numbers = #tpu.dot_dimension_numbers<[1], [0], [0], [1], [0, 0, 1, 1], [], []>} : vector<16x12xf32>, vector<12x32xf32>, vector<16x32xf32> -> vector<16x32xf32>
    %c0_13 = arith.constant 0 : index
    %c0_14 = arith.constant 0 : index
    %27 = vector.load %arg86[%c0_13, %c0_14] : memref<1x32xf32, #tpu.memory_space<vmem>>, vector<1x32xf32>
    %28 = vector.broadcast %27 : vector<1x32xf32> to vector<16x32xf32>
    %29 = arith.addf %26, %28 : vector<16x32xf32>
    %30 = arith.addf %29, %16 : vector<16x32xf32>
    %c0_15 = arith.constant 0 : index
    %c0_16 = arith.constant 0 : index
    %31 = vector.load %arg2[%c0_15, %c0_16] : memref<16x24xf32, #tpu.memory_space<vmem>>, vector<16x24xf32>
    %c0_17 = arith.constant 0 : index
    %c0_18 = arith.constant 0 : index
    %32 = vector.load %arg89[%c0_17, %c0_18] : memref<24x32xf32, #tpu.memory_space<vmem>>, vector<24x32xf32>
    %cst_19 = arith.constant dense<0.000000e+00> : vector<16x32xf32>
    %33 = tpu.matmul %31, %32, %cst_19 {dimension_numbers = #tpu.dot_dimension_numbers<[1], [0], [0], [1], [0, 0, 1, 1], [], []>} : vector<16x24xf32>, vector<24x32xf32>, vector<16x32xf32> -> vector<16x32xf32>
    %c0_20 = arith.constant 0 : index
    %c0_21 = arith.constant 0 : index
    %34 = vector.load %arg88[%c0_20, %c0_21] : memref<1x32xf32, #tpu.memory_space<vmem>>, vector<1x32xf32>
    %35 = vector.broadcast %34 : vector<1x32xf32> to vector<16x32xf32>
    %36 = arith.addf %33, %35 : vector<16x32xf32>
    %37 = arith.addf %36, %16 : vector<16x32xf32>
    %c0_22 = arith.constant 0 : index
    %c0_23 = arith.constant 0 : index
    %38 = vector.load %arg3[%c0_22, %c0_23] : memref<16x24xf32, #tpu.memory_space<vmem>>, vector<16x24xf32>
    %c0_24 = arith.constant 0 : index
    %c0_25 = arith.constant 0 : index
    %39 = vector.load %arg91[%c0_24, %c0_25] : memref<24x32xf32, #tpu.memory_space<vmem>>, vector<24x32xf32>
    %cst_26 = arith.constant dense<0.000000e+00> : vector<16x32xf32>
    %40 = tpu.matmul %38, %39, %cst_26 {dimension_numbers = #tpu.dot_dimension_numbers<[1], [0], [0], [1], [0, 0, 1, 1], [], []>} : vector<16x24xf32>, vector<24x32xf32>, vector<16x32xf32> -> vector<16x32xf32>
    %c0_27 = arith.constant 0 : index
    %c0_28 = arith.constant 0 : index
    %41 = vector.load %arg90[%c0_27, %c0_28] : memref<1x32xf32, #tpu.memory_space<vmem>>, vector<1x32xf32>
    %42 = vector.broadcast %41 : vector<1x32xf32> to vector<16x32xf32>
    %43 = arith.addf %40, %42 : vector<16x32xf32>
    %44 = arith.addf %43, %16 : vector<16x32xf32>
    %c0_29 = arith.constant 0 : index
    %c0_30 = arith.constant 0 : index
    %45 = vector.load %arg36[%c0_29, %c0_30] : memref<32x32xf32, #tpu.memory_space<vmem>>, vector<32x32xf32>
    %cst_31 = arith.constant dense<0.000000e+00> : vector<16x32xf32>
    %46 = tpu.matmul %23, %45, %cst_31 {dimension_numbers = #tpu.dot_dimension_numbers<[1], [0], [0], [1], [0, 0, 1, 1], [], []>} : vector<16x32xf32>, vector<32x32xf32>, vector<16x32xf32> -> vector<16x32xf32>
    %c0_32 = arith.constant 0 : index
    %c0_33 = arith.constant 0 : index
    %47 = vector.load %arg35[%c0_32, %c0_33] : memref<1x32xf32, #tpu.memory_space<vmem>>, vector<1x32xf32>
    %48 = vector.broadcast %47 : vector<1x32xf32> to vector<16x32xf32>
    %49 = arith.addf %46, %48 : vector<16x32xf32>
    %c0_34 = arith.constant 0 : index
    %c0_35 = arith.constant 0 : index
    %50 = vector.load %arg32[%c0_34, %c0_35] : memref<32x32xf32, #tpu.memory_space<vmem>>, vector<32x32xf32>
    %cst_36 = arith.constant dense<0.000000e+00> : vector<16x32xf32>
    %51 = tpu.matmul %23, %50, %cst_36 {dimension_numbers = #tpu.dot_dimension_numbers<[1], [0], [0], [1], [0, 0, 1, 1], [], []>} : vector<16x32xf32>, vector<32x32xf32>, vector<16x32xf32> -> vector<16x32xf32>
    %c0_37 = arith.constant 0 : index
    %c0_38 = arith.constant 0 : index
    %52 = vector.load %arg31[%c0_37, %c0_38] : memref<1x32xf32, #tpu.memory_space<vmem>>, vector<1x32xf32>
    %53 = vector.broadcast %52 : vector<1x32xf32> to vector<16x32xf32>
    %54 = arith.addf %51, %53 : vector<16x32xf32>
    %c0_39 = arith.constant 0 : index
    %c0_40 = arith.constant 0 : index
    %55 = vector.load %arg38[%c0_39, %c0_40] : memref<32x32xf32, #tpu.memory_space<vmem>>, vector<32x32xf32>
    %cst_41 = arith.constant dense<0.000000e+00> : vector<16x32xf32>
    %56 = tpu.matmul %23, %55, %cst_41 {dimension_numbers = #tpu.dot_dimension_numbers<[1], [0], [0], [1], [0, 0, 1, 1], [], []>} : vector<16x32xf32>, vector<32x32xf32>, vector<16x32xf32> -> vector<16x32xf32>
    %c0_42 = arith.constant 0 : index
    %c0_43 = arith.constant 0 : index
    %57 = vector.load %arg37[%c0_42, %c0_43] : memref<1x32xf32, #tpu.memory_space<vmem>>, vector<1x32xf32>
    %58 = vector.broadcast %57 : vector<1x32xf32> to vector<16x32xf32>
    %59 = arith.addf %56, %58 : vector<16x32xf32>
    %60 = vector.extract_strided_slice %49 {offsets = [0, 0], sizes = [8, 32], strides = [1, 1]} : vector<16x32xf32> to vector<8x32xf32>
    %61 = vector.extract_strided_slice %54 {offsets = [0, 0], sizes = [8, 32], strides = [1, 1]} : vector<16x32xf32> to vector<8x32xf32>
    %62 = vector.extract_strided_slice %59 {offsets = [0, 0], sizes = [8, 32], strides = [1, 1]} : vector<16x32xf32> to vector<8x32xf32>
    %cst_44 = arith.constant 0.000000e+00 : f32
    %63 = vector.broadcast %cst_44 : f32 to vector<8x32xf32>
    %64 = vector.broadcast %7 : vector<1x32xf32> to vector<8x32xf32>
    %65 = arith.mulf %60, %64 : vector<8x32xf32>
    %cst_45 = arith.constant dense<0.000000e+00> : vector<8x8xf32>
    %66 = tpu.matmul %65, %61, %cst_45 {dimension_numbers = #tpu.dot_dimension_numbers<[1], [1], [0], [0], [0, 0, 1, 0], [], []>} : vector<8x32xf32>, vector<8x32xf32>, vector<8x8xf32> -> vector<8x8xf32>
    %cst_46 = arith.constant 2.500000e-01 : f32
    %67 = vector.broadcast %cst_46 : f32 to vector<8x8xf32>
    %68 = arith.mulf %66, %67 : vector<8x8xf32>
    %cst_47 = arith.constant dense<0xFF800000> : vector<8xf32>
    %69 = vector.multi_reduction <maximumf>, %68, %cst_47 [1] : vector<8x8xf32> to vector<8xf32>
    %70 = vector.shape_cast %69 : vector<8xf32> to vector<8x1xf32>
    %71 = vector.broadcast %70 : vector<8x1xf32> to vector<8x8xf32>
    %72 = arith.subf %68, %71 : vector<8x8xf32>
    %73 = math.exp %72 : vector<8x8xf32>
    %cst_48 = arith.constant dense<0.000000e+00> : vector<8xf32>
    %74 = vector.multi_reduction <add>, %73, %cst_48 [1] : vector<8x8xf32> to vector<8xf32>
    %75 = vector.shape_cast %74 : vector<8xf32> to vector<8x1xf32>
    %76 = vector.broadcast %75 : vector<8x1xf32> to vector<8x8xf32>
    %77 = arith.divf %73, %76 : vector<8x8xf32>
    %78 = vector.broadcast %7 : vector<1x32xf32> to vector<8x32xf32>
    %79 = arith.mulf %62, %78 : vector<8x32xf32>
    %cst_49 = arith.constant dense<0.000000e+00> : vector<8x32xf32>
    %80 = tpu.matmul %77, %79, %cst_49 {dimension_numbers = #tpu.dot_dimension_numbers<[1], [0], [0], [1], [0, 0, 1, 1], [], []>} : vector<8x8xf32>, vector<8x32xf32>, vector<8x32xf32> -> vector<8x32xf32>
    %81 = arith.addf %63, %80 : vector<8x32xf32>
    %82 = vector.broadcast %14 : vector<1x32xf32> to vector<8x32xf32>
    %83 = arith.mulf %60, %82 : vector<8x32xf32>
    %cst_50 = arith.constant dense<0.000000e+00> : vector<8x8xf32>
    %84 = tpu.matmul %83, %61, %cst_50 {dimension_numbers = #tpu.dot_dimension_numbers<[1], [1], [0], [0], [0, 0, 1, 0], [], []>} : vector<8x32xf32>, vector<8x32xf32>, vector<8x8xf32> -> vector<8x8xf32>
    %cst_51 = arith.constant 2.500000e-01 : f32
    %85 = vector.broadcast %cst_51 : f32 to vector<8x8xf32>
    %86 = arith.mulf %84, %85 : vector<8x8xf32>
    %cst_52 = arith.constant dense<0xFF800000> : vector<8xf32>
    %87 = vector.multi_reduction <maximumf>, %86, %cst_52 [1] : vector<8x8xf32> to vector<8xf32>
    %88 = vector.shape_cast %87 : vector<8xf32> to vector<8x1xf32>
    %89 = vector.broadcast %88 : vector<8x1xf32> to vector<8x8xf32>
    %90 = arith.subf %86, %89 : vector<8x8xf32>
    %91 = math.exp %90 : vector<8x8xf32>
    %cst_53 = arith.constant dense<0.000000e+00> : vector<8xf32>
    %92 = vector.multi_reduction <add>, %91, %cst_53 [1] : vector<8x8xf32> to vector<8xf32>
    %93 = vector.shape_cast %92 : vector<8xf32> to vector<8x1xf32>
    %94 = vector.broadcast %93 : vector<8x1xf32> to vector<8x8xf32>
    %95 = arith.divf %91, %94 : vector<8x8xf32>
    %96 = vector.broadcast %14 : vector<1x32xf32> to vector<8x32xf32>
    %97 = arith.mulf %62, %96 : vector<8x32xf32>
    %cst_54 = arith.constant dense<0.000000e+00> : vector<8x32xf32>
    %98 = tpu.matmul %95, %97, %cst_54 {dimension_numbers = #tpu.dot_dimension_numbers<[1], [0], [0], [1], [0, 0, 1, 1], [], []>} : vector<8x8xf32>, vector<8x32xf32>, vector<8x32xf32> -> vector<8x32xf32>
    %99 = arith.addf %81, %98 : vector<8x32xf32>
    %100 = vector.extract_strided_slice %49 {offsets = [8, 0], sizes = [8, 32], strides = [1, 1]} : vector<16x32xf32> to vector<8x32xf32>
    %101 = vector.extract_strided_slice %54 {offsets = [8, 0], sizes = [8, 32], strides = [1, 1]} : vector<16x32xf32> to vector<8x32xf32>
    %102 = vector.extract_strided_slice %59 {offsets = [8, 0], sizes = [8, 32], strides = [1, 1]} : vector<16x32xf32> to vector<8x32xf32>
    %cst_55 = arith.constant 0.000000e+00 : f32
    %103 = vector.broadcast %cst_55 : f32 to vector<8x32xf32>
    %104 = vector.broadcast %7 : vector<1x32xf32> to vector<8x32xf32>
    %105 = arith.mulf %100, %104 : vector<8x32xf32>
    %cst_56 = arith.constant dense<0.000000e+00> : vector<8x8xf32>
    %106 = tpu.matmul %105, %101, %cst_56 {dimension_numbers = #tpu.dot_dimension_numbers<[1], [1], [0], [0], [0, 0, 1, 0], [], []>} : vector<8x32xf32>, vector<8x32xf32>, vector<8x8xf32> -> vector<8x8xf32>
    %cst_57 = arith.constant 2.500000e-01 : f32
    %107 = vector.broadcast %cst_57 : f32 to vector<8x8xf32>
    %108 = arith.mulf %106, %107 : vector<8x8xf32>
    %cst_58 = arith.constant dense<0xFF800000> : vector<8xf32>
    %109 = vector.multi_reduction <maximumf>, %108, %cst_58 [1] : vector<8x8xf32> to vector<8xf32>
    %110 = vector.shape_cast %109 : vector<8xf32> to vector<8x1xf32>
    %111 = vector.broadcast %110 : vector<8x1xf32> to vector<8x8xf32>
    %112 = arith.subf %108, %111 : vector<8x8xf32>
    %113 = math.exp %112 : vector<8x8xf32>
    %cst_59 = arith.constant dense<0.000000e+00> : vector<8xf32>
    %114 = vector.multi_reduction <add>, %113, %cst_59 [1] : vector<8x8xf32> to vector<8xf32>
    %115 = vector.shape_cast %114 : vector<8xf32> to vector<8x1xf32>
    %116 = vector.broadcast %115 : vector<8x1xf32> to vector<8x8xf32>
    %117 = arith.divf %113, %116 : vector<8x8xf32>
    %118 = vector.broadcast %7 : vector<1x32xf32> to vector<8x32xf32>
    %119 = arith.mulf %102, %118 : vector<8x32xf32>
    %cst_60 = arith.constant dense<0.000000e+00> : vector<8x32xf32>
    %120 = tpu.matmul %117, %119, %cst_60 {dimension_numbers = #tpu.dot_dimension_numbers<[1], [0], [0], [1], [0, 0, 1, 1], [], []>} : vector<8x8xf32>, vector<8x32xf32>, vector<8x32xf32> -> vector<8x32xf32>
    %121 = arith.addf %103, %120 : vector<8x32xf32>
    %122 = vector.broadcast %14 : vector<1x32xf32> to vector<8x32xf32>
    %123 = arith.mulf %100, %122 : vector<8x32xf32>
    %cst_61 = arith.constant dense<0.000000e+00> : vector<8x8xf32>
    %124 = tpu.matmul %123, %101, %cst_61 {dimension_numbers = #tpu.dot_dimension_numbers<[1], [1], [0], [0], [0, 0, 1, 0], [], []>} : vector<8x32xf32>, vector<8x32xf32>, vector<8x8xf32> -> vector<8x8xf32>
    %cst_62 = arith.constant 2.500000e-01 : f32
    %125 = vector.broadcast %cst_62 : f32 to vector<8x8xf32>
    %126 = arith.mulf %124, %125 : vector<8x8xf32>
    %cst_63 = arith.constant dense<0xFF800000> : vector<8xf32>
    %127 = vector.multi_reduction <maximumf>, %126, %cst_63 [1] : vector<8x8xf32> to vector<8xf32>
    %128 = vector.shape_cast %127 : vector<8xf32> to vector<8x1xf32>
    %129 = vector.broadcast %128 : vector<8x1xf32> to vector<8x8xf32>
    %130 = arith.subf %126, %129 : vector<8x8xf32>
    %131 = math.exp %130 : vector<8x8xf32>
    %cst_64 = arith.constant dense<0.000000e+00> : vector<8xf32>
    %132 = vector.multi_reduction <add>, %131, %cst_64 [1] : vector<8x8xf32> to vector<8xf32>
    %133 = vector.shape_cast %132 : vector<8xf32> to vector<8x1xf32>
    %134 = vector.broadcast %133 : vector<8x1xf32> to vector<8x8xf32>
    %135 = arith.divf %131, %134 : vector<8x8xf32>
    %136 = vector.broadcast %14 : vector<1x32xf32> to vector<8x32xf32>
    %137 = arith.mulf %102, %136 : vector<8x32xf32>
    %cst_65 = arith.constant dense<0.000000e+00> : vector<8x32xf32>
    %138 = tpu.matmul %135, %137, %cst_65 {dimension_numbers = #tpu.dot_dimension_numbers<[1], [0], [0], [1], [0, 0, 1, 1], [], []>} : vector<8x8xf32>, vector<8x32xf32>, vector<8x32xf32> -> vector<8x32xf32>
    %139 = arith.addf %121, %138 : vector<8x32xf32>
    %140 = tpu.concatenate %99, %139 in 0 : vector<8x32xf32>, vector<8x32xf32> -> vector<16x32xf32>
    %c0_66 = arith.constant 0 : index
    %c0_67 = arith.constant 0 : index
    %141 = vector.load %arg34[%c0_66, %c0_67] : memref<32x32xf32, #tpu.memory_space<vmem>>, vector<32x32xf32>
    %cst_68 = arith.constant dense<0.000000e+00> : vector<16x32xf32>
    %142 = tpu.matmul %140, %141, %cst_68 {dimension_numbers = #tpu.dot_dimension_numbers<[1], [0], [0], [1], [0, 0, 1, 1], [], []>} : vector<16x32xf32>, vector<32x32xf32>, vector<16x32xf32> -> vector<16x32xf32>
    %c0_69 = arith.constant 0 : index
    %c0_70 = arith.constant 0 : index
    %143 = vector.load %arg33[%c0_69, %c0_70] : memref<1x32xf32, #tpu.memory_space<vmem>>, vector<1x32xf32>
    %144 = vector.broadcast %143 : vector<1x32xf32> to vector<16x32xf32>
    %145 = arith.addf %142, %144 : vector<16x32xf32>
    %146 = arith.addf %23, %145 : vector<16x32xf32>
    %cst_71 = arith.constant dense<0.000000e+00> : vector<16xf32>
    %147 = vector.multi_reduction <add>, %146, %cst_71 [1] : vector<16x32xf32> to vector<16xf32>
    %148 = vector.shape_cast %147 : vector<16xf32> to vector<16x1xf32>
    %cst_72 = arith.constant 3.200000e+01 : f32
    %149 = vector.broadcast %cst_72 : f32 to vector<16x1xf32>
    %150 = arith.divf %148, %149 : vector<16x1xf32>
    %151 = vector.broadcast %150 : vector<16x1xf32> to vector<16x32xf32>
    %152 = arith.subf %146, %151 : vector<16x32xf32>
    %153 = arith.mulf %152, %152 : vector<16x32xf32>
    %cst_73 = arith.constant dense<0.000000e+00> : vector<16xf32>
    %154 = vector.multi_reduction <add>, %153, %cst_73 [1] : vector<16x32xf32> to vector<16xf32>
    %155 = vector.shape_cast %154 : vector<16xf32> to vector<16x1xf32>
    %cst_74 = arith.constant 3.200000e+01 : f32
    %156 = vector.broadcast %cst_74 : f32 to vector<16x1xf32>
    %157 = arith.divf %155, %156 : vector<16x1xf32>
    %158 = vector.broadcast %150 : vector<16x1xf32> to vector<16x32xf32>
    %159 = arith.subf %146, %158 : vector<16x32xf32>
    %cst_75 = arith.constant 9.99999974E-6 : f32
    %160 = vector.broadcast %cst_75 : f32 to vector<16x1xf32>
    %161 = arith.addf %157, %160 : vector<16x1xf32>
    %162 = math.rsqrt %161 : vector<16x1xf32>
    %163 = vector.broadcast %162 : vector<16x1xf32> to vector<16x32xf32>
    %164 = arith.mulf %159, %163 : vector<16x32xf32>
    %c0_76 = arith.constant 0 : index
    %c0_77 = arith.constant 0 : index
    %165 = vector.load %arg44[%c0_76, %c0_77] : memref<1x32xf32, #tpu.memory_space<vmem>>, vector<1x32xf32>
    %166 = vector.broadcast %165 : vector<1x32xf32> to vector<16x32xf32>
    %167 = arith.mulf %164, %166 : vector<16x32xf32>
    %c0_78 = arith.constant 0 : index
    %c0_79 = arith.constant 0 : index
    %168 = vector.load %arg43[%c0_78, %c0_79] : memref<1x32xf32, #tpu.memory_space<vmem>>, vector<1x32xf32>
    %169 = vector.broadcast %168 : vector<1x32xf32> to vector<16x32xf32>
    %170 = arith.addf %167, %169 : vector<16x32xf32>
    %c0_80 = arith.constant 0 : index
    %c0_81 = arith.constant 0 : index
    %171 = vector.load %arg40[%c0_80, %c0_81] : memref<32x64xf32, #tpu.memory_space<vmem>>, vector<32x64xf32>
    %cst_82 = arith.constant dense<0.000000e+00> : vector<16x64xf32>
    %172 = tpu.matmul %170, %171, %cst_82 {dimension_numbers = #tpu.dot_dimension_numbers<[1], [0], [0], [1], [0, 0, 1, 1], [], []>} : vector<16x32xf32>, vector<32x64xf32>, vector<16x64xf32> -> vector<16x64xf32>
    %c0_83 = arith.constant 0 : index
    %c0_84 = arith.constant 0 : index
    %173 = vector.load %arg39[%c0_83, %c0_84] : memref<1x64xf32, #tpu.memory_space<vmem>>, vector<1x64xf32>
    %174 = vector.broadcast %173 : vector<1x64xf32> to vector<16x64xf32>
    %175 = arith.addf %172, %174 : vector<16x64xf32>
    %cst_85 = arith.constant 0.000000e+00 : f32
    %176 = vector.broadcast %cst_85 : f32 to vector<16x64xf32>
    %177 = arith.maximumf %175, %176 : vector<16x64xf32>
    %c0_86 = arith.constant 0 : index
    %c0_87 = arith.constant 0 : index
    %178 = vector.load %arg42[%c0_86, %c0_87] : memref<64x32xf32, #tpu.memory_space<vmem>>, vector<64x32xf32>
    %cst_88 = arith.constant dense<0.000000e+00> : vector<16x32xf32>
    %179 = tpu.matmul %177, %178, %cst_88 {dimension_numbers = #tpu.dot_dimension_numbers<[1], [0], [0], [1], [0, 0, 1, 1], [], []>} : vector<16x64xf32>, vector<64x32xf32>, vector<16x32xf32> -> vector<16x32xf32>
    %c0_89 = arith.constant 0 : index
    %c0_90 = arith.constant 0 : index
    %180 = vector.load %arg41[%c0_89, %c0_90] : memref<1x32xf32, #tpu.memory_space<vmem>>, vector<1x32xf32>
    %181 = vector.broadcast %180 : vector<1x32xf32> to vector<16x32xf32>
    %182 = arith.addf %179, %181 : vector<16x32xf32>
    %183 = arith.addf %170, %182 : vector<16x32xf32>
    %cst_91 = arith.constant dense<0.000000e+00> : vector<16xf32>
    %184 = vector.multi_reduction <add>, %183, %cst_91 [1] : vector<16x32xf32> to vector<16xf32>
    %185 = vector.shape_cast %184 : vector<16xf32> to vector<16x1xf32>
    %cst_92 = arith.constant 3.200000e+01 : f32
    %186 = vector.broadcast %cst_92 : f32 to vector<16x1xf32>
    %187 = arith.divf %185, %186 : vector<16x1xf32>
    %188 = vector.broadcast %187 : vector<16x1xf32> to vector<16x32xf32>
    %189 = arith.subf %183, %188 : vector<16x32xf32>
    %190 = arith.mulf %189, %189 : vector<16x32xf32>
    %cst_93 = arith.constant dense<0.000000e+00> : vector<16xf32>
    %191 = vector.multi_reduction <add>, %190, %cst_93 [1] : vector<16x32xf32> to vector<16xf32>
    %192 = vector.shape_cast %191 : vector<16xf32> to vector<16x1xf32>
    %cst_94 = arith.constant 3.200000e+01 : f32
    %193 = vector.broadcast %cst_94 : f32 to vector<16x1xf32>
    %194 = arith.divf %192, %193 : vector<16x1xf32>
    %195 = vector.broadcast %187 : vector<16x1xf32> to vector<16x32xf32>
    %196 = arith.subf %183, %195 : vector<16x32xf32>
    %cst_95 = arith.constant 9.99999974E-6 : f32
    %197 = vector.broadcast %cst_95 : f32 to vector<16x1xf32>
    %198 = arith.addf %194, %197 : vector<16x1xf32>
    %199 = math.rsqrt %198 : vector<16x1xf32>
    %200 = vector.broadcast %199 : vector<16x1xf32> to vector<16x32xf32>
    %201 = arith.mulf %196, %200 : vector<16x32xf32>
    %c0_96 = arith.constant 0 : index
    %c0_97 = arith.constant 0 : index
    %202 = vector.load %arg46[%c0_96, %c0_97] : memref<1x32xf32, #tpu.memory_space<vmem>>, vector<1x32xf32>
    %203 = vector.broadcast %202 : vector<1x32xf32> to vector<16x32xf32>
    %204 = arith.mulf %201, %203 : vector<16x32xf32>
    %c0_98 = arith.constant 0 : index
    %c0_99 = arith.constant 0 : index
    %205 = vector.load %arg45[%c0_98, %c0_99] : memref<1x32xf32, #tpu.memory_space<vmem>>, vector<1x32xf32>
    %206 = vector.broadcast %205 : vector<1x32xf32> to vector<16x32xf32>
    %207 = arith.addf %204, %206 : vector<16x32xf32>
    %c0_100 = arith.constant 0 : index
    %c0_101 = arith.constant 0 : index
    %208 = vector.load %arg52[%c0_100, %c0_101] : memref<32x32xf32, #tpu.memory_space<vmem>>, vector<32x32xf32>
    %cst_102 = arith.constant dense<0.000000e+00> : vector<16x32xf32>
    %209 = tpu.matmul %30, %208, %cst_102 {dimension_numbers = #tpu.dot_dimension_numbers<[1], [0], [0], [1], [0, 0, 1, 1], [], []>} : vector<16x32xf32>, vector<32x32xf32>, vector<16x32xf32> -> vector<16x32xf32>
    %c0_103 = arith.constant 0 : index
    %c0_104 = arith.constant 0 : index
    %210 = vector.load %arg51[%c0_103, %c0_104] : memref<1x32xf32, #tpu.memory_space<vmem>>, vector<1x32xf32>
    %211 = vector.broadcast %210 : vector<1x32xf32> to vector<16x32xf32>
    %212 = arith.addf %209, %211 : vector<16x32xf32>
    %c0_105 = arith.constant 0 : index
    %c0_106 = arith.constant 0 : index
    %213 = vector.load %arg48[%c0_105, %c0_106] : memref<32x32xf32, #tpu.memory_space<vmem>>, vector<32x32xf32>
    %cst_107 = arith.constant dense<0.000000e+00> : vector<16x32xf32>
    %214 = tpu.matmul %30, %213, %cst_107 {dimension_numbers = #tpu.dot_dimension_numbers<[1], [0], [0], [1], [0, 0, 1, 1], [], []>} : vector<16x32xf32>, vector<32x32xf32>, vector<16x32xf32> -> vector<16x32xf32>
    %c0_108 = arith.constant 0 : index
    %c0_109 = arith.constant 0 : index
    %215 = vector.load %arg47[%c0_108, %c0_109] : memref<1x32xf32, #tpu.memory_space<vmem>>, vector<1x32xf32>
    %216 = vector.broadcast %215 : vector<1x32xf32> to vector<16x32xf32>
    %217 = arith.addf %214, %216 : vector<16x32xf32>
    %c0_110 = arith.constant 0 : index
    %c0_111 = arith.constant 0 : index
    %218 = vector.load %arg54[%c0_110, %c0_111] : memref<32x32xf32, #tpu.memory_space<vmem>>, vector<32x32xf32>
    %cst_112 = arith.constant dense<0.000000e+00> : vector<16x32xf32>
    %219 = tpu.matmul %30, %218, %cst_112 {dimension_numbers = #tpu.dot_dimension_numbers<[1], [0], [0], [1], [0, 0, 1, 1], [], []>} : vector<16x32xf32>, vector<32x32xf32>, vector<16x32xf32> -> vector<16x32xf32>
    %c0_113 = arith.constant 0 : index
    %c0_114 = arith.constant 0 : index
    %220 = vector.load %arg53[%c0_113, %c0_114] : memref<1x32xf32, #tpu.memory_space<vmem>>, vector<1x32xf32>
    %221 = vector.broadcast %220 : vector<1x32xf32> to vector<16x32xf32>
    %222 = arith.addf %219, %221 : vector<16x32xf32>
    %223 = vector.extract_strided_slice %212 {offsets = [0, 0], sizes = [8, 32], strides = [1, 1]} : vector<16x32xf32> to vector<8x32xf32>
    %224 = vector.extract_strided_slice %217 {offsets = [0, 0], sizes = [8, 32], strides = [1, 1]} : vector<16x32xf32> to vector<8x32xf32>
    %225 = vector.extract_strided_slice %222 {offsets = [0, 0], sizes = [8, 32], strides = [1, 1]} : vector<16x32xf32> to vector<8x32xf32>
    %cst_115 = arith.constant 0.000000e+00 : f32
    %226 = vector.broadcast %cst_115 : f32 to vector<8x32xf32>
    %227 = vector.broadcast %7 : vector<1x32xf32> to vector<8x32xf32>
    %228 = arith.mulf %223, %227 : vector<8x32xf32>
    %cst_116 = arith.constant dense<0.000000e+00> : vector<8x8xf32>
    %229 = tpu.matmul %228, %224, %cst_116 {dimension_numbers = #tpu.dot_dimension_numbers<[1], [1], [0], [0], [0, 0, 1, 0], [], []>} : vector<8x32xf32>, vector<8x32xf32>, vector<8x8xf32> -> vector<8x8xf32>
    %cst_117 = arith.constant 2.500000e-01 : f32
    %230 = vector.broadcast %cst_117 : f32 to vector<8x8xf32>
    %231 = arith.mulf %229, %230 : vector<8x8xf32>
    %cst_118 = arith.constant dense<0xFF800000> : vector<8xf32>
    %232 = vector.multi_reduction <maximumf>, %231, %cst_118 [1] : vector<8x8xf32> to vector<8xf32>
    %233 = vector.shape_cast %232 : vector<8xf32> to vector<8x1xf32>
    %234 = vector.broadcast %233 : vector<8x1xf32> to vector<8x8xf32>
    %235 = arith.subf %231, %234 : vector<8x8xf32>
    %236 = math.exp %235 : vector<8x8xf32>
    %cst_119 = arith.constant dense<0.000000e+00> : vector<8xf32>
    %237 = vector.multi_reduction <add>, %236, %cst_119 [1] : vector<8x8xf32> to vector<8xf32>
    %238 = vector.shape_cast %237 : vector<8xf32> to vector<8x1xf32>
    %239 = vector.broadcast %238 : vector<8x1xf32> to vector<8x8xf32>
    %240 = arith.divf %236, %239 : vector<8x8xf32>
    %241 = vector.broadcast %7 : vector<1x32xf32> to vector<8x32xf32>
    %242 = arith.mulf %225, %241 : vector<8x32xf32>
    %cst_120 = arith.constant dense<0.000000e+00> : vector<8x32xf32>
    %243 = tpu.matmul %240, %242, %cst_120 {dimension_numbers = #tpu.dot_dimension_numbers<[1], [0], [0], [1], [0, 0, 1, 1], [], []>} : vector<8x8xf32>, vector<8x32xf32>, vector<8x32xf32> -> vector<8x32xf32>
    %244 = arith.addf %226, %243 : vector<8x32xf32>
    %245 = vector.broadcast %14 : vector<1x32xf32> to vector<8x32xf32>
    %246 = arith.mulf %223, %245 : vector<8x32xf32>
    %cst_121 = arith.constant dense<0.000000e+00> : vector<8x8xf32>
    %247 = tpu.matmul %246, %224, %cst_121 {dimension_numbers = #tpu.dot_dimension_numbers<[1], [1], [0], [0], [0, 0, 1, 0], [], []>} : vector<8x32xf32>, vector<8x32xf32>, vector<8x8xf32> -> vector<8x8xf32>
    %cst_122 = arith.constant 2.500000e-01 : f32
    %248 = vector.broadcast %cst_122 : f32 to vector<8x8xf32>
    %249 = arith.mulf %247, %248 : vector<8x8xf32>
    %cst_123 = arith.constant dense<0xFF800000> : vector<8xf32>
    %250 = vector.multi_reduction <maximumf>, %249, %cst_123 [1] : vector<8x8xf32> to vector<8xf32>
    %251 = vector.shape_cast %250 : vector<8xf32> to vector<8x1xf32>
    %252 = vector.broadcast %251 : vector<8x1xf32> to vector<8x8xf32>
    %253 = arith.subf %249, %252 : vector<8x8xf32>
    %254 = math.exp %253 : vector<8x8xf32>
    %cst_124 = arith.constant dense<0.000000e+00> : vector<8xf32>
    %255 = vector.multi_reduction <add>, %254, %cst_124 [1] : vector<8x8xf32> to vector<8xf32>
    %256 = vector.shape_cast %255 : vector<8xf32> to vector<8x1xf32>
    %257 = vector.broadcast %256 : vector<8x1xf32> to vector<8x8xf32>
    %258 = arith.divf %254, %257 : vector<8x8xf32>
    %259 = vector.broadcast %14 : vector<1x32xf32> to vector<8x32xf32>
    %260 = arith.mulf %225, %259 : vector<8x32xf32>
    %cst_125 = arith.constant dense<0.000000e+00> : vector<8x32xf32>
    %261 = tpu.matmul %258, %260, %cst_125 {dimension_numbers = #tpu.dot_dimension_numbers<[1], [0], [0], [1], [0, 0, 1, 1], [], []>} : vector<8x8xf32>, vector<8x32xf32>, vector<8x32xf32> -> vector<8x32xf32>
    %262 = arith.addf %244, %261 : vector<8x32xf32>
    %263 = vector.extract_strided_slice %212 {offsets = [8, 0], sizes = [8, 32], strides = [1, 1]} : vector<16x32xf32> to vector<8x32xf32>
    %264 = vector.extract_strided_slice %217 {offsets = [8, 0], sizes = [8, 32], strides = [1, 1]} : vector<16x32xf32> to vector<8x32xf32>
    %265 = vector.extract_strided_slice %222 {offsets = [8, 0], sizes = [8, 32], strides = [1, 1]} : vector<16x32xf32> to vector<8x32xf32>
    %cst_126 = arith.constant 0.000000e+00 : f32
    %266 = vector.broadcast %cst_126 : f32 to vector<8x32xf32>
    %267 = vector.broadcast %7 : vector<1x32xf32> to vector<8x32xf32>
    %268 = arith.mulf %263, %267 : vector<8x32xf32>
    %cst_127 = arith.constant dense<0.000000e+00> : vector<8x8xf32>
    %269 = tpu.matmul %268, %264, %cst_127 {dimension_numbers = #tpu.dot_dimension_numbers<[1], [1], [0], [0], [0, 0, 1, 0], [], []>} : vector<8x32xf32>, vector<8x32xf32>, vector<8x8xf32> -> vector<8x8xf32>
    %cst_128 = arith.constant 2.500000e-01 : f32
    %270 = vector.broadcast %cst_128 : f32 to vector<8x8xf32>
    %271 = arith.mulf %269, %270 : vector<8x8xf32>
    %cst_129 = arith.constant dense<0xFF800000> : vector<8xf32>
    %272 = vector.multi_reduction <maximumf>, %271, %cst_129 [1] : vector<8x8xf32> to vector<8xf32>
    %273 = vector.shape_cast %272 : vector<8xf32> to vector<8x1xf32>
    %274 = vector.broadcast %273 : vector<8x1xf32> to vector<8x8xf32>
    %275 = arith.subf %271, %274 : vector<8x8xf32>
    %276 = math.exp %275 : vector<8x8xf32>
    %cst_130 = arith.constant dense<0.000000e+00> : vector<8xf32>
    %277 = vector.multi_reduction <add>, %276, %cst_130 [1] : vector<8x8xf32> to vector<8xf32>
    %278 = vector.shape_cast %277 : vector<8xf32> to vector<8x1xf32>
    %279 = vector.broadcast %278 : vector<8x1xf32> to vector<8x8xf32>
    %280 = arith.divf %276, %279 : vector<8x8xf32>
    %281 = vector.broadcast %7 : vector<1x32xf32> to vector<8x32xf32>
    %282 = arith.mulf %265, %281 : vector<8x32xf32>
    %cst_131 = arith.constant dense<0.000000e+00> : vector<8x32xf32>
    %283 = tpu.matmul %280, %282, %cst_131 {dimension_numbers = #tpu.dot_dimension_numbers<[1], [0], [0], [1], [0, 0, 1, 1], [], []>} : vector<8x8xf32>, vector<8x32xf32>, vector<8x32xf32> -> vector<8x32xf32>
    %284 = arith.addf %266, %283 : vector<8x32xf32>
    %285 = vector.broadcast %14 : vector<1x32xf32> to vector<8x32xf32>
    %286 = arith.mulf %263, %285 : vector<8x32xf32>
    %cst_132 = arith.constant dense<0.000000e+00> : vector<8x8xf32>
    %287 = tpu.matmul %286, %264, %cst_132 {dimension_numbers = #tpu.dot_dimension_numbers<[1], [1], [0], [0], [0, 0, 1, 0], [], []>} : vector<8x32xf32>, vector<8x32xf32>, vector<8x8xf32> -> vector<8x8xf32>
    %cst_133 = arith.constant 2.500000e-01 : f32
    %288 = vector.broadcast %cst_133 : f32 to vector<8x8xf32>
    %289 = arith.mulf %287, %288 : vector<8x8xf32>
    %cst_134 = arith.constant dense<0xFF800000> : vector<8xf32>
    %290 = vector.multi_reduction <maximumf>, %289, %cst_134 [1] : vector<8x8xf32> to vector<8xf32>
    %291 = vector.shape_cast %290 : vector<8xf32> to vector<8x1xf32>
    %292 = vector.broadcast %291 : vector<8x1xf32> to vector<8x8xf32>
    %293 = arith.subf %289, %292 : vector<8x8xf32>
    %294 = math.exp %293 : vector<8x8xf32>
    %cst_135 = arith.constant dense<0.000000e+00> : vector<8xf32>
    %295 = vector.multi_reduction <add>, %294, %cst_135 [1] : vector<8x8xf32> to vector<8xf32>
    %296 = vector.shape_cast %295 : vector<8xf32> to vector<8x1xf32>
    %297 = vector.broadcast %296 : vector<8x1xf32> to vector<8x8xf32>
    %298 = arith.divf %294, %297 : vector<8x8xf32>
    %299 = vector.broadcast %14 : vector<1x32xf32> to vector<8x32xf32>
    %300 = arith.mulf %265, %299 : vector<8x32xf32>
    %cst_136 = arith.constant dense<0.000000e+00> : vector<8x32xf32>
    %301 = tpu.matmul %298, %300, %cst_136 {dimension_numbers = #tpu.dot_dimension_numbers<[1], [0], [0], [1], [0, 0, 1, 1], [], []>} : vector<8x8xf32>, vector<8x32xf32>, vector<8x32xf32> -> vector<8x32xf32>
    %302 = arith.addf %284, %301 : vector<8x32xf32>
    %303 = tpu.concatenate %262, %302 in 0 : vector<8x32xf32>, vector<8x32xf32> -> vector<16x32xf32>
    %c0_137 = arith.constant 0 : index
    %c0_138 = arith.constant 0 : index
    %304 = vector.load %arg50[%c0_137, %c0_138] : memref<32x32xf32, #tpu.memory_space<vmem>>, vector<32x32xf32>
    %cst_139 = arith.constant dense<0.000000e+00> : vector<16x32xf32>
    %305 = tpu.matmul %303, %304, %cst_139 {dimension_numbers = #tpu.dot_dimension_numbers<[1], [0], [0], [1], [0, 0, 1, 1], [], []>} : vector<16x32xf32>, vector<32x32xf32>, vector<16x32xf32> -> vector<16x32xf32>
    %c0_140 = arith.constant 0 : index
    %c0_141 = arith.constant 0 : index
    %306 = vector.load %arg49[%c0_140, %c0_141] : memref<1x32xf32, #tpu.memory_space<vmem>>, vector<1x32xf32>
    %307 = vector.broadcast %306 : vector<1x32xf32> to vector<16x32xf32>
    %308 = arith.addf %305, %307 : vector<16x32xf32>
    %309 = arith.addf %30, %308 : vector<16x32xf32>
    %cst_142 = arith.constant dense<0.000000e+00> : vector<16xf32>
    %310 = vector.multi_reduction <add>, %309, %cst_142 [1] : vector<16x32xf32> to vector<16xf32>
    %311 = vector.shape_cast %310 : vector<16xf32> to vector<16x1xf32>
    %cst_143 = arith.constant 3.200000e+01 : f32
    %312 = vector.broadcast %cst_143 : f32 to vector<16x1xf32>
    %313 = arith.divf %311, %312 : vector<16x1xf32>
    %314 = vector.broadcast %313 : vector<16x1xf32> to vector<16x32xf32>
    %315 = arith.subf %309, %314 : vector<16x32xf32>
    %316 = arith.mulf %315, %315 : vector<16x32xf32>
    %cst_144 = arith.constant dense<0.000000e+00> : vector<16xf32>
    %317 = vector.multi_reduction <add>, %316, %cst_144 [1] : vector<16x32xf32> to vector<16xf32>
    %318 = vector.shape_cast %317 : vector<16xf32> to vector<16x1xf32>
    %cst_145 = arith.constant 3.200000e+01 : f32
    %319 = vector.broadcast %cst_145 : f32 to vector<16x1xf32>
    %320 = arith.divf %318, %319 : vector<16x1xf32>
    %321 = vector.broadcast %313 : vector<16x1xf32> to vector<16x32xf32>
    %322 = arith.subf %309, %321 : vector<16x32xf32>
    %cst_146 = arith.constant 9.99999974E-6 : f32
    %323 = vector.broadcast %cst_146 : f32 to vector<16x1xf32>
    %324 = arith.addf %320, %323 : vector<16x1xf32>
    %325 = math.rsqrt %324 : vector<16x1xf32>
    %326 = vector.broadcast %325 : vector<16x1xf32> to vector<16x32xf32>
    %327 = arith.mulf %322, %326 : vector<16x32xf32>
    %c0_147 = arith.constant 0 : index
    %c0_148 = arith.constant 0 : index
    %328 = vector.load %arg60[%c0_147, %c0_148] : memref<1x32xf32, #tpu.memory_space<vmem>>, vector<1x32xf32>
    %329 = vector.broadcast %328 : vector<1x32xf32> to vector<16x32xf32>
    %330 = arith.mulf %327, %329 : vector<16x32xf32>
    %c0_149 = arith.constant 0 : index
    %c0_150 = arith.constant 0 : index
    %331 = vector.load %arg59[%c0_149, %c0_150] : memref<1x32xf32, #tpu.memory_space<vmem>>, vector<1x32xf32>
    %332 = vector.broadcast %331 : vector<1x32xf32> to vector<16x32xf32>
    %333 = arith.addf %330, %332 : vector<16x32xf32>
    %c0_151 = arith.constant 0 : index
    %c0_152 = arith.constant 0 : index
    %334 = vector.load %arg56[%c0_151, %c0_152] : memref<32x64xf32, #tpu.memory_space<vmem>>, vector<32x64xf32>
    %cst_153 = arith.constant dense<0.000000e+00> : vector<16x64xf32>
    %335 = tpu.matmul %333, %334, %cst_153 {dimension_numbers = #tpu.dot_dimension_numbers<[1], [0], [0], [1], [0, 0, 1, 1], [], []>} : vector<16x32xf32>, vector<32x64xf32>, vector<16x64xf32> -> vector<16x64xf32>
    %c0_154 = arith.constant 0 : index
    %c0_155 = arith.constant 0 : index
    %336 = vector.load %arg55[%c0_154, %c0_155] : memref<1x64xf32, #tpu.memory_space<vmem>>, vector<1x64xf32>
    %337 = vector.broadcast %336 : vector<1x64xf32> to vector<16x64xf32>
    %338 = arith.addf %335, %337 : vector<16x64xf32>
    %cst_156 = arith.constant 0.000000e+00 : f32
    %339 = vector.broadcast %cst_156 : f32 to vector<16x64xf32>
    %340 = arith.maximumf %338, %339 : vector<16x64xf32>
    %c0_157 = arith.constant 0 : index
    %c0_158 = arith.constant 0 : index
    %341 = vector.load %arg58[%c0_157, %c0_158] : memref<64x32xf32, #tpu.memory_space<vmem>>, vector<64x32xf32>
    %cst_159 = arith.constant dense<0.000000e+00> : vector<16x32xf32>
    %342 = tpu.matmul %340, %341, %cst_159 {dimension_numbers = #tpu.dot_dimension_numbers<[1], [0], [0], [1], [0, 0, 1, 1], [], []>} : vector<16x64xf32>, vector<64x32xf32>, vector<16x32xf32> -> vector<16x32xf32>
    %c0_160 = arith.constant 0 : index
    %c0_161 = arith.constant 0 : index
    %343 = vector.load %arg57[%c0_160, %c0_161] : memref<1x32xf32, #tpu.memory_space<vmem>>, vector<1x32xf32>
    %344 = vector.broadcast %343 : vector<1x32xf32> to vector<16x32xf32>
    %345 = arith.addf %342, %344 : vector<16x32xf32>
    %346 = arith.addf %333, %345 : vector<16x32xf32>
    %cst_162 = arith.constant dense<0.000000e+00> : vector<16xf32>
    %347 = vector.multi_reduction <add>, %346, %cst_162 [1] : vector<16x32xf32> to vector<16xf32>
    %348 = vector.shape_cast %347 : vector<16xf32> to vector<16x1xf32>
    %cst_163 = arith.constant 3.200000e+01 : f32
    %349 = vector.broadcast %cst_163 : f32 to vector<16x1xf32>
    %350 = arith.divf %348, %349 : vector<16x1xf32>
    %351 = vector.broadcast %350 : vector<16x1xf32> to vector<16x32xf32>
    %352 = arith.subf %346, %351 : vector<16x32xf32>
    %353 = arith.mulf %352, %352 : vector<16x32xf32>
    %cst_164 = arith.constant dense<0.000000e+00> : vector<16xf32>
    %354 = vector.multi_reduction <add>, %353, %cst_164 [1] : vector<16x32xf32> to vector<16xf32>
    %355 = vector.shape_cast %354 : vector<16xf32> to vector<16x1xf32>
    %cst_165 = arith.constant 3.200000e+01 : f32
    %356 = vector.broadcast %cst_165 : f32 to vector<16x1xf32>
    %357 = arith.divf %355, %356 : vector<16x1xf32>
    %358 = vector.broadcast %350 : vector<16x1xf32> to vector<16x32xf32>
    %359 = arith.subf %346, %358 : vector<16x32xf32>
    %cst_166 = arith.constant 9.99999974E-6 : f32
    %360 = vector.broadcast %cst_166 : f32 to vector<16x1xf32>
    %361 = arith.addf %357, %360 : vector<16x1xf32>
    %362 = math.rsqrt %361 : vector<16x1xf32>
    %363 = vector.broadcast %362 : vector<16x1xf32> to vector<16x32xf32>
    %364 = arith.mulf %359, %363 : vector<16x32xf32>
    %c0_167 = arith.constant 0 : index
    %c0_168 = arith.constant 0 : index
    %365 = vector.load %arg62[%c0_167, %c0_168] : memref<1x32xf32, #tpu.memory_space<vmem>>, vector<1x32xf32>
    %366 = vector.broadcast %365 : vector<1x32xf32> to vector<16x32xf32>
    %367 = arith.mulf %364, %366 : vector<16x32xf32>
    %c0_169 = arith.constant 0 : index
    %c0_170 = arith.constant 0 : index
    %368 = vector.load %arg61[%c0_169, %c0_170] : memref<1x32xf32, #tpu.memory_space<vmem>>, vector<1x32xf32>
    %369 = vector.broadcast %368 : vector<1x32xf32> to vector<16x32xf32>
    %370 = arith.addf %367, %369 : vector<16x32xf32>
    %c0_171 = arith.constant 0 : index
    %c0_172 = arith.constant 0 : index
    %371 = vector.load %arg68[%c0_171, %c0_172] : memref<32x32xf32, #tpu.memory_space<vmem>>, vector<32x32xf32>
    %cst_173 = arith.constant dense<0.000000e+00> : vector<16x32xf32>
    %372 = tpu.matmul %37, %371, %cst_173 {dimension_numbers = #tpu.dot_dimension_numbers<[1], [0], [0], [1], [0, 0, 1, 1], [], []>} : vector<16x32xf32>, vector<32x32xf32>, vector<16x32xf32> -> vector<16x32xf32>
    %c0_174 = arith.constant 0 : index
    %c0_175 = arith.constant 0 : index
    %373 = vector.load %arg67[%c0_174, %c0_175] : memref<1x32xf32, #tpu.memory_space<vmem>>, vector<1x32xf32>
    %374 = vector.broadcast %373 : vector<1x32xf32> to vector<16x32xf32>
    %375 = arith.addf %372, %374 : vector<16x32xf32>
    %c0_176 = arith.constant 0 : index
    %c0_177 = arith.constant 0 : index
    %376 = vector.load %arg64[%c0_176, %c0_177] : memref<32x32xf32, #tpu.memory_space<vmem>>, vector<32x32xf32>
    %cst_178 = arith.constant dense<0.000000e+00> : vector<16x32xf32>
    %377 = tpu.matmul %37, %376, %cst_178 {dimension_numbers = #tpu.dot_dimension_numbers<[1], [0], [0], [1], [0, 0, 1, 1], [], []>} : vector<16x32xf32>, vector<32x32xf32>, vector<16x32xf32> -> vector<16x32xf32>
    %c0_179 = arith.constant 0 : index
    %c0_180 = arith.constant 0 : index
    %378 = vector.load %arg63[%c0_179, %c0_180] : memref<1x32xf32, #tpu.memory_space<vmem>>, vector<1x32xf32>
    %379 = vector.broadcast %378 : vector<1x32xf32> to vector<16x32xf32>
    %380 = arith.addf %377, %379 : vector<16x32xf32>
    %c0_181 = arith.constant 0 : index
    %c0_182 = arith.constant 0 : index
    %381 = vector.load %arg70[%c0_181, %c0_182] : memref<32x32xf32, #tpu.memory_space<vmem>>, vector<32x32xf32>
    %cst_183 = arith.constant dense<0.000000e+00> : vector<16x32xf32>
    %382 = tpu.matmul %37, %381, %cst_183 {dimension_numbers = #tpu.dot_dimension_numbers<[1], [0], [0], [1], [0, 0, 1, 1], [], []>} : vector<16x32xf32>, vector<32x32xf32>, vector<16x32xf32> -> vector<16x32xf32>
    %c0_184 = arith.constant 0 : index
    %c0_185 = arith.constant 0 : index
    %383 = vector.load %arg69[%c0_184, %c0_185] : memref<1x32xf32, #tpu.memory_space<vmem>>, vector<1x32xf32>
    %384 = vector.broadcast %383 : vector<1x32xf32> to vector<16x32xf32>
    %385 = arith.addf %382, %384 : vector<16x32xf32>
    %386 = vector.extract_strided_slice %375 {offsets = [0, 0], sizes = [8, 32], strides = [1, 1]} : vector<16x32xf32> to vector<8x32xf32>
    %387 = vector.extract_strided_slice %380 {offsets = [0, 0], sizes = [8, 32], strides = [1, 1]} : vector<16x32xf32> to vector<8x32xf32>
    %388 = vector.extract_strided_slice %385 {offsets = [0, 0], sizes = [8, 32], strides = [1, 1]} : vector<16x32xf32> to vector<8x32xf32>
    %cst_186 = arith.constant 0.000000e+00 : f32
    %389 = vector.broadcast %cst_186 : f32 to vector<8x32xf32>
    %390 = vector.broadcast %7 : vector<1x32xf32> to vector<8x32xf32>
    %391 = arith.mulf %386, %390 : vector<8x32xf32>
    %cst_187 = arith.constant dense<0.000000e+00> : vector<8x8xf32>
    %392 = tpu.matmul %391, %387, %cst_187 {dimension_numbers = #tpu.dot_dimension_numbers<[1], [1], [0], [0], [0, 0, 1, 0], [], []>} : vector<8x32xf32>, vector<8x32xf32>, vector<8x8xf32> -> vector<8x8xf32>
    %cst_188 = arith.constant 2.500000e-01 : f32
    %393 = vector.broadcast %cst_188 : f32 to vector<8x8xf32>
    %394 = arith.mulf %392, %393 : vector<8x8xf32>
    %cst_189 = arith.constant dense<0xFF800000> : vector<8xf32>
    %395 = vector.multi_reduction <maximumf>, %394, %cst_189 [1] : vector<8x8xf32> to vector<8xf32>
    %396 = vector.shape_cast %395 : vector<8xf32> to vector<8x1xf32>
    %397 = vector.broadcast %396 : vector<8x1xf32> to vector<8x8xf32>
    %398 = arith.subf %394, %397 : vector<8x8xf32>
    %399 = math.exp %398 : vector<8x8xf32>
    %cst_190 = arith.constant dense<0.000000e+00> : vector<8xf32>
    %400 = vector.multi_reduction <add>, %399, %cst_190 [1] : vector<8x8xf32> to vector<8xf32>
    %401 = vector.shape_cast %400 : vector<8xf32> to vector<8x1xf32>
    %402 = vector.broadcast %401 : vector<8x1xf32> to vector<8x8xf32>
    %403 = arith.divf %399, %402 : vector<8x8xf32>
    %404 = vector.broadcast %7 : vector<1x32xf32> to vector<8x32xf32>
    %405 = arith.mulf %388, %404 : vector<8x32xf32>
    %cst_191 = arith.constant dense<0.000000e+00> : vector<8x32xf32>
    %406 = tpu.matmul %403, %405, %cst_191 {dimension_numbers = #tpu.dot_dimension_numbers<[1], [0], [0], [1], [0, 0, 1, 1], [], []>} : vector<8x8xf32>, vector<8x32xf32>, vector<8x32xf32> -> vector<8x32xf32>
    %407 = arith.addf %389, %406 : vector<8x32xf32>
    %408 = vector.broadcast %14 : vector<1x32xf32> to vector<8x32xf32>
    %409 = arith.mulf %386, %408 : vector<8x32xf32>
    %cst_192 = arith.constant dense<0.000000e+00> : vector<8x8xf32>
    %410 = tpu.matmul %409, %387, %cst_192 {dimension_numbers = #tpu.dot_dimension_numbers<[1], [1], [0], [0], [0, 0, 1, 0], [], []>} : vector<8x32xf32>, vector<8x32xf32>, vector<8x8xf32> -> vector<8x8xf32>
    %cst_193 = arith.constant 2.500000e-01 : f32
    %411 = vector.broadcast %cst_193 : f32 to vector<8x8xf32>
    %412 = arith.mulf %410, %411 : vector<8x8xf32>
    %cst_194 = arith.constant dense<0xFF800000> : vector<8xf32>
    %413 = vector.multi_reduction <maximumf>, %412, %cst_194 [1] : vector<8x8xf32> to vector<8xf32>
    %414 = vector.shape_cast %413 : vector<8xf32> to vector<8x1xf32>
    %415 = vector.broadcast %414 : vector<8x1xf32> to vector<8x8xf32>
    %416 = arith.subf %412, %415 : vector<8x8xf32>
    %417 = math.exp %416 : vector<8x8xf32>
    %cst_195 = arith.constant dense<0.000000e+00> : vector<8xf32>
    %418 = vector.multi_reduction <add>, %417, %cst_195 [1] : vector<8x8xf32> to vector<8xf32>
    %419 = vector.shape_cast %418 : vector<8xf32> to vector<8x1xf32>
    %420 = vector.broadcast %419 : vector<8x1xf32> to vector<8x8xf32>
    %421 = arith.divf %417, %420 : vector<8x8xf32>
    %422 = vector.broadcast %14 : vector<1x32xf32> to vector<8x32xf32>
    %423 = arith.mulf %388, %422 : vector<8x32xf32>
    %cst_196 = arith.constant dense<0.000000e+00> : vector<8x32xf32>
    %424 = tpu.matmul %421, %423, %cst_196 {dimension_numbers = #tpu.dot_dimension_numbers<[1], [0], [0], [1], [0, 0, 1, 1], [], []>} : vector<8x8xf32>, vector<8x32xf32>, vector<8x32xf32> -> vector<8x32xf32>
    %425 = arith.addf %407, %424 : vector<8x32xf32>
    %426 = vector.extract_strided_slice %375 {offsets = [8, 0], sizes = [8, 32], strides = [1, 1]} : vector<16x32xf32> to vector<8x32xf32>
    %427 = vector.extract_strided_slice %380 {offsets = [8, 0], sizes = [8, 32], strides = [1, 1]} : vector<16x32xf32> to vector<8x32xf32>
    %428 = vector.extract_strided_slice %385 {offsets = [8, 0], sizes = [8, 32], strides = [1, 1]} : vector<16x32xf32> to vector<8x32xf32>
    %cst_197 = arith.constant 0.000000e+00 : f32
    %429 = vector.broadcast %cst_197 : f32 to vector<8x32xf32>
    %430 = vector.broadcast %7 : vector<1x32xf32> to vector<8x32xf32>
    %431 = arith.mulf %426, %430 : vector<8x32xf32>
    %cst_198 = arith.constant dense<0.000000e+00> : vector<8x8xf32>
    %432 = tpu.matmul %431, %427, %cst_198 {dimension_numbers = #tpu.dot_dimension_numbers<[1], [1], [0], [0], [0, 0, 1, 0], [], []>} : vector<8x32xf32>, vector<8x32xf32>, vector<8x8xf32> -> vector<8x8xf32>
    %cst_199 = arith.constant 2.500000e-01 : f32
    %433 = vector.broadcast %cst_199 : f32 to vector<8x8xf32>
    %434 = arith.mulf %432, %433 : vector<8x8xf32>
    %cst_200 = arith.constant dense<0xFF800000> : vector<8xf32>
    %435 = vector.multi_reduction <maximumf>, %434, %cst_200 [1] : vector<8x8xf32> to vector<8xf32>
    %436 = vector.shape_cast %435 : vector<8xf32> to vector<8x1xf32>
    %437 = vector.broadcast %436 : vector<8x1xf32> to vector<8x8xf32>
    %438 = arith.subf %434, %437 : vector<8x8xf32>
    %439 = math.exp %438 : vector<8x8xf32>
    %cst_201 = arith.constant dense<0.000000e+00> : vector<8xf32>
    %440 = vector.multi_reduction <add>, %439, %cst_201 [1] : vector<8x8xf32> to vector<8xf32>
    %441 = vector.shape_cast %440 : vector<8xf32> to vector<8x1xf32>
    %442 = vector.broadcast %441 : vector<8x1xf32> to vector<8x8xf32>
    %443 = arith.divf %439, %442 : vector<8x8xf32>
    %444 = vector.broadcast %7 : vector<1x32xf32> to vector<8x32xf32>
    %445 = arith.mulf %428, %444 : vector<8x32xf32>
    %cst_202 = arith.constant dense<0.000000e+00> : vector<8x32xf32>
    %446 = tpu.matmul %443, %445, %cst_202 {dimension_numbers = #tpu.dot_dimension_numbers<[1], [0], [0], [1], [0, 0, 1, 1], [], []>} : vector<8x8xf32>, vector<8x32xf32>, vector<8x32xf32> -> vector<8x32xf32>
    %447 = arith.addf %429, %446 : vector<8x32xf32>
    %448 = vector.broadcast %14 : vector<1x32xf32> to vector<8x32xf32>
    %449 = arith.mulf %426, %448 : vector<8x32xf32>
    %cst_203 = arith.constant dense<0.000000e+00> : vector<8x8xf32>
    %450 = tpu.matmul %449, %427, %cst_203 {dimension_numbers = #tpu.dot_dimension_numbers<[1], [1], [0], [0], [0, 0, 1, 0], [], []>} : vector<8x32xf32>, vector<8x32xf32>, vector<8x8xf32> -> vector<8x8xf32>
    %cst_204 = arith.constant 2.500000e-01 : f32
    %451 = vector.broadcast %cst_204 : f32 to vector<8x8xf32>
    %452 = arith.mulf %450, %451 : vector<8x8xf32>
    %cst_205 = arith.constant dense<0xFF800000> : vector<8xf32>
    %453 = vector.multi_reduction <maximumf>, %452, %cst_205 [1] : vector<8x8xf32> to vector<8xf32>
    %454 = vector.shape_cast %453 : vector<8xf32> to vector<8x1xf32>
    %455 = vector.broadcast %454 : vector<8x1xf32> to vector<8x8xf32>
    %456 = arith.subf %452, %455 : vector<8x8xf32>
    %457 = math.exp %456 : vector<8x8xf32>
    %cst_206 = arith.constant dense<0.000000e+00> : vector<8xf32>
    %458 = vector.multi_reduction <add>, %457, %cst_206 [1] : vector<8x8xf32> to vector<8xf32>
    %459 = vector.shape_cast %458 : vector<8xf32> to vector<8x1xf32>
    %460 = vector.broadcast %459 : vector<8x1xf32> to vector<8x8xf32>
    %461 = arith.divf %457, %460 : vector<8x8xf32>
    %462 = vector.broadcast %14 : vector<1x32xf32> to vector<8x32xf32>
    %463 = arith.mulf %428, %462 : vector<8x32xf32>
    %cst_207 = arith.constant dense<0.000000e+00> : vector<8x32xf32>
    %464 = tpu.matmul %461, %463, %cst_207 {dimension_numbers = #tpu.dot_dimension_numbers<[1], [0], [0], [1], [0, 0, 1, 1], [], []>} : vector<8x8xf32>, vector<8x32xf32>, vector<8x32xf32> -> vector<8x32xf32>
    %465 = arith.addf %447, %464 : vector<8x32xf32>
    %466 = tpu.concatenate %425, %465 in 0 : vector<8x32xf32>, vector<8x32xf32> -> vector<16x32xf32>
    %c0_208 = arith.constant 0 : index
    %c0_209 = arith.constant 0 : index
    %467 = vector.load %arg66[%c0_208, %c0_209] : memref<32x32xf32, #tpu.memory_space<vmem>>, vector<32x32xf32>
    %cst_210 = arith.constant dense<0.000000e+00> : vector<16x32xf32>
    %468 = tpu.matmul %466, %467, %cst_210 {dimension_numbers = #tpu.dot_dimension_numbers<[1], [0], [0], [1], [0, 0, 1, 1], [], []>} : vector<16x32xf32>, vector<32x32xf32>, vector<16x32xf32> -> vector<16x32xf32>
    %c0_211 = arith.constant 0 : index
    %c0_212 = arith.constant 0 : index
    %469 = vector.load %arg65[%c0_211, %c0_212] : memref<1x32xf32, #tpu.memory_space<vmem>>, vector<1x32xf32>
    %470 = vector.broadcast %469 : vector<1x32xf32> to vector<16x32xf32>
    %471 = arith.addf %468, %470 : vector<16x32xf32>
    %472 = arith.addf %37, %471 : vector<16x32xf32>
    %cst_213 = arith.constant dense<0.000000e+00> : vector<16xf32>
    %473 = vector.multi_reduction <add>, %472, %cst_213 [1] : vector<16x32xf32> to vector<16xf32>
    %474 = vector.shape_cast %473 : vector<16xf32> to vector<16x1xf32>
    %cst_214 = arith.constant 3.200000e+01 : f32
    %475 = vector.broadcast %cst_214 : f32 to vector<16x1xf32>
    %476 = arith.divf %474, %475 : vector<16x1xf32>
    %477 = vector.broadcast %476 : vector<16x1xf32> to vector<16x32xf32>
    %478 = arith.subf %472, %477 : vector<16x32xf32>
    %479 = arith.mulf %478, %478 : vector<16x32xf32>
    %cst_215 = arith.constant dense<0.000000e+00> : vector<16xf32>
    %480 = vector.multi_reduction <add>, %479, %cst_215 [1] : vector<16x32xf32> to vector<16xf32>
    %481 = vector.shape_cast %480 : vector<16xf32> to vector<16x1xf32>
    %cst_216 = arith.constant 3.200000e+01 : f32
    %482 = vector.broadcast %cst_216 : f32 to vector<16x1xf32>
    %483 = arith.divf %481, %482 : vector<16x1xf32>
    %484 = vector.broadcast %476 : vector<16x1xf32> to vector<16x32xf32>
    %485 = arith.subf %472, %484 : vector<16x32xf32>
    %cst_217 = arith.constant 9.99999974E-6 : f32
    %486 = vector.broadcast %cst_217 : f32 to vector<16x1xf32>
    %487 = arith.addf %483, %486 : vector<16x1xf32>
    %488 = math.rsqrt %487 : vector<16x1xf32>
    %489 = vector.broadcast %488 : vector<16x1xf32> to vector<16x32xf32>
    %490 = arith.mulf %485, %489 : vector<16x32xf32>
    %c0_218 = arith.constant 0 : index
    %c0_219 = arith.constant 0 : index
    %491 = vector.load %arg76[%c0_218, %c0_219] : memref<1x32xf32, #tpu.memory_space<vmem>>, vector<1x32xf32>
    %492 = vector.broadcast %491 : vector<1x32xf32> to vector<16x32xf32>
    %493 = arith.mulf %490, %492 : vector<16x32xf32>
    %c0_220 = arith.constant 0 : index
    %c0_221 = arith.constant 0 : index
    %494 = vector.load %arg75[%c0_220, %c0_221] : memref<1x32xf32, #tpu.memory_space<vmem>>, vector<1x32xf32>
    %495 = vector.broadcast %494 : vector<1x32xf32> to vector<16x32xf32>
    %496 = arith.addf %493, %495 : vector<16x32xf32>
    %c0_222 = arith.constant 0 : index
    %c0_223 = arith.constant 0 : index
    %497 = vector.load %arg72[%c0_222, %c0_223] : memref<32x64xf32, #tpu.memory_space<vmem>>, vector<32x64xf32>
    %cst_224 = arith.constant dense<0.000000e+00> : vector<16x64xf32>
    %498 = tpu.matmul %496, %497, %cst_224 {dimension_numbers = #tpu.dot_dimension_numbers<[1], [0], [0], [1], [0, 0, 1, 1], [], []>} : vector<16x32xf32>, vector<32x64xf32>, vector<16x64xf32> -> vector<16x64xf32>
    %c0_225 = arith.constant 0 : index
    %c0_226 = arith.constant 0 : index
    %499 = vector.load %arg71[%c0_225, %c0_226] : memref<1x64xf32, #tpu.memory_space<vmem>>, vector<1x64xf32>
    %500 = vector.broadcast %499 : vector<1x64xf32> to vector<16x64xf32>
    %501 = arith.addf %498, %500 : vector<16x64xf32>
    %cst_227 = arith.constant 0.000000e+00 : f32
    %502 = vector.broadcast %cst_227 : f32 to vector<16x64xf32>
    %503 = arith.maximumf %501, %502 : vector<16x64xf32>
    %c0_228 = arith.constant 0 : index
    %c0_229 = arith.constant 0 : index
    %504 = vector.load %arg74[%c0_228, %c0_229] : memref<64x32xf32, #tpu.memory_space<vmem>>, vector<64x32xf32>
    %cst_230 = arith.constant dense<0.000000e+00> : vector<16x32xf32>
    %505 = tpu.matmul %503, %504, %cst_230 {dimension_numbers = #tpu.dot_dimension_numbers<[1], [0], [0], [1], [0, 0, 1, 1], [], []>} : vector<16x64xf32>, vector<64x32xf32>, vector<16x32xf32> -> vector<16x32xf32>
    %c0_231 = arith.constant 0 : index
    %c0_232 = arith.constant 0 : index
    %506 = vector.load %arg73[%c0_231, %c0_232] : memref<1x32xf32, #tpu.memory_space<vmem>>, vector<1x32xf32>
    %507 = vector.broadcast %506 : vector<1x32xf32> to vector<16x32xf32>
    %508 = arith.addf %505, %507 : vector<16x32xf32>
    %509 = arith.addf %496, %508 : vector<16x32xf32>
    %cst_233 = arith.constant dense<0.000000e+00> : vector<16xf32>
    %510 = vector.multi_reduction <add>, %509, %cst_233 [1] : vector<16x32xf32> to vector<16xf32>
    %511 = vector.shape_cast %510 : vector<16xf32> to vector<16x1xf32>
    %cst_234 = arith.constant 3.200000e+01 : f32
    %512 = vector.broadcast %cst_234 : f32 to vector<16x1xf32>
    %513 = arith.divf %511, %512 : vector<16x1xf32>
    %514 = vector.broadcast %513 : vector<16x1xf32> to vector<16x32xf32>
    %515 = arith.subf %509, %514 : vector<16x32xf32>
    %516 = arith.mulf %515, %515 : vector<16x32xf32>
    %cst_235 = arith.constant dense<0.000000e+00> : vector<16xf32>
    %517 = vector.multi_reduction <add>, %516, %cst_235 [1] : vector<16x32xf32> to vector<16xf32>
    %518 = vector.shape_cast %517 : vector<16xf32> to vector<16x1xf32>
    %cst_236 = arith.constant 3.200000e+01 : f32
    %519 = vector.broadcast %cst_236 : f32 to vector<16x1xf32>
    %520 = arith.divf %518, %519 : vector<16x1xf32>
    %521 = vector.broadcast %513 : vector<16x1xf32> to vector<16x32xf32>
    %522 = arith.subf %509, %521 : vector<16x32xf32>
    %cst_237 = arith.constant 9.99999974E-6 : f32
    %523 = vector.broadcast %cst_237 : f32 to vector<16x1xf32>
    %524 = arith.addf %520, %523 : vector<16x1xf32>
    %525 = math.rsqrt %524 : vector<16x1xf32>
    %526 = vector.broadcast %525 : vector<16x1xf32> to vector<16x32xf32>
    %527 = arith.mulf %522, %526 : vector<16x32xf32>
    %c0_238 = arith.constant 0 : index
    %c0_239 = arith.constant 0 : index
    %528 = vector.load %arg78[%c0_238, %c0_239] : memref<1x32xf32, #tpu.memory_space<vmem>>, vector<1x32xf32>
    %529 = vector.broadcast %528 : vector<1x32xf32> to vector<16x32xf32>
    %530 = arith.mulf %527, %529 : vector<16x32xf32>
    %c0_240 = arith.constant 0 : index
    %c0_241 = arith.constant 0 : index
    %531 = vector.load %arg77[%c0_240, %c0_241] : memref<1x32xf32, #tpu.memory_space<vmem>>, vector<1x32xf32>
    %532 = vector.broadcast %531 : vector<1x32xf32> to vector<16x32xf32>
    %533 = arith.addf %530, %532 : vector<16x32xf32>
    %534 = vector.extract_strided_slice %533 {offsets = [0, 0], sizes = [8, 32], strides = [1, 1]} : vector<16x32xf32> to vector<8x32xf32>
    %cst_242 = arith.constant dense<0.000000e+00> : vector<32xf32>
    %535 = vector.multi_reduction <add>, %534, %cst_242 [0] : vector<8x32xf32> to vector<32xf32>
    %536 = vector.shape_cast %535 : vector<32xf32> to vector<1x32xf32>
    %cst_243 = arith.constant 8.000000e+00 : f32
    %537 = vector.broadcast %cst_243 : f32 to vector<1x32xf32>
    %538 = arith.divf %536, %537 : vector<1x32xf32>
    %cst_244 = arith.constant 0.000000e+00 : f32
    %539 = vector.broadcast %cst_244 : f32 to vector<8x32xf32>
    %540 = vector.broadcast %538 : vector<1x32xf32> to vector<8x32xf32>
    %541 = arith.addf %540, %539 : vector<8x32xf32>
    %542 = vector.extract_strided_slice %533 {offsets = [8, 0], sizes = [8, 32], strides = [1, 1]} : vector<16x32xf32> to vector<8x32xf32>
    %cst_245 = arith.constant dense<0.000000e+00> : vector<32xf32>
    %543 = vector.multi_reduction <add>, %542, %cst_245 [0] : vector<8x32xf32> to vector<32xf32>
    %544 = vector.shape_cast %543 : vector<32xf32> to vector<1x32xf32>
    %cst_246 = arith.constant 8.000000e+00 : f32
    %545 = vector.broadcast %cst_246 : f32 to vector<1x32xf32>
    %546 = arith.divf %544, %545 : vector<1x32xf32>
    %cst_247 = arith.constant 0.000000e+00 : f32
    %547 = vector.broadcast %cst_247 : f32 to vector<8x32xf32>
    %548 = vector.broadcast %546 : vector<1x32xf32> to vector<8x32xf32>
    %549 = arith.addf %548, %547 : vector<8x32xf32>
    %550 = tpu.concatenate %541, %549 in 0 : vector<8x32xf32>, vector<8x32xf32> -> vector<16x32xf32>
    %551 = arith.addf %207, %370 : vector<16x32xf32>
    %552 = arith.addf %551, %550 : vector<16x32xf32>
    %c0_248 = arith.constant 0 : index
    %c0_249 = arith.constant 0 : index
    %553 = vector.load %arg4[%c0_248, %c0_249] : memref<8x8xf32, #tpu.memory_space<vmem>>, vector<8x8xf32>
    %c0_250 = arith.constant 0 : index
    %c0_251 = arith.constant 0 : index
    %554 = vector.load %arg28[%c0_250, %c0_251] : memref<32x32xf32, #tpu.memory_space<vmem>>, vector<32x32xf32>
    %cst_252 = arith.constant dense<0.000000e+00> : vector<16x32xf32>
    %555 = tpu.matmul %44, %554, %cst_252 {dimension_numbers = #tpu.dot_dimension_numbers<[1], [0], [0], [1], [0, 0, 1, 1], [], []>} : vector<16x32xf32>, vector<32x32xf32>, vector<16x32xf32> -> vector<16x32xf32>
    %c0_253 = arith.constant 0 : index
    %c0_254 = arith.constant 0 : index
    %556 = vector.load %arg27[%c0_253, %c0_254] : memref<1x32xf32, #tpu.memory_space<vmem>>, vector<1x32xf32>
    %557 = vector.broadcast %556 : vector<1x32xf32> to vector<16x32xf32>
    %558 = arith.addf %555, %557 : vector<16x32xf32>
    %c0_255 = arith.constant 0 : index
    %c0_256 = arith.constant 0 : index
    %559 = vector.load %arg24[%c0_255, %c0_256] : memref<32x32xf32, #tpu.memory_space<vmem>>, vector<32x32xf32>
    %cst_257 = arith.constant dense<0.000000e+00> : vector<16x32xf32>
    %560 = tpu.matmul %44, %559, %cst_257 {dimension_numbers = #tpu.dot_dimension_numbers<[1], [0], [0], [1], [0, 0, 1, 1], [], []>} : vector<16x32xf32>, vector<32x32xf32>, vector<16x32xf32> -> vector<16x32xf32>
    %c0_258 = arith.constant 0 : index
    %c0_259 = arith.constant 0 : index
    %561 = vector.load %arg23[%c0_258, %c0_259] : memref<1x32xf32, #tpu.memory_space<vmem>>, vector<1x32xf32>
    %562 = vector.broadcast %561 : vector<1x32xf32> to vector<16x32xf32>
    %563 = arith.addf %560, %562 : vector<16x32xf32>
    %c0_260 = arith.constant 0 : index
    %c0_261 = arith.constant 0 : index
    %564 = vector.load %arg30[%c0_260, %c0_261] : memref<32x32xf32, #tpu.memory_space<vmem>>, vector<32x32xf32>
    %cst_262 = arith.constant dense<0.000000e+00> : vector<16x32xf32>
    %565 = tpu.matmul %44, %564, %cst_262 {dimension_numbers = #tpu.dot_dimension_numbers<[1], [0], [0], [1], [0, 0, 1, 1], [], []>} : vector<16x32xf32>, vector<32x32xf32>, vector<16x32xf32> -> vector<16x32xf32>
    %c0_263 = arith.constant 0 : index
    %c0_264 = arith.constant 0 : index
    %566 = vector.load %arg29[%c0_263, %c0_264] : memref<1x32xf32, #tpu.memory_space<vmem>>, vector<1x32xf32>
    %567 = vector.broadcast %566 : vector<1x32xf32> to vector<16x32xf32>
    %568 = arith.addf %565, %567 : vector<16x32xf32>
    %569 = vector.extract_strided_slice %558 {offsets = [0, 0], sizes = [8, 32], strides = [1, 1]} : vector<16x32xf32> to vector<8x32xf32>
    %570 = vector.extract_strided_slice %563 {offsets = [0, 0], sizes = [8, 32], strides = [1, 1]} : vector<16x32xf32> to vector<8x32xf32>
    %571 = vector.extract_strided_slice %568 {offsets = [0, 0], sizes = [8, 32], strides = [1, 1]} : vector<16x32xf32> to vector<8x32xf32>
    %cst_265 = arith.constant 0.000000e+00 : f32
    %572 = vector.broadcast %cst_265 : f32 to vector<8x32xf32>
    %573 = vector.broadcast %7 : vector<1x32xf32> to vector<8x32xf32>
    %574 = arith.mulf %569, %573 : vector<8x32xf32>
    %cst_266 = arith.constant dense<0.000000e+00> : vector<8x8xf32>
    %575 = tpu.matmul %574, %570, %cst_266 {dimension_numbers = #tpu.dot_dimension_numbers<[1], [1], [0], [0], [0, 0, 1, 0], [], []>} : vector<8x32xf32>, vector<8x32xf32>, vector<8x8xf32> -> vector<8x8xf32>
    %cst_267 = arith.constant 2.500000e-01 : f32
    %576 = vector.broadcast %cst_267 : f32 to vector<8x8xf32>
    %577 = arith.mulf %575, %576 : vector<8x8xf32>
    %578 = arith.addf %577, %553 : vector<8x8xf32>
    %cst_268 = arith.constant dense<0xFF800000> : vector<8xf32>
    %579 = vector.multi_reduction <maximumf>, %578, %cst_268 [1] : vector<8x8xf32> to vector<8xf32>
    %580 = vector.shape_cast %579 : vector<8xf32> to vector<8x1xf32>
    %581 = vector.broadcast %580 : vector<8x1xf32> to vector<8x8xf32>
    %582 = arith.subf %578, %581 : vector<8x8xf32>
    %583 = math.exp %582 : vector<8x8xf32>
    %cst_269 = arith.constant dense<0.000000e+00> : vector<8xf32>
    %584 = vector.multi_reduction <add>, %583, %cst_269 [1] : vector<8x8xf32> to vector<8xf32>
    %585 = vector.shape_cast %584 : vector<8xf32> to vector<8x1xf32>
    %586 = vector.broadcast %585 : vector<8x1xf32> to vector<8x8xf32>
    %587 = arith.divf %583, %586 : vector<8x8xf32>
    %588 = vector.broadcast %7 : vector<1x32xf32> to vector<8x32xf32>
    %589 = arith.mulf %571, %588 : vector<8x32xf32>
    %cst_270 = arith.constant dense<0.000000e+00> : vector<8x32xf32>
    %590 = tpu.matmul %587, %589, %cst_270 {dimension_numbers = #tpu.dot_dimension_numbers<[1], [0], [0], [1], [0, 0, 1, 1], [], []>} : vector<8x8xf32>, vector<8x32xf32>, vector<8x32xf32> -> vector<8x32xf32>
    %591 = arith.addf %572, %590 : vector<8x32xf32>
    %592 = vector.broadcast %14 : vector<1x32xf32> to vector<8x32xf32>
    %593 = arith.mulf %569, %592 : vector<8x32xf32>
    %cst_271 = arith.constant dense<0.000000e+00> : vector<8x8xf32>
    %594 = tpu.matmul %593, %570, %cst_271 {dimension_numbers = #tpu.dot_dimension_numbers<[1], [1], [0], [0], [0, 0, 1, 0], [], []>} : vector<8x32xf32>, vector<8x32xf32>, vector<8x8xf32> -> vector<8x8xf32>
    %cst_272 = arith.constant 2.500000e-01 : f32
    %595 = vector.broadcast %cst_272 : f32 to vector<8x8xf32>
    %596 = arith.mulf %594, %595 : vector<8x8xf32>
    %597 = arith.addf %596, %553 : vector<8x8xf32>
    %cst_273 = arith.constant dense<0xFF800000> : vector<8xf32>
    %598 = vector.multi_reduction <maximumf>, %597, %cst_273 [1] : vector<8x8xf32> to vector<8xf32>
    %599 = vector.shape_cast %598 : vector<8xf32> to vector<8x1xf32>
    %600 = vector.broadcast %599 : vector<8x1xf32> to vector<8x8xf32>
    %601 = arith.subf %597, %600 : vector<8x8xf32>
    %602 = math.exp %601 : vector<8x8xf32>
    %cst_274 = arith.constant dense<0.000000e+00> : vector<8xf32>
    %603 = vector.multi_reduction <add>, %602, %cst_274 [1] : vector<8x8xf32> to vector<8xf32>
    %604 = vector.shape_cast %603 : vector<8xf32> to vector<8x1xf32>
    %605 = vector.broadcast %604 : vector<8x1xf32> to vector<8x8xf32>
    %606 = arith.divf %602, %605 : vector<8x8xf32>
    %607 = vector.broadcast %14 : vector<1x32xf32> to vector<8x32xf32>
    %608 = arith.mulf %571, %607 : vector<8x32xf32>
    %cst_275 = arith.constant dense<0.000000e+00> : vector<8x32xf32>
    %609 = tpu.matmul %606, %608, %cst_275 {dimension_numbers = #tpu.dot_dimension_numbers<[1], [0], [0], [1], [0, 0, 1, 1], [], []>} : vector<8x8xf32>, vector<8x32xf32>, vector<8x32xf32> -> vector<8x32xf32>
    %610 = arith.addf %591, %609 : vector<8x32xf32>
    %611 = vector.extract_strided_slice %558 {offsets = [8, 0], sizes = [8, 32], strides = [1, 1]} : vector<16x32xf32> to vector<8x32xf32>
    %612 = vector.extract_strided_slice %563 {offsets = [8, 0], sizes = [8, 32], strides = [1, 1]} : vector<16x32xf32> to vector<8x32xf32>
    %613 = vector.extract_strided_slice %568 {offsets = [8, 0], sizes = [8, 32], strides = [1, 1]} : vector<16x32xf32> to vector<8x32xf32>
    %cst_276 = arith.constant 0.000000e+00 : f32
    %614 = vector.broadcast %cst_276 : f32 to vector<8x32xf32>
    %615 = vector.broadcast %7 : vector<1x32xf32> to vector<8x32xf32>
    %616 = arith.mulf %611, %615 : vector<8x32xf32>
    %cst_277 = arith.constant dense<0.000000e+00> : vector<8x8xf32>
    %617 = tpu.matmul %616, %612, %cst_277 {dimension_numbers = #tpu.dot_dimension_numbers<[1], [1], [0], [0], [0, 0, 1, 0], [], []>} : vector<8x32xf32>, vector<8x32xf32>, vector<8x8xf32> -> vector<8x8xf32>
    %cst_278 = arith.constant 2.500000e-01 : f32
    %618 = vector.broadcast %cst_278 : f32 to vector<8x8xf32>
    %619 = arith.mulf %617, %618 : vector<8x8xf32>
    %620 = arith.addf %619, %553 : vector<8x8xf32>
    %cst_279 = arith.constant dense<0xFF800000> : vector<8xf32>
    %621 = vector.multi_reduction <maximumf>, %620, %cst_279 [1] : vector<8x8xf32> to vector<8xf32>
    %622 = vector.shape_cast %621 : vector<8xf32> to vector<8x1xf32>
    %623 = vector.broadcast %622 : vector<8x1xf32> to vector<8x8xf32>
    %624 = arith.subf %620, %623 : vector<8x8xf32>
    %625 = math.exp %624 : vector<8x8xf32>
    %cst_280 = arith.constant dense<0.000000e+00> : vector<8xf32>
    %626 = vector.multi_reduction <add>, %625, %cst_280 [1] : vector<8x8xf32> to vector<8xf32>
    %627 = vector.shape_cast %626 : vector<8xf32> to vector<8x1xf32>
    %628 = vector.broadcast %627 : vector<8x1xf32> to vector<8x8xf32>
    %629 = arith.divf %625, %628 : vector<8x8xf32>
    %630 = vector.broadcast %7 : vector<1x32xf32> to vector<8x32xf32>
    %631 = arith.mulf %613, %630 : vector<8x32xf32>
    %cst_281 = arith.constant dense<0.000000e+00> : vector<8x32xf32>
    %632 = tpu.matmul %629, %631, %cst_281 {dimension_numbers = #tpu.dot_dimension_numbers<[1], [0], [0], [1], [0, 0, 1, 1], [], []>} : vector<8x8xf32>, vector<8x32xf32>, vector<8x32xf32> -> vector<8x32xf32>
    %633 = arith.addf %614, %632 : vector<8x32xf32>
    %634 = vector.broadcast %14 : vector<1x32xf32> to vector<8x32xf32>
    %635 = arith.mulf %611, %634 : vector<8x32xf32>
    %cst_282 = arith.constant dense<0.000000e+00> : vector<8x8xf32>
    %636 = tpu.matmul %635, %612, %cst_282 {dimension_numbers = #tpu.dot_dimension_numbers<[1], [1], [0], [0], [0, 0, 1, 0], [], []>} : vector<8x32xf32>, vector<8x32xf32>, vector<8x8xf32> -> vector<8x8xf32>
    %cst_283 = arith.constant 2.500000e-01 : f32
    %637 = vector.broadcast %cst_283 : f32 to vector<8x8xf32>
    %638 = arith.mulf %636, %637 : vector<8x8xf32>
    %639 = arith.addf %638, %553 : vector<8x8xf32>
    %cst_284 = arith.constant dense<0xFF800000> : vector<8xf32>
    %640 = vector.multi_reduction <maximumf>, %639, %cst_284 [1] : vector<8x8xf32> to vector<8xf32>
    %641 = vector.shape_cast %640 : vector<8xf32> to vector<8x1xf32>
    %642 = vector.broadcast %641 : vector<8x1xf32> to vector<8x8xf32>
    %643 = arith.subf %639, %642 : vector<8x8xf32>
    %644 = math.exp %643 : vector<8x8xf32>
    %cst_285 = arith.constant dense<0.000000e+00> : vector<8xf32>
    %645 = vector.multi_reduction <add>, %644, %cst_285 [1] : vector<8x8xf32> to vector<8xf32>
    %646 = vector.shape_cast %645 : vector<8xf32> to vector<8x1xf32>
    %647 = vector.broadcast %646 : vector<8x1xf32> to vector<8x8xf32>
    %648 = arith.divf %644, %647 : vector<8x8xf32>
    %649 = vector.broadcast %14 : vector<1x32xf32> to vector<8x32xf32>
    %650 = arith.mulf %613, %649 : vector<8x32xf32>
    %cst_286 = arith.constant dense<0.000000e+00> : vector<8x32xf32>
    %651 = tpu.matmul %648, %650, %cst_286 {dimension_numbers = #tpu.dot_dimension_numbers<[1], [0], [0], [1], [0, 0, 1, 1], [], []>} : vector<8x8xf32>, vector<8x32xf32>, vector<8x32xf32> -> vector<8x32xf32>
    %652 = arith.addf %633, %651 : vector<8x32xf32>
    %653 = tpu.concatenate %610, %652 in 0 : vector<8x32xf32>, vector<8x32xf32> -> vector<16x32xf32>
    %c0_287 = arith.constant 0 : index
    %c0_288 = arith.constant 0 : index
    %654 = vector.load %arg26[%c0_287, %c0_288] : memref<32x32xf32, #tpu.memory_space<vmem>>, vector<32x32xf32>
    %cst_289 = arith.constant dense<0.000000e+00> : vector<16x32xf32>
    %655 = tpu.matmul %653, %654, %cst_289 {dimension_numbers = #tpu.dot_dimension_numbers<[1], [0], [0], [1], [0, 0, 1, 1], [], []>} : vector<16x32xf32>, vector<32x32xf32>, vector<16x32xf32> -> vector<16x32xf32>
    %c0_290 = arith.constant 0 : index
    %c0_291 = arith.constant 0 : index
    %656 = vector.load %arg25[%c0_290, %c0_291] : memref<1x32xf32, #tpu.memory_space<vmem>>, vector<1x32xf32>
    %657 = vector.broadcast %656 : vector<1x32xf32> to vector<16x32xf32>
    %658 = arith.addf %655, %657 : vector<16x32xf32>
    %659 = arith.addf %44, %658 : vector<16x32xf32>
    %cst_292 = arith.constant dense<0.000000e+00> : vector<16xf32>
    %660 = vector.multi_reduction <add>, %659, %cst_292 [1] : vector<16x32xf32> to vector<16xf32>
    %661 = vector.shape_cast %660 : vector<16xf32> to vector<16x1xf32>
    %cst_293 = arith.constant 3.200000e+01 : f32
    %662 = vector.broadcast %cst_293 : f32 to vector<16x1xf32>
    %663 = arith.divf %661, %662 : vector<16x1xf32>
    %664 = vector.broadcast %663 : vector<16x1xf32> to vector<16x32xf32>
    %665 = arith.subf %659, %664 : vector<16x32xf32>
    %666 = arith.mulf %665, %665 : vector<16x32xf32>
    %cst_294 = arith.constant dense<0.000000e+00> : vector<16xf32>
    %667 = vector.multi_reduction <add>, %666, %cst_294 [1] : vector<16x32xf32> to vector<16xf32>
    %668 = vector.shape_cast %667 : vector<16xf32> to vector<16x1xf32>
    %cst_295 = arith.constant 3.200000e+01 : f32
    %669 = vector.broadcast %cst_295 : f32 to vector<16x1xf32>
    %670 = arith.divf %668, %669 : vector<16x1xf32>
    %671 = vector.broadcast %663 : vector<16x1xf32> to vector<16x32xf32>
    %672 = arith.subf %659, %671 : vector<16x32xf32>
    %cst_296 = arith.constant 9.99999974E-6 : f32
    %673 = vector.broadcast %cst_296 : f32 to vector<16x1xf32>
    %674 = arith.addf %670, %673 : vector<16x1xf32>
    %675 = math.rsqrt %674 : vector<16x1xf32>
    %676 = vector.broadcast %675 : vector<16x1xf32> to vector<16x32xf32>
    %677 = arith.mulf %672, %676 : vector<16x32xf32>
    %c0_297 = arith.constant 0 : index
    %c0_298 = arith.constant 0 : index
    %678 = vector.load %arg18[%c0_297, %c0_298] : memref<1x32xf32, #tpu.memory_space<vmem>>, vector<1x32xf32>
    %679 = vector.broadcast %678 : vector<1x32xf32> to vector<16x32xf32>
    %680 = arith.mulf %677, %679 : vector<16x32xf32>
    %c0_299 = arith.constant 0 : index
    %c0_300 = arith.constant 0 : index
    %681 = vector.load %arg17[%c0_299, %c0_300] : memref<1x32xf32, #tpu.memory_space<vmem>>, vector<1x32xf32>
    %682 = vector.broadcast %681 : vector<1x32xf32> to vector<16x32xf32>
    %683 = arith.addf %680, %682 : vector<16x32xf32>
    %c0_301 = arith.constant 0 : index
    %c0_302 = arith.constant 0 : index
    %684 = vector.load %arg10[%c0_301, %c0_302] : memref<32x32xf32, #tpu.memory_space<vmem>>, vector<32x32xf32>
    %cst_303 = arith.constant dense<0.000000e+00> : vector<16x32xf32>
    %685 = tpu.matmul %683, %684, %cst_303 {dimension_numbers = #tpu.dot_dimension_numbers<[1], [0], [0], [1], [0, 0, 1, 1], [], []>} : vector<16x32xf32>, vector<32x32xf32>, vector<16x32xf32> -> vector<16x32xf32>
    %c0_304 = arith.constant 0 : index
    %c0_305 = arith.constant 0 : index
    %686 = vector.load %arg9[%c0_304, %c0_305] : memref<1x32xf32, #tpu.memory_space<vmem>>, vector<1x32xf32>
    %687 = vector.broadcast %686 : vector<1x32xf32> to vector<16x32xf32>
    %688 = arith.addf %685, %687 : vector<16x32xf32>
    %c0_306 = arith.constant 0 : index
    %c0_307 = arith.constant 0 : index
    %689 = vector.load %arg6[%c0_306, %c0_307] : memref<32x32xf32, #tpu.memory_space<vmem>>, vector<32x32xf32>
    %cst_308 = arith.constant dense<0.000000e+00> : vector<16x32xf32>
    %690 = tpu.matmul %552, %689, %cst_308 {dimension_numbers = #tpu.dot_dimension_numbers<[1], [0], [0], [1], [0, 0, 1, 1], [], []>} : vector<16x32xf32>, vector<32x32xf32>, vector<16x32xf32> -> vector<16x32xf32>
    %c0_309 = arith.constant 0 : index
    %c0_310 = arith.constant 0 : index
    %691 = vector.load %arg5[%c0_309, %c0_310] : memref<1x32xf32, #tpu.memory_space<vmem>>, vector<1x32xf32>
    %692 = vector.broadcast %691 : vector<1x32xf32> to vector<16x32xf32>
    %693 = arith.addf %690, %692 : vector<16x32xf32>
    %c0_311 = arith.constant 0 : index
    %c0_312 = arith.constant 0 : index
    %694 = vector.load %arg12[%c0_311, %c0_312] : memref<32x32xf32, #tpu.memory_space<vmem>>, vector<32x32xf32>
    %cst_313 = arith.constant dense<0.000000e+00> : vector<16x32xf32>
    %695 = tpu.matmul %552, %694, %cst_313 {dimension_numbers = #tpu.dot_dimension_numbers<[1], [0], [0], [1], [0, 0, 1, 1], [], []>} : vector<16x32xf32>, vector<32x32xf32>, vector<16x32xf32> -> vector<16x32xf32>
    %c0_314 = arith.constant 0 : index
    %c0_315 = arith.constant 0 : index
    %696 = vector.load %arg11[%c0_314, %c0_315] : memref<1x32xf32, #tpu.memory_space<vmem>>, vector<1x32xf32>
    %697 = vector.broadcast %696 : vector<1x32xf32> to vector<16x32xf32>
    %698 = arith.addf %695, %697 : vector<16x32xf32>
    %699 = vector.extract_strided_slice %688 {offsets = [0, 0], sizes = [8, 32], strides = [1, 1]} : vector<16x32xf32> to vector<8x32xf32>
    %700 = vector.extract_strided_slice %693 {offsets = [0, 0], sizes = [8, 32], strides = [1, 1]} : vector<16x32xf32> to vector<8x32xf32>
    %701 = vector.extract_strided_slice %698 {offsets = [0, 0], sizes = [8, 32], strides = [1, 1]} : vector<16x32xf32> to vector<8x32xf32>
    %cst_316 = arith.constant 0.000000e+00 : f32
    %702 = vector.broadcast %cst_316 : f32 to vector<8x32xf32>
    %703 = vector.broadcast %7 : vector<1x32xf32> to vector<8x32xf32>
    %704 = arith.mulf %699, %703 : vector<8x32xf32>
    %cst_317 = arith.constant dense<0.000000e+00> : vector<8x8xf32>
    %705 = tpu.matmul %704, %700, %cst_317 {dimension_numbers = #tpu.dot_dimension_numbers<[1], [1], [0], [0], [0, 0, 1, 0], [], []>} : vector<8x32xf32>, vector<8x32xf32>, vector<8x8xf32> -> vector<8x8xf32>
    %cst_318 = arith.constant 2.500000e-01 : f32
    %706 = vector.broadcast %cst_318 : f32 to vector<8x8xf32>
    %707 = arith.mulf %705, %706 : vector<8x8xf32>
    %cst_319 = arith.constant dense<0xFF800000> : vector<8xf32>
    %708 = vector.multi_reduction <maximumf>, %707, %cst_319 [1] : vector<8x8xf32> to vector<8xf32>
    %709 = vector.shape_cast %708 : vector<8xf32> to vector<8x1xf32>
    %710 = vector.broadcast %709 : vector<8x1xf32> to vector<8x8xf32>
    %711 = arith.subf %707, %710 : vector<8x8xf32>
    %712 = math.exp %711 : vector<8x8xf32>
    %cst_320 = arith.constant dense<0.000000e+00> : vector<8xf32>
    %713 = vector.multi_reduction <add>, %712, %cst_320 [1] : vector<8x8xf32> to vector<8xf32>
    %714 = vector.shape_cast %713 : vector<8xf32> to vector<8x1xf32>
    %715 = vector.broadcast %714 : vector<8x1xf32> to vector<8x8xf32>
    %716 = arith.divf %712, %715 : vector<8x8xf32>
    %717 = vector.broadcast %7 : vector<1x32xf32> to vector<8x32xf32>
    %718 = arith.mulf %701, %717 : vector<8x32xf32>
    %cst_321 = arith.constant dense<0.000000e+00> : vector<8x32xf32>
    %719 = tpu.matmul %716, %718, %cst_321 {dimension_numbers = #tpu.dot_dimension_numbers<[1], [0], [0], [1], [0, 0, 1, 1], [], []>} : vector<8x8xf32>, vector<8x32xf32>, vector<8x32xf32> -> vector<8x32xf32>
    %720 = arith.addf %702, %719 : vector<8x32xf32>
    %721 = vector.broadcast %14 : vector<1x32xf32> to vector<8x32xf32>
    %722 = arith.mulf %699, %721 : vector<8x32xf32>
    %cst_322 = arith.constant dense<0.000000e+00> : vector<8x8xf32>
    %723 = tpu.matmul %722, %700, %cst_322 {dimension_numbers = #tpu.dot_dimension_numbers<[1], [1], [0], [0], [0, 0, 1, 0], [], []>} : vector<8x32xf32>, vector<8x32xf32>, vector<8x8xf32> -> vector<8x8xf32>
    %cst_323 = arith.constant 2.500000e-01 : f32
    %724 = vector.broadcast %cst_323 : f32 to vector<8x8xf32>
    %725 = arith.mulf %723, %724 : vector<8x8xf32>
    %cst_324 = arith.constant dense<0xFF800000> : vector<8xf32>
    %726 = vector.multi_reduction <maximumf>, %725, %cst_324 [1] : vector<8x8xf32> to vector<8xf32>
    %727 = vector.shape_cast %726 : vector<8xf32> to vector<8x1xf32>
    %728 = vector.broadcast %727 : vector<8x1xf32> to vector<8x8xf32>
    %729 = arith.subf %725, %728 : vector<8x8xf32>
    %730 = math.exp %729 : vector<8x8xf32>
    %cst_325 = arith.constant dense<0.000000e+00> : vector<8xf32>
    %731 = vector.multi_reduction <add>, %730, %cst_325 [1] : vector<8x8xf32> to vector<8xf32>
    %732 = vector.shape_cast %731 : vector<8xf32> to vector<8x1xf32>
    %733 = vector.broadcast %732 : vector<8x1xf32> to vector<8x8xf32>
    %734 = arith.divf %730, %733 : vector<8x8xf32>
    %735 = vector.broadcast %14 : vector<1x32xf32> to vector<8x32xf32>
    %736 = arith.mulf %701, %735 : vector<8x32xf32>
    %cst_326 = arith.constant dense<0.000000e+00> : vector<8x32xf32>
    %737 = tpu.matmul %734, %736, %cst_326 {dimension_numbers = #tpu.dot_dimension_numbers<[1], [0], [0], [1], [0, 0, 1, 1], [], []>} : vector<8x8xf32>, vector<8x32xf32>, vector<8x32xf32> -> vector<8x32xf32>
    %738 = arith.addf %720, %737 : vector<8x32xf32>
    %739 = vector.extract_strided_slice %688 {offsets = [8, 0], sizes = [8, 32], strides = [1, 1]} : vector<16x32xf32> to vector<8x32xf32>
    %740 = vector.extract_strided_slice %693 {offsets = [8, 0], sizes = [8, 32], strides = [1, 1]} : vector<16x32xf32> to vector<8x32xf32>
    %741 = vector.extract_strided_slice %698 {offsets = [8, 0], sizes = [8, 32], strides = [1, 1]} : vector<16x32xf32> to vector<8x32xf32>
    %cst_327 = arith.constant 0.000000e+00 : f32
    %742 = vector.broadcast %cst_327 : f32 to vector<8x32xf32>
    %743 = vector.broadcast %7 : vector<1x32xf32> to vector<8x32xf32>
    %744 = arith.mulf %739, %743 : vector<8x32xf32>
    %cst_328 = arith.constant dense<0.000000e+00> : vector<8x8xf32>
    %745 = tpu.matmul %744, %740, %cst_328 {dimension_numbers = #tpu.dot_dimension_numbers<[1], [1], [0], [0], [0, 0, 1, 0], [], []>} : vector<8x32xf32>, vector<8x32xf32>, vector<8x8xf32> -> vector<8x8xf32>
    %cst_329 = arith.constant 2.500000e-01 : f32
    %746 = vector.broadcast %cst_329 : f32 to vector<8x8xf32>
    %747 = arith.mulf %745, %746 : vector<8x8xf32>
    %cst_330 = arith.constant dense<0xFF800000> : vector<8xf32>
    %748 = vector.multi_reduction <maximumf>, %747, %cst_330 [1] : vector<8x8xf32> to vector<8xf32>
    %749 = vector.shape_cast %748 : vector<8xf32> to vector<8x1xf32>
    %750 = vector.broadcast %749 : vector<8x1xf32> to vector<8x8xf32>
    %751 = arith.subf %747, %750 : vector<8x8xf32>
    %752 = math.exp %751 : vector<8x8xf32>
    %cst_331 = arith.constant dense<0.000000e+00> : vector<8xf32>
    %753 = vector.multi_reduction <add>, %752, %cst_331 [1] : vector<8x8xf32> to vector<8xf32>
    %754 = vector.shape_cast %753 : vector<8xf32> to vector<8x1xf32>
    %755 = vector.broadcast %754 : vector<8x1xf32> to vector<8x8xf32>
    %756 = arith.divf %752, %755 : vector<8x8xf32>
    %757 = vector.broadcast %7 : vector<1x32xf32> to vector<8x32xf32>
    %758 = arith.mulf %741, %757 : vector<8x32xf32>
    %cst_332 = arith.constant dense<0.000000e+00> : vector<8x32xf32>
    %759 = tpu.matmul %756, %758, %cst_332 {dimension_numbers = #tpu.dot_dimension_numbers<[1], [0], [0], [1], [0, 0, 1, 1], [], []>} : vector<8x8xf32>, vector<8x32xf32>, vector<8x32xf32> -> vector<8x32xf32>
    %760 = arith.addf %742, %759 : vector<8x32xf32>
    %761 = vector.broadcast %14 : vector<1x32xf32> to vector<8x32xf32>
    %762 = arith.mulf %739, %761 : vector<8x32xf32>
    %cst_333 = arith.constant dense<0.000000e+00> : vector<8x8xf32>
    %763 = tpu.matmul %762, %740, %cst_333 {dimension_numbers = #tpu.dot_dimension_numbers<[1], [1], [0], [0], [0, 0, 1, 0], [], []>} : vector<8x32xf32>, vector<8x32xf32>, vector<8x8xf32> -> vector<8x8xf32>
    %cst_334 = arith.constant 2.500000e-01 : f32
    %764 = vector.broadcast %cst_334 : f32 to vector<8x8xf32>
    %765 = arith.mulf %763, %764 : vector<8x8xf32>
    %cst_335 = arith.constant dense<0xFF800000> : vector<8xf32>
    %766 = vector.multi_reduction <maximumf>, %765, %cst_335 [1] : vector<8x8xf32> to vector<8xf32>
    %767 = vector.shape_cast %766 : vector<8xf32> to vector<8x1xf32>
    %768 = vector.broadcast %767 : vector<8x1xf32> to vector<8x8xf32>
    %769 = arith.subf %765, %768 : vector<8x8xf32>
    %770 = math.exp %769 : vector<8x8xf32>
    %cst_336 = arith.constant dense<0.000000e+00> : vector<8xf32>
    %771 = vector.multi_reduction <add>, %770, %cst_336 [1] : vector<8x8xf32> to vector<8xf32>
    %772 = vector.shape_cast %771 : vector<8xf32> to vector<8x1xf32>
    %773 = vector.broadcast %772 : vector<8x1xf32> to vector<8x8xf32>
    %774 = arith.divf %770, %773 : vector<8x8xf32>
    %775 = vector.broadcast %14 : vector<1x32xf32> to vector<8x32xf32>
    %776 = arith.mulf %741, %775 : vector<8x32xf32>
    %cst_337 = arith.constant dense<0.000000e+00> : vector<8x32xf32>
    %777 = tpu.matmul %774, %776, %cst_337 {dimension_numbers = #tpu.dot_dimension_numbers<[1], [0], [0], [1], [0, 0, 1, 1], [], []>} : vector<8x8xf32>, vector<8x32xf32>, vector<8x32xf32> -> vector<8x32xf32>
    %778 = arith.addf %760, %777 : vector<8x32xf32>
    %779 = tpu.concatenate %738, %778 in 0 : vector<8x32xf32>, vector<8x32xf32> -> vector<16x32xf32>
    %c0_338 = arith.constant 0 : index
    %c0_339 = arith.constant 0 : index
    %780 = vector.load %arg8[%c0_338, %c0_339] : memref<32x32xf32, #tpu.memory_space<vmem>>, vector<32x32xf32>
    %cst_340 = arith.constant dense<0.000000e+00> : vector<16x32xf32>
    %781 = tpu.matmul %779, %780, %cst_340 {dimension_numbers = #tpu.dot_dimension_numbers<[1], [0], [0], [1], [0, 0, 1, 1], [], []>} : vector<16x32xf32>, vector<32x32xf32>, vector<16x32xf32> -> vector<16x32xf32>
    %c0_341 = arith.constant 0 : index
    %c0_342 = arith.constant 0 : index
    %782 = vector.load %arg7[%c0_341, %c0_342] : memref<1x32xf32, #tpu.memory_space<vmem>>, vector<1x32xf32>
    %783 = vector.broadcast %782 : vector<1x32xf32> to vector<16x32xf32>
    %784 = arith.addf %781, %783 : vector<16x32xf32>
    %785 = arith.addf %683, %784 : vector<16x32xf32>
    %cst_343 = arith.constant dense<0.000000e+00> : vector<16xf32>
    %786 = vector.multi_reduction <add>, %785, %cst_343 [1] : vector<16x32xf32> to vector<16xf32>
    %787 = vector.shape_cast %786 : vector<16xf32> to vector<16x1xf32>
    %cst_344 = arith.constant 3.200000e+01 : f32
    %788 = vector.broadcast %cst_344 : f32 to vector<16x1xf32>
    %789 = arith.divf %787, %788 : vector<16x1xf32>
    %790 = vector.broadcast %789 : vector<16x1xf32> to vector<16x32xf32>
    %791 = arith.subf %785, %790 : vector<16x32xf32>
    %792 = arith.mulf %791, %791 : vector<16x32xf32>
    %cst_345 = arith.constant dense<0.000000e+00> : vector<16xf32>
    %793 = vector.multi_reduction <add>, %792, %cst_345 [1] : vector<16x32xf32> to vector<16xf32>
    %794 = vector.shape_cast %793 : vector<16xf32> to vector<16x1xf32>
    %cst_346 = arith.constant 3.200000e+01 : f32
    %795 = vector.broadcast %cst_346 : f32 to vector<16x1xf32>
    %796 = arith.divf %794, %795 : vector<16x1xf32>
    %797 = vector.broadcast %789 : vector<16x1xf32> to vector<16x32xf32>
    %798 = arith.subf %785, %797 : vector<16x32xf32>
    %cst_347 = arith.constant 9.99999974E-6 : f32
    %799 = vector.broadcast %cst_347 : f32 to vector<16x1xf32>
    %800 = arith.addf %796, %799 : vector<16x1xf32>
    %801 = math.rsqrt %800 : vector<16x1xf32>
    %802 = vector.broadcast %801 : vector<16x1xf32> to vector<16x32xf32>
    %803 = arith.mulf %798, %802 : vector<16x32xf32>
    %c0_348 = arith.constant 0 : index
    %c0_349 = arith.constant 0 : index
    %804 = vector.load %arg20[%c0_348, %c0_349] : memref<1x32xf32, #tpu.memory_space<vmem>>, vector<1x32xf32>
    %805 = vector.broadcast %804 : vector<1x32xf32> to vector<16x32xf32>
    %806 = arith.mulf %803, %805 : vector<16x32xf32>
    %c0_350 = arith.constant 0 : index
    %c0_351 = arith.constant 0 : index
    %807 = vector.load %arg19[%c0_350, %c0_351] : memref<1x32xf32, #tpu.memory_space<vmem>>, vector<1x32xf32>
    %808 = vector.broadcast %807 : vector<1x32xf32> to vector<16x32xf32>
    %809 = arith.addf %806, %808 : vector<16x32xf32>
    %c0_352 = arith.constant 0 : index
    %c0_353 = arith.constant 0 : index
    %810 = vector.load %arg14[%c0_352, %c0_353] : memref<32x64xf32, #tpu.memory_space<vmem>>, vector<32x64xf32>
    %cst_354 = arith.constant dense<0.000000e+00> : vector<16x64xf32>
    %811 = tpu.matmul %809, %810, %cst_354 {dimension_numbers = #tpu.dot_dimension_numbers<[1], [0], [0], [1], [0, 0, 1, 1], [], []>} : vector<16x32xf32>, vector<32x64xf32>, vector<16x64xf32> -> vector<16x64xf32>
    %c0_355 = arith.constant 0 : index
    %c0_356 = arith.constant 0 : index
    %812 = vector.load %arg13[%c0_355, %c0_356] : memref<1x64xf32, #tpu.memory_space<vmem>>, vector<1x64xf32>
    %813 = vector.broadcast %812 : vector<1x64xf32> to vector<16x64xf32>
    %814 = arith.addf %811, %813 : vector<16x64xf32>
    %cst_357 = arith.constant 0.000000e+00 : f32
    %815 = vector.broadcast %cst_357 : f32 to vector<16x64xf32>
    %816 = arith.maximumf %814, %815 : vector<16x64xf32>
    %c0_358 = arith.constant 0 : index
    %c0_359 = arith.constant 0 : index
    %817 = vector.load %arg16[%c0_358, %c0_359] : memref<64x32xf32, #tpu.memory_space<vmem>>, vector<64x32xf32>
    %cst_360 = arith.constant dense<0.000000e+00> : vector<16x32xf32>
    %818 = tpu.matmul %816, %817, %cst_360 {dimension_numbers = #tpu.dot_dimension_numbers<[1], [0], [0], [1], [0, 0, 1, 1], [], []>} : vector<16x64xf32>, vector<64x32xf32>, vector<16x32xf32> -> vector<16x32xf32>
    %c0_361 = arith.constant 0 : index
    %c0_362 = arith.constant 0 : index
    %819 = vector.load %arg15[%c0_361, %c0_362] : memref<1x32xf32, #tpu.memory_space<vmem>>, vector<1x32xf32>
    %820 = vector.broadcast %819 : vector<1x32xf32> to vector<16x32xf32>
    %821 = arith.addf %818, %820 : vector<16x32xf32>
    %822 = arith.addf %809, %821 : vector<16x32xf32>
    %cst_363 = arith.constant dense<0.000000e+00> : vector<16xf32>
    %823 = vector.multi_reduction <add>, %822, %cst_363 [1] : vector<16x32xf32> to vector<16xf32>
    %824 = vector.shape_cast %823 : vector<16xf32> to vector<16x1xf32>
    %cst_364 = arith.constant 3.200000e+01 : f32
    %825 = vector.broadcast %cst_364 : f32 to vector<16x1xf32>
    %826 = arith.divf %824, %825 : vector<16x1xf32>
    %827 = vector.broadcast %826 : vector<16x1xf32> to vector<16x32xf32>
    %828 = arith.subf %822, %827 : vector<16x32xf32>
    %829 = arith.mulf %828, %828 : vector<16x32xf32>
    %cst_365 = arith.constant dense<0.000000e+00> : vector<16xf32>
    %830 = vector.multi_reduction <add>, %829, %cst_365 [1] : vector<16x32xf32> to vector<16xf32>
    %831 = vector.shape_cast %830 : vector<16xf32> to vector<16x1xf32>
    %cst_366 = arith.constant 3.200000e+01 : f32
    %832 = vector.broadcast %cst_366 : f32 to vector<16x1xf32>
    %833 = arith.divf %831, %832 : vector<16x1xf32>
    %834 = vector.broadcast %826 : vector<16x1xf32> to vector<16x32xf32>
    %835 = arith.subf %822, %834 : vector<16x32xf32>
    %cst_367 = arith.constant 9.99999974E-6 : f32
    %836 = vector.broadcast %cst_367 : f32 to vector<16x1xf32>
    %837 = arith.addf %833, %836 : vector<16x1xf32>
    %838 = math.rsqrt %837 : vector<16x1xf32>
    %839 = vector.broadcast %838 : vector<16x1xf32> to vector<16x32xf32>
    %840 = arith.mulf %835, %839 : vector<16x32xf32>
    %c0_368 = arith.constant 0 : index
    %c0_369 = arith.constant 0 : index
    %841 = vector.load %arg22[%c0_368, %c0_369] : memref<1x32xf32, #tpu.memory_space<vmem>>, vector<1x32xf32>
    %842 = vector.broadcast %841 : vector<1x32xf32> to vector<16x32xf32>
    %843 = arith.mulf %840, %842 : vector<16x32xf32>
    %c0_370 = arith.constant 0 : index
    %c0_371 = arith.constant 0 : index
    %844 = vector.load %arg21[%c0_370, %c0_371] : memref<1x32xf32, #tpu.memory_space<vmem>>, vector<1x32xf32>
    %845 = vector.broadcast %844 : vector<1x32xf32> to vector<16x32xf32>
    %846 = arith.addf %843, %845 : vector<16x32xf32>
    %cst_372 = arith.constant dense<0.000000e+00> : vector<16xf32>
    %847 = vector.multi_reduction <add>, %846, %cst_372 [1] : vector<16x32xf32> to vector<16xf32>
    %848 = vector.shape_cast %847 : vector<16xf32> to vector<16x1xf32>
    %cst_373 = arith.constant 3.200000e+01 : f32
    %849 = vector.broadcast %cst_373 : f32 to vector<16x1xf32>
    %850 = arith.divf %848, %849 : vector<16x1xf32>
    %851 = vector.broadcast %850 : vector<16x1xf32> to vector<16x32xf32>
    %852 = arith.subf %846, %851 : vector<16x32xf32>
    %853 = arith.mulf %852, %852 : vector<16x32xf32>
    %cst_374 = arith.constant dense<0.000000e+00> : vector<16xf32>
    %854 = vector.multi_reduction <add>, %853, %cst_374 [1] : vector<16x32xf32> to vector<16xf32>
    %855 = vector.shape_cast %854 : vector<16xf32> to vector<16x1xf32>
    %cst_375 = arith.constant 3.200000e+01 : f32
    %856 = vector.broadcast %cst_375 : f32 to vector<16x1xf32>
    %857 = arith.divf %855, %856 : vector<16x1xf32>
    %858 = vector.broadcast %850 : vector<16x1xf32> to vector<16x32xf32>
    %859 = arith.subf %846, %858 : vector<16x32xf32>
    %cst_376 = arith.constant 9.99999974E-6 : f32
    %860 = vector.broadcast %cst_376 : f32 to vector<16x1xf32>
    %861 = arith.addf %857, %860 : vector<16x1xf32>
    %862 = math.rsqrt %861 : vector<16x1xf32>
    %863 = vector.broadcast %862 : vector<16x1xf32> to vector<16x32xf32>
    %864 = arith.mulf %859, %863 : vector<16x32xf32>
    %c0_377 = arith.constant 0 : index
    %c0_378 = arith.constant 0 : index
    %865 = vector.load %arg80[%c0_377, %c0_378] : memref<1x32xf32, #tpu.memory_space<vmem>>, vector<1x32xf32>
    %866 = vector.broadcast %865 : vector<1x32xf32> to vector<16x32xf32>
    %867 = arith.mulf %864, %866 : vector<16x32xf32>
    %c0_379 = arith.constant 0 : index
    %c0_380 = arith.constant 0 : index
    %868 = vector.load %arg79[%c0_379, %c0_380] : memref<1x32xf32, #tpu.memory_space<vmem>>, vector<1x32xf32>
    %869 = vector.broadcast %868 : vector<1x32xf32> to vector<16x32xf32>
    %870 = arith.addf %867, %869 : vector<16x32xf32>
    %c0_381 = arith.constant 0 : index
    %c0_382 = arith.constant 0 : index
    %871 = vector.load %arg82[%c0_381, %c0_382] : memref<32x24xf32, #tpu.memory_space<vmem>>, vector<32x24xf32>
    %cst_383 = arith.constant dense<0.000000e+00> : vector<16x24xf32>
    %872 = tpu.matmul %870, %871, %cst_383 {dimension_numbers = #tpu.dot_dimension_numbers<[1], [0], [0], [1], [0, 0, 1, 1], [], []>} : vector<16x32xf32>, vector<32x24xf32>, vector<16x24xf32> -> vector<16x24xf32>
    %c0_384 = arith.constant 0 : index
    %c0_385 = arith.constant 0 : index
    %873 = vector.load %arg81[%c0_384, %c0_385] : memref<1x24xf32, #tpu.memory_space<vmem>>, vector<1x24xf32>
    %874 = vector.broadcast %873 : vector<1x24xf32> to vector<16x24xf32>
    %875 = arith.addf %872, %874 : vector<16x24xf32>
    %cst_386 = arith.constant dense<0xFF800000> : vector<16xf32>
    %876 = vector.multi_reduction <maximumf>, %875, %cst_386 [1] : vector<16x24xf32> to vector<16xf32>
    %877 = vector.shape_cast %876 : vector<16xf32> to vector<16x1xf32>
    %878 = vector.broadcast %877 : vector<16x1xf32> to vector<16x24xf32>
    %879 = arith.subf %875, %878 : vector<16x24xf32>
    %880 = math.exp %879 : vector<16x24xf32>
    %cst_387 = arith.constant dense<0.000000e+00> : vector<16xf32>
    %881 = vector.multi_reduction <add>, %880, %cst_387 [1] : vector<16x24xf32> to vector<16xf32>
    %882 = vector.shape_cast %881 : vector<16xf32> to vector<16x1xf32>
    %883 = vector.broadcast %882 : vector<16x1xf32> to vector<16x24xf32>
    %884 = arith.divf %880, %883 : vector<16x24xf32>
    %c0_388 = arith.constant 0 : index
    %c0_389 = arith.constant 0 : index
    %885 = vector.load %arg92[%c0_388, %c0_389] : memref<16x24xf32, #tpu.memory_space<vmem>>, vector<16x24xf32>
    tpu.vector_store %arg92[%c0_388, %c0_389], %884 {strides = array<i32>} : memref<16x24xf32, #tpu.memory_space<vmem>>, vector<16x24xf32>,
    return
  }
}

</mosaic_0001>

<bundles_post_ra>
// kernel: music_transformer_forward.1
= control target key start
LH: loop header
LB: loop body
LE: loop exit
PB: predicated region body
PF: predicated region fallthrough
CT: control target
= control target key end

     0   :  { %s11162_s6 = smov 1   ;;  %s11163_s10 = smov 2   ;;  %s12816_s0 = inlined_call_operand.smem [shape: u32[93], index: -1, kind: input, shape index: {}] }
   0x1   :  { %s11331_s5 = sld [smem:[%s12816_s0]]   ;;  %s11164_s14 = smov 3  }
   0x2   :  { %s11336_s9 = sld [smem:[%s12816_s0 + %s11162_s6]]   ;;  %s11165_s18 = smov 4  }
   0x3   :  { %s11341_s13 = sld [smem:[%s12816_s0 + %s11163_s10]]   ;;  %s11166_s22 = smov 5  }
   0x4   :  { %s11346_s17 = sld [smem:[%s12816_s0 + %s11164_s14]]   ;;  %s11167_s26 = smov 6  }
   0x5   :  { %s11351_s21 = sld [smem:[%s12816_s0 + %s11165_s18]]   ;;  %s11168_s30 = smov 7  }
   0x6   :  { %s11356_s25 = sld [smem:[%s12816_s0 + %s11166_s22]]   ;;  %s11169_s4 = smov 8  }
   0x7   :  { %12888 = sst [smem:[#allocation132_spill]] %s11331_s5  ;;  %s11170_s10 = smov 9  }
   0x8   :  { %s11361_s29 = sld [smem:[%s12816_s0 + %s11167_s26]]   ;;  %s11171_s15 = smov 10  }
   0x9   :  { %12889 = sst [smem:[#allocation133_spill]] %s11341_s13  ;;  %s11172_s20 = smov 11  }
   0xa   :  { %s11366_s3 = sld [smem:[%s12816_s0 + %s11168_s30]]   ;;  %s11173_s26 = smov 12  }
   0xb   :  { %12890 = sst [smem:[#allocation134_spill]] %s11351_s21  ;;  %s11174_s1 = smov 13  }
   0xc   :  { %s11371_s8 = sld [smem:[%s12816_s0 + %s11169_s4]]   ;;  %s11175_s7 = smov 14  }
   0xd   :  { %s11376_s14 = sld [smem:[%s12816_s0 + %s11170_s10]]   ;;  %s11177_s22 = smov 16  }
   0xe   :  { %12891 = sst [smem:[#allocation135_spill]] %s11361_s29  ;;  %s11178_s28 = smov 17  }
   0xf   :  { %s11381_s19 = sld [smem:[%s12816_s0 + %s11171_s15]]   ;;  %s11176_s15 = smov 15  }
  0x10   :  { %12892 = sst [smem:[#allocation136_spill]] %s11366_s3 }
  0x11   :  { %s11386_s24 = sld [smem:[%s12816_s0 + %s11172_s20]]  }
  0x12   :  { %12893 = sst [smem:[#allocation137_spill]] %s11371_s8 }
  0x13   :  { %s11391_s30 = sld [smem:[%s12816_s0 + %s11173_s26]]  }
  0x14   :  { %s11396_s6 = sld [smem:[%s12816_s0 + %s11174_s1]]  }
  0x15   :  { %12894 = sst [smem:[#allocation138_spill]] %s11381_s19 }
  0x16   :  { %s11401_s12 = sld [smem:[%s12816_s0 + %s11175_s7]]   ;;  %s11179_s7 = smov 18  }
  0x17   :  { %12895 = sst [smem:[#allocation139_spill]] %s11386_s24 }
  0x18   :  { %s11406_s20 = sld [smem:[%s12816_s0 + %s11176_s15]]   ;;  %s11180_s15 = smov 19  }
  0x19   :  { %12896 = sst [smem:[#allocation140_spill]] %s11391_s30 }
  0x1a   :  { %s11411_s27 = sld [smem:[%s12816_s0 + %s11177_s22]]   ;;  %s11181_s22 = smov 20  }
  0x1b   :  { %s11416_s4 = sld [smem:[%s12816_s0 + %s11178_s28]]   ;;  %s11182_s28 = smov 21  }
  0x1c   :  { %12897 = sst [smem:[#allocation141_spill]] %s11401_s12 }
  0x1d   :  { %s11421_s12 = sld [smem:[%s12816_s0 + %s11179_s7]]   ;;  %s11183_s7 = smov 22  }
  0x1e   :  { %12898 = sst [smem:[#allocation142_spill]] %s11406_s20 }
  0x1f   :  { %s11426_s8 = sld [smem:[%s12816_s0 + %s11180_s15]]   ;;  %s11184_s15 = smov 23  }
  0x20   :  { %12899 = sst [smem:[#allocation143_spill]] %s11411_s27 }
  0x21   :  { %s11431_s27 = sld [smem:[%s12816_s0 + %s11181_s22]]   ;;  %s11185_s22 = smov 24  }
  0x22   :  { %s11436_s30 = sld [smem:[%s12816_s0 + %s11182_s28]]   ;;  %s11186_s28 = smov 25  }
  0x23   :  { %12900 = sst [smem:[#allocation144_spill]] %s11421_s12 }
  0x24   :  { %s11441_s19 = sld [smem:[%s12816_s0 + %s11183_s7]]   ;;  %s11187_s7 = smov 26  }
  0x25   :  { %s11446_s29 = sld [smem:[%s12816_s0 + %s11184_s15]]   ;;  %s11188_s15 = smov 27  }
  0x26   :  { %s11456_s12 = sld [smem:[%s12816_s0 + %s11186_s28]]   ;;  %s11190_s28 = smov 29  }
  0x27   :  { %12901 = sst [smem:[#allocation145_spill]] %s11431_s27 }
  0x28   :  { %s11451_s27 = sld [smem:[%s12816_s0 + %s11185_s22]]   ;;  %s11189_s22 = smov 28  }
  0x29   :  { %s11466_s20 = sld [smem:[%s12816_s0 + %s11188_s15]]   ;;  %s11192_s15 = smov 31  }
  0x2a   :  { %12902 = sst [smem:[#allocation146_spill]] %s11441_s19 }
  0x2b   :  { %s11461_s19 = sld [smem:[%s12816_s0 + %s11187_s7]]   ;;  %s11191_s7 = smov 30  }
  0x2c   :  { %12904 = sst [smem:[#allocation148_spill]] %s11456_s12 }
  0x2d   :  { %s11476_s12 = sld [smem:[%s12816_s0 + %s11190_s28]]   ;;  %s11194_s28 = smov 33  }
  0x2e   :  { %12903 = sst [smem:[#allocation147_spill]] %s11451_s27 }
  0x2f   :  { %s11471_s27 = sld [smem:[%s12816_s0 + %s11189_s22]]   ;;  %s11193_s22 = smov 32  }
  0x30   :  { %s11486_s24 = sld [smem:[%s12816_s0 + %s11192_s15]]   ;;  %s11196_s15 = smov 35  }
  0x31   :  { %12905 = sst [smem:[#allocation149_spill]] %s11461_s19 }
  0x32   :  { %s11481_s19 = sld [smem:[%s12816_s0 + %s11191_s7]]   ;;  %s11195_s7 = smov 34  }
  0x33   :  { %12907 = sst [smem:[#allocation151_spill]] %s11476_s12 }
  0x34   :  { %s11496_s12 = sld [smem:[%s12816_s0 + %s11194_s28]]   ;;  %s11198_s28 = smov 37  }
  0x35   :  { %12906 = sst [smem:[#allocation150_spill]] %s11471_s27 }
  0x36   :  { %s11491_s27 = sld [smem:[%s12816_s0 + %s11193_s22]]   ;;  %s11197_s22 = smov 36  }
  0x37   :  { %s11506_s3 = sld [smem:[%s12816_s0 + %s11196_s15]]   ;;  %s11200_s15 = smov 39  }
  0x38   :  { %12908 = sst [smem:[#allocation152_spill]] %s11481_s19 }
  0x39   :  { %s11501_s19 = sld [smem:[%s12816_s0 + %s11195_s7]]   ;;  %s11199_s7 = smov 38  }
  0x3a   :  { %12910 = sst [smem:[#allocation154_spill]] %s11496_s12 }
  0x3b   :  { %s11516_s12 = sld [smem:[%s12816_s0 + %s11198_s28]]   ;;  %s11202_s28 = smov 41  }
  0x3c   :  { %12909 = sst [smem:[#allocation153_spill]] %s11491_s27 }
  0x3d   :  { %s11511_s27 = sld [smem:[%s12816_s0 + %s11197_s22]]   ;;  %s11201_s22 = smov 40  }
  0x3e   :  { %s11526_s21 = sld [smem:[%s12816_s0 + %s11200_s15]]   ;;  %s11204_s15 = smov 43  }
  0x3f   :  { %12911 = sst [smem:[#allocation155_spill]] %s11501_s19 }
  0x40   :  { %s11521_s19 = sld [smem:[%s12816_s0 + %s11199_s7]]   ;;  %s11203_s7 = smov 42  }
  0x41   :  { %12913 = sst [smem:[#allocation157_spill]] %s11516_s12 }
  0x42   :  { %s11536_s12 = sld [smem:[%s12816_s0 + %s11202_s28]]   ;;  %s11206_s28 = smov 45  }
  0x43   :  { %12912 = sst [smem:[#allocation156_spill]] %s11511_s27 }
  0x44   :  { %s11531_s27 = sld [smem:[%s12816_s0 + %s11201_s22]]   ;;  %s11205_s22 = smov 44  }
  0x45   :  { %s11546_s13 = sld [smem:[%s12816_s0 + %s11204_s15]]   ;;  %s11208_s15 = smov 47  }
  0x46   :  { %12914 = sst [smem:[#allocation158_spill]] %s11521_s19 }
  0x47   :  { %s11541_s19 = sld [smem:[%s12816_s0 + %s11203_s7]]   ;;  %s11207_s7 = smov 46  }
  0x48   :  { %12916 = sst [smem:[#allocation160_spill]] %s11536_s12 }
  0x49   :  { %s11556_s12 = sld [smem:[%s12816_s0 + %s11206_s28]]   ;;  %s11210_s28 = smov 49  }
  0x4a   :  { %12915 = sst [smem:[#allocation159_spill]] %s11531_s27 }
  0x4b   :  { %s11551_s27 = sld [smem:[%s12816_s0 + %s11205_s22]]   ;;  %s11209_s22 = smov 48  }
  0x4c   :  { %s11566_s5 = sld [smem:[%s12816_s0 + %s11208_s15]]   ;;  %s11212_s15 = smov 51  }
  0x4d   :  { %12917 = sst [smem:[#allocation161_spill]] %s11541_s19 }
  0x4e   :  { %s11561_s19 = sld [smem:[%s12816_s0 + %s11207_s7]]   ;;  %s11211_s7 = smov 50  }
  0x4f   :  { %12919 = sst [smem:[#allocation163_spill]] %s11556_s12 }
  0x50   :  { %s11576_s12 = sld [smem:[%s12816_s0 + %s11210_s28]]   ;;  %s11214_s28 = smov 53  }
  0x51   :  { %12918 = sst [smem:[#allocation162_spill]] %s11551_s27 }
  0x52   :  { %12921 = sst [smem:[#allocation165_spill]] %s11566_s5 }
  0x53   :  { %s11571_s27 = sld [smem:[%s12816_s0 + %s11209_s22]]   ;;  %s11213_s22 = smov 52  }
  0x54   :  { %12920 = sst [smem:[#allocation164_spill]] %s11561_s19 }
  0x55   :  { %s11581_s19 = sld [smem:[%s12816_s0 + %s11211_s7]]   ;;  %s11215_s7 = smov 54  }
  0x56   :  { %12923 = sst [smem:[#allocation167_spill]] %s11576_s12 }
  0x57   :  { %s11586_s5 = sld [smem:[%s12816_s0 + %s11212_s15]]   ;;  %s11216_s15 = smov 55  }
  0x58   :  { %s11596_s12 = sld [smem:[%s12816_s0 + %s11214_s28]]   ;;  %s11218_s28 = smov 57  }
  0x59   :  { %12922 = sst [smem:[#allocation166_spill]] %s11571_s27 }
  0x5a   :  { %s11591_s27 = sld [smem:[%s12816_s0 + %s11213_s22]]   ;;  %s11217_s22 = smov 56  }
  0x5b   :  { %12924 = sst [smem:[#allocation168_spill]] %s11581_s19 }
  0x5c   :  { %s11601_s19 = sld [smem:[%s12816_s0 + %s11215_s7]]   ;;  %s11219_s7 = smov 58  }
  0x5d   :  { %12925 = sst [smem:[#allocation169_spill]] %s11586_s5 }
  0x5e   :  { %12927 = sst [smem:[#allocation171_spill]] %s11596_s12 }
  0x5f   :  { %s11606_s5 = sld [smem:[%s12816_s0 + %s11216_s15]]   ;;  %s11220_s15 = smov 59  }
  0x60   :  { %12926 = sst [smem:[#allocation170_spill]] %s11591_s27 }
  0x61   :  { %s11611_s27 = sld [smem:[%s12816_s0 + %s11217_s22]]   ;;  %s11221_s22 = smov 60  }
  0x62   :  { %12928 = sst [smem:[#allocation172_spill]] %s11601_s19 }
  0x63   :  { %s11616_s12 = sld [smem:[%s12816_s0 + %s11218_s28]]   ;;  %s11222_s28 = smov 61  }
  0x64   :  { %s11621_s19 = sld [smem:[%s12816_s0 + %s11219_s7]]   ;;  %s11223_s7 = smov 62  }
  0x65   :  { %12929 = sst [smem:[#allocation173_spill]] %s11606_s5 }
  0x66   :  { %s11626_s5 = sld [smem:[%s12816_s0 + %s11220_s15]]   ;;  %s11224_s15 = smov 63  }
  0x67   :  { %12930 = sst [smem:[#allocation174_spill]] %s11611_s27 }
  0x68   :  { %s11631_s27 = sld [smem:[%s12816_s0 + %s11221_s22]]   ;;  %s11225_s22 = smov 64  }
  0x69   :  { %12931 = sst [smem:[#allocation175_spill]] %s11616_s12 }
  0x6a   :  { %12932 = sst [smem:[#allocation176_spill]] %s11621_s19 }
  0x6b   :  { %s11636_s12 = sld [smem:[%s12816_s0 + %s11222_s28]]   ;;  %s11226_s28 = smov 65  }
  0x6c   :  { %12933 = sst [smem:[#allocation177_spill]] %s11626_s5 }
  0x6d   :  { %s11641_s19 = sld [smem:[%s12816_s0 + %s11223_s7]]   ;;  %s11227_s7 = smov 66  }
  0x6e   :  { %12934 = sst [smem:[#allocation178_spill]] %s11631_s27 }
  0x6f   :  { %s11646_s5 = sld [smem:[%s12816_s0 + %s11224_s15]]   ;;  %s11228_s15 = smov 67  }
  0x70   :  { %s11651_s27 = sld [smem:[%s12816_s0 + %s11225_s22]]   ;;  %s11229_s22 = smov 68  }
  0x71   :  { %12935 = sst [smem:[#allocation179_spill]] %s11636_s12 }
  0x72   :  { %s11656_s12 = sld [smem:[%s12816_s0 + %s11226_s28]]   ;;  %s11230_s28 = smov 69  }
  0x73   :  { %12936 = sst [smem:[#allocation180_spill]] %s11641_s19 }
  0x74   :  { %s11661_s19 = sld [smem:[%s12816_s0 + %s11227_s7]]   ;;  %s11231_s7 = smov 70  }
  0x75   :  { %12937 = sst [smem:[#allocation181_spill]] %s11646_s5 }
  0x76   :  { %12938 = sst [smem:[#allocation182_spill]] %s11651_s27 }
  0x77   :  { %s11666_s5 = sld [smem:[%s12816_s0 + %s11228_s15]]   ;;  %s11232_s15 = smov 71  }
  0x78   :  { %12939 = sst [smem:[#allocation183_spill]] %s11656_s12 }
  0x79   :  { %s11671_s27 = sld [smem:[%s12816_s0 + %s11229_s22]]   ;;  %s11233_s22 = smov 72  }
  0x7a   :  { %12940 = sst [smem:[#allocation184_spill]] %s11661_s19 }
  0x7b   :  { %s11676_s12 = sld [smem:[%s12816_s0 + %s11230_s28]]   ;;  %s11234_s28 = smov 73  }
  0x7c   :  { %s11681_s19 = sld [smem:[%s12816_s0 + %s11231_s7]]   ;;  %s11235_s7 = smov 74  }
  0x7d   :  { %12941 = sst [smem:[#allocation185_spill]] %s11666_s5 }
  0x7e   :  { %s11686_s5 = sld [smem:[%s12816_s0 + %s11232_s15]]   ;;  %s11236_s15 = smov 75  }
  0x7f   :  { %12942 = sst [smem:[#allocation186_spill]] %s11671_s27 }
  0x80   :  { %s11691_s27 = sld [smem:[%s12816_s0 + %s11233_s22]]   ;;  %s11237_s22 = smov 76  }
  0x81   :  { %12943 = sst [smem:[#allocation187_spill]] %s11676_s12 }
  0x82   :  { %12944 = sst [smem:[#allocation188_spill]] %s11681_s19 }
  0x83   :  { %s11696_s12 = sld [smem:[%s12816_s0 + %s11234_s28]]   ;;  %s11238_s28 = smov 77  }
  0x84   :  { %12945 = sst [smem:[#allocation189_spill]] %s11686_s5 }
  0x85   :  { %s11701_s19 = sld [smem:[%s12816_s0 + %s11235_s7]]   ;;  %s11239_s7 = smov 78  }
  0x86   :  { %12946 = sst [smem:[#allocation190_spill]] %s11691_s27 }
  0x87   :  { %s11706_s5 = sld [smem:[%s12816_s0 + %s11236_s15]]   ;;  %s11240_s15 = smov 79  }
  0x88   :  { %s11711_s27 = sld [smem:[%s12816_s0 + %s11237_s22]]   ;;  %s11241_s22 = smov 80  }
  0x89   :  { %12947 = sst [smem:[#allocation191_spill]] %s11696_s12 }
  0x8a   :  { %s11716_s12 = sld [smem:[%s12816_s0 + %s11238_s28]]   ;;  %s11242_s28 = smov 81  }
  0x8b   :  { %12948 = sst [smem:[#allocation192_spill]] %s11701_s19 }
  0x8c   :  { %s11721_s19 = sld [smem:[%s12816_s0 + %s11239_s7]]   ;;  %s11243_s7 = smov 82  }
  0x8d   :  { %12949 = sst [smem:[#allocation193_spill]] %s11706_s5 }
  0x8e   :  { %12950 = sst [smem:[#allocation194_spill]] %s11711_s27 }
  0x8f   :  { %s11726_s5 = sld [smem:[%s12816_s0 + %s11240_s15]]   ;;  %s11244_s15 = smov 83  }
  0x90   :  { %12951 = sst [smem:[#allocation195_spill]] %s11716_s12 }
  0x91   :  { %s11731_s27 = sld [smem:[%s12816_s0 + %s11241_s22]]   ;;  %s11245_s22 = smov 84  }
  0x92   :  { %12952 = sst [smem:[#allocation196_spill]] %s11721_s19 }
  0x93   :  { %s11736_s12 = sld [smem:[%s12816_s0 + %s11242_s28]]   ;;  %s11246_s28 = smov 85  }
  0x94   :  { %s11741_s19 = sld [smem:[%s12816_s0 + %s11243_s7]]   ;;  %s11247_s7 = smov 86  }
  0x95   :  { %12953 = sst [smem:[#allocation197_spill]] %s11726_s5 }
  0x96   :  { %s11746_s5 = sld [smem:[%s12816_s0 + %s11244_s15]]   ;;  %s11248_s15 = smov 87  }
  0x97   :  { %12954 = sst [smem:[#allocation198_spill]] %s11731_s27 }
  0x98   :  { %s11751_s27 = sld [smem:[%s12816_s0 + %s11245_s22]]   ;;  %s11249_s22 = smov 88  }
  0x99   :  { %12955 = sst [smem:[#allocation199_spill]] %s11736_s12 }
  0x9a   :  { %12956 = sst [smem:[#allocation200_spill]] %s11741_s19 }
  0x9b   :  { %s11756_s12 = sld [smem:[%s12816_s0 + %s11246_s28]]   ;;  %s11250_s28 = smov 89  }
  0x9c   :  { %12957 = sst [smem:[#allocation201_spill]] %s11746_s5 }
  0x9d   :  { %s11761_s19 = sld [smem:[%s12816_s0 + %s11247_s7]]   ;;  %s11251_s7 = smov 90  }
  0x9e   :  { %12958 = sst [smem:[#allocation202_spill]] %s11751_s27 }
  0x9f   :  { %s11766_s5 = sld [smem:[%s12816_s0 + %s11248_s15]]   ;;  %s11252_s15 = smov 91  }
  0xa0   :  { %s11771_s27 = sld [smem:[%s12816_s0 + %s11249_s22]]   ;;  %s11253_s22 = smov 92  }
  0xa1   :  { %12959 = sst [smem:[#allocation203_spill]] %s11756_s12 }
  0xa2   :  { %s11776_s12 = sld [smem:[%s12816_s0 + %s11250_s28]]  }
  0xa3   :  { %12960 = sst [smem:[#allocation204_spill]] %s11761_s19 }
  0xa4   :  { %s11781_s19 = sld [smem:[%s12816_s0 + %s11251_s7]]  }
  0xa5   :  { %12961 = sst [smem:[#allocation205_spill]] %s11766_s5 }
  0xa6   :  { %12962 = sst [smem:[#allocation206_spill]] %s11771_s27 }
  0xa7   :  { %s11786_s5 = sld [smem:[%s12816_s0 + %s11252_s15]]  }
  0xa8   :  { %s11791_s27 = sld [smem:[%s12816_s0 + %s11253_s22]]  }
  0xa9   :  { %190 = vsyncpa [#allocation3], 0 }
  0xaa   :  { %191 = vsyncpa [#allocation6], 0 }
  0xab   :  { %192 = vsyncpa [#allocation9], 0 }
  0xac   :  { %193 = vsyncpa [#allocation12], 0 }
  0xad   :  { %194 = vsyncpa [#allocation15], 0 }
  0xae   :  { %195 = vsyncpa [#allocation18], 0 }
  0xaf   :  { %196 = vsyncpa [#allocation21], 0 }
  0xb0   :  { %197 = vsyncpa [#allocation24], 0 }
  0xb1   :  { %198 = vsyncpa [#allocation27], 0 }
  0xb2   :  { %199 = vsyncpa [#allocation30], 0 }
  0xb3   :  { %200 = vsyncpa [#allocation33], 0 }
  0xb4   :  { %201 = vsyncpa [#allocation36], 0 }
  0xb5   :  { %202 = vsyncpa [#allocation39], 0 }
  0xb6   :  { %203 = vsyncpa [#allocation42], 0 }
  0xb7   :  { %204 = vsyncpa [#allocation45], 0 }
  0xb8   :  { %205 = vsyncpa [#allocation48], 0 }
  0xb9   :  { %206 = vsyncpa [#allocation51], 0 }
  0xba   :  { %207 = vsyncpa [#allocation54], 0 }
  0xbb   :  { %208 = vsyncpa [#allocation57], 0 }
  0xbc   :  { %209 = vsyncpa [#allocation60], 0 }
  0xbd   :  { %210 = vsyncpa [#allocation63], 0 }
  0xbe   :  { %211 = vsyncpa [#allocation66], 0 }
  0xbf   :  { %212 = vsyncpa [#allocation69], 0 }
  0xc0   :  { %213 = vsyncpa [#allocation72], 0 }
  0xc1   :  { %214 = vsyncpa [#allocation75], 0 }
  0xc2   :  { %215 = vsyncpa [#allocation78], 0 }
  0xc3   :  { %216 = vsyncpa [#allocation81], 0 }
  0xc4   :  { %217 = vsyncpa [#allocation84], 0 }
  0xc5   :  { %218 = vsyncpa [#allocation87], 0 }
  0xc6   :  { %219 = vsyncpa [#allocation90], 0 }
  0xc7   :  { %220 = vsyncpa [#allocation93], 0 }
  0xc8   :  { %221 = vsyncpa [#allocation96], 0 }
  0xc9   :  { %222 = vsyncpa [#allocation4], 0  ;;  %s11254_s0 = smov [#allocation5]   ;;  %s11255_s1 = smov [#allocation8]  }
  0xca   :  { %s240_s28 = sshll.u32 %s11254_s0, 4  ;;  %s264_s2 = sshll.u32 %s11255_s1, 4  ;;  %s241_s28 = int_to_ptr.vmem [resolvable:$true] %s240_s28  ;;  %s11793_s2 = int_to_ptr.vmem [resolvable:$true] %s264_s2 }
  0xcb   :  { %s9688_s7 = scalar_lea.hbm %s11336_s9, 256 }
  0xcc   :  { %p9689_p0 = scmp.ne.s32.totalorder %s11336_s9, %s9688_s7  ;;  %p9692_p1 = scmp.lt.u32.totalorder %s9688_s7, %s11336_s9 }
  0xce   :  { %p9694_p2 = pnand %p9692_p1, %p9689_p0 }
  0xd0   :  { %9697 = shalt.err (!%p9694_p2)
}
  0xd1   :  { %s9698_s10 = scalar_lea.vmem %s241_s28, 256  ;;  %p9703_p4 = scmp.lt.s32.totalorder %s241_s28, %s241_s28 }
  0xd2   :  { %p9699_p3 = scmp.ne.s32.totalorder %s241_s28, %s9698_s10  ;;  %p9704_p5 = scmp.lt.s32.totalorder %s9698_s10, %s9698_s10 }
  0xd4   :  { %p9705_p6 = por %p9704_p5, %p9703_p4 }
  0xd6   :  { %p9706_p7 = pnand %p9705_p6, %p9699_p3 }
  0xd8   :  { %9709 = shalt.err (!%p9706_p7)
}
  0xd9   :  { %s11256_s11 = smov 128   ;;  %s11257_s15 = smov 8  }
  0xda   :  { %246 = dma.hbm_to_vmem [thread:$0]  %s11336_s9, 256, %s241_s28, [#allocation6], %s11256_s11, %s11256_s11, %s11257_s15  }
  0xdb   :  { %s9710_s16 = scalar_lea.hbm %s11346_s17, 256 }
  0xdc   :  { %p9711_p8 = scmp.ne.s32.totalorder %s11346_s17, %s9710_s16  ;;  %p9714_p9 = scmp.lt.u32.totalorder %s9710_s16, %s11346_s17 }
  0xde   :  { %p9716_p10 = pnand %p9714_p9, %p9711_p8 }
  0xe0   :  { %9719 = shalt.err (!%p9716_p10)
}
  0xe1   :  { %s9720_s18 = scalar_lea.vmem %s11793_s2, 256  ;;  %p9725_p12 = scmp.lt.s32.totalorder %s11793_s2, %s11793_s2 }
  0xe2   :  { %p9721_p11 = scmp.ne.s32.totalorder %s11793_s2, %s9720_s18  ;;  %p9726_p13 = scmp.lt.s32.totalorder %s9720_s18, %s9720_s18 }
  0xe4   :  { %p9727_p0 = por %p9726_p13, %p9725_p12 }
  0xe6   :  { %p9728_p1 = pnand %p9727_p0, %p9721_p11 }
  0xe8   :  { %9731 = shalt.err (!%p9728_p1)
}
  0xe9   :  { %270 = dma.hbm_to_vmem [thread:$0]  %s11346_s17, 256, %s11793_s2, [#allocation9], %s11256_s11, %s11256_s11, %s11257_s15  }
  0xea   :  { %s11258_s9 = smov [#allocation11]   ;;  %s11259_s23 = smov [#allocation14]  }
  0xeb   :  { %s287_s22 = sshll.u32 %s11258_s9, 4  ;;  %s311_s26 = sshll.u32 %s11259_s23, 4  ;;  %s288_s22 = int_to_ptr.vmem [resolvable:$true] %s287_s22  ;;  %s312_s26 = int_to_ptr.vmem [resolvable:$true] %s311_s26 }
  0xec   :  { %s9732_s0 = scalar_lea.hbm %s11356_s25, 16 }
  0xed   :  { %p9733_p2 = scmp.ne.s32.totalorder %s11356_s25, %s9732_s0  ;;  %p9736_p3 = scmp.lt.u32.totalorder %s9732_s0, %s11356_s25 }
  0xef   :  { %p9738_p4 = pnand %p9736_p3, %p9733_p2 }
  0xf1   :  { %9741 = shalt.err (!%p9738_p4)
}
  0xf2   :  { %s9742_s28 = scalar_lea.vmem %s288_s22, 16  ;;  %s9746_s1 = scalar_lea.vmem %s288_s22, 32 }
  0xf3   :  { %p9743_p5 = scmp.ne.s32.totalorder %s288_s22, %s9742_s28  ;;  %p9747_p6 = scmp.lt.s32.totalorder %s288_s22, %s288_s22 }
  0xf4   :  { %p9748_p7 = scmp.lt.s32.totalorder %s9746_s1, %s9742_s28 }
  0xf6   :  { %p9749_p8 = por %p9748_p7, %p9747_p6 }
  0xf8   :  { %p9750_p9 = pnand %p9749_p8, %p9743_p5 }
  0xfa   :  { %9753 = shalt.err (!%p9750_p9)
}
  0xfb   :  { %290 = dma.hbm_to_vmem [thread:$0]  %s11356_s25, 16, %s288_s22, [#allocation12]  }
  0xfc   :  { %s9754_s17 = scalar_lea.hbm %s11376_s14, 16 }
  0xfd   :  { %p9755_p10 = scmp.ne.s32.totalorder %s11376_s14, %s9754_s17  ;;  %p9758_p11 = scmp.lt.u32.totalorder %s9754_s17, %s11376_s14 }
  0xff   :  { %p9760_p12 = pnand %p9758_p11, %p9755_p10 }
 0x101   :  { %9763 = shalt.err (!%p9760_p12)
}
 0x102   :  { %s9764_s2 = scalar_lea.vmem %s312_s26, 16  ;;  %s9768_s7 = scalar_lea.vmem %s312_s26, 32 }
 0x103   :  { %p9765_p13 = scmp.ne.s32.totalorder %s312_s26, %s9764_s2  ;;  %p9769_p0 = scmp.lt.s32.totalorder %s312_s26, %s312_s26 }
 0x104   :  { %p9770_p1 = scmp.lt.s32.totalorder %s9768_s7, %s9764_s2 }
 0x106   :  { %p9771_p2 = por %p9770_p1, %p9769_p0 }
 0x108   :  { %p9772_p3 = pnand %p9771_p2, %p9765_p13 }
 0x10a   :  { %9775 = shalt.err (!%p9772_p3)
}
 0x10b   :  { %314 = dma.hbm_to_vmem [thread:$0]  %s11376_s14, 16, %s312_s26, [#allocation15]  }
 0x10c   :  { %s11260_s10 = smov [#allocation17]   ;;  %s11261_s16 = smov [#allocation20]  }
 0x10d   :  { %s335_s25 = sshll.u32 %s11260_s10, 4  ;;  %s359_s18 = sshll.u32 %s11261_s16, 4  ;;  %s336_s25 = int_to_ptr.vmem [resolvable:$true] %s335_s25  ;;  %s360_s18 = int_to_ptr.vmem [resolvable:$true] %s359_s18 }
 0x10e   :  { %s9776_s9 = scalar_lea.hbm %s11396_s6, 16 }
 0x10f   :  { %p9777_p4 = scmp.ne.s32.totalorder %s11396_s6, %s9776_s9  ;;  %p9780_p5 = scmp.lt.u32.totalorder %s9776_s9, %s11396_s6 }
 0x111   :  { %p9782_p6 = pnand %p9780_p5, %p9777_p4 }
 0x113   :  { %9785 = shalt.err (!%p9782_p6)
}
 0x114   :  { %s9786_s22 = scalar_lea.vmem %s336_s25, 16  ;;  %s9790_s23 = scalar_lea.vmem %s336_s25, 32 }
 0x115   :  { %p9787_p7 = scmp.ne.s32.totalorder %s336_s25, %s9786_s22  ;;  %p9791_p8 = scmp.lt.s32.totalorder %s336_s25, %s336_s25 }
 0x116   :  { %p9792_p9 = scmp.lt.s32.totalorder %s9790_s23, %s9786_s22 }
 0x118   :  { %p9793_p10 = por %p9792_p9, %p9791_p8 }
 0x11a   :  { %p9794_p11 = pnand %p9793_p10, %p9787_p7 }
 0x11c   :  { %9797 = shalt.err (!%p9794_p11)
}
 0x11d   :  { %338 = dma.hbm_to_vmem [thread:$0]  %s11396_s6, 16, %s336_s25, [#allocation18]  }
 0x11e   :  { %s9798_s14 = scalar_lea.hbm %s11416_s4, 16 }
 0x11f   :  { %p9799_p12 = scmp.ne.s32.totalorder %s11416_s4, %s9798_s14  ;;  %p9802_p13 = scmp.lt.u32.totalorder %s9798_s14, %s11416_s4 }
 0x121   :  { %p9804_p0 = pnand %p9802_p13, %p9799_p12 }
 0x123   :  { %9807 = shalt.err (!%p9804_p0)
}
 0x124   :  { %s9808_s26 = scalar_lea.vmem %s360_s18, 16  ;;  %s9812_s0 = scalar_lea.vmem %s360_s18, 32 }
 0x125   :  { %p9809_p1 = scmp.ne.s32.totalorder %s360_s18, %s9808_s26  ;;  %p9813_p2 = scmp.lt.s32.totalorder %s360_s18, %s360_s18 }
 0x126   :  { %p9814_p3 = scmp.lt.s32.totalorder %s9812_s0, %s9808_s26 }
 0x128   :  { %p9815_p4 = por %p9814_p3, %p9813_p2 }
 0x12a   :  { %p9816_p5 = pnand %p9815_p4, %p9809_p1 }
 0x12c   :  { %9819 = shalt.err (!%p9816_p5)
}
 0x12d   :  { %362 = dma.hbm_to_vmem [thread:$0]  %s11416_s4, 16, %s360_s18, [#allocation21]  }
 0x12e   :  { %s11262_s28 = smov [#allocation23]   ;;  %s11263_s1 = smov [#allocation26]  }
 0x12f   :  { %s379_s6 = sshll.u32 %s11262_s28, 4  ;;  %s399_s17 = sshll.u32 %s11263_s1, 4  ;;  %s380_s6 = int_to_ptr.vmem [resolvable:$true] %s379_s6  ;;  %s400_s17 = int_to_ptr.vmem [resolvable:$true] %s399_s17 }
 0x130   :  { %s9820_s2 = scalar_lea.hbm %s11426_s8, 16 }
 0x131   :  { %p9821_p6 = scmp.ne.s32.totalorder %s11426_s8, %s9820_s2  ;;  %p9824_p7 = scmp.lt.u32.totalorder %s9820_s2, %s11426_s8 }
 0x133   :  { %p9826_p8 = pnand %p9824_p7, %p9821_p6 }
 0x135   :  { %9829 = shalt.err (!%p9826_p8)
}
 0x136   :  { %s9830_s7 = scalar_lea.vmem %s380_s6, 16  ;;  %s9834_s10 = scalar_lea.vmem %s380_s6, 32 }
 0x137   :  { %p9831_p9 = scmp.ne.s32.totalorder %s380_s6, %s9830_s7  ;;  %p9835_p10 = scmp.lt.s32.totalorder %s380_s6, %s380_s6 }
 0x138   :  { %p9836_p11 = scmp.lt.s32.totalorder %s9834_s10, %s9830_s7 }
 0x13a   :  { %p9837_p12 = por %p9836_p11, %p9835_p10 }
 0x13c   :  { %p9838_p13 = pnand %p9837_p12, %p9831_p9 }
 0x13e   :  { %9841 = shalt.err (!%p9838_p13)
}
 0x13f   :  { %382 = dma.hbm_to_vmem [thread:$0]  %s11426_s8, 16, %s380_s6, [#allocation24]  }
 0x140   :  { %s9842_s4 = scalar_lea.hbm %s11436_s30, 16 }
 0x141   :  { %p9843_p0 = scmp.ne.s32.totalorder %s11436_s30, %s9842_s4  ;;  %p9846_p1 = scmp.lt.u32.totalorder %s9842_s4, %s11436_s30 }
 0x143   :  { %p9848_p2 = pnand %p9846_p1, %p9843_p0 }
 0x145   :  { %9851 = shalt.err (!%p9848_p2)
}
 0x146   :  { %s9852_s25 = scalar_lea.vmem %s400_s17, 16  ;;  %s9856_s16 = scalar_lea.vmem %s400_s17, 32 }
 0x147   :  { %p9853_p3 = scmp.ne.s32.totalorder %s400_s17, %s9852_s25  ;;  %p9857_p4 = scmp.lt.s32.totalorder %s400_s17, %s400_s17 }
 0x148   :  { %p9858_p5 = scmp.lt.s32.totalorder %s9856_s16, %s9852_s25 }
 0x14a   :  { %p9859_p6 = por %p9858_p5, %p9857_p4 }
 0x14c   :  { %p9860_p7 = pnand %p9859_p6, %p9853_p3 }
 0x14e   :  { %9863 = shalt.err (!%p9860_p7)
}
 0x14f   :  { %402 = dma.hbm_to_vmem [thread:$0]  %s11436_s30, 16, %s400_s17, [#allocation27]  }
 0x150   :  { %s11264_s18 = smov [#allocation29]   ;;  %s11265_s9 = smov [#allocation32]  }
 0x151   :  { %s419_s8 = sshll.u32 %s11264_s18, 4  ;;  %s443_s22 = sshll.u32 %s11265_s9, 4  ;;  %s420_s8 = int_to_ptr.vmem [resolvable:$true] %s419_s8  ;;  %s444_s22 = int_to_ptr.vmem [resolvable:$true] %s443_s22 }
 0x152   :  { %s9864_s23 = scalar_lea.hbm %s11446_s29, 16 }
 0x153   :  { %p9865_p8 = scmp.ne.s32.totalorder %s11446_s29, %s9864_s23  ;;  %p9868_p9 = scmp.lt.u32.totalorder %s9864_s23, %s11446_s29 }
 0x155   :  { %p9870_p10 = pnand %p9868_p9, %p9865_p8 }
 0x157   :  { %9873 = shalt.err (!%p9870_p10)
}
 0x158   :  { %s9874_s14 = scalar_lea.vmem %s420_s8, 16  ;;  %s9878_s26 = scalar_lea.vmem %s420_s8, 32 }
 0x159   :  { %p9875_p11 = scmp.ne.s32.totalorder %s420_s8, %s9874_s14  ;;  %p9879_p12 = scmp.lt.s32.totalorder %s420_s8, %s420_s8 }
 0x15a   :  { %p9880_p13 = scmp.lt.s32.totalorder %s9878_s26, %s9874_s14 }
 0x15c   :  { %p9881_p0 = por %p9880_p13, %p9879_p12 }
 0x15e   :  { %p9882_p1 = pnand %p9881_p0, %p9875_p11 }
 0x160   :  { %9885 = shalt.err (!%p9882_p1)
}
 0x161   :  { %422 = dma.hbm_to_vmem [thread:$0]  %s11446_s29, 16, %s420_s8, [#allocation30]  }
 0x162   :  { %s9886_s30 = scalar_lea.hbm %s11466_s20, 16 }
 0x163   :  { %p9887_p2 = scmp.ne.s32.totalorder %s11466_s20, %s9886_s30  ;;  %p9890_p3 = scmp.lt.u32.totalorder %s9886_s30, %s11466_s20 }
 0x165   :  { %p9892_p4 = pnand %p9890_p3, %p9887_p2 }
 0x167   :  { %9895 = shalt.err (!%p9892_p4)
}
 0x168   :  { %s9896_s0 = scalar_lea.vmem %s444_s22, 16  ;;  %s9900_s28 = scalar_lea.vmem %s444_s22, 32 }
 0x169   :  { %p9897_p5 = scmp.ne.s32.totalorder %s444_s22, %s9896_s0  ;;  %p9901_p6 = scmp.lt.s32.totalorder %s444_s22, %s444_s22 }
 0x16a   :  { %p9902_p7 = scmp.lt.s32.totalorder %s9900_s28, %s9896_s0 }
 0x16c   :  { %p9903_p8 = por %p9902_p7, %p9901_p6 }
 0x16e   :  { %p9904_p9 = pnand %p9903_p8, %p9897_p5 }
 0x170   :  { %9907 = shalt.err (!%p9904_p9)
}
 0x171   :  { %446 = dma.hbm_to_vmem [thread:$0]  %s11466_s20, 16, %s444_s22, [#allocation33]  }
 0x172   :  { %s11266_s6 = smov [#allocation35]   ;;  %s11267_s1 = smov [#allocation38]  }
 0x173   :  { %s467_s29 = sshll.u32 %s11266_s6, 4  ;;  %s491_s17 = sshll.u32 %s11267_s1, 4  ;;  %s468_s29 = int_to_ptr.vmem [resolvable:$true] %s467_s29  ;;  %s492_s17 = int_to_ptr.vmem [resolvable:$true] %s491_s17 }
 0x174   :  { %s9908_s2 = scalar_lea.hbm %s11486_s24, 16 }
 0x175   :  { %p9909_p10 = scmp.ne.s32.totalorder %s11486_s24, %s9908_s2  ;;  %p9912_p11 = scmp.lt.u32.totalorder %s9908_s2, %s11486_s24 }
 0x177   :  { %p9914_p12 = pnand %p9912_p11, %p9909_p10 }
 0x179   :  { %9917 = shalt.err (!%p9914_p12)
}
 0x17a   :  { %s9918_s7 = scalar_lea.vmem %s468_s29, 16  ;;  %s9922_s10 = scalar_lea.vmem %s468_s29, 32 }
 0x17b   :  { %p9919_p13 = scmp.ne.s32.totalorder %s468_s29, %s9918_s7  ;;  %p9923_p0 = scmp.lt.s32.totalorder %s468_s29, %s468_s29 }
 0x17c   :  { %p9924_p1 = scmp.lt.s32.totalorder %s9922_s10, %s9918_s7 }
 0x17e   :  { %p9925_p2 = por %p9924_p1, %p9923_p0 }
 0x180   :  { %p9926_p3 = pnand %p9925_p2, %p9919_p13 }
 0x182   :  { %9929 = shalt.err (!%p9926_p3)
}
 0x183   :  { %470 = dma.hbm_to_vmem [thread:$0]  %s11486_s24, 16, %s468_s29, [#allocation36]  }
 0x184   :  { %s9930_s20 = scalar_lea.hbm %s11506_s3, 16 }
 0x185   :  { %p9931_p4 = scmp.ne.s32.totalorder %s11506_s3, %s9930_s20  ;;  %p9934_p5 = scmp.lt.u32.totalorder %s9930_s20, %s11506_s3 }
 0x187   :  { %p9936_p6 = pnand %p9934_p5, %p9931_p4 }
 0x189   :  { %9939 = shalt.err (!%p9936_p6)
}
 0x18a   :  { %s9940_s4 = scalar_lea.vmem %s492_s17, 16  ;;  %s9944_s25 = scalar_lea.vmem %s492_s17, 32 }
 0x18b   :  { %p9941_p7 = scmp.ne.s32.totalorder %s492_s17, %s9940_s4  ;;  %p9945_p8 = scmp.lt.s32.totalorder %s492_s17, %s492_s17 }
 0x18c   :  { %p9946_p9 = scmp.lt.s32.totalorder %s9944_s25, %s9940_s4 }
 0x18e   :  { %p9947_p10 = por %p9946_p9, %p9945_p8 }
 0x190   :  { %p9948_p11 = pnand %p9947_p10, %p9941_p7 }
 0x192   :  { %9951 = shalt.err (!%p9948_p11)
}
 0x193   :  { %494 = dma.hbm_to_vmem [thread:$0]  %s11506_s3, 16, %s492_s17, [#allocation39]  }
 0x194   :  { %s11268_s16 = smov [#allocation41]   ;;  %s11269_s18 = smov [#allocation44]  }
 0x195   :  { %s515_s24 = sshll.u32 %s11268_s16, 4  ;;  %s539_s8 = sshll.u32 %s11269_s18, 4  ;;  %s516_s24 = int_to_ptr.vmem [resolvable:$true] %s515_s24  ;;  %s540_s8 = int_to_ptr.vmem [resolvable:$true] %s539_s8 }
 0x196   :  { %s9952_s9 = scalar_lea.hbm %s11526_s21, 16 }
 0x197   :  { %p9953_p12 = scmp.ne.s32.totalorder %s11526_s21, %s9952_s9  ;;  %p9956_p13 = scmp.lt.u32.totalorder %s9952_s9, %s11526_s21 }
 0x199   :  { %p9958_p0 = pnand %p9956_p13, %p9953_p12 }
 0x19b   :  { %9961 = shalt.err (!%p9958_p0)
}
 0x19c   :  { %s9962_s22 = scalar_lea.vmem %s516_s24, 16  ;;  %s9966_s23 = scalar_lea.vmem %s516_s24, 32 }
 0x19d   :  { %p9963_p1 = scmp.ne.s32.totalorder %s516_s24, %s9962_s22  ;;  %p9967_p2 = scmp.lt.s32.totalorder %s516_s24, %s516_s24 }
 0x19e   :  { %p9968_p3 = scmp.lt.s32.totalorder %s9966_s23, %s9962_s22 }
 0x1a0   :  { %p9969_p4 = por %p9968_p3, %p9967_p2 }
 0x1a2   :  { %p9970_p5 = pnand %p9969_p4, %p9963_p1 }
 0x1a4   :  { %9973 = shalt.err (!%p9970_p5)
}
 0x1a5   :  { %518 = dma.hbm_to_vmem [thread:$0]  %s11526_s21, 16, %s516_s24, [#allocation42]  }
 0x1a6   :  { %s9974_s3 = scalar_lea.hbm %s11546_s13, 16 }
 0x1a7   :  { %p9975_p6 = scmp.ne.s32.totalorder %s11546_s13, %s9974_s3  ;;  %p9978_p7 = scmp.lt.u32.totalorder %s9974_s3, %s11546_s13 }
 0x1a9   :  { %p9980_p8 = pnand %p9978_p7, %p9975_p6 }
 0x1ab   :  { %9983 = shalt.err (!%p9980_p8)
}
 0x1ac   :  { %s9984_s14 = scalar_lea.vmem %s540_s8, 16  ;;  %s9988_s26 = scalar_lea.vmem %s540_s8, 32 }
 0x1ad   :  { %p9985_p9 = scmp.ne.s32.totalorder %s540_s8, %s9984_s14  ;;  %p9989_p10 = scmp.lt.s32.totalorder %s540_s8, %s540_s8 }
 0x1ae   :  { %p9990_p11 = scmp.lt.s32.totalorder %s9988_s26, %s9984_s14 }
 0x1b0   :  { %p9991_p12 = por %p9990_p11, %p9989_p10 }
 0x1b2   :  { %p9992_p13 = pnand %p9991_p12, %p9985_p9 }
 0x1b4   :  { %9995 = shalt.err (!%p9992_p13)
}
 0x1b5   :  { %s12963_s30 = sld [smem:[#allocation163_spill]]  ;;  %s11270_s0 = smov [#allocation47]  }
 0x1b6   :  { %542 = dma.hbm_to_vmem [thread:$0]  %s11546_s13, 16, %s540_s8, [#allocation45]  }
 0x1b7   :  { %s559_s21 = sshll.u32 %s11270_s0, 4  ;;  %s11271_s28 = smov [#allocation50]   ;;  %s560_s21 = int_to_ptr.vmem [resolvable:$true] %s559_s21 }
 0x1b8   :  { %s579_s6 = sshll.u32 %s11271_s28, 4  ;;  %s580_s6 = int_to_ptr.vmem [resolvable:$true] %s579_s6 }
 0x1bb   :  { %s9996_s29 = scalar_lea.hbm %s12963_s30, 16 }
 0x1bc   :  { %p9997_p0 = scmp.ne.s32.totalorder %s12963_s30, %s9996_s29  ;;  %p10000_p1 = scmp.lt.u32.totalorder %s9996_s29, %s12963_s30 }
 0x1be   :  { %p10002_p2 = pnand %p10000_p1, %p9997_p0 }
 0x1c0   :  { %10005 = shalt.err (!%p10002_p2)
}
 0x1c1   :  { %s10006_s1 = scalar_lea.vmem %s560_s21, 16  ;;  %s10010_s17 = scalar_lea.vmem %s560_s21, 32 }
 0x1c2   :  { %p10007_p3 = scmp.ne.s32.totalorder %s560_s21, %s10006_s1  ;;  %p10011_p4 = scmp.lt.s32.totalorder %s560_s21, %s560_s21 }
 0x1c3   :  { %p10012_p5 = scmp.lt.s32.totalorder %s10010_s17, %s10006_s1 }
 0x1c5   :  { %p10013_p6 = por %p10012_p5, %p10011_p4 }
 0x1c7   :  { %p10014_p7 = pnand %p10013_p6, %p10007_p3 }
 0x1c9   :  { %10017 = shalt.err (!%p10014_p7)
}
 0x1ca   :  { %s12964_s13 = sld [smem:[#allocation165_spill]] }
 0x1cb   :  { %562 = dma.hbm_to_vmem [thread:$0]  %s12963_s30, 16, %s560_s21, [#allocation48]  }
 0x1d0   :  { %s10018_s2 = scalar_lea.hbm %s12964_s13, 16 }
 0x1d1   :  { %p10019_p8 = scmp.ne.s32.totalorder %s12964_s13, %s10018_s2  ;;  %p10022_p9 = scmp.lt.u32.totalorder %s10018_s2, %s12964_s13 }
 0x1d3   :  { %p10024_p10 = pnand %p10022_p9, %p10019_p8 }
 0x1d5   :  { %10027 = shalt.err (!%p10024_p10)
}
 0x1d6   :  { %s10028_s7 = scalar_lea.vmem %s580_s6, 16  ;;  %s10032_s10 = scalar_lea.vmem %s580_s6, 32 }
 0x1d7   :  { %p10029_p11 = scmp.ne.s32.totalorder %s580_s6, %s10028_s7  ;;  %p10033_p12 = scmp.lt.s32.totalorder %s580_s6, %s580_s6 }
 0x1d8   :  { %p10034_p13 = scmp.lt.s32.totalorder %s10032_s10, %s10028_s7 }
 0x1da   :  { %p10035_p0 = por %p10034_p13, %p10033_p12 }
 0x1dc   :  { %p10036_p1 = pnand %p10035_p0, %p10029_p11 }
 0x1de   :  { %10039 = shalt.err (!%p10036_p1)
}
 0x1df   :  { %s12965_s20 = sld [smem:[#allocation168_spill]]  ;;  %s11272_s4 = smov [#allocation53]  }
 0x1e0   :  { %582 = dma.hbm_to_vmem [thread:$0]  %s12964_s13, 16, %s580_s6, [#allocation51]  }
 0x1e1   :  { %s600_s25 = sshll.u32 %s11272_s4, 4  ;;  %s11273_s16 = smov [#allocation56]   ;;  %s601_s25 = int_to_ptr.vmem [resolvable:$true] %s600_s25 }
 0x1e2   :  { %s622_s24 = sshll.u32 %s11273_s16, 4  ;;  %s11870_s24 = int_to_ptr.vmem [resolvable:$true] %s622_s24 }
 0x1e5   :  { %s10040_s18 = scalar_lea.hbm %s12965_s20, 512 }
 0x1e6   :  { %p10041_p2 = scmp.ne.s32.totalorder %s12965_s20, %s10040_s18  ;;  %p10044_p3 = scmp.lt.u32.totalorder %s10040_s18, %s12965_s20 }
 0x1e8   :  { %p10046_p4 = pnand %p10044_p3, %p10041_p2 }
 0x1ea   :  { %10049 = shalt.err (!%p10046_p4)
}
 0x1eb   :  { %s10050_s8 = scalar_lea.vmem %s601_s25, 512  ;;  %p10055_p6 = scmp.lt.s32.totalorder %s601_s25, %s601_s25 }
 0x1ec   :  { %p10051_p5 = scmp.ne.s32.totalorder %s601_s25, %s10050_s8  ;;  %p10056_p7 = scmp.lt.s32.totalorder %s10050_s8, %s10050_s8 }
 0x1ee   :  { %p10057_p8 = por %p10056_p7, %p10055_p6 }
 0x1f0   :  { %p10058_p9 = pnand %p10057_p8, %p10051_p5 }
 0x1f2   :  { %10061 = shalt.err (!%p10058_p9)
}
 0x1f3   :  { %s12966_s9 = sld [smem:[#allocation170_spill]] }
 0x1f4   :  { %606 = dma.hbm_to_vmem [thread:$0]  %s12965_s20, 512, %s601_s25, [#allocation54], %s11256_s11, %s11256_s11, %s11257_s15  }
 0x1f9   :  { %s10062_s22 = scalar_lea.hbm %s12966_s9, 512 }
 0x1fa   :  { %p10063_p10 = scmp.ne.s32.totalorder %s12966_s9, %s10062_s22  ;;  %p10066_p11 = scmp.lt.u32.totalorder %s10062_s22, %s12966_s9 }
 0x1fc   :  { %p10068_p12 = pnand %p10066_p11, %p10063_p10 }
 0x1fe   :  { %10071 = shalt.err (!%p10068_p12)
}
 0x1ff   :  { %s10072_s23 = scalar_lea.vmem %s11870_s24, 512  ;;  %p10077_p0 = scmp.lt.s32.totalorder %s11870_s24, %s11870_s24 }
 0x200   :  { %p10073_p13 = scmp.ne.s32.totalorder %s11870_s24, %s10072_s23  ;;  %p10078_p1 = scmp.lt.s32.totalorder %s10072_s23, %s10072_s23 }
 0x202   :  { %p10079_p2 = por %p10078_p1, %p10077_p0 }
 0x204   :  { %p10080_p3 = pnand %p10079_p2, %p10073_p13 }
 0x206   :  { %10083 = shalt.err (!%p10080_p3)
}
 0x207   :  { %s12967_s3 = sld [smem:[#allocation173_spill]]  ;;  %s11274_s14 = smov [#allocation59]  }
 0x208   :  { %628 = dma.hbm_to_vmem [thread:$0]  %s12966_s9, 512, %s11870_s24, [#allocation57], %s11256_s11, %s11256_s11, %s11257_s15  }
 0x209   :  { %s647_s26 = sshll.u32 %s11274_s14, 4  ;;  %s11275_s30 = smov [#allocation62]   ;;  %s648_s26 = int_to_ptr.vmem [resolvable:$true] %s647_s26 }
 0x20a   :  { %s669_s0 = sshll.u32 %s11275_s30, 4  ;;  %s670_s0 = int_to_ptr.vmem [resolvable:$true] %s669_s0 }
 0x20d   :  { %s10084_s21 = scalar_lea.hbm %s12967_s3, 16 }
 0x20e   :  { %p10085_p4 = scmp.ne.s32.totalorder %s12967_s3, %s10084_s21  ;;  %p10088_p5 = scmp.lt.u32.totalorder %s10084_s21, %s12967_s3 }
 0x210   :  { %p10090_p6 = pnand %p10088_p5, %p10085_p4 }
 0x212   :  { %10093 = shalt.err (!%p10090_p6)
}
 0x213   :  { %s10094_s28 = scalar_lea.vmem %s648_s26, 16  ;;  %s10098_s6 = scalar_lea.vmem %s648_s26, 32 }
 0x214   :  { %p10095_p7 = scmp.ne.s32.totalorder %s648_s26, %s10094_s28  ;;  %p10099_p8 = scmp.lt.s32.totalorder %s648_s26, %s648_s26 }
 0x215   :  { %p10100_p9 = scmp.lt.s32.totalorder %s10098_s6, %s10094_s28 }
 0x217   :  { %p10101_p10 = por %p10100_p9, %p10099_p8 }
 0x219   :  { %p10102_p11 = pnand %p10101_p10, %p10095_p7 }
 0x21b   :  { %10105 = shalt.err (!%p10102_p11)
}
 0x21c   :  { %s12968_s29 = sld [smem:[#allocation175_spill]] }
 0x21d   :  { %650 = dma.hbm_to_vmem [thread:$0]  %s12967_s3, 16, %s648_s26, [#allocation60]  }
 0x222   :  { %s10106_s1 = scalar_lea.hbm %s12968_s29, 16 }
 0x223   :  { %p10107_p12 = scmp.ne.s32.totalorder %s12968_s29, %s10106_s1  ;;  %p10110_p13 = scmp.lt.u32.totalorder %s10106_s1, %s12968_s29 }
 0x225   :  { %p10112_p0 = pnand %p10110_p13, %p10107_p12 }
 0x227   :  { %10115 = shalt.err (!%p10112_p0)
}
 0x228   :  { %s10116_s17 = scalar_lea.vmem %s670_s0, 16  ;;  %s10120_s13 = scalar_lea.vmem %s670_s0, 32 }
 0x229   :  { %p10117_p1 = scmp.ne.s32.totalorder %s670_s0, %s10116_s17  ;;  %p10121_p2 = scmp.lt.s32.totalorder %s670_s0, %s670_s0 }
 0x22a   :  { %p10122_p3 = scmp.lt.s32.totalorder %s10120_s13, %s10116_s17 }
 0x22c   :  { %p10123_p4 = por %p10122_p3, %p10121_p2 }
 0x22e   :  { %p10124_p5 = pnand %p10123_p4, %p10117_p1 }
 0x230   :  { %10127 = shalt.err (!%p10124_p5)
}
 0x231   :  { %s12969_s2 = sld [smem:[#allocation178_spill]]  ;;  %s11276_s7 = smov [#allocation65]  }
 0x232   :  { %672 = dma.hbm_to_vmem [thread:$0]  %s12968_s29, 16, %s670_s0, [#allocation63]  }
 0x233   :  { %s691_s10 = sshll.u32 %s11276_s7, 4  ;;  %s11277_s20 = smov [#allocation68]   ;;  %s692_s10 = int_to_ptr.vmem [resolvable:$true] %s691_s10 }
 0x234   :  { %s711_s4 = sshll.u32 %s11277_s20, 4  ;;  %s712_s4 = int_to_ptr.vmem [resolvable:$true] %s711_s4 }
 0x237   :  { %s10128_s25 = scalar_lea.hbm %s12969_s2, 16 }
 0x238   :  { %p10129_p6 = scmp.ne.s32.totalorder %s12969_s2, %s10128_s25  ;;  %p10132_p7 = scmp.lt.u32.totalorder %s10128_s25, %s12969_s2 }
 0x23a   :  { %p10134_p8 = pnand %p10132_p7, %p10129_p6 }
 0x23c   :  { %10137 = shalt.err (!%p10134_p8)
}
 0x23d   :  { %s10138_s16 = scalar_lea.vmem %s692_s10, 16  ;;  %s10142_s24 = scalar_lea.vmem %s692_s10, 32 }
 0x23e   :  { %p10139_p9 = scmp.ne.s32.totalorder %s692_s10, %s10138_s16  ;;  %p10143_p10 = scmp.lt.s32.totalorder %s692_s10, %s692_s10 }
 0x23f   :  { %p10144_p11 = scmp.lt.s32.totalorder %s10142_s24, %s10138_s16 }
 0x241   :  { %p10145_p12 = por %p10144_p11, %p10143_p10 }
 0x243   :  { %p10146_p13 = pnand %p10145_p12, %p10139_p9 }
 0x245   :  { %10149 = shalt.err (!%p10146_p13)
}
 0x246   :  { %s12970_s18 = sld [smem:[#allocation180_spill]] }
 0x247   :  { %694 = dma.hbm_to_vmem [thread:$0]  %s12969_s2, 16, %s692_s10, [#allocation66]  }
 0x24c   :  { %s10150_s8 = scalar_lea.hbm %s12970_s18, 16 }
 0x24d   :  { %p10151_p0 = scmp.ne.s32.totalorder %s12970_s18, %s10150_s8  ;;  %p10154_p1 = scmp.lt.u32.totalorder %s10150_s8, %s12970_s18 }
 0x24f   :  { %p10156_p2 = pnand %p10154_p1, %p10151_p0 }
 0x251   :  { %10159 = shalt.err (!%p10156_p2)
}
 0x252   :  { %s10160_s9 = scalar_lea.vmem %s712_s4, 16  ;;  %s10164_s22 = scalar_lea.vmem %s712_s4, 32 }
 0x253   :  { %p10161_p3 = scmp.ne.s32.totalorder %s712_s4, %s10160_s9  ;;  %p10165_p4 = scmp.lt.s32.totalorder %s712_s4, %s712_s4 }
 0x254   :  { %p10166_p5 = scmp.lt.s32.totalorder %s10164_s22, %s10160_s9 }
 0x256   :  { %p10167_p6 = por %p10166_p5, %p10165_p4 }
 0x258   :  { %p10168_p7 = pnand %p10167_p6, %p10161_p3 }
 0x25a   :  { %10171 = shalt.err (!%p10168_p7)
}
 0x25b   :  { %s12971_s23 = sld [smem:[#allocation183_spill]]  ;;  %s11278_s3 = smov [#allocation71]  }
 0x25c   :  { %714 = dma.hbm_to_vmem [thread:$0]  %s12970_s18, 16, %s712_s4, [#allocation69]  }
 0x25d   :  { %s733_s14 = sshll.u32 %s11278_s3, 4  ;;  %s11279_s26 = smov [#allocation74]   ;;  %s734_s14 = int_to_ptr.vmem [resolvable:$true] %s733_s14 }
 0x25e   :  { %s755_s30 = sshll.u32 %s11279_s26, 4  ;;  %s756_s30 = int_to_ptr.vmem [resolvable:$true] %s755_s30 }
 0x261   :  { %s10172_s0 = scalar_lea.hbm %s12971_s23, 16 }
 0x262   :  { %p10173_p8 = scmp.ne.s32.totalorder %s12971_s23, %s10172_s0  ;;  %p10176_p9 = scmp.lt.u32.totalorder %s10172_s0, %s12971_s23 }
 0x264   :  { %p10178_p10 = pnand %p10176_p9, %p10173_p8 }
 0x266   :  { %10181 = shalt.err (!%p10178_p10)
}
 0x267   :  { %s10182_s21 = scalar_lea.vmem %s734_s14, 16  ;;  %s10186_s28 = scalar_lea.vmem %s734_s14, 32 }
 0x268   :  { %p10183_p11 = scmp.ne.s32.totalorder %s734_s14, %s10182_s21  ;;  %p10187_p12 = scmp.lt.s32.totalorder %s734_s14, %s734_s14 }
 0x269   :  { %p10188_p13 = scmp.lt.s32.totalorder %s10186_s28, %s10182_s21 }
 0x26b   :  { %p10189_p0 = por %p10188_p13, %p10187_p12 }
 0x26d   :  { %p10190_p1 = pnand %p10189_p0, %p10183_p11 }
 0x26f   :  { %10193 = shalt.err (!%p10190_p1)
}
 0x270   :  { %s12972_s6 = sld [smem:[#allocation185_spill]] }
 0x271   :  { %736 = dma.hbm_to_vmem [thread:$0]  %s12971_s23, 16, %s734_s14, [#allocation72]  }
 0x276   :  { %s10194_s29 = scalar_lea.hbm %s12972_s6, 16 }
 0x277   :  { %p10195_p2 = scmp.ne.s32.totalorder %s12972_s6, %s10194_s29  ;;  %p10198_p3 = scmp.lt.u32.totalorder %s10194_s29, %s12972_s6 }
 0x279   :  { %p10200_p4 = pnand %p10198_p3, %p10195_p2 }
 0x27b   :  { %10203 = shalt.err (!%p10200_p4)
}
 0x27c   :  { %s10204_s1 = scalar_lea.vmem %s756_s30, 16  ;;  %s10208_s17 = scalar_lea.vmem %s756_s30, 32 }
 0x27d   :  { %p10205_p5 = scmp.ne.s32.totalorder %s756_s30, %s10204_s1  ;;  %p10209_p6 = scmp.lt.s32.totalorder %s756_s30, %s756_s30 }
 0x27e   :  { %p10210_p7 = scmp.lt.s32.totalorder %s10208_s17, %s10204_s1 }
 0x280   :  { %p10211_p8 = por %p10210_p7, %p10209_p6 }
 0x282   :  { %p10212_p9 = pnand %p10211_p8, %p10205_p5 }
 0x284   :  { %10215 = shalt.err (!%p10212_p9)
}
 0x285   :  { %s12973_s13 = sld [smem:[#allocation187_spill]]  ;;  %s11280_s2 = smov [#allocation77]  }
 0x286   :  { %758 = dma.hbm_to_vmem [thread:$0]  %s12972_s6, 16, %s756_s30, [#allocation75]  }
 0x287   :  { %s777_s7 = sshll.u32 %s11280_s2, 4  ;;  %s11281_s10 = smov [#allocation80]   ;;  %s778_s7 = int_to_ptr.vmem [resolvable:$true] %s777_s7 }
 0x288   :  { %s798_s20 = sshll.u32 %s11281_s10, 4  ;;  %s11915_s20 = int_to_ptr.vmem [resolvable:$true] %s798_s20 }
 0x28b   :  { %s10216_s4 = scalar_lea.hbm %s12973_s13, 16 }
 0x28c   :  { %p10217_p10 = scmp.ne.s32.totalorder %s12973_s13, %s10216_s4  ;;  %p10220_p11 = scmp.lt.u32.totalorder %s10216_s4, %s12973_s13 }
 0x28e   :  { %p10222_p12 = pnand %p10220_p11, %p10217_p10 }
 0x290   :  { %10225 = shalt.err (!%p10222_p12)
}
 0x291   :  { %s10226_s25 = scalar_lea.vmem %s778_s7, 16  ;;  %s10230_s16 = scalar_lea.vmem %s778_s7, 32 }
 0x292   :  { %p10227_p13 = scmp.ne.s32.totalorder %s778_s7, %s10226_s25  ;;  %p10231_p0 = scmp.lt.s32.totalorder %s778_s7, %s778_s7 }
 0x293   :  { %p10232_p1 = scmp.lt.s32.totalorder %s10230_s16, %s10226_s25 }
 0x295   :  { %p10233_p2 = por %p10232_p1, %p10231_p0 }
 0x297   :  { %p10234_p3 = pnand %p10233_p2, %p10227_p13 }
 0x299   :  { %10237 = shalt.err (!%p10234_p3)
}
 0x29a   :  { %s12974_s24 = sld [smem:[#allocation190_spill]] }
 0x29b   :  { %780 = dma.hbm_to_vmem [thread:$0]  %s12973_s13, 16, %s778_s7, [#allocation78]  }
 0x2a0   :  { %s10238_s18 = scalar_lea.hbm %s12974_s24, 512 }
 0x2a1   :  { %p10239_p4 = scmp.ne.s32.totalorder %s12974_s24, %s10238_s18  ;;  %p10242_p5 = scmp.lt.u32.totalorder %s10238_s18, %s12974_s24 }
 0x2a3   :  { %p10244_p6 = pnand %p10242_p5, %p10239_p4 }
 0x2a5   :  { %10247 = shalt.err (!%p10244_p6)
}
 0x2a6   :  { %s10248_s8 = scalar_lea.vmem %s11915_s20, 512  ;;  %p10253_p8 = scmp.lt.s32.totalorder %s11915_s20, %s11915_s20 }
 0x2a7   :  { %p10249_p7 = scmp.ne.s32.totalorder %s11915_s20, %s10248_s8  ;;  %p10254_p9 = scmp.lt.s32.totalorder %s10248_s8, %s10248_s8 }
 0x2a9   :  { %p10255_p10 = por %p10254_p9, %p10253_p8 }
 0x2ab   :  { %p10256_p11 = pnand %p10255_p10, %p10249_p7 }
 0x2ad   :  { %10259 = shalt.err (!%p10256_p11)
}
 0x2ae   :  { %s12975_s9 = sld [smem:[#allocation197_spill]]  ;;  %s11282_s22 = smov [#allocation83]  }
 0x2af   :  { %804 = dma.hbm_to_vmem [thread:$0]  %s12974_s24, 512, %s11915_s20, [#allocation81], %s11256_s11, %s11256_s11, %s11257_s15  }
 0x2b0   :  { %s831_s23 = sshll.u32 %s11282_s22, 4  ;;  %s11283_s3 = smov [#allocation86]   ;;  %s832_s23 = int_to_ptr.vmem [resolvable:$true] %s831_s23 }
 0x2b1   :  { %s851_s14 = sshll.u32 %s11283_s3, 4  ;;  %s852_s14 = int_to_ptr.vmem [resolvable:$true] %s851_s14 }
 0x2b4   :  { %s10260_s26 = scalar_lea.hbm %s12975_s9, 16 }
 0x2b5   :  { %p10261_p12 = scmp.ne.s32.totalorder %s12975_s9, %s10260_s26  ;;  %p10264_p13 = scmp.lt.u32.totalorder %s10260_s26, %s12975_s9 }
 0x2b7   :  { %p10266_p0 = pnand %p10264_p13, %p10261_p12 }
 0x2b9   :  { %10269 = shalt.err (!%p10266_p0)
}
 0x2ba   :  { %s10270_s30 = scalar_lea.vmem %s832_s23, 16  ;;  %s10274_s0 = scalar_lea.vmem %s832_s23, 32 }
 0x2bb   :  { %p10271_p1 = scmp.ne.s32.totalorder %s832_s23, %s10270_s30  ;;  %p10275_p2 = scmp.lt.s32.totalorder %s832_s23, %s832_s23 }
 0x2bc   :  { %p10276_p3 = scmp.lt.s32.totalorder %s10274_s0, %s10270_s30 }
 0x2be   :  { %p10277_p4 = por %p10276_p3, %p10275_p2 }
 0x2c0   :  { %p10278_p5 = pnand %p10277_p4, %p10271_p1 }
 0x2c2   :  { %10281 = shalt.err (!%p10278_p5)
}
 0x2c3   :  { %s12976_s21 = sld [smem:[#allocation199_spill]] }
 0x2c4   :  { %834 = dma.hbm_to_vmem [thread:$0]  %s12975_s9, 16, %s832_s23, [#allocation84]  }
 0x2c9   :  { %s10282_s28 = scalar_lea.hbm %s12976_s21, 16 }
 0x2ca   :  { %p10283_p6 = scmp.ne.s32.totalorder %s12976_s21, %s10282_s28  ;;  %p10286_p7 = scmp.lt.u32.totalorder %s10282_s28, %s12976_s21 }
 0x2cc   :  { %p10288_p8 = pnand %p10286_p7, %p10283_p6 }
 0x2ce   :  { %10291 = shalt.err (!%p10288_p8)
}
 0x2cf   :  { %s10292_s6 = scalar_lea.vmem %s852_s14, 16  ;;  %s10296_s29 = scalar_lea.vmem %s852_s14, 32 }
 0x2d0   :  { %p10293_p9 = scmp.ne.s32.totalorder %s852_s14, %s10292_s6  ;;  %p10297_p10 = scmp.lt.s32.totalorder %s852_s14, %s852_s14 }
 0x2d1   :  { %p10298_p11 = scmp.lt.s32.totalorder %s10296_s29, %s10292_s6 }
 0x2d3   :  { %p10299_p12 = por %p10298_p11, %p10297_p10 }
 0x2d5   :  { %p10300_p13 = pnand %p10299_p12, %p10293_p9 }
 0x2d7   :  { %10303 = shalt.err (!%p10300_p13)
}
 0x2d8   :  { %s12977_s1 = sld [smem:[#allocation202_spill]]  ;;  %s11284_s17 = smov [#allocation89]  }
 0x2d9   :  { %854 = dma.hbm_to_vmem [thread:$0]  %s12976_s21, 16, %s852_s14, [#allocation87]  }
 0x2da   :  { %s873_s13 = sshll.u32 %s11284_s17, 4  ;;  %s11285_s2 = smov [#allocation92]   ;;  %s874_s13 = int_to_ptr.vmem [resolvable:$true] %s873_s13 }
 0x2db   :  { %s895_s7 = sshll.u32 %s11285_s2, 4  ;;  %s896_s7 = int_to_ptr.vmem [resolvable:$true] %s895_s7 }
 0x2de   :  { %s10304_s10 = scalar_lea.hbm %s12977_s1, 16 }
 0x2df   :  { %p10305_p0 = scmp.ne.s32.totalorder %s12977_s1, %s10304_s10  ;;  %p10308_p1 = scmp.lt.u32.totalorder %s10304_s10, %s12977_s1 }
 0x2e1   :  { %p10310_p2 = pnand %p10308_p1, %p10305_p0 }
 0x2e3   :  { %10313 = shalt.err (!%p10310_p2)
}
 0x2e4   :  { %s10314_s20 = scalar_lea.vmem %s874_s13, 16  ;;  %s10318_s4 = scalar_lea.vmem %s874_s13, 32 }
 0x2e5   :  { %p10315_p3 = scmp.ne.s32.totalorder %s874_s13, %s10314_s20  ;;  %p10319_p4 = scmp.lt.s32.totalorder %s874_s13, %s874_s13 }
 0x2e6   :  { %p10320_p5 = scmp.lt.s32.totalorder %s10318_s4, %s10314_s20 }
 0x2e8   :  { %p10321_p6 = por %p10320_p5, %p10319_p4 }
 0x2ea   :  { %p10322_p7 = pnand %p10321_p6, %p10315_p3 }
 0x2ec   :  { %10325 = shalt.err (!%p10322_p7)
}
 0x2ed   :  { %s12978_s25 = sld [smem:[#allocation204_spill]] }
 0x2ee   :  { %876 = dma.hbm_to_vmem [thread:$0]  %s12977_s1, 16, %s874_s13, [#allocation90]  }
 0x2f3   :  { %s10326_s16 = scalar_lea.hbm %s12978_s25, 16 }
 0x2f4   :  { %p10327_p8 = scmp.ne.s32.totalorder %s12978_s25, %s10326_s16  ;;  %p10330_p9 = scmp.lt.u32.totalorder %s10326_s16, %s12978_s25 }
 0x2f6   :  { %p10332_p10 = pnand %p10330_p9, %p10327_p8 }
 0x2f8   :  { %10335 = shalt.err (!%p10332_p10)
}
 0x2f9   :  { %s10336_s24 = scalar_lea.vmem %s896_s7, 16  ;;  %s10340_s18 = scalar_lea.vmem %s896_s7, 32 }
 0x2fa   :  { %p10337_p11 = scmp.ne.s32.totalorder %s896_s7, %s10336_s24  ;;  %p10341_p12 = scmp.lt.s32.totalorder %s896_s7, %s896_s7 }
 0x2fb   :  { %p10342_p13 = scmp.lt.s32.totalorder %s10340_s18, %s10336_s24 }
 0x2fd   :  { %p10343_p0 = por %p10342_p13, %p10341_p12 }
 0x2ff   :  { %p10344_p1 = pnand %p10343_p0, %p10337_p11 }
 0x301   :  { %10347 = shalt.err (!%p10344_p1)
}
 0x302   :  { %s12979_s8 = sld [smem:[#allocation206_spill]]  ;;  %s11286_s9 = smov [#allocation95]  }
 0x303   :  { %898 = dma.hbm_to_vmem [thread:$0]  %s12978_s25, 16, %s896_s7, [#allocation93]  }
 0x304   :  { %s917_s22 = sshll.u32 %s11286_s9, 4  ;;  %s11287_s23 = smov [#allocation2]   ;;  %s918_s22 = int_to_ptr.vmem [resolvable:$true] %s917_s22 }
 0x305   :  { %s228_s3 = sshll.u32 %s11287_s23, 4  ;;  %s11949_s3 = int_to_ptr.vmem [resolvable:$true] %s228_s3 }
 0x308   :  { %s10348_s14 = scalar_lea.hbm %s12979_s8, 16 }
 0x309   :  { %p10349_p2 = scmp.ne.s32.totalorder %s12979_s8, %s10348_s14  ;;  %p10352_p3 = scmp.lt.u32.totalorder %s10348_s14, %s12979_s8 }
 0x30b   :  { %p10354_p4 = pnand %p10352_p3, %p10349_p2 }
 0x30d   :  { %10357 = shalt.err (!%p10354_p4)
}
 0x30e   :  { %s10358_s26 = scalar_lea.vmem %s918_s22, 16  ;;  %s10362_s30 = scalar_lea.vmem %s918_s22, 32 }
 0x30f   :  { %p10359_p5 = scmp.ne.s32.totalorder %s918_s22, %s10358_s26  ;;  %p10363_p6 = scmp.lt.s32.totalorder %s918_s22, %s918_s22 }
 0x310   :  { %p10364_p7 = scmp.lt.s32.totalorder %s10362_s30, %s10358_s26 }
 0x312   :  { %p10365_p8 = por %p10364_p7, %p10363_p6 }
 0x314   :  { %p10366_p9 = pnand %p10365_p8, %p10359_p5 }
 0x316   :  { %10369 = shalt.err (!%p10366_p9)
}
 0x317   :  { %s12980_s0 = sld [smem:[#allocation132_spill]] }
 0x318   :  { %920 = dma.hbm_to_vmem [thread:$0]  %s12979_s8, 16, %s918_s22, [#allocation96]  }
 0x31d   :  { %s10370_s21 = scalar_lea.hbm %s12980_s0, 256 }
 0x31e   :  { %p10371_p10 = scmp.ne.s32.totalorder %s12980_s0, %s10370_s21  ;;  %p10374_p11 = scmp.lt.u32.totalorder %s10370_s21, %s12980_s0 }
 0x320   :  { %p10376_p12 = pnand %p10374_p11, %p10371_p10 }
 0x322   :  { %10379 = shalt.err (!%p10376_p12)
}
 0x323   :  { %s10380_s28 = scalar_lea.vmem %s11949_s3, 256  ;;  %p10385_p0 = scmp.lt.s32.totalorder %s11949_s3, %s11949_s3 }
 0x324   :  { %p10381_p13 = scmp.ne.s32.totalorder %s11949_s3, %s10380_s28  ;;  %p10386_p1 = scmp.lt.s32.totalorder %s10380_s28, %s10380_s28 }
 0x326   :  { %p10387_p2 = por %p10386_p1, %p10385_p0 }
 0x328   :  { %p10388_p3 = pnand %p10387_p2, %p10381_p13 }
 0x32a   :  { %10391 = shalt.err (!%p10388_p3)
}
 0x32b   :  { %s12981_s6 = sld [smem:[#allocation133_spill]]  ;;  %s11288_s29 = smov [#allocation7]  }
 0x32c   :  { %234 = dma.hbm_to_vmem [thread:$0]  %s12980_s0, 256, %s11949_s3, [#allocation3], %s11256_s11, %s11256_s11, %s11257_s15  }
 0x32d   :  { %s252_s1 = sshll.u32 %s11288_s29, 4  ;;  %s11289_s17 = smov [#allocation10]   ;;  %s253_s1 = int_to_ptr.vmem [resolvable:$true] %s252_s1 }
 0x32e   :  { %s277_s13 = sshll.u32 %s11289_s17, 4  ;;  %s278_s13 = int_to_ptr.vmem [resolvable:$true] %s277_s13 }
 0x331   :  { %s10392_s2 = scalar_lea.hbm %s12981_s6, 256 }
 0x332   :  { %p10393_p4 = scmp.ne.s32.totalorder %s12981_s6, %s10392_s2  ;;  %p10396_p5 = scmp.lt.u32.totalorder %s10392_s2, %s12981_s6 }
 0x334   :  { %p10398_p6 = pnand %p10396_p5, %p10393_p4 }
 0x336   :  { %10401 = shalt.err (!%p10398_p6)
}
 0x337   :  { %s10402_s7 = scalar_lea.vmem %s253_s1, 256  ;;  %p10407_p8 = scmp.lt.s32.totalorder %s253_s1, %s253_s1 }
 0x338   :  { %p10403_p7 = scmp.ne.s32.totalorder %s253_s1, %s10402_s7  ;;  %p10408_p9 = scmp.lt.s32.totalorder %s10402_s7, %s10402_s7 }
 0x33a   :  { %p10409_p10 = por %p10408_p9, %p10407_p8 }
 0x33c   :  { %p10410_p11 = pnand %p10409_p10, %p10403_p7 }
 0x33e   :  { %10413 = shalt.err (!%p10410_p11)
}
 0x33f   :  { %s12982_s10 = sld [smem:[#allocation134_spill]] }
 0x340   :  { %258 = dma.hbm_to_vmem [thread:$0]  %s12981_s6, 256, %s253_s1, [#allocation6], %s11256_s11, %s11256_s11, %s11257_s15  }
 0x345   :  { %s10414_s20 = scalar_lea.hbm %s12982_s10, 128 }
 0x346   :  { %p10415_p12 = scmp.ne.s32.totalorder %s12982_s10, %s10414_s20  ;;  %p10418_p13 = scmp.lt.u32.totalorder %s10414_s20, %s12982_s10 }
 0x348   :  { %p10420_p0 = pnand %p10418_p13, %p10415_p12 }
 0x34a   :  { %10423 = shalt.err (!%p10420_p0)
}
 0x34b   :  { %s10424_s4 = scalar_lea.vmem %s278_s13, 128  ;;  %p10429_p2 = scmp.lt.s32.totalorder %s278_s13, %s278_s13 }
 0x34c   :  { %p10425_p1 = scmp.ne.s32.totalorder %s278_s13, %s10424_s4  ;;  %p10430_p3 = scmp.lt.s32.totalorder %s10424_s4, %s10424_s4 }
 0x34e   :  { %p10431_p4 = por %p10430_p3, %p10429_p2 }
 0x350   :  { %p10432_p5 = pnand %p10431_p4, %p10425_p1 }
 0x352   :  { %10435 = shalt.err (!%p10432_p5)
}
 0x353   :  { %s12983_s25 = sld [smem:[#allocation136_spill]]  ;;  %s11290_s16 = smov [#allocation13]  }
 0x354   :  { %280 = dma.hbm_to_vmem [thread:$0]  %s12982_s10, 128, %s278_s13, [#allocation9]  }
 0x355   :  { %s299_s24 = sshll.u32 %s11290_s16, 4  ;;  %s11291_s18 = smov [#allocation16]   ;;  %s300_s24 = int_to_ptr.vmem [resolvable:$true] %s299_s24 }
 0x356   :  { %s323_s8 = sshll.u32 %s11291_s18, 4  ;;  %s324_s8 = int_to_ptr.vmem [resolvable:$true] %s323_s8 }
 0x359   :  { %s10436_s9 = scalar_lea.hbm %s12983_s25, 16 }
 0x35a   :  { %p10437_p6 = scmp.ne.s32.totalorder %s12983_s25, %s10436_s9  ;;  %p10440_p7 = scmp.lt.u32.totalorder %s10436_s9, %s12983_s25 }
 0x35c   :  { %p10442_p8 = pnand %p10440_p7, %p10437_p6 }
 0x35e   :  { %10445 = shalt.err (!%p10442_p8)
}
 0x35f   :  { %s10446_s22 = scalar_lea.vmem %s300_s24, 16  ;;  %s10450_s23 = scalar_lea.vmem %s300_s24, 32 }
 0x360   :  { %p10447_p9 = scmp.ne.s32.totalorder %s300_s24, %s10446_s22  ;;  %p10451_p10 = scmp.lt.s32.totalorder %s300_s24, %s300_s24 }
 0x361   :  { %p10452_p11 = scmp.lt.s32.totalorder %s10450_s23, %s10446_s22 }
 0x363   :  { %p10453_p12 = por %p10452_p11, %p10451_p10 }
 0x365   :  { %p10454_p13 = pnand %p10453_p12, %p10447_p9 }
 0x367   :  { %10457 = shalt.err (!%p10454_p13)
}
 0x368   :  { %s12984_s3 = sld [smem:[#allocation139_spill]] }
 0x369   :  { %302 = dma.hbm_to_vmem [thread:$0]  %s12983_s25, 16, %s300_s24, [#allocation12]  }
 0x36e   :  { %s10458_s14 = scalar_lea.hbm %s12984_s3, 16 }
 0x36f   :  { %p10459_p0 = scmp.ne.s32.totalorder %s12984_s3, %s10458_s14  ;;  %p10462_p1 = scmp.lt.u32.totalorder %s10458_s14, %s12984_s3 }
 0x371   :  { %p10464_p2 = pnand %p10462_p1, %p10459_p0 }
 0x373   :  { %10467 = shalt.err (!%p10464_p2)
}
 0x374   :  { %s10468_s26 = scalar_lea.vmem %s324_s8, 16  ;;  %s10472_s30 = scalar_lea.vmem %s324_s8, 32 }
 0x375   :  { %p10469_p3 = scmp.ne.s32.totalorder %s324_s8, %s10468_s26  ;;  %p10473_p4 = scmp.lt.s32.totalorder %s324_s8, %s324_s8 }
 0x376   :  { %p10474_p5 = scmp.lt.s32.totalorder %s10472_s30, %s10468_s26 }
 0x378   :  { %p10475_p6 = por %p10474_p5, %p10473_p4 }
 0x37a   :  { %p10476_p7 = pnand %p10475_p6, %p10469_p3 }
 0x37c   :  { %10479 = shalt.err (!%p10476_p7)
}
 0x37d   :  { %s12985_s0 = sld [smem:[#allocation142_spill]]  ;;  %s11292_s21 = smov [#allocation19]  }
 0x37e   :  { %326 = dma.hbm_to_vmem [thread:$0]  %s12984_s3, 16, %s324_s8, [#allocation15]  }
 0x37f   :  { %s347_s28 = sshll.u32 %s11292_s21, 4  ;;  %s11293_s6 = smov [#allocation22]   ;;  %s348_s28 = int_to_ptr.vmem [resolvable:$true] %s347_s28 }
 0x380   :  { %s369_s29 = sshll.u32 %s11293_s6, 4  ;;  %s370_s29 = int_to_ptr.vmem [resolvable:$true] %s369_s29 }
 0x383   :  { %s10480_s1 = scalar_lea.hbm %s12985_s0, 16 }
 0x384   :  { %p10481_p8 = scmp.ne.s32.totalorder %s12985_s0, %s10480_s1  ;;  %p10484_p9 = scmp.lt.u32.totalorder %s10480_s1, %s12985_s0 }
 0x386   :  { %p10486_p10 = pnand %p10484_p9, %p10481_p8 }
 0x388   :  { %10489 = shalt.err (!%p10486_p10)
}
 0x389   :  { %s10490_s17 = scalar_lea.vmem %s348_s28, 16  ;;  %s10494_s13 = scalar_lea.vmem %s348_s28, 32 }
 0x38a   :  { %p10491_p11 = scmp.ne.s32.totalorder %s348_s28, %s10490_s17  ;;  %p10495_p12 = scmp.lt.s32.totalorder %s348_s28, %s348_s28 }
 0x38b   :  { %p10496_p13 = scmp.lt.s32.totalorder %s10494_s13, %s10490_s17 }
 0x38d   :  { %p10497_p0 = por %p10496_p13, %p10495_p12 }
 0x38f   :  { %p10498_p1 = pnand %p10497_p0, %p10491_p11 }
 0x391   :  { %10501 = shalt.err (!%p10498_p1)
}
 0x392   :  { %s12986_s2 = sld [smem:[#allocation144_spill]] }
 0x393   :  { %350 = dma.hbm_to_vmem [thread:$0]  %s12985_s0, 16, %s348_s28, [#allocation18]  }
 0x398   :  { %s10502_s7 = scalar_lea.hbm %s12986_s2, 16 }
 0x399   :  { %p10503_p2 = scmp.ne.s32.totalorder %s12986_s2, %s10502_s7  ;;  %p10506_p3 = scmp.lt.u32.totalorder %s10502_s7, %s12986_s2 }
 0x39b   :  { %p10508_p4 = pnand %p10506_p3, %p10503_p2 }
 0x39d   :  { %10511 = shalt.err (!%p10508_p4)
}
 0x39e   :  { %s10512_s10 = scalar_lea.vmem %s370_s29, 16  ;;  %s10516_s20 = scalar_lea.vmem %s370_s29, 32 }
 0x39f   :  { %p10513_p5 = scmp.ne.s32.totalorder %s370_s29, %s10512_s10  ;;  %p10517_p6 = scmp.lt.s32.totalorder %s370_s29, %s370_s29 }
 0x3a0   :  { %p10518_p7 = scmp.lt.s32.totalorder %s10516_s20, %s10512_s10 }
 0x3a2   :  { %p10519_p8 = por %p10518_p7, %p10517_p6 }
 0x3a4   :  { %p10520_p9 = pnand %p10519_p8, %p10513_p5 }
 0x3a6   :  { %10523 = shalt.err (!%p10520_p9)
}
 0x3a7   :  { %s12987_s4 = sld [smem:[#allocation145_spill]]  ;;  %s11294_s25 = smov [#allocation25]  }
 0x3a8   :  { %372 = dma.hbm_to_vmem [thread:$0]  %s12986_s2, 16, %s370_s29, [#allocation21]  }
 0x3a9   :  { %s389_s16 = sshll.u32 %s11294_s25, 4  ;;  %s11295_s24 = smov [#allocation28]   ;;  %s390_s16 = int_to_ptr.vmem [resolvable:$true] %s389_s16 }
 0x3aa   :  { %s409_s18 = sshll.u32 %s11295_s24, 4  ;;  %s410_s18 = int_to_ptr.vmem [resolvable:$true] %s409_s18 }
 0x3ad   :  { %s10524_s8 = scalar_lea.hbm %s12987_s4, 16 }
 0x3ae   :  { %p10525_p10 = scmp.ne.s32.totalorder %s12987_s4, %s10524_s8  ;;  %p10528_p11 = scmp.lt.u32.totalorder %s10524_s8, %s12987_s4 }
 0x3b0   :  { %p10530_p12 = pnand %p10528_p11, %p10525_p10 }
 0x3b2   :  { %10533 = shalt.err (!%p10530_p12)
}
 0x3b3   :  { %s10534_s9 = scalar_lea.vmem %s390_s16, 16  ;;  %s10538_s22 = scalar_lea.vmem %s390_s16, 32 }
 0x3b4   :  { %p10535_p13 = scmp.ne.s32.totalorder %s390_s16, %s10534_s9  ;;  %p10539_p0 = scmp.lt.s32.totalorder %s390_s16, %s390_s16 }
 0x3b5   :  { %p10540_p1 = scmp.lt.s32.totalorder %s10538_s22, %s10534_s9 }
 0x3b7   :  { %p10541_p2 = por %p10540_p1, %p10539_p0 }
 0x3b9   :  { %p10542_p3 = pnand %p10541_p2, %p10535_p13 }
 0x3bb   :  { %10545 = shalt.err (!%p10542_p3)
}
 0x3bc   :  { %s12988_s23 = sld [smem:[#allocation146_spill]] }
 0x3bd   :  { %392 = dma.hbm_to_vmem [thread:$0]  %s12987_s4, 16, %s390_s16, [#allocation24]  }
 0x3c2   :  { %s10546_s3 = scalar_lea.hbm %s12988_s23, 16 }
 0x3c3   :  { %p10547_p4 = scmp.ne.s32.totalorder %s12988_s23, %s10546_s3  ;;  %p10550_p5 = scmp.lt.u32.totalorder %s10546_s3, %s12988_s23 }
 0x3c5   :  { %p10552_p6 = pnand %p10550_p5, %p10547_p4 }
 0x3c7   :  { %10555 = shalt.err (!%p10552_p6)
}
 0x3c8   :  { %s10556_s14 = scalar_lea.vmem %s410_s18, 16  ;;  %s10560_s26 = scalar_lea.vmem %s410_s18, 32 }
 0x3c9   :  { %p10557_p7 = scmp.ne.s32.totalorder %s410_s18, %s10556_s14  ;;  %p10561_p8 = scmp.lt.s32.totalorder %s410_s18, %s410_s18 }
 0x3ca   :  { %p10562_p9 = scmp.lt.s32.totalorder %s10560_s26, %s10556_s14 }
 0x3cc   :  { %p10563_p10 = por %p10562_p9, %p10561_p8 }
 0x3ce   :  { %p10564_p11 = pnand %p10563_p10, %p10557_p7 }
 0x3d0   :  { %10567 = shalt.err (!%p10564_p11)
}
 0x3d1   :  { %s12989_s30 = sld [smem:[#allocation148_spill]]  ;;  %s11296_s0 = smov [#allocation31]  }
 0x3d2   :  { %412 = dma.hbm_to_vmem [thread:$0]  %s12988_s23, 16, %s410_s18, [#allocation27]  }
 0x3d3   :  { %s431_s21 = sshll.u32 %s11296_s0, 4  ;;  %s11297_s28 = smov [#allocation34]   ;;  %s432_s21 = int_to_ptr.vmem [resolvable:$true] %s431_s21 }
 0x3d4   :  { %s455_s6 = sshll.u32 %s11297_s28, 4  ;;  %s456_s6 = int_to_ptr.vmem [resolvable:$true] %s455_s6 }
 0x3d7   :  { %s10568_s29 = scalar_lea.hbm %s12989_s30, 16 }
 0x3d8   :  { %p10569_p12 = scmp.ne.s32.totalorder %s12989_s30, %s10568_s29  ;;  %p10572_p13 = scmp.lt.u32.totalorder %s10568_s29, %s12989_s30 }
 0x3da   :  { %p10574_p0 = pnand %p10572_p13, %p10569_p12 }
 0x3dc   :  { %10577 = shalt.err (!%p10574_p0)
}
 0x3dd   :  { %s10578_s1 = scalar_lea.vmem %s432_s21, 16  ;;  %s10582_s17 = scalar_lea.vmem %s432_s21, 32 }
 0x3de   :  { %p10579_p1 = scmp.ne.s32.totalorder %s432_s21, %s10578_s1  ;;  %p10583_p2 = scmp.lt.s32.totalorder %s432_s21, %s432_s21 }
 0x3df   :  { %p10584_p3 = scmp.lt.s32.totalorder %s10582_s17, %s10578_s1 }
 0x3e1   :  { %p10585_p4 = por %p10584_p3, %p10583_p2 }
 0x3e3   :  { %p10586_p5 = pnand %p10585_p4, %p10579_p1 }
 0x3e5   :  { %10589 = shalt.err (!%p10586_p5)
}
 0x3e6   :  { %s12990_s13 = sld [smem:[#allocation151_spill]] }
 0x3e7   :  { %434 = dma.hbm_to_vmem [thread:$0]  %s12989_s30, 16, %s432_s21, [#allocation30]  }
 0x3ec   :  { %s10590_s2 = scalar_lea.hbm %s12990_s13, 16 }
 0x3ed   :  { %p10591_p6 = scmp.ne.s32.totalorder %s12990_s13, %s10590_s2  ;;  %p10594_p7 = scmp.lt.u32.totalorder %s10590_s2, %s12990_s13 }
 0x3ef   :  { %p10596_p8 = pnand %p10594_p7, %p10591_p6 }
 0x3f1   :  { %10599 = shalt.err (!%p10596_p8)
}
 0x3f2   :  { %s10600_s7 = scalar_lea.vmem %s456_s6, 16  ;;  %s10604_s10 = scalar_lea.vmem %s456_s6, 32 }
 0x3f3   :  { %p10601_p9 = scmp.ne.s32.totalorder %s456_s6, %s10600_s7  ;;  %p10605_p10 = scmp.lt.s32.totalorder %s456_s6, %s456_s6 }
 0x3f4   :  { %p10606_p11 = scmp.lt.s32.totalorder %s10604_s10, %s10600_s7 }
 0x3f6   :  { %p10607_p12 = por %p10606_p11, %p10605_p10 }
 0x3f8   :  { %p10608_p13 = pnand %p10607_p12, %p10601_p9 }
 0x3fa   :  { %10611 = shalt.err (!%p10608_p13)
}
 0x3fb   :  { %s12991_s20 = sld [smem:[#allocation154_spill]]  ;;  %s11298_s4 = smov [#allocation37]  }
 0x3fc   :  { %458 = dma.hbm_to_vmem [thread:$0]  %s12990_s13, 16, %s456_s6, [#allocation33]  }
 0x3fd   :  { %s479_s25 = sshll.u32 %s11298_s4, 4  ;;  %s11299_s16 = smov [#allocation40]   ;;  %s480_s25 = int_to_ptr.vmem [resolvable:$true] %s479_s25 }
 0x3fe   :  { %s503_s24 = sshll.u32 %s11299_s16, 4  ;;  %s504_s24 = int_to_ptr.vmem [resolvable:$true] %s503_s24 }
 0x401   :  { %s10612_s18 = scalar_lea.hbm %s12991_s20, 16 }
 0x402   :  { %p10613_p0 = scmp.ne.s32.totalorder %s12991_s20, %s10612_s18  ;;  %p10616_p1 = scmp.lt.u32.totalorder %s10612_s18, %s12991_s20 }
 0x404   :  { %p10618_p2 = pnand %p10616_p1, %p10613_p0 }
 0x406   :  { %10621 = shalt.err (!%p10618_p2)
}
 0x407   :  { %s10622_s8 = scalar_lea.vmem %s480_s25, 16  ;;  %s10626_s9 = scalar_lea.vmem %s480_s25, 32 }
 0x408   :  { %p10623_p3 = scmp.ne.s32.totalorder %s480_s25, %s10622_s8  ;;  %p10627_p4 = scmp.lt.s32.totalorder %s480_s25, %s480_s25 }
 0x409   :  { %p10628_p5 = scmp.lt.s32.totalorder %s10626_s9, %s10622_s8 }
 0x40b   :  { %p10629_p6 = por %p10628_p5, %p10627_p4 }
 0x40d   :  { %p10630_p7 = pnand %p10629_p6, %p10623_p3 }
 0x40f   :  { %10633 = shalt.err (!%p10630_p7)
}
 0x410   :  { %s12992_s22 = sld [smem:[#allocation157_spill]] }
 0x411   :  { %482 = dma.hbm_to_vmem [thread:$0]  %s12991_s20, 16, %s480_s25, [#allocation36]  }
 0x416   :  { %s10634_s23 = scalar_lea.hbm %s12992_s22, 16 }
 0x417   :  { %p10635_p8 = scmp.ne.s32.totalorder %s12992_s22, %s10634_s23  ;;  %p10638_p9 = scmp.lt.u32.totalorder %s10634_s23, %s12992_s22 }
 0x419   :  { %p10640_p10 = pnand %p10638_p9, %p10635_p8 }
 0x41b   :  { %10643 = shalt.err (!%p10640_p10)
}
 0x41c   :  { %s10644_s3 = scalar_lea.vmem %s504_s24, 16  ;;  %s10648_s14 = scalar_lea.vmem %s504_s24, 32 }
 0x41d   :  { %p10645_p11 = scmp.ne.s32.totalorder %s504_s24, %s10644_s3  ;;  %p10649_p12 = scmp.lt.s32.totalorder %s504_s24, %s504_s24 }
 0x41e   :  { %p10650_p13 = scmp.lt.s32.totalorder %s10648_s14, %s10644_s3 }
 0x420   :  { %p10651_p0 = por %p10650_p13, %p10649_p12 }
 0x422   :  { %p10652_p1 = pnand %p10651_p0, %p10645_p11 }
 0x424   :  { %10655 = shalt.err (!%p10652_p1)
}
 0x425   :  { %s12993_s26 = sld [smem:[#allocation160_spill]]  ;;  %s11300_s30 = smov [#allocation43]  }
 0x426   :  { %506 = dma.hbm_to_vmem [thread:$0]  %s12992_s22, 16, %s504_s24, [#allocation39]  }
 0x427   :  { %s527_s0 = sshll.u32 %s11300_s30, 4  ;;  %s11301_s21 = smov [#allocation46]   ;;  %s528_s0 = int_to_ptr.vmem [resolvable:$true] %s527_s0 }
 0x428   :  { %s549_s28 = sshll.u32 %s11301_s21, 4  ;;  %s550_s28 = int_to_ptr.vmem [resolvable:$true] %s549_s28 }
 0x42b   :  { %s10656_s6 = scalar_lea.hbm %s12993_s26, 16 }
 0x42c   :  { %p10657_p2 = scmp.ne.s32.totalorder %s12993_s26, %s10656_s6  ;;  %p10660_p3 = scmp.lt.u32.totalorder %s10656_s6, %s12993_s26 }
 0x42e   :  { %p10662_p4 = pnand %p10660_p3, %p10657_p2 }
 0x430   :  { %10665 = shalt.err (!%p10662_p4)
}
 0x431   :  { %s10666_s29 = scalar_lea.vmem %s528_s0, 16  ;;  %s10670_s1 = scalar_lea.vmem %s528_s0, 32 }
 0x432   :  { %p10667_p5 = scmp.ne.s32.totalorder %s528_s0, %s10666_s29  ;;  %p10671_p6 = scmp.lt.s32.totalorder %s528_s0, %s528_s0 }
 0x433   :  { %p10672_p7 = scmp.lt.s32.totalorder %s10670_s1, %s10666_s29 }
 0x435   :  { %p10673_p8 = por %p10672_p7, %p10671_p6 }
 0x437   :  { %p10674_p9 = pnand %p10673_p8, %p10667_p5 }
 0x439   :  { %10677 = shalt.err (!%p10674_p9)
}
 0x43a   :  { %s12994_s17 = sld [smem:[#allocation162_spill]] }
 0x43b   :  { %530 = dma.hbm_to_vmem [thread:$0]  %s12993_s26, 16, %s528_s0, [#allocation42]  }
 0x440   :  { %s10678_s13 = scalar_lea.hbm %s12994_s17, 16 }
 0x441   :  { %p10679_p10 = scmp.ne.s32.totalorder %s12994_s17, %s10678_s13  ;;  %p10682_p11 = scmp.lt.u32.totalorder %s10678_s13, %s12994_s17 }
 0x443   :  { %p10684_p12 = pnand %p10682_p11, %p10679_p10 }
 0x445   :  { %10687 = shalt.err (!%p10684_p12)
}
 0x446   :  { %s10688_s2 = scalar_lea.vmem %s550_s28, 16  ;;  %s10692_s7 = scalar_lea.vmem %s550_s28, 32 }
 0x447   :  { %p10689_p13 = scmp.ne.s32.totalorder %s550_s28, %s10688_s2  ;;  %p10693_p0 = scmp.lt.s32.totalorder %s550_s28, %s550_s28 }
 0x448   :  { %p10694_p1 = scmp.lt.s32.totalorder %s10692_s7, %s10688_s2 }
 0x44a   :  { %p10695_p2 = por %p10694_p1, %p10693_p0 }
 0x44c   :  { %p10696_p3 = pnand %p10695_p2, %p10689_p13 }
 0x44e   :  { %10699 = shalt.err (!%p10696_p3)
}
 0x44f   :  { %s12995_s10 = sld [smem:[#allocation164_spill]]  ;;  %s11302_s20 = smov [#allocation49]  }
 0x450   :  { %552 = dma.hbm_to_vmem [thread:$0]  %s12994_s17, 16, %s550_s28, [#allocation45]  }
 0x451   :  { %s569_s4 = sshll.u32 %s11302_s20, 4  ;;  %s11303_s25 = smov [#allocation52]   ;;  %s570_s4 = int_to_ptr.vmem [resolvable:$true] %s569_s4 }
 0x452   :  { %s591_s16 = sshll.u32 %s11303_s25, 4  ;;  %s592_s16 = int_to_ptr.vmem [resolvable:$true] %s591_s16 }
 0x455   :  { %s10700_s24 = scalar_lea.hbm %s12995_s10, 16 }
 0x456   :  { %p10701_p4 = scmp.ne.s32.totalorder %s12995_s10, %s10700_s24  ;;  %p10704_p5 = scmp.lt.u32.totalorder %s10700_s24, %s12995_s10 }
 0x458   :  { %p10706_p6 = pnand %p10704_p5, %p10701_p4 }
 0x45a   :  { %10709 = shalt.err (!%p10706_p6)
}
 0x45b   :  { %s10710_s18 = scalar_lea.vmem %s570_s4, 16  ;;  %s10714_s8 = scalar_lea.vmem %s570_s4, 32 }
 0x45c   :  { %p10711_p7 = scmp.ne.s32.totalorder %s570_s4, %s10710_s18  ;;  %p10715_p8 = scmp.lt.s32.totalorder %s570_s4, %s570_s4 }
 0x45d   :  { %p10716_p9 = scmp.lt.s32.totalorder %s10714_s8, %s10710_s18 }
 0x45f   :  { %p10717_p10 = por %p10716_p9, %p10715_p8 }
 0x461   :  { %p10718_p11 = pnand %p10717_p10, %p10711_p7 }
 0x463   :  { %10721 = shalt.err (!%p10718_p11)
}
 0x464   :  { %s12996_s9 = sld [smem:[#allocation167_spill]] }
 0x465   :  { %572 = dma.hbm_to_vmem [thread:$0]  %s12995_s10, 16, %s570_s4, [#allocation48]  }
 0x46a   :  { %s10722_s22 = scalar_lea.hbm %s12996_s9, 16 }
 0x46b   :  { %p10723_p12 = scmp.ne.s32.totalorder %s12996_s9, %s10722_s22  ;;  %p10726_p13 = scmp.lt.u32.totalorder %s10722_s22, %s12996_s9 }
 0x46d   :  { %p10728_p0 = pnand %p10726_p13, %p10723_p12 }
 0x46f   :  { %10731 = shalt.err (!%p10728_p0)
}
 0x470   :  { %s10732_s23 = scalar_lea.vmem %s592_s16, 16  ;;  %s10736_s3 = scalar_lea.vmem %s592_s16, 32 }
 0x471   :  { %p10733_p1 = scmp.ne.s32.totalorder %s592_s16, %s10732_s23  ;;  %p10737_p2 = scmp.lt.s32.totalorder %s592_s16, %s592_s16 }
 0x472   :  { %p10738_p3 = scmp.lt.s32.totalorder %s10736_s3, %s10732_s23 }
 0x474   :  { %p10739_p4 = por %p10738_p3, %p10737_p2 }
 0x476   :  { %p10740_p5 = pnand %p10739_p4, %p10733_p1 }
 0x478   :  { %10743 = shalt.err (!%p10740_p5)
}
 0x479   :  { %s12997_s14 = sld [smem:[#allocation169_spill]]  ;;  %s11304_s26 = smov [#allocation55]  }
 0x47a   :  { %594 = dma.hbm_to_vmem [thread:$0]  %s12996_s9, 16, %s592_s16, [#allocation51]  }
 0x47b   :  { %s613_s30 = sshll.u32 %s11304_s26, 4  ;;  %s11305_s0 = smov [#allocation58]   ;;  %s614_s30 = int_to_ptr.vmem [resolvable:$true] %s613_s30 }
 0x47c   :  { %s635_s21 = sshll.u32 %s11305_s0, 4  ;;  %s636_s21 = int_to_ptr.vmem [resolvable:$true] %s635_s21 }
 0x47f   :  { %s10744_s28 = scalar_lea.hbm %s12997_s14, 16 }
 0x480   :  { %p10745_p6 = scmp.ne.s32.totalorder %s12997_s14, %s10744_s28  ;;  %p10748_p7 = scmp.lt.u32.totalorder %s10744_s28, %s12997_s14 }
 0x482   :  { %p10750_p8 = pnand %p10748_p7, %p10745_p6 }
 0x484   :  { %10753 = shalt.err (!%p10750_p8)
}
 0x485   :  { %s10754_s6 = scalar_lea.vmem %s614_s30, 16  ;;  %s10758_s29 = scalar_lea.vmem %s614_s30, 32 }
 0x486   :  { %p10755_p9 = scmp.ne.s32.totalorder %s614_s30, %s10754_s6  ;;  %p10759_p10 = scmp.lt.s32.totalorder %s614_s30, %s614_s30 }
 0x487   :  { %p10760_p11 = scmp.lt.s32.totalorder %s10758_s29, %s10754_s6 }
 0x489   :  { %p10761_p12 = por %p10760_p11, %p10759_p10 }
 0x48b   :  { %p10762_p13 = pnand %p10761_p12, %p10755_p9 }
 0x48d   :  { %10765 = shalt.err (!%p10762_p13)
}
 0x48e   :  { %s12998_s1 = sld [smem:[#allocation171_spill]] }
 0x48f   :  { %616 = dma.hbm_to_vmem [thread:$0]  %s12997_s14, 16, %s614_s30, [#allocation54]  }
 0x494   :  { %s10766_s17 = scalar_lea.hbm %s12998_s1, 16 }
 0x495   :  { %p10767_p0 = scmp.ne.s32.totalorder %s12998_s1, %s10766_s17  ;;  %p10770_p1 = scmp.lt.u32.totalorder %s10766_s17, %s12998_s1 }
 0x497   :  { %p10772_p2 = pnand %p10770_p1, %p10767_p0 }
 0x499   :  { %10775 = shalt.err (!%p10772_p2)
}
 0x49a   :  { %s10776_s13 = scalar_lea.vmem %s636_s21, 16  ;;  %s10780_s2 = scalar_lea.vmem %s636_s21, 32 }
 0x49b   :  { %p10777_p3 = scmp.ne.s32.totalorder %s636_s21, %s10776_s13  ;;  %p10781_p4 = scmp.lt.s32.totalorder %s636_s21, %s636_s21 }
 0x49c   :  { %p10782_p5 = scmp.lt.s32.totalorder %s10780_s2, %s10776_s13 }
 0x49e   :  { %p10783_p6 = por %p10782_p5, %p10781_p4 }
 0x4a0   :  { %p10784_p7 = pnand %p10783_p6, %p10777_p3 }
 0x4a2   :  { %10787 = shalt.err (!%p10784_p7)
}
 0x4a3   :  { %s12999_s7 = sld [smem:[#allocation174_spill]]  ;;  %s11306_s10 = smov [#allocation61]  }
 0x4a4   :  { %638 = dma.hbm_to_vmem [thread:$0]  %s12998_s1, 16, %s636_s21, [#allocation57]  }
 0x4a5   :  { %s656_s20 = sshll.u32 %s11306_s10, 4  ;;  %s11307_s4 = smov [#allocation64]   ;;  %s657_s20 = int_to_ptr.vmem [resolvable:$true] %s656_s20 }
 0x4a6   :  { %s681_s25 = sshll.u32 %s11307_s4, 4  ;;  %s682_s25 = int_to_ptr.vmem [resolvable:$true] %s681_s25 }
 0x4a9   :  { %s10788_s16 = scalar_lea.hbm %s12999_s7, 512 }
 0x4aa   :  { %p10789_p8 = scmp.ne.s32.totalorder %s12999_s7, %s10788_s16  ;;  %p10792_p9 = scmp.lt.u32.totalorder %s10788_s16, %s12999_s7 }
 0x4ac   :  { %p10794_p10 = pnand %p10792_p9, %p10789_p8 }
 0x4ae   :  { %10797 = shalt.err (!%p10794_p10)
}
 0x4af   :  { %s10798_s24 = scalar_lea.vmem %s657_s20, 512  ;;  %p10803_p12 = scmp.lt.s32.totalorder %s657_s20, %s657_s20 }
 0x4b0   :  { %p10799_p11 = scmp.ne.s32.totalorder %s657_s20, %s10798_s24  ;;  %p10804_p13 = scmp.lt.s32.totalorder %s10798_s24, %s10798_s24 }
 0x4b2   :  { %p10805_p0 = por %p10804_p13, %p10803_p12 }
 0x4b4   :  { %p10806_p1 = pnand %p10805_p0, %p10799_p11 }
 0x4b6   :  { %10809 = shalt.err (!%p10806_p1)
}
 0x4b7   :  { %s13000_s18 = sld [smem:[#allocation177_spill]] }
 0x4b8   :  { %662 = dma.hbm_to_vmem [thread:$0]  %s12999_s7, 512, %s657_s20, [#allocation60], %s11256_s11, %s11256_s11, %s11257_s15  }
 0x4bd   :  { %s10810_s8 = scalar_lea.hbm %s13000_s18, 16 }
 0x4be   :  { %p10811_p2 = scmp.ne.s32.totalorder %s13000_s18, %s10810_s8  ;;  %p10814_p3 = scmp.lt.u32.totalorder %s10810_s8, %s13000_s18 }
 0x4c0   :  { %p10816_p4 = pnand %p10814_p3, %p10811_p2 }
 0x4c2   :  { %10819 = shalt.err (!%p10816_p4)
}
 0x4c3   :  { %s10820_s9 = scalar_lea.vmem %s682_s25, 16  ;;  %s10824_s22 = scalar_lea.vmem %s682_s25, 32 }
 0x4c4   :  { %p10821_p5 = scmp.ne.s32.totalorder %s682_s25, %s10820_s9  ;;  %p10825_p6 = scmp.lt.s32.totalorder %s682_s25, %s682_s25 }
 0x4c5   :  { %p10826_p7 = scmp.lt.s32.totalorder %s10824_s22, %s10820_s9 }
 0x4c7   :  { %p10827_p8 = por %p10826_p7, %p10825_p6 }
 0x4c9   :  { %p10828_p9 = pnand %p10827_p8, %p10821_p5 }
 0x4cb   :  { %10831 = shalt.err (!%p10828_p9)
}
 0x4cc   :  { %s13001_s23 = sld [smem:[#allocation179_spill]]  ;;  %s11308_s3 = smov [#allocation67]  }
 0x4cd   :  { %684 = dma.hbm_to_vmem [thread:$0]  %s13000_s18, 16, %s682_s25, [#allocation63]  }
 0x4ce   :  { %s701_s14 = sshll.u32 %s11308_s3, 4  ;;  %s11309_s26 = smov [#allocation70]   ;;  %s702_s14 = int_to_ptr.vmem [resolvable:$true] %s701_s14 }
 0x4cf   :  { %s721_s30 = sshll.u32 %s11309_s26, 4  ;;  %s722_s30 = int_to_ptr.vmem [resolvable:$true] %s721_s30 }
 0x4d2   :  { %s10832_s0 = scalar_lea.hbm %s13001_s23, 16 }
 0x4d3   :  { %p10833_p10 = scmp.ne.s32.totalorder %s13001_s23, %s10832_s0  ;;  %p10836_p11 = scmp.lt.u32.totalorder %s10832_s0, %s13001_s23 }
 0x4d5   :  { %p10838_p12 = pnand %p10836_p11, %p10833_p10 }
 0x4d7   :  { %10841 = shalt.err (!%p10838_p12)
}
 0x4d8   :  { %s10842_s21 = scalar_lea.vmem %s702_s14, 16  ;;  %s10846_s28 = scalar_lea.vmem %s702_s14, 32 }
 0x4d9   :  { %p10843_p13 = scmp.ne.s32.totalorder %s702_s14, %s10842_s21  ;;  %p10847_p0 = scmp.lt.s32.totalorder %s702_s14, %s702_s14 }
 0x4da   :  { %p10848_p1 = scmp.lt.s32.totalorder %s10846_s28, %s10842_s21 }
 0x4dc   :  { %p10849_p2 = por %p10848_p1, %p10847_p0 }
 0x4de   :  { %p10850_p3 = pnand %p10849_p2, %p10843_p13 }
 0x4e0   :  { %10853 = shalt.err (!%p10850_p3)
}
 0x4e1   :  { %s13002_s6 = sld [smem:[#allocation181_spill]] }
 0x4e2   :  { %704 = dma.hbm_to_vmem [thread:$0]  %s13001_s23, 16, %s702_s14, [#allocation66]  }
 0x4e7   :  { %s10854_s29 = scalar_lea.hbm %s13002_s6, 16 }
 0x4e8   :  { %p10855_p4 = scmp.ne.s32.totalorder %s13002_s6, %s10854_s29  ;;  %p10858_p5 = scmp.lt.u32.totalorder %s10854_s29, %s13002_s6 }
 0x4ea   :  { %p10860_p6 = pnand %p10858_p5, %p10855_p4 }
 0x4ec   :  { %10863 = shalt.err (!%p10860_p6)
}
 0x4ed   :  { %s10864_s1 = scalar_lea.vmem %s722_s30, 16  ;;  %s10868_s17 = scalar_lea.vmem %s722_s30, 32 }
 0x4ee   :  { %p10865_p7 = scmp.ne.s32.totalorder %s722_s30, %s10864_s1  ;;  %p10869_p8 = scmp.lt.s32.totalorder %s722_s30, %s722_s30 }
 0x4ef   :  { %p10870_p9 = scmp.lt.s32.totalorder %s10868_s17, %s10864_s1 }
 0x4f1   :  { %p10871_p10 = por %p10870_p9, %p10869_p8 }
 0x4f3   :  { %p10872_p11 = pnand %p10871_p10, %p10865_p7 }
 0x4f5   :  { %10875 = shalt.err (!%p10872_p11)
}
 0x4f6   :  { %s13003_s13 = sld [smem:[#allocation184_spill]]  ;;  %s11310_s2 = smov [#allocation73]  }
 0x4f7   :  { %724 = dma.hbm_to_vmem [thread:$0]  %s13002_s6, 16, %s722_s30, [#allocation69]  }
 0x4f8   :  { %s742_s7 = sshll.u32 %s11310_s2, 4  ;;  %s11311_s10 = smov [#allocation76]   ;;  %s743_s7 = int_to_ptr.vmem [resolvable:$true] %s742_s7 }
 0x4f9   :  { %s764_s20 = sshll.u32 %s11311_s10, 4  ;;  %s12061_s20 = int_to_ptr.vmem [resolvable:$true] %s764_s20 }
 0x4fc   :  { %s10876_s4 = scalar_lea.hbm %s13003_s13, 512 }
 0x4fd   :  { %p10877_p12 = scmp.ne.s32.totalorder %s13003_s13, %s10876_s4  ;;  %p10880_p13 = scmp.lt.u32.totalorder %s10876_s4, %s13003_s13 }
 0x4ff   :  { %p10882_p0 = pnand %p10880_p13, %p10877_p12 }
 0x501   :  { %10885 = shalt.err (!%p10882_p0)
}
 0x502   :  { %s10886_s25 = scalar_lea.vmem %s743_s7, 512  ;;  %p10891_p2 = scmp.lt.s32.totalorder %s743_s7, %s743_s7 }
 0x503   :  { %p10887_p1 = scmp.ne.s32.totalorder %s743_s7, %s10886_s25  ;;  %p10892_p3 = scmp.lt.s32.totalorder %s10886_s25, %s10886_s25 }
 0x505   :  { %p10893_p4 = por %p10892_p3, %p10891_p2 }
 0x507   :  { %p10894_p5 = pnand %p10893_p4, %p10887_p1 }
 0x509   :  { %10897 = shalt.err (!%p10894_p5)
}
 0x50a   :  { %s13004_s16 = sld [smem:[#allocation186_spill]] }
 0x50b   :  { %748 = dma.hbm_to_vmem [thread:$0]  %s13003_s13, 512, %s743_s7, [#allocation72], %s11256_s11, %s11256_s11, %s11257_s15  }
 0x510   :  { %s10898_s24 = scalar_lea.hbm %s13004_s16, 512 }
 0x511   :  { %p10899_p6 = scmp.ne.s32.totalorder %s13004_s16, %s10898_s24  ;;  %p10902_p7 = scmp.lt.u32.totalorder %s10898_s24, %s13004_s16 }
 0x513   :  { %p10904_p8 = pnand %p10902_p7, %p10899_p6 }
 0x515   :  { %10907 = shalt.err (!%p10904_p8)
}
 0x516   :  { %s10908_s18 = scalar_lea.vmem %s12061_s20, 512  ;;  %p10913_p10 = scmp.lt.s32.totalorder %s12061_s20, %s12061_s20 }
 0x517   :  { %p10909_p9 = scmp.ne.s32.totalorder %s12061_s20, %s10908_s18  ;;  %p10914_p11 = scmp.lt.s32.totalorder %s10908_s18, %s10908_s18 }
 0x519   :  { %p10915_p12 = por %p10914_p11, %p10913_p10 }
 0x51b   :  { %p10916_p13 = pnand %p10915_p12, %p10909_p9 }
 0x51d   :  { %10919 = shalt.err (!%p10916_p13)
}
 0x51e   :  { %s13005_s8 = sld [smem:[#allocation189_spill]]  ;;  %s11312_s9 = smov [#allocation79]  }
 0x51f   :  { %770 = dma.hbm_to_vmem [thread:$0]  %s13004_s16, 512, %s12061_s20, [#allocation75], %s11256_s11, %s11256_s11, %s11257_s15  }
 0x520   :  { %s789_s22 = sshll.u32 %s11312_s9, 4  ;;  %s11313_s23 = smov [#allocation82]   ;;  %s790_s22 = int_to_ptr.vmem [resolvable:$true] %s789_s22 }
 0x521   :  { %s819_s3 = sshll.u32 %s11313_s23, 4  ;;  %s820_s3 = int_to_ptr.vmem [resolvable:$true] %s819_s3 }
 0x524   :  { %s10920_s14 = scalar_lea.hbm %s13005_s8, 16 }
 0x525   :  { %p10921_p0 = scmp.ne.s32.totalorder %s13005_s8, %s10920_s14  ;;  %p10924_p1 = scmp.lt.u32.totalorder %s10920_s14, %s13005_s8 }
 0x527   :  { %p10926_p2 = pnand %p10924_p1, %p10921_p0 }
 0x529   :  { %10929 = shalt.err (!%p10926_p2)
}
 0x52a   :  { %s10930_s26 = scalar_lea.vmem %s790_s22, 16  ;;  %s10934_s30 = scalar_lea.vmem %s790_s22, 32 }
 0x52b   :  { %p10931_p3 = scmp.ne.s32.totalorder %s790_s22, %s10930_s26  ;;  %p10935_p4 = scmp.lt.s32.totalorder %s790_s22, %s790_s22 }
 0x52c   :  { %p10936_p5 = scmp.lt.s32.totalorder %s10934_s30, %s10930_s26 }
 0x52e   :  { %p10937_p6 = por %p10936_p5, %p10935_p4 }
 0x530   :  { %p10938_p7 = pnand %p10937_p6, %p10931_p3 }
 0x532   :  { %10941 = shalt.err (!%p10938_p7)
}
 0x533   :  { %s13006_s0 = sld [smem:[#allocation195_spill]] }
 0x534   :  { %792 = dma.hbm_to_vmem [thread:$0]  %s13005_s8, 16, %s790_s22, [#allocation78]  }
 0x539   :  { %s10942_s21 = scalar_lea.hbm %s13006_s0, 16 }
 0x53a   :  { %p10943_p8 = scmp.ne.s32.totalorder %s13006_s0, %s10942_s21  ;;  %p10946_p9 = scmp.lt.u32.totalorder %s10942_s21, %s13006_s0 }
 0x53c   :  { %p10948_p10 = pnand %p10946_p9, %p10943_p8 }
 0x53e   :  { %10951 = shalt.err (!%p10948_p10)
}
 0x53f   :  { %s10952_s28 = scalar_lea.vmem %s820_s3, 16  ;;  %s10956_s6 = scalar_lea.vmem %s820_s3, 32 }
 0x540   :  { %p10953_p11 = scmp.ne.s32.totalorder %s820_s3, %s10952_s28  ;;  %p10957_p12 = scmp.lt.s32.totalorder %s820_s3, %s820_s3 }
 0x541   :  { %p10958_p13 = scmp.lt.s32.totalorder %s10956_s6, %s10952_s28 }
 0x543   :  { %p10959_p0 = por %p10958_p13, %p10957_p12 }
 0x545   :  { %p10960_p1 = pnand %p10959_p0, %p10953_p11 }
 0x547   :  { %10963 = shalt.err (!%p10960_p1)
}
 0x548   :  { %s13007_s29 = sld [smem:[#allocation198_spill]]  ;;  %s11314_s1 = smov [#allocation85]  }
 0x549   :  { %822 = dma.hbm_to_vmem [thread:$0]  %s13006_s0, 16, %s820_s3, [#allocation81]  }
 0x54a   :  { %s841_s17 = sshll.u32 %s11314_s1, 4  ;;  %s11315_s13 = smov [#allocation88]   ;;  %s842_s17 = int_to_ptr.vmem [resolvable:$true] %s841_s17 }
 0x54b   :  { %s863_s2 = sshll.u32 %s11315_s13, 4  ;;  %s864_s2 = int_to_ptr.vmem [resolvable:$true] %s863_s2 }
 0x54e   :  { %s10964_s7 = scalar_lea.hbm %s13007_s29, 16 }
 0x54f   :  { %p10965_p2 = scmp.ne.s32.totalorder %s13007_s29, %s10964_s7  ;;  %p10968_p3 = scmp.lt.u32.totalorder %s10964_s7, %s13007_s29 }
 0x551   :  { %p10970_p4 = pnand %p10968_p3, %p10965_p2 }
 0x553   :  { %10973 = shalt.err (!%p10970_p4)
}
 0x554   :  { %s10974_s10 = scalar_lea.vmem %s842_s17, 16  ;;  %s10978_s20 = scalar_lea.vmem %s842_s17, 32 }
 0x555   :  { %p10975_p5 = scmp.ne.s32.totalorder %s842_s17, %s10974_s10  ;;  %p10979_p6 = scmp.lt.s32.totalorder %s842_s17, %s842_s17 }
 0x556   :  { %p10980_p7 = scmp.lt.s32.totalorder %s10978_s20, %s10974_s10 }
 0x558   :  { %p10981_p8 = por %p10980_p7, %p10979_p6 }
 0x55a   :  { %p10982_p9 = pnand %p10981_p8, %p10975_p5 }
 0x55c   :  { %10985 = shalt.err (!%p10982_p9)
}
 0x55d   :  { %s13008_s4 = sld [smem:[#allocation201_spill]] }
 0x55e   :  { %844 = dma.hbm_to_vmem [thread:$0]  %s13007_s29, 16, %s842_s17, [#allocation84]  }
 0x563   :  { %s10986_s25 = scalar_lea.hbm %s13008_s4, 128 }
 0x564   :  { %p10987_p10 = scmp.ne.s32.totalorder %s13008_s4, %s10986_s25  ;;  %p10990_p11 = scmp.lt.u32.totalorder %s10986_s25, %s13008_s4 }
 0x566   :  { %p10992_p12 = pnand %p10990_p11, %p10987_p10 }
 0x568   :  { %10995 = shalt.err (!%p10992_p12)
}
 0x569   :  { %s10996_s16 = scalar_lea.vmem %s864_s2, 128  ;;  %p11001_p0 = scmp.lt.s32.totalorder %s864_s2, %s864_s2 }
 0x56a   :  { %p10997_p13 = scmp.ne.s32.totalorder %s864_s2, %s10996_s16  ;;  %p11002_p1 = scmp.lt.s32.totalorder %s10996_s16, %s10996_s16 }
 0x56c   :  { %p11003_p2 = por %p11002_p1, %p11001_p0 }
 0x56e   :  { %p11004_p3 = pnand %p11003_p2, %p10997_p13 }
 0x570   :  { %11007 = shalt.err (!%p11004_p3)
}
 0x571   :  { %s13009_s24 = sld [smem:[#allocation203_spill]]  ;;  %s11316_s18 = smov [#allocation91]  }
 0x572   :  { %866 = dma.hbm_to_vmem [thread:$0]  %s13008_s4, 128, %s864_s2, [#allocation87]  }
 0x573   :  { %s882_s8 = sshll.u32 %s11316_s18, 4  ;;  %s11317_s9 = smov [#allocation94]   ;;  %s883_s8 = int_to_ptr.vmem [resolvable:$true] %s882_s8 }
 0x574   :  { %s904_s22 = sshll.u32 %s11317_s9, 4  ;;  %s12098_s22 = int_to_ptr.vmem [resolvable:$true] %s904_s22 }
 0x577   :  { %s11008_s23 = scalar_lea.hbm %s13009_s24, 256 }
 0x578   :  { %p11009_p4 = scmp.ne.s32.totalorder %s13009_s24, %s11008_s23  ;;  %p11012_p5 = scmp.lt.u32.totalorder %s11008_s23, %s13009_s24 }
 0x57a   :  { %p11014_p6 = pnand %p11012_p5, %p11009_p4 }
 0x57c   :  { %11017 = shalt.err (!%p11014_p6)
}
 0x57d   :  { %s11018_s3 = scalar_lea.vmem %s883_s8, 256  ;;  %p11023_p8 = scmp.lt.s32.totalorder %s883_s8, %s883_s8 }
 0x57e   :  { %p11019_p7 = scmp.ne.s32.totalorder %s883_s8, %s11018_s3  ;;  %p11024_p9 = scmp.lt.s32.totalorder %s11018_s3, %s11018_s3 }
 0x580   :  { %p11025_p10 = por %p11024_p9, %p11023_p8 }
 0x582   :  { %p11026_p11 = pnand %p11025_p10, %p11019_p7 }
 0x584   :  { %11029 = shalt.err (!%p11026_p11)
}
 0x585   :  { %s13010_s14 = sld [smem:[#allocation205_spill]] }
 0x586   :  { %888 = dma.hbm_to_vmem [thread:$0]  %s13009_s24, 256, %s883_s8, [#allocation90], %s11256_s11, %s11256_s11, %s11257_s15  }
 0x58b   :  { %s11030_s26 = scalar_lea.hbm %s13010_s14, 256 }
 0x58c   :  { %p11031_p12 = scmp.ne.s32.totalorder %s13010_s14, %s11030_s26  ;;  %p11034_p13 = scmp.lt.u32.totalorder %s11030_s26, %s13010_s14 }
 0x58e   :  { %p11036_p0 = pnand %p11034_p13, %p11031_p12 }
 0x590   :  { %11039 = shalt.err (!%p11036_p0)
}
 0x591   :  { %s11040_s30 = scalar_lea.vmem %s12098_s22, 256  ;;  %p11045_p2 = scmp.lt.s32.totalorder %s12098_s22, %s12098_s22 }
 0x592   :  { %p11041_p1 = scmp.ne.s32.totalorder %s12098_s22, %s11040_s30  ;;  %p11046_p3 = scmp.lt.s32.totalorder %s11040_s30, %s11040_s30 }
 0x594   :  { %p11047_p4 = por %p11046_p3, %p11045_p2 }
 0x596   :  { %p11048_p5 = pnand %p11047_p4, %p11041_p1 }
 0x598   :  { %11051 = shalt.err (!%p11048_p5)
}
 0x599   :  { %910 = dma.hbm_to_vmem [thread:$0]  %s13010_s14, 256, %s12098_s22, [#allocation93], %s11256_s11, %s11256_s11, %s11257_s15  }
 0x59a   :  { %s11318_s0 = smov [#allocation97]   ;;  %s11052_s28 = scalar_lea.hbm %s11781_s19, 16 }
 0x59b   :  { %s929_s21 = sshll.u32 %s11318_s0, 4  ;;  %p11053_p6 = scmp.ne.s32.totalorder %s11781_s19, %s11052_s28  ;;  %s930_s21 = int_to_ptr.vmem [resolvable:$true] %s929_s21 }
 0x59c   :  { %p11056_p7 = scmp.lt.u32.totalorder %s11052_s28, %s11781_s19 }
 0x59e   :  { %p11058_p8 = pnand %p11056_p7, %p11053_p6 }
 0x5a0   :  { %11061 = shalt.err (!%p11058_p8)
}
 0x5a1   :  { %s11062_s6 = scalar_lea.vmem %s930_s21, 16  ;;  %s11066_s29 = scalar_lea.vmem %s930_s21, 32 }
 0x5a2   :  { %p11063_p9 = scmp.ne.s32.totalorder %s930_s21, %s11062_s6  ;;  %p11067_p10 = scmp.lt.s32.totalorder %s930_s21, %s930_s21 }
 0x5a3   :  { %p11068_p11 = scmp.lt.s32.totalorder %s11066_s29, %s11062_s6 }
 0x5a5   :  { %p11069_p12 = por %p11068_p11, %p11067_p10 }
 0x5a7   :  { %p11070_p13 = pnand %p11069_p12, %p11063_p9 }
 0x5a9   :  { %11073 = shalt.err (!%p11070_p13)
}
 0x5aa   :  { %932 = dma.hbm_to_vmem [thread:$0]  %s11781_s19, 16, %s930_s21, [#allocation96]  }
 0x5ab   :  { %11096 = dma.done.wait [#allocation3], 256  }
 0x5ac   :  { %11097 = vsyncadd [#allocation3], 4294967040 }
 0x5ad   :  { %11098 = dma.done.wait [#allocation6], 512  }
 0x5ae   :  { %11099 = vsyncadd [#allocation6], 4294966784 }
 0x5af   :  { %11100 = dma.done.wait [#allocation9], 384  }
 0x5b0   :  { %11101 = vsyncadd [#allocation9], 4294966912 }
 0x5b1   :  { %11102 = dma.done.wait [#allocation12], 32  }
 0x5b2   :  { %11103 = vsyncadd [#allocation12], 4294967264 }
 0x5b3   :  { %11104 = dma.done.wait [#allocation15], 32  }
 0x5b4   :  { %11105 = vsyncadd [#allocation15], 4294967264 }
 0x5b5   :  { %11106 = dma.done.wait [#allocation18], 32  }
 0x5b6   :  { %11107 = vsyncadd [#allocation18], 4294967264 }
 0x5b7   :  { %11108 = dma.done.wait [#allocation21], 32  }
 0x5b8   :  { %11109 = vsyncadd [#allocation21], 4294967264 }
 0x5b9   :  { %11110 = dma.done.wait [#allocation24], 32  }
 0x5ba   :  { %11111 = vsyncadd [#allocation24], 4294967264 }
 0x5bb   :  { %11112 = dma.done.wait [#allocation27], 32  }
 0x5bc   :  { %11113 = vsyncadd [#allocation27], 4294967264 }
 0x5bd   :  { %11114 = dma.done.wait [#allocation30], 32  }
 0x5be   :  { %11115 = vsyncadd [#allocation30], 4294967264 }
 0x5bf   :  { %11116 = dma.done.wait [#allocation33], 32  }
 0x5c0   :  { %11117 = vsyncadd [#allocation33], 4294967264 }
 0x5c1   :  { %11118 = dma.done.wait [#allocation36], 32  }
 0x5c2   :  { %11119 = vsyncadd [#allocation36], 4294967264 }
 0x5c3   :  { %11120 = dma.done.wait [#allocation39], 32  }
 0x5c4   :  { %11121 = vsyncadd [#allocation39], 4294967264 }
 0x5c5   :  { %11122 = dma.done.wait [#allocation42], 32  }
 0x5c6   :  { %11123 = vsyncadd [#allocation42], 4294967264 }
 0x5c7   :  { %11124 = dma.done.wait [#allocation45], 32  }
 0x5c8   :  { %11125 = vsyncadd [#allocation45], 4294967264 }
 0x5c9   :  { %11126 = dma.done.wait [#allocation48], 32  }
 0x5ca   :  { %11127 = vsyncadd [#allocation48], 4294967264 }
 0x5cb   :  { %11128 = dma.done.wait [#allocation51], 32  }
 0x5cc   :  { %11129 = vsyncadd [#allocation51], 4294967264 }
 0x5cd   :  { %11130 = dma.done.wait [#allocation54], 528  }
 0x5ce   :  { %11131 = vsyncadd [#allocation54], 4294966768 }
 0x5cf   :  { %11132 = dma.done.wait [#allocation57], 528  }
 0x5d0   :  { %11133 = vsyncadd [#allocation57], 4294966768 }
 0x5d1   :  { %11134 = dma.done.wait [#allocation60], 528  }
 0x5d2   :  { %11135 = vsyncadd [#allocation60], 4294966768 }
 0x5d3   :  { %11136 = dma.done.wait [#allocation63], 32  }
 0x5d4   :  { %11137 = vsyncadd [#allocation63], 4294967264 }
 0x5d5   :  { %11138 = dma.done.wait [#allocation66], 32  }
 0x5d6   :  { %11139 = vsyncadd [#allocation66], 4294967264 }
 0x5d7   :  { %11140 = dma.done.wait [#allocation69], 32  }
 0x5d8   :  { %11141 = vsyncadd [#allocation69], 4294967264 }
 0x5d9   :  { %11142 = dma.done.wait [#allocation72], 528  }
 0x5da   :  { %11143 = vsyncadd [#allocation72], 4294966768 }
 0x5db   :  { %11144 = dma.done.wait [#allocation75], 528  }
 0x5dc   :  { %11145 = vsyncadd [#allocation75], 4294966768 }
 0x5dd   :  { %11146 = dma.done.wait [#allocation78], 32  }
 0x5de   :  { %11147 = vsyncadd [#allocation78], 4294967264 }
 0x5df   :  { %11148 = dma.done.wait [#allocation81], 528  }
 0x5e0   :  { %11149 = vsyncadd [#allocation81], 4294966768 }
 0x5e1   :  { %11150 = dma.done.wait [#allocation84], 32  }
 0x5e2   :  { %11151 = vsyncadd [#allocation84], 4294967264 }
 0x5e3   :  { %11152 = dma.done.wait [#allocation87], 144  }
 0x5e4   :  { %11153 = vsyncadd [#allocation87], 4294967152 }
 0x5e5   :  { %11154 = dma.done.wait [#allocation90], 272  }
 0x5e6   :  { %11155 = vsyncadd [#allocation90], 4294967024 }
 0x5e7   :  { %11156 = dma.done.wait [#allocation93], 272  }
 0x5e8   :  { %11157 = vsyncadd [#allocation93], 4294967024 }
 0x5e9   :  { %11158 = dma.done.wait [#allocation96], 32  }
 0x5ea   :  { %11159 = vsyncadd [#allocation96], 4294967264  ;;  %vm1148_vm0 = vcmask 130048   ;;  %vm1250_vm1 = vcmask 1043456   ;;  %v1139_v0 = vld [vmem:[#allocation91] sm:$0xff]  ;;  %v1140_v1 = vld [vmem:[#allocation91 + $0x8] sm:$0xff] }
 0x5eb   :  { %v1137_v2 = vld [vmem:[#allocation2] sm:$0xff]  ;;  %vm1243_vm2 = vcmask 97280   ;;  %v9097_v3 = vpack.c.bf16 %v1140_v1, %v1139_v0  ;;  %vm11319_vm3 = vmmov 1   ;;  %v1232_v7 = vld [vmem:[#allocation5] sm:$0xff]  ;;  %s13011_s19 = sld [smem:[#allocation156_spill]]  ;;  %v1334_v9 = vld [vmem:[%s11776_s12 + $0x8] sm:$0xff] }
 0x5ec   :  { %8518 = vmatprep.mubr.msk.f32.mxu0 %vm1148_vm0, %v1137_v2  ;;  %v1234_v4 = vld [vmem:[#allocation94] sm:$0xff]  ;;  %v1235_v5 = vld [vmem:[#allocation94 + $0x8] sm:$0xf]  ;;  %vm9102_vm4 = vmpackc.low %vm1250_vm1, %vm11319_vm3  ;;  %8525 = vmatprep.mubr.msk.f32.mxu1 %vm1243_vm2, %v1232_v7  ;;  %s13012_s1 = sld [smem:[#allocation153_spill]]  ;;  %vm1343_vm5 = vcmask 195584   ;;  %v11320_v37 = vmov 0.0  }
 0x5ed   :  { %v9101_v6 = vpack.c.bf16 %v1235_v5, %v1234_v4  ;;  %v1333_v8 = vld [vmem:[%s11776_s12] sm:$0xff]  ;;  %9098 = vmatprep.subr.bf16.mxu0 %v9097_v3  ;;  %v1430_v12 = vld [vmem:[%s11786_s5 + $0x8] sm:$0xff]  ;;  %v1233_v15 = vld [vmem:[#allocation5 + $0x8] sm:$0xff]  ;;  %vm1533_vm6 = vcmask 261120   ;;  %vm11321_vm7 = vmmov 0   ;;  %vm1865_vm12 = vcmask 64512  }
 0x5ee   :  { %v9107_v10 = vpack.c.bf16 %v1334_v9, %v1333_v8  ;;  %v1429_v11 = vld [vmem:[%s11786_s5] sm:$0xff]  ;;  %9100 = vmatpush3.bf16.msra.mxu0 %v9097_v3  ;;  %v1138_v13 = vld [vmem:[#allocation2 + $0x8] sm:$0xff]  ;;  %v1335_v16 = vld [vmem:[%s11776_s12 + $0x10] sm:$0xff]  ;;  %s13014_s12 = sld [smem:[#allocation155_spill]]  ;;  %s13015_s17 = sld [smem:[#allocation159_spill]]  ;;  %vm2682_vm13 = vcmask 523264  }
 0x5ef   :  { %9103 = vmatprep.subr.msk.bf16.mxu1 %vm9102_vm4, %v9101_v6  ;;  %v9111_v14 = vpack.c.bf16 %v1430_v12, %v1429_v11  ;;  %v1431_v19 = vld [vmem:[%s11786_s5 + $0x10] sm:$0xff]  ;;  %v1331_v20 = vld [vmem:[#allocation7] sm:$0xff]  ;;  %v1332_v25 = vld [vmem:[#allocation7 + $0x8] sm:$0xff]  ;;  %s13013_s5 = sld [smem:[#allocation158_spill]]  ;;  %s13016_s13 = sld [smem:[#allocation161_spill]] }
 0x5f0   :  { %9106 = vmatpush3.bf16.msk.msra.mxu1 %vm9102_vm4, %v9101_v6  ;;  %9108 = vmatprep.subr.bf16.mxu0 %v9107_v10  ;;  %v1427_v21 = vld [vmem:[#allocation8] sm:$0xff]  ;;  %v1428_v26 = vld [vmem:[#allocation8 + $0x8] sm:$0xff]  ;;  %v8046_v38 = vld [vmem:[#allocation89] ss:$0 sm:$0xff]  ;;  %v1124_v6 = vlaneseq  ;;  %s13017_s2 = sld [smem:[#allocation166_spill]]  ;;  %s13018_s7 = sld [smem:[#allocation172_spill]] }
 0x5f1   :  { %9112 = vmatprep.subr.bf16.mxu1 %v9111_v14  ;;  %v1522_v17 = vld [vmem:[%s13011_s19] sm:$0xff]  ;;  %v1523_v18 = vld [vmem:[%s13011_s19 + $0x8] sm:$0xff]  ;;  %8519 = vmatmul.mubr.msk.f32.vlgmr.msra.gmra.mrb[0].mxu0 %vm1148_vm0, %v1138_v13  ;;  %v1524_v28 = vld [vmem:[%s13011_s19 + $0x10] sm:$0xff]  ;;  %s13019_s10 = sld [smem:[#allocation176_spill]]  ;;  %s13020_s20 = sld [smem:[#allocation182_spill]] }
 0x5f2   :  { %9110 = vmatpush3.bf16.msra.mxu0 %v9107_v10  ;;  %v1615_v22 = vld [vmem:[%s13012_s1] sm:$0xff]  ;;  %v1616_v23 = vld [vmem:[%s13012_s1 + $0x8] sm:$0xff]  ;;  %v9115_v24 = vpack.c.bf16 %v1523_v18, %v1522_v17  ;;  %8534 = vmatprep.mubr.msk.f32.mxu0 %vm1343_vm5, %v1331_v20  ;;  %v1525_v29 = vld [vmem:[%s13011_s19 + $0x18] sm:$0xff]  ;;  %v1125_v7 = vand.u32 127, %v1124_v6  ;;  %s13021_s4 = sld [smem:[#allocation188_spill]]  ;;  %s13022_s25 = sld [smem:[#allocation150_spill]] }
 0x5f3   :  { %8526 = vmatmul.mubr.msk.f32.vlgmr.msra.gmra.mrb[0].mxu1 %vm1243_vm2, %v1233_v15  ;;  %8532 = vmatprep.subr.mxu0 %v1335_v16  ;;  %v9123_v27 = vpack.c.bf16 %v1616_v23, %v1615_v22  ;;  %v9119_v30 = vpack.c.bf16 %v1525_v29, %v1524_v28  ;;  %v1617_v31 = vld [vmem:[%s13012_s1 + $0x10] sm:$0xff]  ;;  %v1618_v32 = vld [vmem:[%s13012_s1 + $0x18] sm:$0xff]  ;;  %v1136_v41 = vld [vmem:[#allocation88] sm:$0xff]  ;;  %s13023_s16 = sld [smem:[#allocation192_spill]]  ;;  %s13024_s24 = sld [smem:[#allocation194_spill]] }
 0x5f4   :  { %9114 = vmatpush3.bf16.msra.mxu1 %v9111_v14  ;;  %8543 = vmatprep.mubr.msk.f32.mxu1 %vm1343_vm5, %v1427_v21  ;;  %v9127_v33 = vpack.c.bf16 %v1618_v32, %v1617_v31  ;;  %v8049_v39 = vld [vmem:[#allocation92] ss:$0 sm:$0xff]  ;;  %v8056_v56 = vld [vmem:[#allocation97] ss:$0 sm:$0xff]  ;;  %v8053_v57 = vld [vmem:[#allocation95] ss:$0 sm:$0xff] }
 0x5f5   :  { %8541 = vmatprep.subr.mxu1 %v1431_v19  ;;  %v1701_v34 = vld [vmem:[%s13013_s5] sm:$0xff]  ;;  %v1702_v35 = vld [vmem:[%s13013_s5 + $0x8] sm:$0xff]  ;;  %v1703_v46 = vld [vmem:[%s13013_s5 + $0x10] sm:$0xff]  ;;  %vm1127_vm8 = vcmp.lt.s32.totalorder %v1125_v7, 16  ;;  %vm1131_vm9 = vcmp.ge.s32.totalorder %v1125_v7, 16  ;;  %vm1132_vm10 = vcmp.lt.s32.totalorder %v1125_v7, 32 }
 0x5f6   :  { %8533 = vmatpush3.msra.mxu0 %v1335_v16  ;;  %v9131_v36 = vpack.c.bf16 %v1702_v35, %v1701_v34  ;;  %v1704_v47 = vld [vmem:[%s13013_s5 + $0x18] sm:$0xff]  ;;  %v8059_v8 = vld [vmem:[#allocation38] ss:$0 sm:$0xff]  ;;  %v8062_v9 = vld [vmem:[#allocation35] ss:$0 sm:$0xff]  ;;  %v12184_v12 = vsel %vm1127_vm8, 1.0, %v11320_v37 }
 0x5f7   :  { %9116 = vmatprep.subr.bf16.mxu0 %v9115_v24  ;;  %8535 = vmatmul.mubr.msk.f32.vlgmr.msra.gmra.mrb[2].mxu0 %vm1343_vm5, %v1332_v25  ;;  %v9135_v54 = vpack.c.bf16 %v1704_v47, %v1703_v46  ;;  %vm1133_vm11 = vmand %vm1131_vm9, %vm1132_vm10  ;;  %s13025_s18 = sld [smem:[#allocation193_spill]]  ;;  %s13026_s8 = sld [smem:[#allocation147_spill]] }
 0x5f8   :  { %8542 = vmatpush3.msra.mxu1 %v1431_v19  ;;  %9118 = vmatpush3.bf16.msra.mxu0 %v9115_v24  ;;  %v12190_v18 = vsel %vm1133_vm11, 1.0, %v11320_v37  ;;  %v8065_v19 = vld [vmem:[#allocation40] ss:$0 sm:$0xff]  ;;  %s13027_s9 = sld [smem:[#allocation152_spill]]  ;;  %s13028_s22 = sld [smem:[#allocation191_spill]] }
 0x5f9   :  { %8544 = vmatmul.mubr.msk.f32.vlgmr.msra.gmra.mrb[2].mxu1 %vm1343_vm5, %v1428_v26  ;;  %9124 = vmatprep.subr.bf16.mxu1 %v9123_v27  ;;  %s13029_s23 = sld [smem:[#allocation149_spill]]  ;;  %s13030_s3 = sld [smem:[#allocation135_spill]] }
 0x5fa   :  { %9126 = vmatpush3.bf16.msra.mxu1 %v9123_v27  ;;  %9120 = vmatprep.subr.bf16.mxu0 %v9119_v30  ;;  %s13031_s14 = sld [smem:[#allocation196_spill]]  ;;  %s13032_s26 = sld [smem:[#allocation138_spill]] }
 0x5fb   :  { %9128 = vmatprep.subr.bf16.mxu1 %v9127_v33  ;;  %s13033_s30 = sld [smem:[#allocation140_spill]]  ;;  %s13034_s0 = sld [smem:[#allocation137_spill]] }
 0x5fc   :  { %9122 = vmatpush3.bf16.msra.mxu0 %v9119_v30  ;;  %s13035_s21 = sld [smem:[#allocation141_spill]]  ;;  %s13036_s28 = sld [smem:[#allocation143_spill]] }
 0x5fd   :  { %9132 = vmatprep.subr.bf16.mxu0 %v9131_v36  ;;  %s13037_s6 = sld [smem:[#allocation200_spill]]  ;;  %s11322_s29 = smov [#allocation98]  }
 0x5fe   :  { %9130 = vmatpush3.bf16.msra.mxu1 %v9127_v33  ;;  %s7909_s19 = sshll.u32 %s11322_s29, 4  ;;  %s7910_s19 = int_to_ptr.vmem [resolvable:$true] %s7909_s19 }
 0x5ff   :  { %8579 = vmatprep.subr.mxu1 %v11320_v37  ;;  %s11074_s1 = scalar_lea.vmem %s7910_s19, 256  ;;  %p11079_p1 = scmp.lt.s32.totalorder %s7910_s19, %s7910_s19 }
 0x600   :  { %p11075_p0 = scmp.ne.s32.totalorder %s7910_s19, %s11074_s1  ;;  %p11080_p2 = scmp.lt.s32.totalorder %s11074_s1, %s11074_s1 }
 0x602   :  { %p11081_p3 = por %p11080_p2, %p11079_p1 }
 0x604   :  { %p11082_p4 = pnand %p11081_p3, %p11075_p0 }
 0x6c4   :  { %v8520_v40 = vpop.f32.mrb[0].mxu0 }
 0x6c5   :  { %v1227_v42 = vadd.f32 %v8520_v40, %v8046_v38  ;;  %v1221_v43 = vpop.f32.mrb[1].mxu0 }
 0x6c6   :  { %v8527_v44 = vpop.f32.mrb[0].mxu1  ;;  %v1222_v45 = vadd.f32 %v8046_v38, %v1221_v43 }
 0x6c7   :  { %v1326_v48 = vadd.f32 %v8527_v44, %v8049_v39  ;;  %v1320_v49 = vpop.f32.mrb[1].mxu1  ;;  %v12154_v53 = vadd.f32 %v1227_v42, %v1136_v41 }
 0x6c8   :  { %v1321_v50 = vadd.f32 %v8049_v39, %v1320_v49  ;;  %v12150_v51 = vadd.f32 %v1222_v45, %v1136_v41 }
 0x6c9   :  { %v12152_v52 = vadd.f32 %v1326_v48, %v1136_v41 }
 0x6ca   :  { %v12156_v55 = vadd.f32 %v1321_v50, %v1136_v41  ;;  %8554 = vmatprep.mubr.msk.f32.mxu0 %vm1533_vm6, %v12150_v51  ;;  %8565 = vmatprep.mubr.msk.f32.mxu1 %vm1533_vm6, %v12150_v51  ;;  %v8536_v59 = vpop.f32.mrb[2].mxu0 }
 0x6cb   :  { %8555 = vmatmul.mubr.msk.f32.vlgmr.msra.gmra.mrb[4].mxu0 %vm1533_vm6, %v12154_v53  ;;  %8566 = vmatmul.mubr.msk.f32.vlgmr.msra.gmra.mrb[4].mxu1 %vm1533_vm6, %v12154_v53  ;;  %v1422_v61 = vadd.f32 %v8536_v59, %v8053_v57  ;;  %v1416_v63 = vpop.f32.mrb[3].mxu0 }
 0x6cc   :  { %v8545_v58 = vpop.f32.mrb[2].mxu1  ;;  %9134 = vmatpush3.bf16.msra.mxu0 %v9131_v36  ;;  %8576 = vmatprep.mubr.msk.f32.mxu0 %vm1533_vm6, %v12150_v51  ;;  %v1417_v1 = vadd.f32 %v8053_v57, %v1416_v63 }
 0x6cd   :  { %v1517_v60 = vadd.f32 %v8545_v58, %v8056_v56  ;;  %v1511_v62 = vpop.f32.mrb[3].mxu1  ;;  %9136 = vmatprep.subr.bf16.mxu0 %v9135_v54  ;;  %v12170_v3 = vadd.f32 %v1422_v61, %v1136_v41  ;;  %8581 = vmatprep.mubr.msk.f32.mxu1 %vm11321_vm7, %v11320_v37 }
 0x6ce   :  { %v1512_v0 = vadd.f32 %v8056_v56, %v1511_v62  ;;  %v12174_v5 = vadd.f32 %v1417_v1, %v1136_v41 }
 0x6cf   :  { %v12168_v2 = vadd.f32 %v1517_v60, %v1136_v41 }
 0x6d0   :  { %v12172_v4 = vadd.f32 %v1512_v0, %v1136_v41  ;;  %9138 = vmatpush3.bf16.msra.mxu0 %v9135_v54 }
 0x6d1   :  { %8589 = vmatprep.subr.mxu0 %v11320_v37 }
 0x6d3   :  { %8577 = vmatmul.mubr.msk.f32.vlgmr.msra.gmra.mrb[6].mxu0 %vm1533_vm6, %v12154_v53 }
 0x6d4   :  { %8591 = vmatprep.mubr.msk.f32.mxu0 %vm11321_vm7, %v11320_v37 }
 0x79e   :  { %v8556_v10 = vpop.f32.mrb[4].mxu0  ;;  %v8567_v11 = vpop.f32.mrb[4].mxu1 }
 0x79f   :  { %v1606_v13 = vpop.f32.mrb[5].mxu0  ;;  %v1692_v14 = vpop.f32.mrb[5].mxu1  ;;  %v1612_v21 = vadd.f32 %v8556_v10, %v8059_v8  ;;  %v1698_v25 = vadd.f32 %v8567_v11, %v8062_v9 }
 0x7a0   :  { %v1607_v15 = vadd.f32 %v8059_v8, %v1606_v13  ;;  %v1693_v16 = vadd.f32 %v8062_v9, %v1692_v14 }
 0x7a1   :  { %v2111_v28 = vmul.f32 %v12184_v12, %v1612_v21  ;;  %v2201_v29 = vmul.f32 %v12190_v18, %v1612_v21 }
 0x7a2   :  { %v1787_v17 = vmul.f32 %v12184_v12, %v1607_v15  ;;  %8580 = vmatpush3.xpose.msk.msra.mxu1 %vm1533_vm6, %v1693_v16  ;;  %v1878_v22 = vmul.f32 %v12190_v18, %v1607_v15 }
 0x7a3   :  { %8584 = vmatprep.subr.mxu1 %v11320_v37 }
 0x7a5   :  { %8582 = vmatmul.mubr.msk.f32.vlgmr.msra.gmra.mrb[6].mxu1 %vm1533_vm6, %v1787_v17 }
 0x7a6   :  { %v8578_v20 = vpop.f32.mrb[6].mxu0  ;;  %8585 = vmatpush3.xpose.msk.msra.mxu1 %vm1533_vm6, %v1693_v16  ;;  %8586 = vmatprep.mubr.msk.f32.mxu1 %vm11321_vm7, %v11320_v37 }
 0x7a7   :  { %v12197_v23 = vadd.f32 %v8578_v20, %v8065_v19  ;;  %v1778_v24 = vpop.f32.mrb[7].mxu0  ;;  %8599 = vmatprep.subr.mxu1 %v11320_v37 }
 0x7a8   :  { %v12200_v26 = vadd.f32 %v8065_v19, %v1778_v24 }
 0x7a9   :  { %8587 = vmatmul.mubr.msk.f32.vlgmr.msra.gmra.mrb[8].mxu1 %vm1533_vm6, %v1878_v22  ;;  %v2287_v24 = vmul.f32 %v12190_v18, %v12197_v23 }
 0x7aa   :  { %v1964_v27 = vmul.f32 %v12190_v18, %v12200_v26  ;;  %8600 = vmatpush3.xpose.msk.msra.mxu1 %vm1533_vm6, %v1698_v25  ;;  %8601 = vmatprep.mubr.msk.f32.mxu1 %vm11321_vm7, %v11320_v37  ;;  %v1877_v17 = vmul.f32 %v12184_v12, %v12200_v26  ;;  %v2200_v26 = vmul.f32 %v12184_v12, %v12197_v23 }
 0x7ab   :  { %8604 = vmatprep.subr.mxu1 %v11320_v37 }
 0x7ac   :  { %8590 = vmatpush3.msra.mxu0 %v1964_v27 }
 0x7ad   :  { %8602 = vmatmul.mubr.msk.f32.vlgmr.msra.gmra.mrb[10].mxu1 %vm1533_vm6, %v2111_v28  ;;  %8594 = vmatprep.subr.mxu0 %v11320_v37 }
 0x7ae   :  { %8605 = vmatpush3.xpose.msk.msra.mxu1 %vm1533_vm6, %v1698_v25  ;;  %8606 = vmatprep.mubr.msk.f32.mxu1 %vm11321_vm7, %v11320_v37 }
 0x7b1   :  { %8607 = vmatmul.mubr.msk.f32.vlgmr.msra.gmra.mrb[12].mxu1 %vm1533_vm6, %v2201_v29  ;;  %v2434_v29 = vld [vmem:[%s13014_s12] sm:$0xff] }
 0x878   :  { %v1860_v30 = vpop.f32.mrb[6].mxu1 }
 0x879   :  { %v8583_v31 = vpop.f32.mrb[7].mxu1  ;;  %v1864_v35 = vmul.f32 0.25, %v1860_v30  ;;  %v2435_v30 = vld [vmem:[%s13014_s12 + $0x8] sm:$0xff] }
 0x87a   :  { %v2436_v31 = vld [vmem:[%s13014_s12 + $0x10] sm:$0xff] }
 0x87b   :  { %v1866_v40 = vsel %vm1865_vm12, %v1864_v35, -inf }
 0x87c   :  { %v1948_v32 = vpop.f32.mrb[8].mxu1 }
 0x87d   :  { %v1952_v33 = vmul.f32 0.25, %v1948_v32  ;;  %v8588_v34 = vpop.f32.mrb[9].mxu1  ;;  %v9139_v32 = vpack.c.bf16 %v2435_v30, %v2434_v29 }
 0x87f   :  { %v1953_v36 = vsel %vm1865_vm12, %v1952_v33, -inf  ;;  %9140 = vmatprep.subr.bf16.mxu1 %v9139_v32 }
 0x880   :  { %1954 = vmax.xlane.f32.xlu0 %v1953_v36  ;;  %v2184_v38 = vpop.f32.mrb[10].mxu1  ;;  %9142 = vmatpush3.bf16.msra.mxu1 %v9139_v32 }
 0x881   :  { %v8603_v39 = vpop.f32.mrb[11].mxu1  ;;  %v2188_v44 = vmul.f32 0.25, %v2184_v38 }
 0x882   :  { %v8080_v39 = vld [vmem:[#allocation37] ss:$0 sm:$0xff] }
 0x883   :  { %v2189_v46 = vsel %vm1865_vm12, %v2188_v44, -inf }
 0x884   :  { %1867 = vmax.xlane.f32.xlu0 %v1866_v40  ;;  %v2271_v41 = vpop.f32.mrb[12].mxu1 }
 0x885   :  { %v2275_v42 = vmul.f32 0.25, %v2271_v41  ;;  %v8608_v43 = vpop.f32.mrb[13].mxu1 }
 0x887   :  { %v2276_v45 = vsel %vm1865_vm12, %v2275_v42, -inf }
 0x888   :  { %2277 = vmax.xlane.f32.xlu1 %v2276_v45 }
 0x88c   :  { %2190 = vmax.xlane.f32.xlu1 %v2189_v46 }
 0x90d   :  { %v1955_v47 = vpop.xlane.xlu0 %1954 }
 0x90e   :  { %v1956_v48 = vsub.f32 %v1952_v33, %v1955_v47  ;;  %v2437_v33 = vld [vmem:[%s13014_s12 + $0x18] sm:$0xff] }
 0x90f   :  { %v9143_v34 = vpack.c.bf16 %v2437_v33, %v2436_v31  ;;  %v8084_v33 = vld [vmem:[#allocation44] ss:$0 sm:$0xff] }
 0x910   :  { %v1957_v49 = vmul.f32 1.442695, %v1956_v48 }
 0x911   :  { %v1868_v50 = vpop.xlane.xlu0 %1867  ;;  %9144 = vmatprep.subr.bf16.mxu1 %v9143_v34 }
 0x912   :  { %9560 = vpow2.f32 %v1957_v49  ;;  %v1869_v54 = vsub.f32 %v1864_v35, %v1868_v50  ;;  %9146 = vmatpush3.bf16.msra.mxu1 %v9143_v34 }
 0x914   :  { %v1870_v56 = vmul.f32 1.442695, %v1869_v54 }
 0x915   :  { %v2278_v57 = vpop.xlane.xlu1 %2277 }
 0x916   :  { %9562 = vpow2.f32 %v1870_v56  ;;  %v2279_v58 = vsub.f32 %v2275_v42, %v2278_v57 }
 0x918   :  { %v2280_v59 = vmul.f32 1.442695, %v2279_v58 }
 0x919   :  { %v2191_v60 = vpop.xlane.xlu1 %2190 }
 0x91a   :  { %9564 = vpow2.f32 %v2280_v59  ;;  %v2192_v61 = vsub.f32 %v2188_v44, %v2191_v60  ;;  %v2573_v60 = vld [vmem:[%s13015_s17] sm:$0xff] }
 0x91c   :  { %v9561_v62 = vpop.eup %9560  ;;  %v2193_v63 = vmul.f32 1.442695, %v2192_v61  ;;  %v2574_v61 = vld [vmem:[%s13015_s17 + $0x8] sm:$0xff] }
 0x91d   :  { %v1959_v0 = vsel %vm1865_vm12, %v9561_v62, 0.0 }
 0x91e   :  { %9566 = vpow2.f32 %v2193_v63  ;;  %1960 = vadd.xlane.f32.xlu0 %v1959_v0  ;;  %v2575_v63 = vld [vmem:[%s13015_s17 + $0x10] sm:$0xff]  ;;  %v2576_v0 = vld [vmem:[%s13015_s17 + $0x18] sm:$0xff] }
 0x920   :  { %v9563_v1 = vpop.eup %9562 }
 0x921   :  { %v1872_v6 = vsel %vm1865_vm12, %v9563_v1, 0.0 }
 0x922   :  { %1873 = vadd.xlane.f32.xlu1 %v1872_v6  ;;  %v2810_v6 = vld [vmem:[#allocation56] sm:$0xff] }
 0x924   :  { %v9565_v7 = vpop.eup %9564 }
 0x925   :  { %v2282_v8 = vsel %vm1865_vm12, %v9565_v7, 0.0 }
 0x926   :  { %2283 = vadd.xlane.f32.xlu0 %v2282_v8 }
 0x928   :  { %v9567_v9 = vpop.eup %9566 }
 0x929   :  { %v2195_v10 = vsel %vm1865_vm12, %v9567_v9, 0.0 }
 0x92a   :  { %2196 = vadd.xlane.f32.xlu1 %v2195_v10  ;;  %v2668_v10 = vld [vmem:[%s13016_s13 + $0x8] sm:$0xff] }
 0x9ab   :  { %v1961_v11 = vpop.xlane.xlu0 %1960 }
 0x9ac   :  { %9568 = vrcp.f32 %v1961_v11  ;;  %v2669_v11 = vld [vmem:[%s13016_s13 + $0x10] sm:$0xff] }
 0x9af   :  { %v1874_v13 = vpop.xlane.xlu1 %1873 }
 0x9b0   :  { %9570 = vrcp.f32 %v1874_v13 }
 0x9b3   :  { %v2284_v14 = vpop.xlane.xlu0 %2283 }
 0x9b4   :  { %9572 = vrcp.f32 %v2284_v14  ;;  %v2670_v14 = vld [vmem:[%s13016_s13 + $0x18] sm:$0xff] }
 0x9b6   :  { %v9569_v15 = vpop.eup %9568 }
 0x9b7   :  { %v1963_v16 = vmul.f32 %v9569_v15, %v9561_v62  ;;  %v2197_v19 = vpop.xlane.xlu1 %2196  ;;  %v9147_v62 = vpack.c.bf16 %v2574_v61, %v2573_v60  ;;  %v9159_v15 = vpack.c.bf16 %v2670_v14, %v2669_v11  ;;  %v2991_v60 = vld [vmem:[%s13018_s7 + $0x18] sm:$0xff] }
 0x9b8   :  { %9574 = vrcp.f32 %v2197_v19 }
 0x9b9   :  { %8592 = vmatmul.mubr.msk.f32.vlgmr.msra.gmra.mrb[8].mxu0 %vm1865_vm12, %v1963_v16  ;;  %v2671_v16 = vld [vmem:[%s13016_s13 + $0x20] sm:$0xff] }
 0x9ba   :  { %8595 = vmatpush3.msra.mxu0 %v1877_v17  ;;  %8596 = vmatprep.mubr.msk.f32.mxu0 %vm11321_vm7, %v11320_v37  ;;  %v9571_v20 = vpop.eup %9570  ;;  %v2672_v17 = vld [vmem:[%s13016_s13 + $0x28] sm:$0xff] }
 0x9bb   :  { %8609 = vmatprep.subr.mxu0 %v11320_v37  ;;  %v1876_v21 = vmul.f32 %v9571_v20, %v9563_v1  ;;  %v9151_v1 = vpack.c.bf16 %v2576_v0, %v2575_v63  ;;  %v9163_v19 = vpack.c.bf16 %v2672_v17, %v2671_v16 }
 0x9be   :  { %v9573_v22 = vpop.eup %9572 }
 0x9bf   :  { %v2286_v25 = vmul.f32 %v9573_v22, %v9565_v7  ;;  %v2811_v7 = vld [vmem:[#allocation56 + $0x8] sm:$0xff] }
 0x9c0   :  { %v9171_v8 = vpack.c.bf16 %v2811_v7, %v2810_v6  ;;  %v8093_v6 = vld [vmem:[#allocation55] ss:$0 sm:$0xff]  ;;  %v8096_v7 = vld [vmem:[#allocation50] ss:$0 sm:$0xff] }
 0x9c1   :  { %8597 = vmatmul.mubr.msk.f32.vlgmr.msra.gmra.mrb[8].mxu0 %vm1865_vm12, %v1876_v21 }
 0x9c2   :  { %8610 = vmatpush3.msra.mxu0 %v2287_v24  ;;  %8611 = vmatprep.mubr.msk.f32.mxu0 %vm11321_vm7, %v11320_v37  ;;  %v9575_v27 = vpop.eup %9574 }
 0x9c3   :  { %8614 = vmatprep.subr.mxu0 %v11320_v37  ;;  %v2199_v28 = vmul.f32 %v9575_v27, %v9567_v9  ;;  %v2667_v9 = vld [vmem:[%s13016_s13] sm:$0xff] }
 0x9c4   :  { %v9155_v13 = vpack.c.bf16 %v2668_v10, %v2667_v9 }
 0x9c5   :  { %8612 = vmatmul.mubr.msk.f32.vlgmr.msra.gmra.mrb[10].mxu0 %vm1865_vm12, %v2286_v25 }
 0x9c6   :  { %8615 = vmatpush3.msra.mxu0 %v2200_v26  ;;  %8616 = vmatprep.mubr.msk.f32.mxu0 %vm11321_vm7, %v11320_v37 }
 0x9c7   :  { %9148 = vmatprep.subr.bf16.mxu0 %v9147_v62  ;;  %9156 = vmatprep.subr.bf16.mxu1 %v9155_v13 }
 0x9cd   :  { %8617 = vmatmul.mubr.msk.f32.vlgmr.msra.gmra.mrb[10].mxu0 %vm1865_vm12, %v2199_v28  ;;  %v8083_v28 = vld [vmem:[#allocation46] ss:$0 sm:$0xff] }
 0x9ce   :  { %9150 = vmatpush3.bf16.msra.mxu0 %v9147_v62 }
 0x9cf   :  { %9152 = vmatprep.subr.bf16.mxu0 %v9151_v1 }
 0x9d2   :  { %9154 = vmatpush3.bf16.msra.mxu0 %v9151_v1 }
 0x9d3   :  { %9172 = vmatprep.subr.bf16.mxu0 %v9171_v8 }
 0xa94   :  { %v2107_v23 = vpop.f32.mrb[8].mxu0 }
 0xa95   :  { %v8598_v35 = vpop.f32.mrb[9].mxu0  ;;  %8627 = vmatprep.mubr.msk.f32.mxu1 %vm1533_vm6, %v2107_v23  ;;  %v2812_v23 = vld [vmem:[#allocation56 + $0x10] sm:$0xff] }
 0xa96   :  { %v2813_v35 = vld [vmem:[#allocation56 + $0x18] sm:$0xff] }
 0xaa0   :  { %v2430_v36 = vpop.f32.mrb[10].mxu0 }
 0xaa1   :  { %v8618_v38 = vpop.f32.mrb[11].mxu0  ;;  %8628 = vmatmul.mubr.msk.f32.vlgmr.msra.gmra.mrb[14].mxu1 %vm1533_vm6, %v2430_v36 }
 0xaa2   :  { %9158 = vmatpush3.bf16.msra.mxu1 %v9155_v13 }
 0xaa3   :  { %9160 = vmatprep.subr.bf16.mxu1 %v9159_v15 }
 0xaa6   :  { %9162 = vmatpush3.bf16.msra.mxu1 %v9159_v15 }
 0xaa7   :  { %9164 = vmatprep.subr.bf16.mxu1 %v9163_v19 }
 0xaaa   :  { %9166 = vmatpush3.bf16.msra.mxu1 %v9163_v19 }
 0xb74   :  { %v8629_v40 = vpop.f32.mrb[14].mxu1 }
 0xb75   :  { %v2523_v41 = vadd.f32 %v8629_v40, %v8080_v39  ;;  %v2517_v42 = vpop.f32.mrb[15].mxu1  ;;  %v2902_v40 = vld [vmem:[%s13017_s2] sm:$0xff] }
 0xb76   :  { %v2518_v43 = vadd.f32 %v8080_v39, %v2517_v42  ;;  %v9175_v39 = vpack.c.bf16 %v2813_v35, %v2812_v23 }
 0xb77   :  { %v2527_v44 = vadd.f32 %v2523_v41, %v12154_v53  ;;  %v2903_v41 = vld [vmem:[%s13017_s2 + $0x8] sm:$0xff] }
 0xb78   :  { %v2526_v45 = vadd.f32 %v2518_v43, %v12150_v51  ;;  %v9179_v42 = vpack.c.bf16 %v2903_v41, %v2902_v40  ;;  %v2904_v43 = vld [vmem:[%s13017_s2 + $0x10] sm:$0xff] }
 0xb79   :  { %v2531_v46 = vsel %vm1533_vm6, %v2527_v44, 0.0 }
 0xb7a   :  { %2532 = vadd.xlane.f32.xlu1 %v2531_v46  ;;  %v2528_v47 = vsel %vm1533_vm6, %v2526_v45, 0.0  ;;  %v2673_v46 = vld [vmem:[%s13016_s13 + $0x30] sm:$0xff] }
 0xb7b   :  { %2529 = vadd.xlane.f32.xlu0 %v2528_v47  ;;  %v2674_v47 = vld [vmem:[%s13016_s13 + $0x38] sm:$0xff] }
 0xc07   :  { %v2533_v48 = vpop.xlane.xlu1 %2532 }
 0xc08   :  { %v2536_v49 = vmul.f32 0.03125, %v2533_v48  ;;  %v2530_v50 = vpop.xlane.xlu0 %2529  ;;  %v9167_v48 = vpack.c.bf16 %v2674_v47, %v2673_v46 }
 0xc09   :  { %v2535_v54 = vmul.f32 0.03125, %v2530_v50  ;;  %v2989_v50 = vld [vmem:[%s13018_s7 + $0x8] sm:$0xff] }
 0xc0a   :  { %v2538_v56 = vsub.f32 %v2527_v44, %v2536_v49  ;;  %v2905_v44 = vld [vmem:[%s13017_s2 + $0x18] sm:$0xff]  ;;  %9168 = vmatprep.subr.bf16.mxu1 %v9167_v48  ;;  %v2988_v49 = vld [vmem:[%s13018_s7] sm:$0xff] }
 0xc0b   :  { %v2537_v57 = vsub.f32 %v2526_v45, %v2535_v54  ;;  %v9183_v45 = vpack.c.bf16 %v2905_v44, %v2904_v43  ;;  %9170 = vmatpush3.bf16.msra.mxu1 %v9167_v48  ;;  %v9187_v54 = vpack.c.bf16 %v2989_v50, %v2988_v49 }
 0xc0c   :  { %v2540_v58 = vmul.f32 %v2538_v56, %v2538_v56 }
 0xc0d   :  { %v2539_v53 = vmul.f32 %v2537_v57, %v2537_v57  ;;  %9188 = vmatprep.subr.bf16.mxu1 %v9187_v54 }
 0xc0e   :  { %v2544_v51 = vsel %vm1533_vm6, %v2540_v58, 0.0 }
 0xc0f   :  { %2545 = vadd.xlane.f32.xlu1 %v2544_v51  ;;  %v2541_v59 = vsel %vm1533_vm6, %v2539_v53, 0.0 }
 0xc10   :  { %2542 = vadd.xlane.f32.xlu0 %v2541_v59  ;;  %v2990_v59 = vld [vmem:[%s13018_s7 + $0x10] sm:$0xff] }
 0xc11   :  { %v9191_v63 = vpack.c.bf16 %v2991_v60, %v2990_v59 }
 0xc9c   :  { %v2546_v20 = vpop.xlane.xlu1 %2545 }
 0xc9d   :  { %v2548_v21 = vmul.f32 0.03125, %v2546_v20  ;;  %v2543_v22 = vpop.xlane.xlu0 %2542 }
 0xc9e   :  { %v2547_v24 = vmul.f32 0.03125, %v2543_v22  ;;  %v8099_v22 = vld [vmem:[#allocation58] ss:$0 sm:$0xff] }
 0xc9f   :  { %v2550_v25 = vadd.f32 1e-05, %v2548_v21 }
 0xca0   :  { %v2549_v26 = vadd.f32 1e-05, %v2547_v24 }
 0xca1   :  { %9576 = vrsqrt.f32 %v2550_v25 }
 0xca2   :  { %9578 = vrsqrt.f32 %v2549_v26 }
 0xcab   :  { %v9577_v27 = vpop.eup %9576 }
 0xcac   :  { %v9579_v29 = vpop.eup %9578  ;;  %v2554_v30 = vmul.f32 %v9577_v27, %v2538_v56  ;;  %v8085_v56 = vld [vmem:[#allocation41] ss:$0 sm:$0xff] }
 0xcad   :  { %v2553_v31 = vmul.f32 %v9579_v29, %v2537_v57 }
 0xcae   :  { %v2563_v32 = vmul.f32 %v8083_v28, %v2554_v30 }
 0xcaf   :  { %v2562_v34 = vmul.f32 %v8083_v28, %v2553_v31 }
 0xcb0   :  { %v12267_v38 = vadd.f32 %v8084_v33, %v2563_v32 }
 0xcb1   :  { %v12265_v36 = vadd.f32 %v8084_v33, %v2562_v34 }
 0xcb3   :  { %8638 = vmatprep.mubr.msk.f32.mxu0 %vm1533_vm6, %v12265_v36 }
 0xcb4   :  { %8639 = vmatmul.mubr.msk.f32.vlgmr.msra.gmra.mrb[12].mxu0 %vm1533_vm6, %v12267_v38 }
 0xcb5   :  { %9174 = vmatpush3.bf16.msra.mxu0 %v9171_v8  ;;  %8668 = vmatprep.mubr.msk.f32.mxu0 %vm1533_vm6, %v12156_v55 }
 0xcb6   :  { %9176 = vmatprep.subr.bf16.mxu0 %v9175_v39 }
 0xcb9   :  { %9178 = vmatpush3.bf16.msra.mxu0 %v9175_v39 }
 0xcba   :  { %9180 = vmatprep.subr.bf16.mxu0 %v9179_v42 }
 0xcbc   :  { %8669 = vmatmul.mubr.msk.f32.vlgmr.msra.gmra.mrb[14].mxu0 %vm1533_vm6, %v12152_v52 }
 0xcbd   :  { %9182 = vmatpush3.bf16.msra.mxu0 %v9179_v42  ;;  %8679 = vmatprep.mubr.msk.f32.mxu0 %vm1533_vm6, %v12156_v55 }
 0xcbe   :  { %9184 = vmatprep.subr.bf16.mxu0 %v9183_v45 }
 0xcc1   :  { %9186 = vmatpush3.bf16.msra.mxu0 %v9183_v45 }
 0xcc2   :  { %8693 = vmatprep.subr.mxu0 %v11320_v37 }
 0xcc4   :  { %8680 = vmatmul.mubr.msk.f32.vlgmr.msra.gmra.mrb[16].mxu0 %vm1533_vm6, %v12152_v52 }
 0xcc5   :  { %8695 = vmatprep.mubr.msk.f32.mxu0 %vm11321_vm7, %v11320_v37 }
 0xd87   :  { %v8640_v57 = vpop.f32.mrb[12].mxu0 }
 0xd88   :  { %v2662_v58 = vadd.f32 %v8640_v57, %v8085_v56  ;;  %v2656_v53 = vpop.f32.mrb[13].mxu0 }
 0xd89   :  { %v2657_v51 = vadd.f32 %v8085_v56, %v2656_v53 }
 0xd8a   :  { %v2666_v62 = vmax.f32 %v2662_v58, 0.0 }
 0xd8b   :  { %v2665_v61 = vmax.f32 %v2657_v51, 0.0 }
 0xd8d   :  { %8657 = vmatprep.mubr.msk.f32.mxu1 %vm2682_vm13, %v2665_v61 }
 0xd8e   :  { %8658 = vmatmul.mubr.msk.f32.vlgmr.msra.gmra.mrb[16].mxu1 %vm2682_vm13, %v2666_v62 }
 0xd8f   :  { %v8670_v0 = vpop.f32.mrb[14].mxu0  ;;  %9190 = vmatpush3.bf16.msra.mxu1 %v9187_v54  ;;  %8690 = vmatprep.mubr.msk.f32.mxu1 %vm1533_vm6, %v12156_v55 }
 0xd90   :  { %v2893_v1 = vpop.f32.mrb[15].mxu0  ;;  %9192 = vmatprep.subr.bf16.mxu1 %v9191_v63  ;;  %v2899_v14 = vadd.f32 %v8670_v0, %v8093_v6 }
 0xd91   :  { %v2894_v9 = vadd.f32 %v8093_v6, %v2893_v1 }
 0xd92   :  { %v3397_v17 = vmul.f32 %v12184_v12, %v2899_v14  ;;  %v3487_v19 = vmul.f32 %v12190_v18, %v2899_v14 }
 0xd93   :  { %9194 = vmatpush3.bf16.msra.mxu1 %v9191_v63  ;;  %v3074_v13 = vmul.f32 %v12184_v12, %v2894_v9  ;;  %v3164_v15 = vmul.f32 %v12190_v18, %v2894_v9 }
 0xd94   :  { %8698 = vmatprep.subr.mxu1 %v11320_v37 }
 0xd96   :  { %8691 = vmatmul.mubr.msk.f32.vlgmr.msra.gmra.mrb[18].mxu1 %vm1533_vm6, %v12152_v52 }
 0xd97   :  { %v8681_v8 = vpop.f32.mrb[16].mxu0  ;;  %8700 = vmatprep.mubr.msk.f32.mxu1 %vm11321_vm7, %v11320_v37 }
 0xd98   :  { %v2979_v10 = vpop.f32.mrb[17].mxu0  ;;  %v2985_v16 = vadd.f32 %v8681_v8, %v8096_v7 }
 0xd99   :  { %v2980_v11 = vadd.f32 %v8096_v7, %v2979_v10 }
 0xd9b   :  { %8694 = vmatpush3.xpose.msk.msra.mxu0 %vm1533_vm6, %v2980_v11 }
 0xd9c   :  { %8699 = vmatpush3.xpose.msk.msra.mxu1 %vm1533_vm6, %v2980_v11  ;;  %8703 = vmatprep.subr.mxu0 %v11320_v37 }
 0xd9d   :  { %8713 = vmatprep.subr.mxu1 %v11320_v37 }
 0xd9e   :  { %8696 = vmatmul.mubr.msk.f32.vlgmr.msra.gmra.mrb[18].mxu0 %vm1533_vm6, %v3074_v13 }
 0xd9f   :  { %8701 = vmatmul.mubr.msk.f32.vlgmr.msra.gmra.mrb[20].mxu1 %vm1533_vm6, %v3164_v15  ;;  %8705 = vmatprep.mubr.msk.f32.mxu0 %vm11321_vm7, %v11320_v37 }
 0xda0   :  { %8714 = vmatpush3.xpose.msk.msra.mxu1 %vm1533_vm6, %v2985_v16  ;;  %8715 = vmatprep.mubr.msk.f32.mxu1 %vm11321_vm7, %v11320_v37 }
 0xda1   :  { %8718 = vmatprep.subr.mxu1 %v11320_v37 }
 0xda3   :  { %8716 = vmatmul.mubr.msk.f32.vlgmr.msra.gmra.mrb[22].mxu1 %vm1533_vm6, %v3397_v17 }
 0xda4   :  { %8719 = vmatpush3.xpose.msk.msra.mxu1 %vm1533_vm6, %v2985_v16  ;;  %8720 = vmatprep.mubr.msk.f32.mxu1 %vm11321_vm7, %v11320_v37 }
 0xda7   :  { %8721 = vmatmul.mubr.msk.f32.vlgmr.msra.gmra.mrb[24].mxu1 %vm1533_vm6, %v3487_v19 }
 0xe61   :  { %v12324_v20 = vpop.f32.mrb[16].mxu1 }
 0xe62   :  { %v12326_v21 = vpop.f32.mrb[17].mxu1 }
 0xe69   :  { %v8692_v24 = vpop.f32.mrb[18].mxu1 }
 0xe6a   :  { %v12328_v25 = vadd.f32 %v8692_v24, %v8099_v22  ;;  %v3065_v26 = vpop.f32.mrb[19].mxu1 }
 0xe6b   :  { %v3066_v27 = vadd.f32 %v8099_v22, %v3065_v26 }
 0xe6c   :  { %v3573_v24 = vmul.f32 %v12190_v18, %v12328_v25 }
 0xe6d   :  { %v3250_v28 = vmul.f32 %v12190_v18, %v3066_v27  ;;  %v3163_v15 = vmul.f32 %v12184_v12, %v3066_v27  ;;  %v3486_v27 = vmul.f32 %v12184_v12, %v12328_v25 }
 0xe6f   :  { %8704 = vmatpush3.msra.mxu0 %v3250_v28 }
 0xe70   :  { %8708 = vmatprep.subr.mxu0 %v11320_v37 }
 0xe71   :  { %v3147_v29 = vpop.f32.mrb[18].mxu0 }
 0xe72   :  { %v3151_v30 = vmul.f32 0.25, %v3147_v29  ;;  %v8697_v31 = vpop.f32.mrb[19].mxu0  ;;  %v3234_v32 = vpop.f32.mrb[20].mxu1 }
 0xe73   :  { %v3238_v33 = vmul.f32 0.25, %v3234_v32  ;;  %v8702_v34 = vpop.f32.mrb[21].mxu1  ;;  %v3721_v31 = vld [vmem:[#allocation53 + $0x8] sm:$0xff]  ;;  %v3722_v32 = vld [vmem:[#allocation53 + $0x10] sm:$0xff] }
 0xe74   :  { %v3152_v23 = vsel %vm1865_vm12, %v3151_v30, -inf  ;;  %v3723_v34 = vld [vmem:[#allocation53 + $0x18] sm:$0xff] }
 0xe75   :  { %3153 = vmax.xlane.f32.xlu1 %v3152_v23  ;;  %v3239_v35 = vsel %vm1865_vm12, %v3238_v33, -inf  ;;  %v9199_v23 = vpack.c.bf16 %v3723_v34, %v3722_v32 }
 0xe76   :  { %3240 = vmax.xlane.f32.xlu0 %v3239_v35  ;;  %v3470_v39 = vpop.f32.mrb[22].mxu1 }
 0xe77   :  { %v3474_v40 = vmul.f32 0.25, %v3470_v39  ;;  %v8717_v41 = vpop.f32.mrb[23].mxu1 }
 0xe78   :  { %v8114_v41 = vld [vmem:[#allocation52] ss:$0 sm:$0xff] }
 0xe79   :  { %v3475_v42 = vsel %vm1865_vm12, %v3474_v40, -inf }
 0xe7a   :  { %3476 = vmax.xlane.f32.xlu1 %v3475_v42  ;;  %v3557_v43 = vpop.f32.mrb[24].mxu1 }
 0xe7b   :  { %v3561_v44 = vmul.f32 0.25, %v3557_v43  ;;  %v8722_v45 = vpop.f32.mrb[25].mxu1 }
 0xe7d   :  { %v3562_v46 = vsel %vm1865_vm12, %v3561_v44, -inf }
 0xe7e   :  { %3563 = vmax.xlane.f32.xlu0 %v3562_v46 }
 0xf02   :  { %v3154_v47 = vpop.xlane.xlu1 %3153 }
 0xf03   :  { %v3155_v48 = vsub.f32 %v3151_v30, %v3154_v47  ;;  %v3241_v49 = vpop.xlane.xlu0 %3240  ;;  %v3720_v30 = vld [vmem:[#allocation53] sm:$0xff] }
 0xf04   :  { %v3242_v50 = vsub.f32 %v3238_v33, %v3241_v49  ;;  %v9195_v33 = vpack.c.bf16 %v3721_v31, %v3720_v30  ;;  %v8117_v31 = vld [vmem:[#allocation65] ss:$0 sm:$0xff] }
 0xf05   :  { %v3156_v54 = vmul.f32 1.442695, %v3155_v48 }
 0xf06   :  { %v3243_v56 = vmul.f32 1.442695, %v3242_v50  ;;  %9196 = vmatprep.subr.bf16.mxu1 %v9195_v33 }
 0xf07   :  { %9580 = vpow2.f32 %v3156_v54  ;;  %v3477_v57 = vpop.xlane.xlu1 %3476  ;;  %9198 = vmatpush3.bf16.msra.mxu1 %v9195_v33 }
 0xf08   :  { %9582 = vpow2.f32 %v3243_v56  ;;  %v3478_v58 = vsub.f32 %v3474_v40, %v3477_v57  ;;  %9200 = vmatprep.subr.bf16.mxu1 %v9199_v23 }
 0xf0a   :  { %v3479_v53 = vmul.f32 1.442695, %v3478_v58 }
 0xf0b   :  { %v3564_v51 = vpop.xlane.xlu0 %3563  ;;  %9202 = vmatpush3.bf16.msra.mxu1 %v9199_v23 }
 0xf0c   :  { %9584 = vpow2.f32 %v3479_v53  ;;  %v3565_v59 = vsub.f32 %v3561_v44, %v3564_v51 }
 0xf0e   :  { %v3566_v60 = vmul.f32 1.442695, %v3565_v59 }
 0xf10   :  { %9586 = vpow2.f32 %v3566_v60 }
 0xf11   :  { %v9581_v61 = vpop.eup %9580 }
 0xf12   :  { %v9583_v62 = vpop.eup %9582  ;;  %v3158_v63 = vsel %vm1865_vm12, %v9581_v61, 0.0 }
 0xf13   :  { %3159 = vadd.xlane.f32.xlu1 %v3158_v63  ;;  %v3245_v0 = vsel %vm1865_vm12, %v9583_v62, 0.0  ;;  %v3860_v63 = vld [vmem:[#allocation61 + $0x10] sm:$0xff] }
 0xf14   :  { %3246 = vadd.xlane.f32.xlu0 %v3245_v0  ;;  %v3861_v0 = vld [vmem:[#allocation61 + $0x18] sm:$0xff] }
 0xf16   :  { %v9585_v1 = vpop.eup %9584 }
 0xf17   :  { %v3481_v6 = vsel %vm1865_vm12, %v9585_v1, 0.0 }
 0xf18   :  { %3482 = vadd.xlane.f32.xlu1 %v3481_v6  ;;  %v4094_v6 = vld [vmem:[#allocation76] sm:$0xff] }
 0xf1a   :  { %v9587_v7 = vpop.eup %9586 }
 0xf1b   :  { %v3568_v8 = vsel %vm1865_vm12, %v9587_v7, 0.0 }
 0xf1c   :  { %3569 = vadd.xlane.f32.xlu0 %v3568_v8 }
 0xfa0   :  { %v3160_v10 = vpop.xlane.xlu1 %3159 }
 0xfa1   :  { %v3247_v9 = vpop.xlane.xlu0 %3246 }
 0xfa2   :  { %9588 = vrcp.f32 %v3247_v9  ;;  %v3952_v9 = vld [vmem:[%s13019_s10] sm:$0xff] }
 0xfa3   :  { %9590 = vrcp.f32 %v3160_v10  ;;  %v3953_v10 = vld [vmem:[%s13019_s10 + $0x8] sm:$0xff] }
 0xfa5   :  { %v3483_v16 = vpop.xlane.xlu1 %3482 }
 0xfa9   :  { %v3570_v11 = vpop.xlane.xlu0 %3569 }
 0xfaa   :  { %9592 = vrcp.f32 %v3570_v11  ;;  %v3954_v11 = vld [vmem:[%s13019_s10 + $0x10] sm:$0xff] }
 0xfab   :  { %9594 = vrcp.f32 %v3483_v16  ;;  %v3956_v16 = vld [vmem:[%s13019_s10 + $0x20] sm:$0xff] }
 0xfac   :  { %v9589_v13 = vpop.eup %9588 }
 0xfad   :  { %v3249_v14 = vmul.f32 %v9589_v13, %v9583_v62  ;;  %v9591_v17 = vpop.eup %9590  ;;  %v9211_v13 = vpack.c.bf16 %v3953_v10, %v3952_v9  ;;  %v8130_v9 = vld [vmem:[#allocation70] ss:$0 sm:$0xff] }
 0xfae   :  { %v3162_v19 = vmul.f32 %v9591_v17, %v9581_v61  ;;  %v3859_v61 = vld [vmem:[#allocation61 + $0x8] sm:$0xff] }
 0xfaf   :  { %8706 = vmatmul.mubr.msk.f32.vlgmr.msra.gmra.mrb[20].mxu0 %vm1865_vm12, %v3249_v14  ;;  %v3955_v14 = vld [vmem:[%s13019_s10 + $0x18] sm:$0xff]  ;;  %v3957_v17 = vld [vmem:[%s13019_s10 + $0x28] sm:$0xff]  ;;  %9212 = vmatprep.subr.bf16.mxu1 %v9211_v13 }
 0xfb0   :  { %8709 = vmatpush3.msra.mxu0 %v3163_v15  ;;  %8710 = vmatprep.mubr.msk.f32.mxu0 %vm11321_vm7, %v11320_v37  ;;  %v9215_v15 = vpack.c.bf16 %v3955_v14, %v3954_v11 }
 0xfb1   :  { %8723 = vmatprep.subr.mxu0 %v11320_v37 }
 0xfb4   :  { %v9593_v22 = vpop.eup %9592 }
 0xfb5   :  { %v3572_v26 = vmul.f32 %v9593_v22, %v9587_v7  ;;  %v9595_v28 = vpop.eup %9594  ;;  %v4095_v7 = vld [vmem:[#allocation76 + $0x8] sm:$0xff] }
 0xfb6   :  { %v3485_v29 = vmul.f32 %v9595_v28, %v9585_v1  ;;  %v9207_v1 = vpack.c.bf16 %v3861_v0, %v3860_v63  ;;  %v9227_v8 = vpack.c.bf16 %v4095_v7, %v4094_v6 }
 0xfb7   :  { %8711 = vmatmul.mubr.msk.f32.vlgmr.msra.gmra.mrb[20].mxu0 %vm1865_vm12, %v3162_v19  ;;  %v9219_v19 = vpack.c.bf16 %v3957_v17, %v3956_v16 }
 0xfb8   :  { %8724 = vmatpush3.msra.mxu0 %v3573_v24  ;;  %8725 = vmatprep.mubr.msk.f32.mxu0 %vm11321_vm7, %v11320_v37 }
 0xfb9   :  { %8728 = vmatprep.subr.mxu0 %v11320_v37 }
 0xfbb   :  { %8726 = vmatmul.mubr.msk.f32.vlgmr.msra.gmra.mrb[22].mxu0 %vm1865_vm12, %v3572_v26 }
 0xfbc   :  { %8729 = vmatpush3.msra.mxu0 %v3486_v27  ;;  %8730 = vmatprep.mubr.msk.f32.mxu0 %vm11321_vm7, %v11320_v37 }
 0xfc3   :  { %8731 = vmatmul.mubr.msk.f32.vlgmr.msra.gmra.mrb[22].mxu0 %vm1865_vm12, %v3485_v29 }
0x108a   :  { %v3393_v25 = vpop.f32.mrb[20].mxu0 }
0x108b   :  { %v8712_v35 = vpop.f32.mrb[21].mxu0  ;;  %8741 = vmatprep.mubr.msk.f32.mxu1 %vm1533_vm6, %v3393_v25  ;;  %v8118_v25 = vld [vmem:[#allocation64] ss:$0 sm:$0xff] }
0x1096   :  { %v3716_v39 = vpop.f32.mrb[22].mxu0 }
0x1097   :  { %v8732_v40 = vpop.f32.mrb[23].mxu0  ;;  %8742 = vmatmul.mubr.msk.f32.vlgmr.msra.gmra.mrb[26].mxu1 %vm1533_vm6, %v3716_v39  ;;  %v4096_v39 = vld [vmem:[#allocation76 + $0x10] sm:$0xff] }
0x1098   :  { %9214 = vmatpush3.bf16.msra.mxu1 %v9211_v13  ;;  %v4097_v40 = vld [vmem:[#allocation76 + $0x18] sm:$0xff] }
0x1099   :  { %9216 = vmatprep.subr.bf16.mxu1 %v9215_v15 }
0x109c   :  { %9218 = vmatpush3.bf16.msra.mxu1 %v9215_v15 }
0x109d   :  { %9220 = vmatprep.subr.bf16.mxu1 %v9219_v19 }
0x10a0   :  { %9222 = vmatpush3.bf16.msra.mxu1 %v9219_v19 }
0x116a   :  { %v8743_v42 = vpop.f32.mrb[26].mxu1 }
0x116b   :  { %v3809_v43 = vadd.f32 %v8743_v42, %v8114_v41  ;;  %v3803_v44 = vpop.f32.mrb[27].mxu1 }
0x116c   :  { %v3804_v45 = vadd.f32 %v8114_v41, %v3803_v44  ;;  %v4186_v44 = vld [vmem:[%s13020_s20] sm:$0xff] }
0x116d   :  { %v3813_v46 = vadd.f32 %v3809_v43, %v12152_v52  ;;  %v9231_v43 = vpack.c.bf16 %v4097_v40, %v4096_v39 }
0x116e   :  { %v3812_v47 = vadd.f32 %v3804_v45, %v12156_v55  ;;  %v3858_v55 = vld [vmem:[#allocation61] sm:$0xff] }
0x116f   :  { %v3817_v48 = vsel %vm1533_vm6, %v3813_v46, 0.0  ;;  %v9203_v62 = vpack.c.bf16 %v3859_v61, %v3858_v55  ;;  %v4187_v45 = vld [vmem:[%s13020_s20 + $0x8] sm:$0xff]  ;;  %v4274_v61 = vld [vmem:[%s13021_s4 + $0x10] sm:$0xff] }
0x1170   :  { %3818 = vadd.xlane.f32.xlu1 %v3817_v48  ;;  %v3814_v49 = vsel %vm1533_vm6, %v3812_v47, 0.0  ;;  %v4189_v48 = vld [vmem:[%s13020_s20 + $0x18] sm:$0xff] }
0x1171   :  { %3815 = vadd.xlane.f32.xlu0 %v3814_v49  ;;  %9204 = vmatprep.subr.bf16.mxu0 %v9203_v62 }
0x1172   :  { %9206 = vmatpush3.bf16.msra.mxu0 %v9203_v62  ;;  %v4275_v62 = vld [vmem:[%s13021_s4 + $0x18] sm:$0xff] }
0x1173   :  { %9208 = vmatprep.subr.bf16.mxu0 %v9207_v1 }
0x1176   :  { %9210 = vmatpush3.bf16.msra.mxu0 %v9207_v1  ;;  %v9247_v1 = vpack.c.bf16 %v4275_v62, %v4274_v61 }
0x1177   :  { %9228 = vmatprep.subr.bf16.mxu0 %v9227_v8 }
0x11fd   :  { %v3819_v50 = vpop.xlane.xlu1 %3818 }
0x11fe   :  { %v3821_v54 = vmul.f32 0.03125, %v3819_v50  ;;  %v3816_v56 = vpop.xlane.xlu0 %3815  ;;  %v3958_v50 = vld [vmem:[%s13019_s10 + $0x30] sm:$0xff] }
0x11ff   :  { %v3820_v57 = vmul.f32 0.03125, %v3816_v56 }
0x1200   :  { %v3823_v58 = vsub.f32 %v3813_v46, %v3821_v54  ;;  %v9235_v46 = vpack.c.bf16 %v4187_v45, %v4186_v44  ;;  %v3959_v54 = vld [vmem:[%s13019_s10 + $0x38] sm:$0xff] }
0x1201   :  { %v3822_v53 = vsub.f32 %v3812_v47, %v3820_v57  ;;  %v4188_v47 = vld [vmem:[%s13020_s20 + $0x10] sm:$0xff]  ;;  %v9223_v56 = vpack.c.bf16 %v3959_v54, %v3958_v50  ;;  %v4272_v57 = vld [vmem:[%s13021_s4] sm:$0xff] }
0x1202   :  { %v3825_v51 = vmul.f32 %v3823_v58, %v3823_v58  ;;  %v9239_v49 = vpack.c.bf16 %v4189_v48, %v4188_v47 }
0x1203   :  { %v3824_v59 = vmul.f32 %v3822_v53, %v3822_v53  ;;  %9224 = vmatprep.subr.bf16.mxu1 %v9223_v56 }
0x1204   :  { %v3829_v60 = vsel %vm1533_vm6, %v3825_v51, 0.0  ;;  %9226 = vmatpush3.bf16.msra.mxu1 %v9223_v56  ;;  %v8119_v51 = vld [vmem:[#allocation59] ss:$0 sm:$0xff] }
0x1205   :  { %3830 = vadd.xlane.f32.xlu1 %v3829_v60  ;;  %v3826_v52 = vsel %vm1533_vm6, %v3824_v59, 0.0 }
0x1206   :  { %3827 = vadd.xlane.f32.xlu0 %v3826_v52 }
0x1292   :  { %v3831_v22 = vpop.xlane.xlu1 %3830 }
0x1293   :  { %v3833_v24 = vmul.f32 0.03125, %v3831_v22  ;;  %v3828_v26 = vpop.xlane.xlu0 %3827 }
0x1294   :  { %v3832_v27 = vmul.f32 0.03125, %v3828_v26 }
0x1295   :  { %v3835_v28 = vadd.f32 1e-05, %v3833_v24 }
0x1296   :  { %v3834_v29 = vadd.f32 1e-05, %v3832_v27 }
0x1297   :  { %9596 = vrsqrt.f32 %v3835_v28  ;;  %v8133_v28 = vld [vmem:[#allocation77] ss:$0 sm:$0xff] }
0x1298   :  { %9598 = vrsqrt.f32 %v3834_v29 }
0x12a1   :  { %v9597_v30 = vpop.eup %9596 }
0x12a2   :  { %v9599_v32 = vpop.eup %9598  ;;  %v3839_v33 = vmul.f32 %v9597_v30, %v3823_v58  ;;  %v4273_v58 = vld [vmem:[%s13021_s4 + $0x8] sm:$0xff] }
0x12a3   :  { %v3838_v34 = vmul.f32 %v9599_v32, %v3822_v53  ;;  %v9243_v53 = vpack.c.bf16 %v4273_v58, %v4272_v57 }
0x12a4   :  { %v3848_v23 = vmul.f32 %v8117_v31, %v3839_v33 }
0x12a5   :  { %v3847_v35 = vmul.f32 %v8117_v31, %v3838_v34  ;;  %9244 = vmatprep.subr.bf16.mxu1 %v9243_v53 }
0x12a6   :  { %v12373_v42 = vadd.f32 %v8118_v25, %v3848_v23 }
0x12a7   :  { %v12371_v41 = vadd.f32 %v8118_v25, %v3847_v35 }
0x12a9   :  { %8752 = vmatprep.mubr.msk.f32.mxu0 %vm1533_vm6, %v12371_v41 }
0x12aa   :  { %8753 = vmatmul.mubr.msk.f32.vlgmr.msra.gmra.mrb[24].mxu0 %vm1533_vm6, %v12373_v42 }
0x12ab   :  { %9230 = vmatpush3.bf16.msra.mxu0 %v9227_v8  ;;  %8782 = vmatprep.mubr.msk.f32.mxu0 %vm1533_vm6, %v12174_v5  ;;  %v8127_v8 = vld [vmem:[#allocation74] ss:$0 sm:$0xff] }
0x12ac   :  { %9232 = vmatprep.subr.bf16.mxu0 %v9231_v43 }
0x12af   :  { %9234 = vmatpush3.bf16.msra.mxu0 %v9231_v43 }
0x12b0   :  { %9236 = vmatprep.subr.bf16.mxu0 %v9235_v46 }
0x12b2   :  { %8783 = vmatmul.mubr.msk.f32.vlgmr.msra.gmra.mrb[26].mxu0 %vm1533_vm6, %v12170_v3 }
0x12b3   :  { %9238 = vmatpush3.bf16.msra.mxu0 %v9235_v46  ;;  %8793 = vmatprep.mubr.msk.f32.mxu0 %vm1533_vm6, %v12174_v5 }
0x12b4   :  { %9240 = vmatprep.subr.bf16.mxu0 %v9239_v49 }
0x12b7   :  { %9242 = vmatpush3.bf16.msra.mxu0 %v9239_v49 }
0x12b8   :  { %8807 = vmatprep.subr.mxu0 %v11320_v37 }
0x12ba   :  { %8794 = vmatmul.mubr.msk.f32.vlgmr.msra.gmra.mrb[28].mxu0 %vm1533_vm6, %v12170_v3 }
0x12bb   :  { %8809 = vmatprep.mubr.msk.f32.mxu0 %vm11321_vm7, %v11320_v37 }
0x137d   :  { %v8754_v59 = vpop.f32.mrb[24].mxu0 }
0x137e   :  { %v3947_v60 = vadd.f32 %v8754_v59, %v8119_v51  ;;  %v3941_v52 = vpop.f32.mrb[25].mxu0 }
0x137f   :  { %v3942_v55 = vadd.f32 %v8119_v51, %v3941_v52 }
0x1380   :  { %v3951_v0 = vmax.f32 %v3947_v60, 0.0 }
0x1381   :  { %v3950_v63 = vmax.f32 %v3942_v55, 0.0 }
0x1383   :  { %8771 = vmatprep.mubr.msk.f32.mxu1 %vm2682_vm13, %v3950_v63 }
0x1384   :  { %8772 = vmatmul.mubr.msk.f32.vlgmr.msra.gmra.mrb[28].mxu1 %vm2682_vm13, %v3951_v0 }
0x1385   :  { %v8784_v6 = vpop.f32.mrb[26].mxu0  ;;  %9246 = vmatpush3.bf16.msra.mxu1 %v9243_v53  ;;  %8804 = vmatprep.mubr.msk.f32.mxu1 %vm1533_vm6, %v12174_v5 }
0x1386   :  { %v4177_v7 = vpop.f32.mrb[27].mxu0  ;;  %9248 = vmatprep.subr.bf16.mxu1 %v9247_v1  ;;  %v4183_v16 = vadd.f32 %v8784_v6, %v8127_v8 }
0x1387   :  { %v4178_v11 = vadd.f32 %v8127_v8, %v4177_v7 }
0x1388   :  { %v4681_v22 = vmul.f32 %v12184_v12, %v4183_v16  ;;  %v4771_v24 = vmul.f32 %v12190_v18, %v4183_v16 }
0x1389   :  { %9250 = vmatpush3.bf16.msra.mxu1 %v9247_v1  ;;  %v4358_v15 = vmul.f32 %v12184_v12, %v4178_v11  ;;  %v4448_v17 = vmul.f32 %v12190_v18, %v4178_v11 }
0x138a   :  { %8812 = vmatprep.subr.mxu1 %v11320_v37 }
0x138c   :  { %8805 = vmatmul.mubr.msk.f32.vlgmr.msra.gmra.mrb[30].mxu1 %vm1533_vm6, %v12170_v3 }
0x138d   :  { %v8795_v10 = vpop.f32.mrb[28].mxu0  ;;  %8814 = vmatprep.mubr.msk.f32.mxu1 %vm11321_vm7, %v11320_v37 }
0x138e   :  { %v4263_v13 = vpop.f32.mrb[29].mxu0  ;;  %v4269_v19 = vadd.f32 %v8795_v10, %v8130_v9 }
0x138f   :  { %v4264_v14 = vadd.f32 %v8130_v9, %v4263_v13 }
0x1391   :  { %8808 = vmatpush3.xpose.msk.msra.mxu0 %vm1533_vm6, %v4264_v14 }
0x1392   :  { %8813 = vmatpush3.xpose.msk.msra.mxu1 %vm1533_vm6, %v4264_v14  ;;  %8817 = vmatprep.subr.mxu0 %v11320_v37 }
0x1393   :  { %8827 = vmatprep.subr.mxu1 %v11320_v37 }
0x1394   :  { %8810 = vmatmul.mubr.msk.f32.vlgmr.msra.gmra.mrb[30].mxu0 %vm1533_vm6, %v4358_v15 }
0x1395   :  { %8815 = vmatmul.mubr.msk.f32.vlgmr.msra.gmra.mrb[32].mxu1 %vm1533_vm6, %v4448_v17  ;;  %8819 = vmatprep.mubr.msk.f32.mxu0 %vm11321_vm7, %v11320_v37 }
0x1396   :  { %8828 = vmatpush3.xpose.msk.msra.mxu1 %vm1533_vm6, %v4269_v19  ;;  %8829 = vmatprep.mubr.msk.f32.mxu1 %vm11321_vm7, %v11320_v37 }
0x1397   :  { %8832 = vmatprep.subr.mxu1 %v11320_v37 }
0x1399   :  { %8830 = vmatmul.mubr.msk.f32.vlgmr.msra.gmra.mrb[34].mxu1 %vm1533_vm6, %v4681_v22 }
0x139a   :  { %8833 = vmatpush3.xpose.msk.msra.mxu1 %vm1533_vm6, %v4269_v19  ;;  %8834 = vmatprep.mubr.msk.f32.mxu1 %vm11321_vm7, %v11320_v37 }
0x139d   :  { %8835 = vmatmul.mubr.msk.f32.vlgmr.msra.gmra.mrb[36].mxu1 %vm1533_vm6, %v4771_v24 }
0x1457   :  { %v12430_v26 = vpop.f32.mrb[28].mxu1 }
0x1458   :  { %v12432_v27 = vpop.f32.mrb[29].mxu1 }
0x145f   :  { %v8806_v29 = vpop.f32.mrb[30].mxu1 }
0x1460   :  { %v12434_v30 = vadd.f32 %v8806_v29, %v8133_v28  ;;  %v4349_v31 = vpop.f32.mrb[31].mxu1 }
0x1461   :  { %v4350_v32 = vadd.f32 %v8133_v28, %v4349_v31 }
0x1463   :  { %v4534_v33 = vmul.f32 %v12190_v18, %v4350_v32  ;;  %v4447_v22 = vmul.f32 %v12184_v12, %v4350_v32 }
0x1465   :  { %8818 = vmatpush3.msra.mxu0 %v4534_v33  ;;  %v4857_v33 = vmul.f32 %v12190_v18, %v12434_v30 }
0x1466   :  { %8822 = vmatprep.subr.mxu0 %v11320_v37 }
0x1467   :  { %v4431_v34 = vpop.f32.mrb[30].mxu0 }
0x1468   :  { %v4435_v23 = vmul.f32 0.25, %v4431_v34  ;;  %v8811_v25 = vpop.f32.mrb[31].mxu0  ;;  %v4518_v35 = vpop.f32.mrb[32].mxu1  ;;  %v4770_v34 = vmul.f32 %v12184_v12, %v12434_v30 }
0x1469   :  { %v4522_v39 = vmul.f32 0.25, %v4518_v35  ;;  %v8816_v40 = vpop.f32.mrb[33].mxu1  ;;  %v5004_v35 = vld [vmem:[#allocation73] sm:$0xff] }
0x146a   :  { %v4436_v43 = vsel %vm1865_vm12, %v4435_v23, -inf  ;;  %v5006_v40 = vld [vmem:[#allocation73 + $0x10] sm:$0xff] }
0x146b   :  { %4437 = vmax.xlane.f32.xlu1 %v4436_v43  ;;  %v4523_v44 = vsel %vm1865_vm12, %v4522_v39, -inf }
0x146c   :  { %4524 = vmax.xlane.f32.xlu0 %v4523_v44  ;;  %v4754_v45 = vpop.f32.mrb[34].mxu1  ;;  %v5007_v44 = vld [vmem:[#allocation73 + $0x18] sm:$0xff] }
0x146d   :  { %v4758_v46 = vmul.f32 0.25, %v4754_v45  ;;  %v8831_v47 = vpop.f32.mrb[35].mxu1  ;;  %v9255_v45 = vpack.c.bf16 %v5007_v44, %v5006_v40 }
0x146f   :  { %v4759_v48 = vsel %vm1865_vm12, %v4758_v46, -inf }
0x1470   :  { %4760 = vmax.xlane.f32.xlu1 %v4759_v48  ;;  %v4841_v49 = vpop.f32.mrb[36].mxu1 }
0x1471   :  { %v4845_v50 = vmul.f32 0.25, %v4841_v49  ;;  %v8836_v54 = vpop.f32.mrb[37].mxu1  ;;  %v8148_v49 = vld [vmem:[#allocation71] ss:$0 sm:$0xff] }
0x1473   :  { %v4846_v56 = vsel %vm1865_vm12, %v4845_v50, -inf }
0x1474   :  { %4847 = vmax.xlane.f32.xlu0 %v4846_v56 }
0x14f8   :  { %v4438_v57 = vpop.xlane.xlu1 %4437 }
0x14f9   :  { %v4439_v58 = vsub.f32 %v4435_v23, %v4438_v57  ;;  %v4525_v53 = vpop.xlane.xlu0 %4524 }
0x14fa   :  { %v4526_v51 = vsub.f32 %v4522_v39, %v4525_v53  ;;  %v5005_v39 = vld [vmem:[#allocation73 + $0x8] sm:$0xff] }
0x14fb   :  { %v4440_v59 = vmul.f32 1.442695, %v4439_v58  ;;  %v9251_v43 = vpack.c.bf16 %v5005_v39, %v5004_v35 }
0x14fc   :  { %v4527_v60 = vmul.f32 1.442695, %v4526_v51 }
0x14fd   :  { %9600 = vpow2.f32 %v4440_v59  ;;  %v4761_v52 = vpop.xlane.xlu1 %4760  ;;  %9252 = vmatprep.subr.bf16.mxu1 %v9251_v43 }
0x14fe   :  { %9602 = vpow2.f32 %v4527_v60  ;;  %v4762_v55 = vsub.f32 %v4758_v46, %v4761_v52  ;;  %9254 = vmatpush3.bf16.msra.mxu1 %v9251_v43  ;;  %v8151_v43 = vld [vmem:[%s13024_s24] ss:$0 sm:$0xff] }
0x14ff   :  { %9256 = vmatprep.subr.bf16.mxu1 %v9255_v45 }
0x1500   :  { %v4763_v61 = vmul.f32 1.442695, %v4762_v55 }
0x1501   :  { %v4848_v62 = vpop.xlane.xlu0 %4847 }
0x1502   :  { %9604 = vpow2.f32 %v4763_v61  ;;  %v4849_v63 = vsub.f32 %v4845_v50, %v4848_v62  ;;  %9258 = vmatpush3.bf16.msra.mxu1 %v9255_v45 }
0x1504   :  { %v4850_v0 = vmul.f32 1.442695, %v4849_v63 }
0x1506   :  { %9606 = vpow2.f32 %v4850_v0 }
0x1507   :  { %v9601_v1 = vpop.eup %9600 }
0x1508   :  { %v9603_v6 = vpop.eup %9602  ;;  %v4442_v7 = vsel %vm1865_vm12, %v9601_v1, 0.0 }
0x1509   :  { %4443 = vadd.xlane.f32.xlu1 %v4442_v7  ;;  %v4529_v8 = vsel %vm1865_vm12, %v9603_v6, 0.0  ;;  %v5143_v7 = vld [vmem:[#allocation80 + $0x8] sm:$0xff] }
0x150a   :  { %4530 = vadd.xlane.f32.xlu0 %v4529_v8 }
0x150c   :  { %v9605_v9 = vpop.eup %9604 }
0x150d   :  { %v4765_v10 = vsel %vm1865_vm12, %v9605_v9, 0.0 }
0x150e   :  { %4766 = vadd.xlane.f32.xlu1 %v4765_v10  ;;  %v5145_v10 = vld [vmem:[#allocation80 + $0x18] sm:$0xff] }
0x1510   :  { %v9607_v11 = vpop.eup %9606 }
0x1511   :  { %v4852_v13 = vsel %vm1865_vm12, %v9607_v11, 0.0 }
0x1512   :  { %4853 = vadd.xlane.f32.xlu0 %v4852_v13  ;;  %v5402_v13 = vld [vmem:[%s13022_s25] sm:$0xff] }
0x1596   :  { %v4444_v15 = vpop.xlane.xlu1 %4443 }
0x1597   :  { %v4531_v14 = vpop.xlane.xlu0 %4530 }
0x1598   :  { %9608 = vrcp.f32 %v4531_v14  ;;  %v5403_v14 = vld [vmem:[%s13022_s25 + $0x8] sm:$0xff] }
0x1599   :  { %9610 = vrcp.f32 %v4444_v15  ;;  %v9283_v15 = vpack.c.bf16 %v5403_v14, %v5402_v13 }
0x159b   :  { %v4767_v24 = vpop.xlane.xlu1 %4766 }
0x159f   :  { %v4854_v16 = vpop.xlane.xlu0 %4853 }
0x15a0   :  { %9612 = vrcp.f32 %v4854_v16  ;;  %v5236_v16 = vld [vmem:[%s13023_s16] sm:$0xff] }
0x15a1   :  { %9614 = vrcp.f32 %v4767_v24  ;;  %v5239_v24 = vld [vmem:[%s13023_s16 + $0x18] sm:$0xff] }
0x15a2   :  { %v9609_v17 = vpop.eup %9608 }
0x15a3   :  { %v4533_v19 = vmul.f32 %v9609_v17, %v9603_v6  ;;  %v9611_v28 = vpop.eup %9610  ;;  %v5142_v6 = vld [vmem:[#allocation80] sm:$0xff]  ;;  %v5237_v17 = vld [vmem:[%s13023_s16 + $0x8] sm:$0xff] }
0x15a4   :  { %v4446_v29 = vmul.f32 %v9611_v28, %v9601_v1  ;;  %v9259_v8 = vpack.c.bf16 %v5143_v7, %v5142_v6 }
0x15a5   :  { %8820 = vmatmul.mubr.msk.f32.vlgmr.msra.gmra.mrb[32].mxu0 %vm1865_vm12, %v4533_v19  ;;  %v5238_v19 = vld [vmem:[%s13023_s16 + $0x10] sm:$0xff] }
0x15a6   :  { %8823 = vmatpush3.msra.mxu0 %v4447_v22  ;;  %8824 = vmatprep.mubr.msk.f32.mxu0 %vm11321_vm7, %v11320_v37  ;;  %v9267_v22 = vpack.c.bf16 %v5237_v17, %v5236_v16  ;;  %v9271_v28 = vpack.c.bf16 %v5239_v24, %v5238_v19  ;;  %v8161_v17 = vld [vmem:[#allocation32] ss:$0 sm:$0xff]  ;;  %v8164_v19 = vld [vmem:[#allocation29] ss:$0 sm:$0xff] }
0x15a7   :  { %8837 = vmatprep.subr.mxu0 %v11320_v37 }
0x15a8   :  { %9268 = vmatprep.subr.bf16.mxu1 %v9267_v22 }
0x15aa   :  { %v9613_v31 = vpop.eup %9612 }
0x15ab   :  { %v4856_v32 = vmul.f32 %v9613_v31, %v9607_v11  ;;  %v9615_v23 = vpop.eup %9614  ;;  %v5241_v31 = vld [vmem:[%s13023_s16 + $0x28] sm:$0xff] }
0x15ac   :  { %v4769_v25 = vmul.f32 %v9615_v23, %v9605_v9  ;;  %v5144_v9 = vld [vmem:[#allocation80 + $0x10] sm:$0xff] }
0x15ad   :  { %8825 = vmatmul.mubr.msk.f32.vlgmr.msra.gmra.mrb[32].mxu0 %vm1865_vm12, %v4446_v29  ;;  %v9263_v11 = vpack.c.bf16 %v5145_v10, %v5144_v9  ;;  %v5240_v29 = vld [vmem:[%s13023_s16 + $0x20] sm:$0xff]  ;;  %v5582_v9 = vld [vmem:[%s13027_s9 + $0x10] sm:$0xff]  ;;  %v5583_v10 = vld [vmem:[%s13027_s9 + $0x18] sm:$0xff] }
0x15ae   :  { %8838 = vmatpush3.msra.mxu0 %v4857_v33  ;;  %8839 = vmatprep.mubr.msk.f32.mxu0 %vm11321_vm7, %v11320_v37  ;;  %v9275_v33 = vpack.c.bf16 %v5241_v31, %v5240_v29  ;;  %v9303_v14 = vpack.c.bf16 %v5583_v10, %v5582_v9 }
0x15af   :  { %8842 = vmatprep.subr.mxu0 %v11320_v37 }
0x15b1   :  { %8840 = vmatmul.mubr.msk.f32.vlgmr.msra.gmra.mrb[34].mxu0 %vm1865_vm12, %v4856_v32 }
0x15b2   :  { %8843 = vmatpush3.msra.mxu0 %v4770_v34  ;;  %8844 = vmatprep.mubr.msk.f32.mxu0 %vm11321_vm7, %v11320_v37 }
0x15b3   :  { %9260 = vmatprep.subr.bf16.mxu0 %v9259_v8 }
0x15b9   :  { %8845 = vmatmul.mubr.msk.f32.vlgmr.msra.gmra.mrb[34].mxu0 %vm1865_vm12, %v4769_v25 }
0x15ba   :  { %9262 = vmatpush3.bf16.msra.mxu0 %v9259_v8 }
0x15bb   :  { %9264 = vmatprep.subr.bf16.mxu0 %v9263_v11 }
0x15be   :  { %9266 = vmatpush3.bf16.msra.mxu0 %v9263_v11 }
0x15bf   :  { %9284 = vmatprep.subr.bf16.mxu0 %v9283_v15 }
0x1680   :  { %v4677_v30 = vpop.f32.mrb[32].mxu0 }
0x1681   :  { %v8826_v46 = vpop.f32.mrb[33].mxu0  ;;  %8855 = vmatprep.mubr.msk.f32.mxu1 %vm1533_vm6, %v4677_v30 }
0x168c   :  { %v5000_v47 = vpop.f32.mrb[34].mxu0 }
0x168d   :  { %v8846_v48 = vpop.f32.mrb[35].mxu0  ;;  %8856 = vmatmul.mubr.msk.f32.vlgmr.msra.gmra.mrb[38].mxu1 %vm1533_vm6, %v5000_v47  ;;  %v8152_v47 = vld [vmem:[%s13025_s18] ss:$0 sm:$0xff] }
0x168e   :  { %9270 = vmatpush3.bf16.msra.mxu1 %v9267_v22 }
0x168f   :  { %9272 = vmatprep.subr.bf16.mxu1 %v9271_v28 }
0x1692   :  { %9274 = vmatpush3.bf16.msra.mxu1 %v9271_v28 }
0x1693   :  { %9276 = vmatprep.subr.bf16.mxu1 %v9275_v33 }
0x1696   :  { %9278 = vmatpush3.bf16.msra.mxu1 %v9275_v33 }
0x1760   :  { %v8857_v50 = vpop.f32.mrb[38].mxu1 }
0x1761   :  { %v5093_v54 = vadd.f32 %v8857_v50, %v8148_v49  ;;  %v5087_v56 = vpop.f32.mrb[39].mxu1  ;;  %v5405_v50 = vld [vmem:[%s13022_s25 + $0x18] sm:$0xff] }
0x1762   :  { %v5088_v57 = vadd.f32 %v8148_v49, %v5087_v56  ;;  %v5404_v49 = vld [vmem:[%s13022_s25 + $0x10] sm:$0xff] }
0x1763   :  { %v5097_v58 = vadd.f32 %v5093_v54, %v12170_v3 }
0x1764   :  { %v5096_v53 = vadd.f32 %v5088_v57, %v12174_v5  ;;  %v9287_v57 = vpack.c.bf16 %v5405_v50, %v5404_v49 }
0x1765   :  { %v5101_v51 = vsel %vm1533_vm6, %v5097_v58, 0.0 }
0x1766   :  { %5102 = vadd.xlane.f32.xlu1 %v5101_v51  ;;  %v5098_v59 = vsel %vm1533_vm6, %v5096_v53, 0.0 }
0x1767   :  { %5099 = vadd.xlane.f32.xlu0 %v5098_v59  ;;  %v5496_v59 = vld [vmem:[%s13026_s8 + $0x10] sm:$0xff] }
0x17f3   :  { %v5103_v60 = vpop.xlane.xlu1 %5102 }
0x17f4   :  { %v5105_v52 = vmul.f32 0.03125, %v5103_v60  ;;  %v5100_v55 = vpop.xlane.xlu0 %5099  ;;  %v5497_v60 = vld [vmem:[%s13026_s8 + $0x18] sm:$0xff] }
0x17f5   :  { %v5104_v61 = vmul.f32 0.03125, %v5100_v55  ;;  %v5242_v55 = vld [vmem:[%s13023_s16 + $0x30] sm:$0xff] }
0x17f6   :  { %v5107_v62 = vsub.f32 %v5097_v58, %v5105_v52  ;;  %v5494_v58 = vld [vmem:[%s13026_s8] sm:$0xff]  ;;  %v9295_v52 = vpack.c.bf16 %v5497_v60, %v5496_v59 }
0x17f7   :  { %v5106_v63 = vsub.f32 %v5096_v53, %v5104_v61  ;;  %v5495_v53 = vld [vmem:[%s13026_s8 + $0x8] sm:$0xff]  ;;  %v5243_v61 = vld [vmem:[%s13023_s16 + $0x38] sm:$0xff] }
0x17f8   :  { %v5109_v0 = vmul.f32 %v5107_v62, %v5107_v62  ;;  %v9291_v51 = vpack.c.bf16 %v5495_v53, %v5494_v58 }
0x17f9   :  { %v5108_v1 = vmul.f32 %v5106_v63, %v5106_v63 }
0x17fa   :  { %v5113_v3 = vsel %vm1533_vm6, %v5109_v0, 0.0  ;;  %v5581_v0 = vld [vmem:[%s13027_s9 + $0x8] sm:$0xff] }
0x17fb   :  { %5114 = vadd.xlane.f32.xlu1 %v5113_v3  ;;  %v5110_v5 = vsel %vm1533_vm6, %v5108_v1, 0.0  ;;  %v8153_v3 = vld [vmem:[#allocation79] ss:$0 sm:$0xff] }
0x17fc   :  { %5111 = vadd.xlane.f32.xlu0 %v5110_v5 }
0x1888   :  { %v5115_v32 = vpop.xlane.xlu1 %5114 }
0x1889   :  { %v5117_v34 = vmul.f32 0.03125, %v5115_v32  ;;  %v5112_v23 = vpop.xlane.xlu0 %5111 }
0x188a   :  { %v5116_v25 = vmul.f32 0.03125, %v5112_v23 }
0x188b   :  { %v5119_v35 = vadd.f32 1e-05, %v5117_v34 }
0x188c   :  { %v5118_v39 = vadd.f32 1e-05, %v5116_v25 }
0x188d   :  { %9616 = vrsqrt.f32 %v5119_v35 }
0x188e   :  { %9618 = vrsqrt.f32 %v5118_v39 }
0x1897   :  { %v9617_v40 = vpop.eup %9616 }
0x1898   :  { %v9619_v44 = vpop.eup %9618  ;;  %v5123_v45 = vmul.f32 %v9617_v40, %v5107_v62  ;;  %v9279_v62 = vpack.c.bf16 %v5243_v61, %v5242_v55  ;;  %v8167_v40 = vld [vmem:[#allocation34] ss:$0 sm:$0xff] }
0x1899   :  { %v5122_v30 = vmul.f32 %v9619_v44, %v5106_v63  ;;  %v5580_v63 = vld [vmem:[%s13027_s9] sm:$0xff] }
0x189a   :  { %v5132_v46 = vmul.f32 %v8151_v43, %v5123_v45  ;;  %9280 = vmatprep.subr.bf16.mxu1 %v9279_v62  ;;  %v9299_v1 = vpack.c.bf16 %v5581_v0, %v5580_v63 }
0x189b   :  { %v5131_v48 = vmul.f32 %v8151_v43, %v5122_v30  ;;  %9282 = vmatpush3.bf16.msra.mxu1 %v9279_v62 }
0x189c   :  { %v12485_v56 = vadd.f32 %v8152_v47, %v5132_v46  ;;  %9300 = vmatprep.subr.bf16.mxu1 %v9299_v1 }
0x189d   :  { %v12483_v54 = vadd.f32 %v8152_v47, %v5131_v48  ;;  %v5401_v48 = vld [vmem:[#allocation10] sm:$0xff] }
0x189f   :  { %8866 = vmatprep.mubr.msk.f32.mxu0 %vm1533_vm6, %v12483_v54 }
0x18a0   :  { %8867 = vmatmul.mubr.msk.f32.vlgmr.msra.gmra.mrb[36].mxu0 %vm1533_vm6, %v12485_v56 }
0x18a1   :  { %9286 = vmatpush3.bf16.msra.mxu0 %v9283_v15  ;;  %8896 = vmatprep.mubr.msk.f32.mxu0 %vm1533_vm6, %v12172_v4 }
0x18a2   :  { %9288 = vmatprep.subr.bf16.mxu0 %v9287_v57 }
0x18a5   :  { %9290 = vmatpush3.bf16.msra.mxu0 %v9287_v57 }
0x18a6   :  { %9292 = vmatprep.subr.bf16.mxu0 %v9291_v51 }
0x18a8   :  { %8897 = vmatmul.mubr.msk.f32.vlgmr.msra.gmra.mrb[38].mxu0 %vm1533_vm6, %v12168_v2 }
0x18a9   :  { %9294 = vmatpush3.bf16.msra.mxu0 %v9291_v51  ;;  %8907 = vmatprep.mubr.msk.f32.mxu0 %vm1533_vm6, %v12172_v4 }
0x18aa   :  { %9296 = vmatprep.subr.bf16.mxu0 %v9295_v52 }
0x18ad   :  { %9298 = vmatpush3.bf16.msra.mxu0 %v9295_v52 }
0x18ae   :  { %8921 = vmatprep.subr.mxu0 %v11320_v37 }
0x18b0   :  { %8908 = vmatmul.mubr.msk.f32.vlgmr.msra.gmra.mrb[40].mxu0 %vm1533_vm6, %v12168_v2 }
0x18b1   :  { %8923 = vmatprep.mubr.msk.f32.mxu0 %vm11321_vm7, %v11320_v37 }
0x1973   :  { %v8868_v5 = vpop.f32.mrb[36].mxu0 }
0x1974   :  { %v5231_v6 = vadd.f32 %v8868_v5, %v8153_v3  ;;  %v5225_v7 = vpop.f32.mrb[37].mxu0 }
0x1975   :  { %v5226_v8 = vadd.f32 %v8153_v3, %v5225_v7 }
0x1976   :  { %v5235_v13 = vmax.f32 %v5231_v6, 0.0 }
0x1977   :  { %v5234_v11 = vmax.f32 %v5226_v8, 0.0 }
0x1979   :  { %8885 = vmatprep.mubr.msk.f32.mxu1 %vm2682_vm13, %v5234_v11 }
0x197a   :  { %8886 = vmatmul.mubr.msk.f32.vlgmr.msra.gmra.mrb[40].mxu1 %vm2682_vm13, %v5235_v13 }
0x197b   :  { %v8898_v15 = vpop.f32.mrb[38].mxu0  ;;  %9302 = vmatpush3.bf16.msra.mxu1 %v9299_v1  ;;  %8918 = vmatprep.mubr.msk.f32.mxu1 %vm1533_vm6, %v12172_v4 }
0x197c   :  { %v5485_v16 = vpop.f32.mrb[39].mxu0  ;;  %9304 = vmatprep.subr.bf16.mxu1 %v9303_v14  ;;  %v5491_v33 = vadd.f32 %v8898_v15, %v8161_v17 }
0x197d   :  { %v5486_v24 = vadd.f32 %v8161_v17, %v5485_v16 }
0x197e   :  { %v5991_v23 = vmul.f32 %v12184_v12, %v5491_v33  ;;  %v6082_v25 = vmul.f32 %v12190_v18, %v5491_v33 }
0x197f   :  { %9306 = vmatpush3.bf16.msra.mxu1 %v9303_v14  ;;  %v5666_v31 = vmul.f32 %v12184_v12, %v5486_v24  ;;  %v5757_v32 = vmul.f32 %v12190_v18, %v5486_v24 }
0x1980   :  { %8926 = vmatprep.subr.mxu1 %v11320_v37 }
0x1982   :  { %8919 = vmatmul.mubr.msk.f32.vlgmr.msra.gmra.mrb[42].mxu1 %vm1533_vm6, %v12168_v2 }
0x1983   :  { %v8909_v22 = vpop.f32.mrb[40].mxu0  ;;  %8928 = vmatprep.mubr.msk.f32.mxu1 %vm11321_vm7, %v11320_v37 }
0x1984   :  { %v5571_v28 = vpop.f32.mrb[41].mxu0  ;;  %v5577_v34 = vadd.f32 %v8909_v22, %v8164_v19 }
0x1985   :  { %v5572_v29 = vadd.f32 %v8164_v19, %v5571_v28  ;;  %v8156_v28 = vld [vmem:[%s13028_s22] ss:$0 sm:$0xff] }
0x1987   :  { %8922 = vmatpush3.xpose.msk.msra.mxu0 %vm1533_vm6, %v5572_v29 }
0x1988   :  { %8927 = vmatpush3.xpose.msk.msra.mxu1 %vm1533_vm6, %v5572_v29  ;;  %8931 = vmatprep.subr.mxu0 %v11320_v37 }
0x1989   :  { %8941 = vmatprep.subr.mxu1 %v11320_v37 }
0x198a   :  { %8924 = vmatmul.mubr.msk.f32.vlgmr.msra.gmra.mrb[42].mxu0 %vm1533_vm6, %v5666_v31 }
0x198b   :  { %8929 = vmatmul.mubr.msk.f32.vlgmr.msra.gmra.mrb[44].mxu1 %vm1533_vm6, %v5757_v32  ;;  %8933 = vmatprep.mubr.msk.f32.mxu0 %vm11321_vm7, %v11320_v37 }
0x198c   :  { %8942 = vmatpush3.xpose.msk.msra.mxu1 %vm1533_vm6, %v5577_v34  ;;  %8943 = vmatprep.mubr.msk.f32.mxu1 %vm11321_vm7, %v11320_v37 }
0x198d   :  { %8946 = vmatprep.subr.mxu1 %v11320_v37 }
0x198f   :  { %8944 = vmatmul.mubr.msk.f32.vlgmr.msra.gmra.mrb[46].mxu1 %vm1533_vm6, %v5991_v23  ;;  %v8122_v23 = vld [vmem:[#allocation62] ss:$0 sm:$0xff] }
0x1990   :  { %8947 = vmatpush3.xpose.msk.msra.mxu1 %vm1533_vm6, %v5577_v34  ;;  %8948 = vmatprep.mubr.msk.f32.mxu1 %vm11321_vm7, %v11320_v37 }
0x1993   :  { %8949 = vmatmul.mubr.msk.f32.vlgmr.msra.gmra.mrb[48].mxu1 %vm1533_vm6, %v6082_v25 }
0x1a4d   :  { %v8887_v35 = vpop.f32.mrb[40].mxu1 }
0x1a4e   :  { %v5323_v39 = vpop.f32.mrb[41].mxu1  ;;  %v5329_v32 = vadd.f32 %v8887_v35, %v8156_v28  ;;  %v4045_v35 = vadd.f32 %v12430_v26, %v8122_v23 }
0x1a55   :  { %v8920_v43 = vpop.f32.mrb[42].mxu1 }
0x1a56   :  { %v12542_v44 = vadd.f32 %v8920_v43, %v8167_v40  ;;  %v5657_v45 = vpop.f32.mrb[43].mxu1  ;;  %v4040_v43 = vadd.f32 %v8122_v23, %v12432_v27 }
0x1a57   :  { %v12544_v30 = vadd.f32 %v8167_v40, %v5657_v45  ;;  %v8088_v40 = vld [vmem:[#allocation43] ss:$0 sm:$0xff]  ;;  %v5324_v45 = vadd.f32 %v8156_v28, %v5323_v39  ;;  %v12578_v39 = vadd.f32 %v4045_v35, %v12373_v42 }
0x1a58   :  { %v12570_v27 = vadd.f32 %v4040_v43, %v12371_v41 }
0x1a59   :  { %v5844_v46 = vmul.f32 %v12190_v18, %v12544_v30  ;;  %v4053_v41 = vsel %vm1533_vm6, %v12578_v39, 0.0 }
0x1a5a   :  { %v4050_v26 = vsel %vm1533_vm6, %v12570_v27, 0.0 }
0x1a5b   :  { %8932 = vmatpush3.msra.mxu0 %v5844_v46 }
0x1a5c   :  { %8936 = vmatprep.subr.mxu0 %v11320_v37 }
0x1a5d   :  { %v5739_v47 = vpop.f32.mrb[42].mxu0 }
0x1a5e   :  { %v5743_v49 = vmul.f32 0.25, %v5739_v47  ;;  %v8925_v50 = vpop.f32.mrb[43].mxu0  ;;  %v5827_v57 = vpop.f32.mrb[44].mxu1  ;;  %v12559_v47 = vadd.f32 %v5329_v32, %v12485_v56  ;;  %v2761_v56 = vadd.f32 %v12324_v20, %v8088_v40 }
0x1a5f   :  { %v5831_v58 = vmul.f32 0.25, %v5827_v57  ;;  %v8930_v53 = vpop.f32.mrb[45].mxu1 }
0x1a60   :  { %v5744_v51 = vadd.f32 %v5743_v49, %v5401_v48  ;;  %v2756_v49 = vadd.f32 %v8088_v40, %v12326_v21  ;;  %v5337_v50 = vsel %vm1533_vm6, %v12559_v47, 0.0 }
0x1a61   :  { %v5832_v59 = vadd.f32 %v5831_v58, %v5401_v48  ;;  %v12567_v58 = vadd.f32 %v5324_v45, %v12483_v54  ;;  %v12588_v54 = vadd.f32 %v2761_v56, %v12267_v38 }
0x1a62   :  { %v6064_v60 = vpop.f32.mrb[46].mxu1  ;;  %v5745_v52 = vsel %vm1865_vm12, %v5744_v51, -inf  ;;  %v12581_v53 = vadd.f32 %v2756_v49, %v12265_v36 }
0x1a63   :  { %v6068_v55 = vmul.f32 0.25, %v6064_v60  ;;  %5746 = vmax.xlane.f32.xlu1 %v5745_v52  ;;  %v8945_v61 = vpop.f32.mrb[47].mxu1  ;;  %v5833_v62 = vsel %vm1865_vm12, %v5832_v59, -inf  ;;  %v5334_v21 = vsel %vm1533_vm6, %v12567_v58, 0.0  ;;  %v2769_v42 = vsel %vm1533_vm6, %v12588_v54, 0.0 }
0x1a64   :  { %5834 = vmax.xlane.f32.xlu0 %v5833_v62  ;;  %v2766_v20 = vsel %vm1533_vm6, %v12581_v53, 0.0 }
0x1a65   :  { %v6069_v63 = vadd.f32 %v6068_v55, %v5401_v48  ;;  %v5756_v55 = vmul.f32 %v12184_v12, %v12544_v30 }
0x1a66   :  { %v6152_v0 = vpop.f32.mrb[48].mxu1 }
0x1a67   :  { %v6156_v1 = vmul.f32 0.25, %v6152_v0  ;;  %v8950_v3 = vpop.f32.mrb[49].mxu1  ;;  %v6070_v5 = vsel %vm1865_vm12, %v6069_v63, -inf  ;;  %v6169_v0 = vmul.f32 %v12190_v18, %v12542_v44 }
0x1a68   :  { %6071 = vmax.xlane.f32.xlu1 %v6070_v5 }
0x1a69   :  { %v6157_v6 = vadd.f32 %v6156_v1, %v5401_v48  ;;  %v6081_v1 = vmul.f32 %v12184_v12, %v12542_v44 }
0x1a6b   :  { %v6158_v7 = vsel %vm1865_vm12, %v6157_v6, -inf }
0x1a6c   :  { %6159 = vmax.xlane.f32.xlu0 %v6158_v7  ;;  %v6317_v7 = vld [vmem:[%s13029_s23 + $0x8] sm:$0xff] }
0x1af0   :  { %v5747_v8 = vpop.xlane.xlu1 %5746 }
0x1af1   :  { %v5748_v9 = vsub.f32 %v5744_v51, %v5747_v8  ;;  %v5835_v10 = vpop.xlane.xlu0 %5834  ;;  %v6318_v8 = vld [vmem:[%s13029_s23 + $0x10] sm:$0xff] }
0x1af2   :  { %v5836_v11 = vsub.f32 %v5832_v59, %v5835_v10  ;;  %v6319_v10 = vld [vmem:[%s13029_s23 + $0x18] sm:$0xff] }
0x1af3   :  { %v5749_v13 = vmul.f32 1.442695, %v5748_v9 }
0x1af4   :  { %v5837_v14 = vmul.f32 1.442695, %v5836_v11  ;;  %v9311_v11 = vpack.c.bf16 %v6319_v10, %v6318_v8 }
0x1af5   :  { %9620 = vpow2.f32 %v5749_v13  ;;  %v6072_v15 = vpop.xlane.xlu1 %6071 }
0x1af6   :  { %9622 = vpow2.f32 %v5837_v14  ;;  %v6073_v16 = vsub.f32 %v6069_v63, %v6072_v15 }
0x1af8   :  { %v6074_v17 = vmul.f32 1.442695, %v6073_v16 }
0x1af9   :  { %v6160_v19 = vpop.xlane.xlu0 %6159 }
0x1afa   :  { %9624 = vpow2.f32 %v6074_v17  ;;  %v6161_v22 = vsub.f32 %v6157_v6, %v6160_v19  ;;  %v6316_v6 = vld [vmem:[%s13029_s23] sm:$0xff] }
0x1afb   :  { %v9307_v9 = vpack.c.bf16 %v6317_v7, %v6316_v6 }
0x1afc   :  { %v6162_v24 = vmul.f32 1.442695, %v6161_v22 }
0x1afd   :  { %9308 = vmatprep.subr.bf16.mxu1 %v9307_v9 }
0x1afe   :  { %9626 = vpow2.f32 %v6162_v24  ;;  %9310 = vmatpush3.bf16.msra.mxu1 %v9307_v9 }
0x1aff   :  { %v9621_v29 = vpop.eup %9620  ;;  %9312 = vmatprep.subr.bf16.mxu1 %v9311_v11 }
0x1b00   :  { %v9623_v31 = vpop.eup %9622  ;;  %v5751_v33 = vsel %vm1865_vm12, %v9621_v29, 0.0 }
0x1b01   :  { %5752 = vadd.xlane.f32.xlu1 %v5751_v33  ;;  %v5839_v34 = vsel %vm1865_vm12, %v9623_v31, 0.0 }
0x1b02   :  { %5840 = vadd.xlane.f32.xlu0 %v5839_v34  ;;  %9314 = vmatpush3.bf16.msra.mxu1 %v9311_v11 }
0x1b04   :  { %v9625_v25 = vpop.eup %9624 }
0x1b05   :  { %v6076_v46 = vsel %vm1865_vm12, %v9625_v25, 0.0 }
0x1b06   :  { %6077 = vadd.xlane.f32.xlu1 %v6076_v46 }
0x1b08   :  { %v9627_v48 = vpop.eup %9626 }
0x1b09   :  { %v6164_v57 = vsel %vm1865_vm12, %v9627_v48, 0.0 }
0x1b0a   :  { %5338 = vadd.xlane.f32.xlu1 %v5337_v50  ;;  %6165 = vadd.xlane.f32.xlu0 %v6164_v57 }
0x1b0e   :  { %5335 = vadd.xlane.f32.xlu0 %v5334_v21  ;;  %4051 = vadd.xlane.f32.xlu1 %v4050_v26 }
0x1b12   :  { %4054 = vadd.xlane.f32.xlu1 %v4053_v41  ;;  %2767 = vadd.xlane.f32.xlu0 %v2766_v20 }
0x1b16   :  { %2770 = vadd.xlane.f32.xlu0 %v2769_v42 }
0x1b8e   :  { %v5753_v36 = vpop.xlane.xlu1 %5752 }
0x1b8f   :  { %v5841_v51 = vpop.xlane.xlu0 %5840 }
0x1b90   :  { %9628 = vrcp.f32 %v5841_v51 }
0x1b91   :  { %9630 = vrcp.f32 %v5753_v36 }
0x1b93   :  { %v6078_v38 = vpop.xlane.xlu1 %6077 }
0x1b97   :  { %v6166_v59 = vpop.xlane.xlu0 %6165  ;;  %v5339_v16 = vpop.xlane.xlu1 %5338 }
0x1b98   :  { %9632 = vrcp.f32 %v6166_v59  ;;  %v5341_v22 = vmul.f32 0.03125, %v5339_v16 }
0x1b99   :  { %9634 = vrcp.f32 %v6078_v38 }
0x1b9a   :  { %v9629_v60 = vpop.eup %9628  ;;  %v12617_v33 = vsub.f32 %v12559_v47, %v5341_v22 }
0x1b9b   :  { %v5843_v52 = vmul.f32 %v9629_v60, %v9623_v31  ;;  %v9631_v61 = vpop.eup %9630  ;;  %v5336_v17 = vpop.xlane.xlu0 %5335  ;;  %v6546_v60 = vld [vmem:[%s13030_s3] sm:$0xff] }
0x1b9c   :  { %v5755_v62 = vmul.f32 %v9631_v61, %v9621_v29  ;;  %v4052_v19 = vpop.xlane.xlu1 %4051  ;;  %v5340_v28 = vmul.f32 0.03125, %v5336_v17  ;;  %v8182_v29 = vld [vmem:[#allocation31] ss:$0 sm:$0xff]  ;;  %v5345_v57 = vmul.f32 %v12617_v33, %v12617_v33  ;;  %v6549_v61 = vld [vmem:[%s13030_s3 + $0x18] sm:$0xff] }
0x1b9d   :  { %8934 = vmatmul.mubr.msk.f32.vlgmr.msra.gmra.mrb[44].mxu0 %vm1865_vm12, %v5843_v52  ;;  %v4056_v32 = vmul.f32 0.03125, %v4052_v19  ;;  %v6547_v52 = vld [vmem:[%s13030_s3 + $0x8] sm:$0xff] }
0x1b9e   :  { %8937 = vmatpush3.msra.mxu0 %v5756_v55  ;;  %8938 = vmatprep.mubr.msk.f32.mxu0 %vm11321_vm7, %v11320_v37  ;;  %v6548_v55 = vld [vmem:[%s13030_s3 + $0x10] sm:$0xff]  ;;  %v9323_v38 = vpack.c.bf16 %v6547_v52, %v6546_v60 }
0x1b9f   :  { %8951 = vmatprep.subr.mxu0 %v11320_v37  ;;  %v2768_v24 = vpop.xlane.xlu0 %2767  ;;  %v12625_v35 = vsub.f32 %v12570_v27, %v4056_v32  ;;  %v5349_v27 = vsel %vm1533_vm6, %v5345_v57, 0.0 }
0x1ba0   :  { %v4055_v40 = vpop.xlane.xlu1 %4054  ;;  %v2772_v43 = vmul.f32 0.03125, %v2768_v24  ;;  %9324 = vmatprep.subr.bf16.mxu1 %v9323_v38 }
0x1ba1   :  { %v4057_v50 = vmul.f32 0.03125, %v4055_v40  ;;  %v4060_v26 = vmul.f32 %v12625_v35, %v12625_v35 }
0x1ba2   :  { %v9633_v63 = vpop.eup %9632 }
0x1ba3   :  { %v6168_v30 = vmul.f32 %v9633_v63, %v9627_v48  ;;  %v9635_v3 = vpop.eup %9634  ;;  %v2771_v46 = vpop.xlane.xlu0 %2770 }
0x1ba4   :  { %v6080_v5 = vmul.f32 %v9635_v3, %v9625_v25  ;;  %v12620_v25 = vsub.f32 %v12567_v58, %v5340_v28  ;;  %v12631_v58 = vsub.f32 %v12581_v53, %v2772_v43  ;;  %v2773_v56 = vmul.f32 0.03125, %v2771_v46 }
0x1ba5   :  { %8939 = vmatmul.mubr.msk.f32.vlgmr.msra.gmra.mrb[44].mxu0 %vm1865_vm12, %v5755_v62  ;;  %v9327_v62 = vpack.c.bf16 %v6549_v61, %v6548_v55 }
0x1ba6   :  { %8952 = vmatpush3.msra.mxu0 %v6169_v0  ;;  %8953 = vmatprep.mubr.msk.f32.mxu0 %vm11321_vm7, %v11320_v37  ;;  %v12643_v53 = vsub.f32 %v12588_v54, %v2773_v56  ;;  %v2776_v20 = vmul.f32 %v12631_v58, %v12631_v58 }
0x1ba7   :  { %8956 = vmatprep.subr.mxu0 %v11320_v37 }
0x1ba8   :  { %v2778_v51 = vsel %vm1533_vm6, %v2776_v20, 0.0  ;;  %v2777_v54 = vmul.f32 %v12643_v53, %v12643_v53 }
0x1ba9   :  { %8954 = vmatmul.mubr.msk.f32.vlgmr.msra.gmra.mrb[46].mxu0 %vm1865_vm12, %v6168_v30 }
0x1baa   :  { %8957 = vmatpush3.msra.mxu0 %v6081_v1  ;;  %8958 = vmatprep.mubr.msk.f32.mxu0 %vm11321_vm7, %v11320_v37  ;;  %v2781_v59 = vsel %vm1533_vm6, %v2777_v54, 0.0 }
0x1bb1   :  { %8959 = vmatmul.mubr.msk.f32.vlgmr.msra.gmra.mrb[46].mxu0 %vm1865_vm12, %v6080_v5 }
0x1c78   :  { %v5987_v44 = vpop.f32.mrb[44].mxu0 }
0x1c79   :  { %v8940_v13 = vpop.f32.mrb[45].mxu0  ;;  %8969 = vmatprep.mubr.msk.f32.mxu1 %vm1533_vm6, %v5987_v44 }
0x1c84   :  { %v6312_v14 = vpop.f32.mrb[46].mxu0 }
0x1c85   :  { %v8960_v15 = vpop.f32.mrb[47].mxu0  ;;  %8970 = vmatmul.mubr.msk.f32.vlgmr.msra.gmra.mrb[50].mxu1 %vm1533_vm6, %v6312_v14 }
0x1c86   :  { %9326 = vmatpush3.bf16.msra.mxu1 %v9323_v38 }
0x1c87   :  { %9328 = vmatprep.subr.bf16.mxu1 %v9327_v62 }
0x1c8a   :  { %9330 = vmatpush3.bf16.msra.mxu1 %v9327_v62 }
0x1c8b   :  { %9005 = vmatprep.subr.mxu1 %v11320_v37 }
0x1d58   :  { %v8971_v31 = vpop.f32.mrb[50].mxu1 }
0x1d59   :  { %v6405_v34 = vadd.f32 %v8971_v31, %v8182_v29  ;;  %v6399_v23 = vpop.f32.mrb[51].mxu1 }
0x1d5a   :  { %v6400_v45 = vadd.f32 %v8182_v29, %v6399_v23 }
0x1d5b   :  { %v6409_v48 = vadd.f32 %v6405_v34, %v12168_v2  ;;  %v5344_v2 = vmul.f32 %v12620_v25, %v12620_v25 }
0x1d5c   :  { %v6408_v49 = vadd.f32 %v6400_v45, %v12172_v4  ;;  %v12637_v4 = vsub.f32 %v12578_v39, %v4057_v50  ;;  %v4062_v39 = vsel %vm1533_vm6, %v4060_v26, 0.0  ;;  %v8159_v45 = vld [vmem:[%s13031_s14] ss:$0 sm:$0xff] }
0x1d5d   :  { %v6413_v47 = vsel %vm1533_vm6, %v6409_v48, 0.0  ;;  %v5346_v41 = vsel %vm1533_vm6, %v5344_v2, 0.0 }
0x1d5e   :  { %6414 = vadd.xlane.f32.xlu1 %v6413_v47  ;;  %v6410_v21 = vsel %vm1533_vm6, %v6408_v49, 0.0  ;;  %v4061_v42 = vmul.f32 %v12637_v4, %v12637_v4 }
0x1d5f   :  { %6411 = vadd.xlane.f32.xlu0 %v6410_v21 }
0x1d60   :  { %v4065_v36 = vsel %vm1533_vm6, %v4061_v42, 0.0 }
0x1d62   :  { %5350 = vadd.xlane.f32.xlu1 %v5349_v27 }
0x1d63   :  { %5347 = vadd.xlane.f32.xlu0 %v5346_v41 }
0x1d66   :  { %4063 = vadd.xlane.f32.xlu1 %v4062_v39 }
0x1d67   :  { %2779 = vadd.xlane.f32.xlu0 %v2778_v51 }
0x1d6a   :  { %4066 = vadd.xlane.f32.xlu1 %v4065_v36  ;;  %v8125_v36 = vld [vmem:[#allocation68] ss:$0 sm:$0xff] }
0x1d6b   :  { %2782 = vadd.xlane.f32.xlu0 %v2781_v59  ;;  %v8091_v59 = vld [vmem:[#allocation49] ss:$0 sm:$0xff] }
0x1deb   :  { %v6415_v63 = vpop.xlane.xlu1 %6414 }
0x1dec   :  { %v6417_v0 = vmul.f32 0.03125, %v6415_v63  ;;  %v6412_v30 = vpop.xlane.xlu0 %6411 }
0x1ded   :  { %v6416_v1 = vmul.f32 0.03125, %v6412_v30 }
0x1dee   :  { %v12661_v3 = vsub.f32 %v6409_v48, %v6417_v0 }
0x1def   :  { %v12663_v5 = vsub.f32 %v6408_v49, %v6416_v1  ;;  %v5351_v6 = vpop.xlane.xlu1 %5350  ;;  %v8160_v49 = vld [vmem:[#allocation82] ss:$0 sm:$0xff] }
0x1df0   :  { %v5353_v7 = vmul.f32 0.03125, %v5351_v6  ;;  %v5348_v8 = vpop.xlane.xlu0 %5347  ;;  %v6421_v9 = vmul.f32 %v12661_v3, %v12661_v3 }
0x1df1   :  { %v5352_v10 = vmul.f32 0.03125, %v5348_v8  ;;  %v6420_v11 = vmul.f32 %v12663_v5, %v12663_v5 }
0x1df2   :  { %v5355_v44 = vadd.f32 1e-05, %v5353_v7  ;;  %v6425_v13 = vsel %vm1533_vm6, %v6421_v9, 0.0  ;;  %v6454_v7 = vld [vmem:[%s13032_s26] sm:$0xff] }
0x1df3   :  { %v5354_v14 = vadd.f32 1e-05, %v5352_v10  ;;  %6426 = vadd.xlane.f32.xlu1 %v6425_v13  ;;  %v4064_v15 = vpop.xlane.xlu1 %4063  ;;  %v6422_v16 = vsel %vm1533_vm6, %v6420_v11, 0.0 }
0x1df4   :  { %9636 = vrsqrt.f32 %v5355_v44  ;;  %v4068_v17 = vmul.f32 0.03125, %v4064_v15  ;;  %6423 = vadd.xlane.f32.xlu0 %v6422_v16  ;;  %v2780_v19 = vpop.xlane.xlu0 %2779  ;;  %v6456_v15 = vld [vmem:[%s13032_s26 + $0x10] sm:$0xff]  ;;  %v6457_v16 = vld [vmem:[%s13032_s26 + $0x18] sm:$0xff] }
0x1df5   :  { %9638 = vrsqrt.f32 %v5354_v14  ;;  %v2784_v22 = vmul.f32 0.03125, %v2780_v19  ;;  %v9319_v19 = vpack.c.bf16 %v6457_v16, %v6456_v15 }
0x1df6   :  { %v4070_v24 = vadd.f32 1e-05, %v4068_v17 }
0x1df7   :  { %v2786_v28 = vadd.f32 1e-05, %v2784_v22  ;;  %v4067_v29 = vpop.xlane.xlu1 %4066 }
0x1df8   :  { %v4069_v31 = vmul.f32 0.03125, %v4067_v29  ;;  %v2783_v32 = vpop.xlane.xlu0 %2782  ;;  %9640 = vrsqrt.f32 %v4070_v24 }
0x1df9   :  { %v2785_v34 = vmul.f32 0.03125, %v2783_v32  ;;  %9642 = vrsqrt.f32 %v2786_v28  ;;  %v6638_v32 = vld [vmem:[%s13033_s30] sm:$0xff] }
0x1dfa   :  { %v4071_v23 = vadd.f32 1e-05, %v4069_v31 }
0x1dfb   :  { %v2787_v40 = vadd.f32 1e-05, %v2785_v34  ;;  %v6639_v34 = vld [vmem:[%s13033_s30 + $0x8] sm:$0xff] }
0x1dfc   :  { %9644 = vrsqrt.f32 %v4071_v23 }
0x1dfd   :  { %9646 = vrsqrt.f32 %v2787_v40  ;;  %v9331_v40 = vpack.c.bf16 %v6639_v34, %v6638_v32 }
0x1dfe   :  { %v9637_v43 = vpop.eup %9636 }
0x1dff   :  { %v9639_v46 = vpop.eup %9638  ;;  %v5359_v48 = vmul.f32 %v9637_v43, %v12617_v33 }
0x1e00   :  { %v5358_v50 = vmul.f32 %v9639_v46, %v12620_v25 }
0x1e01   :  { %v5368_v47 = vmul.f32 %v8159_v45, %v5359_v48 }
0x1e02   :  { %v5367_v57 = vmul.f32 %v8159_v45, %v5358_v50  ;;  %v9641_v56 = vpop.eup %9640 }
0x1e03   :  { %v5377_v21 = vadd.f32 %v8160_v49, %v5368_v47  ;;  %v9643_v2 = vpop.eup %9642  ;;  %v4074_v51 = vmul.f32 %v9641_v56, %v12625_v35  ;;  %v8092_v35 = vld [vmem:[#allocation47] ss:$0 sm:$0xff] }
0x1e04   :  { %v5376_v27 = vadd.f32 %v8160_v49, %v5367_v57  ;;  %v2790_v33 = vmul.f32 %v9643_v2, %v12631_v58  ;;  %v8126_v58 = vld [vmem:[#allocation67] ss:$0 sm:$0xff]  ;;  %v8185_v57 = vld [vmem:[#allocation22] ss:$0 sm:$0xff] }
0x1e05   :  { %v5388_v26 = vsel %vm1533_vm6, %v5377_v21, 0.0  ;;  %v4083_v62 = vmul.f32 %v8125_v36, %v4074_v51 }
0x1e06   :  { %v9645_v41 = vpop.eup %9644  ;;  %v5389_v20 = vrot.slane %v5388_v26, 4  ;;  %v5378_v39 = vsel %vm1533_vm6, %v5376_v27, 0.0  ;;  %v2799_v61 = vmul.f32 %v8091_v59, %v2790_v33 }
0x1e07   :  { %v9647_v42 = vpop.eup %9646  ;;  %v5379_v54 = vrot.slane %v5378_v39, 4  ;;  %v4075_v25 = vmul.f32 %v9645_v41, %v12637_v4  ;;  %v6455_v4 = vld [vmem:[%s13032_s26 + $0x8] sm:$0xff] }
0x1e08   :  { %v2791_v60 = vmul.f32 %v9647_v42, %v12643_v53  ;;  %v5390_v52 = vadd.f32 %v5389_v20, %v5388_v26  ;;  %v9315_v9 = vpack.c.bf16 %v6455_v4, %v6454_v7  ;;  %v2808_v10 = vadd.f32 %v8092_v35, %v2799_v61  ;;  %v8186_v26 = vld [vmem:[#allocation20] ss:$0 sm:$0xff]  ;;  %v8193_v61 = vld [vmem:[#allocation16] ss:$0 sm:$0xff] }
0x1e09   :  { %v5380_v55 = vadd.f32 %v5379_v54, %v5378_v39  ;;  %v4084_v0 = vmul.f32 %v8125_v36, %v4075_v25  ;;  %v4092_v53 = vadd.f32 %v8126_v58, %v4083_v62  ;;  %v6640_v20 = vld [vmem:[%s13033_s30 + $0x10] sm:$0xff]  ;;  %v6641_v39 = vld [vmem:[%s13033_s30 + $0x18] sm:$0xff] }
0x1e0a   :  { %v5391_v38 = vrot.slane %v5390_v52, 2  ;;  %v2800_v30 = vmul.f32 %v8091_v59, %v2791_v60  ;;  %9316 = vmatprep.subr.bf16.mxu0 %v9315_v9  ;;  %v9335_v33 = vpack.c.bf16 %v6641_v39, %v6640_v20  ;;  %v8187_v59 = vld [vmem:[#allocation14] ss:$0 sm:$0xff] }
0x1e0b   :  { %v5381_v63 = vrot.slane %v5380_v55, 2  ;;  %v4093_v13 = vadd.f32 %v8126_v58, %v4084_v0  ;;  %9318 = vmatpush3.bf16.msra.mxu0 %v9315_v9  ;;  %v5397_v28 = vadd.f32 %v4092_v53, %v2808_v10 }
0x1e0c   :  { %v5392_v1 = vadd.f32 %v5391_v38, %v5390_v52  ;;  %v2809_v44 = vadd.f32 %v8092_v35, %v2800_v30  ;;  %9320 = vmatprep.subr.bf16.mxu0 %v9319_v19 }
0x1e0d   :  { %v5382_v6 = vadd.f32 %v5381_v63, %v5380_v55 }
0x1e0e   :  { %v5393_v8 = vrot.slane %v5392_v1, 1  ;;  %v5398_v29 = vadd.f32 %v4093_v13, %v2809_v44 }
0x1e0f   :  { %v5383_v11 = vrot.slane %v5382_v6, 1  ;;  %9322 = vmatpush3.bf16.msra.mxu0 %v9319_v19 }
0x1e10   :  { %v5394_v14 = vadd.f32 %v5393_v8, %v5392_v1  ;;  %9332 = vmatprep.subr.bf16.mxu0 %v9331_v40 }
0x1e11   :  { %v5384_v17 = vadd.f32 %v5383_v11, %v5382_v6 }
0x1e12   :  { %v5395_v22 = vmul.f32 0.125, %v5394_v14 }
0x1e13   :  { %v5386_v24 = vmul.f32 0.125, %v5384_v17 }
0x1e14   :  { %v5400_v23 = vadd.f32 %v5398_v29, %v5395_v22 }
0x1e15   :  { %v5399_v31 = vadd.f32 %v5397_v28, %v5386_v24 }
0x1e17   :  { %8991 = vmatprep.mubr.msk.f32.mxu1 %vm1533_vm6, %v5399_v31 }
0x1e18   :  { %8992 = vmatmul.mubr.msk.f32.vlgmr.msra.gmra.mrb[52].mxu1 %vm1533_vm6, %v5400_v23 }
0x1e19   :  { %9007 = vmatprep.mubr.msk.f32.mxu1 %vm11321_vm7, %v11320_v37 }
0x1e80   :  { %v6427_v43 = vpop.xlane.xlu1 %6426 }
0x1e81   :  { %v6429_v45 = vmul.f32 0.03125, %v6427_v43  ;;  %v6424_v46 = vpop.xlane.xlu0 %6423 }
0x1e82   :  { %v6428_v48 = vmul.f32 0.03125, %v6424_v46 }
0x1e83   :  { %v6431_v49 = vadd.f32 1e-05, %v6429_v45 }
0x1e84   :  { %v6430_v50 = vadd.f32 1e-05, %v6428_v48 }
0x1e85   :  { %9648 = vrsqrt.f32 %v6431_v49 }
0x1e86   :  { %9650 = vrsqrt.f32 %v6430_v50 }
0x1e8f   :  { %v9649_v47 = vpop.eup %9648 }
0x1e90   :  { %v9651_v56 = vpop.eup %9650  ;;  %v6435_v21 = vmul.f32 %v9649_v47, %v12661_v3  ;;  %v8190_v3 = vld [vmem:[#allocation11] ss:$0 sm:$0xff] }
0x1e91   :  { %v6434_v2 = vmul.f32 %v9651_v56, %v12663_v5 }
0x1e92   :  { %v6444_v27 = vmul.f32 %v8185_v57, %v6435_v21 }
0x1e93   :  { %v6443_v41 = vmul.f32 %v8185_v57, %v6434_v2 }
0x1e94   :  { %v12696_v51 = vadd.f32 %v8186_v26, %v6444_v27 }
0x1e95   :  { %v12694_v42 = vadd.f32 %v8186_v26, %v6443_v41 }
0x1e97   :  { %8980 = vmatprep.mubr.msk.f32.mxu0 %vm1533_vm6, %v12694_v42 }
0x1e98   :  { %8981 = vmatmul.mubr.msk.f32.vlgmr.msra.gmra.mrb[48].mxu0 %vm1533_vm6, %v12696_v51 }
0x1e99   :  { %9334 = vmatpush3.bf16.msra.mxu0 %v9331_v40  ;;  %9002 = vmatprep.mubr.msk.f32.mxu0 %vm1533_vm6, %v5399_v31 }
0x1e9a   :  { %9336 = vmatprep.subr.bf16.mxu0 %v9335_v33 }
0x1e9d   :  { %9338 = vmatpush3.bf16.msra.mxu0 %v9335_v33 }
0x1e9e   :  { %9015 = vmatprep.subr.mxu0 %v11320_v37 }
0x1ea0   :  { %9003 = vmatmul.mubr.msk.f32.vlgmr.msra.gmra.mrb[50].mxu0 %vm1533_vm6, %v5400_v23 }
0x1ea1   :  { %9017 = vmatprep.mubr.msk.f32.mxu0 %vm11321_vm7, %v11320_v37 }
0x1eeb   :  { %v8993_v5 = vpop.f32.mrb[52].mxu1 }
0x1eec   :  { %v6635_v54 = vadd.f32 %v8993_v5, %v8190_v3  ;;  %v6629_v36 = vpop.f32.mrb[53].mxu1 }
0x1eed   :  { %v6630_v25 = vadd.f32 %v8190_v3, %v6629_v36 }
0x1eef   :  { %9006 = vmatpush3.xpose.msk.msra.mxu1 %vm1533_vm6, %v6630_v25 }
0x1ef0   :  { %9010 = vmatprep.subr.mxu1 %v11320_v37 }
0x1f6b   :  { %v8982_v60 = vpop.f32.mrb[48].mxu0 }
0x1f6c   :  { %v6537_v52 = vpop.f32.mrb[49].mxu0  ;;  %v6543_v62 = vadd.f32 %v8982_v60, %v8187_v59 }
0x1f6d   :  { %v6538_v55 = vadd.f32 %v8187_v59, %v6537_v52 }
0x1f6e   :  { %v7047_v1 = vmul.f32 %v12184_v12, %v6543_v62  ;;  %v7137_v7 = vmul.f32 %v12190_v18, %v6543_v62  ;;  %v7370_v62 = vld [vmem:[%s13034_s0] sm:$0xff] }
0x1f6f   :  { %v6724_v38 = vmul.f32 %v12184_v12, %v6538_v55  ;;  %v6814_v63 = vmul.f32 %v12190_v18, %v6538_v55 }
0x1f71   :  { %9008 = vmatmul.mubr.msk.f32.vlgmr.msra.gmra.mrb[54].mxu1 %vm1533_vm6, %v6724_v38 }
0x1f72   :  { %9011 = vmatpush3.xpose.msk.msra.mxu1 %vm1533_vm6, %v6630_v25  ;;  %9012 = vmatprep.mubr.msk.f32.mxu1 %vm11321_vm7, %v11320_v37 }
0x1f73   :  { %v9004_v0 = vpop.f32.mrb[50].mxu0  ;;  %9025 = vmatprep.subr.mxu1 %v11320_v37 }
0x1f74   :  { %v12716_v30 = vadd.f32 %v9004_v0, %v8193_v61  ;;  %v6715_v35 = vpop.f32.mrb[51].mxu0  ;;  %v7372_v0 = vld [vmem:[%s13034_s0 + $0x10] sm:$0xff] }
0x1f75   :  { %v12718_v58 = vadd.f32 %v8193_v61, %v6715_v35  ;;  %9013 = vmatmul.mubr.msk.f32.vlgmr.msra.gmra.mrb[56].mxu1 %vm1533_vm6, %v6814_v63  ;;  %v7371_v63 = vld [vmem:[%s13034_s0 + $0x8] sm:$0xff] }
0x1f76   :  { %9026 = vmatpush3.xpose.msk.msra.mxu1 %vm1533_vm6, %v6635_v54  ;;  %9027 = vmatprep.mubr.msk.f32.mxu1 %vm11321_vm7, %v11320_v37  ;;  %v7223_v52 = vmul.f32 %v12190_v18, %v12716_v30  ;;  %v7136_v38 = vmul.f32 %v12184_v12, %v12716_v30  ;;  %v9339_v35 = vpack.c.bf16 %v7371_v63, %v7370_v62 }
0x1f77   :  { %v6900_v6 = vmul.f32 %v12190_v18, %v12718_v58  ;;  %9030 = vmatprep.subr.mxu1 %v11320_v37 }
0x1f79   :  { %9016 = vmatpush3.msra.mxu0 %v6900_v6  ;;  %9028 = vmatmul.mubr.msk.f32.vlgmr.msra.gmra.mrb[58].mxu1 %vm1533_vm6, %v7047_v1 }
0x1f7a   :  { %9031 = vmatpush3.xpose.msk.msra.mxu1 %vm1533_vm6, %v6635_v54  ;;  %9032 = vmatprep.mubr.msk.f32.mxu1 %vm11321_vm7, %v11320_v37  ;;  %v6813_v54 = vmul.f32 %v12184_v12, %v12718_v58  ;;  %v7373_v58 = vld [vmem:[%s13034_s0 + $0x18] sm:$0xff] }
0x1f7b   :  { %9020 = vmatprep.subr.mxu0 %v11320_v37  ;;  %v9343_v1 = vpack.c.bf16 %v7373_v58, %v7372_v0  ;;  %9340 = vmatprep.subr.bf16.mxu1 %v9339_v35 }
0x1f7d   :  { %9033 = vmatmul.mubr.msk.f32.vlgmr.msra.gmra.mrb[60].mxu1 %vm1533_vm6, %v7137_v7  ;;  %v8208_v7 = vld [vmem:[#allocation13] ss:$0 sm:$0xff] }
0x1f7e   :  { %9342 = vmatpush3.bf16.msra.mxu1 %v9339_v35 }
0x1f7f   :  { %9344 = vmatprep.subr.bf16.mxu1 %v9343_v1 }
0x1f82   :  { %9346 = vmatpush3.bf16.msra.mxu1 %v9343_v1 }
0x2044   :  { %v6797_v4 = vpop.f32.mrb[54].mxu1 }
0x2045   :  { %v6801_v8 = vmul.f32 0.25, %v6797_v4  ;;  %v9009_v9 = vpop.f32.mrb[55].mxu1 }
0x2047   :  { %v6802_v10 = vsel %vm1865_vm12, %v6801_v8, -inf }
0x2048   :  { %6803 = vmax.xlane.f32.xlu1 %v6802_v10  ;;  %v6884_v53 = vpop.f32.mrb[56].mxu1 }
0x2049   :  { %v6888_v11 = vmul.f32 0.25, %v6884_v53  ;;  %v9014_v44 = vpop.f32.mrb[57].mxu1 }
0x204b   :  { %v6889_v13 = vsel %vm1865_vm12, %v6888_v11, -inf }
0x204c   :  { %6890 = vmax.xlane.f32.xlu0 %v6889_v13  ;;  %v7120_v14 = vpop.f32.mrb[58].mxu1 }
0x204d   :  { %v7124_v15 = vmul.f32 0.25, %v7120_v14  ;;  %v9029_v16 = vpop.f32.mrb[59].mxu1 }
0x204f   :  { %v7125_v17 = vsel %vm1865_vm12, %v7124_v15, -inf }
0x2050   :  { %7126 = vmax.xlane.f32.xlu1 %v7125_v17  ;;  %v7207_v19 = vpop.f32.mrb[60].mxu1 }
0x2051   :  { %v7211_v22 = vmul.f32 0.25, %v7207_v19  ;;  %v9034_v24 = vpop.f32.mrb[61].mxu1 }
0x2053   :  { %v7212_v28 = vsel %vm1865_vm12, %v7211_v22, -inf }
0x2054   :  { %7213 = vmax.xlane.f32.xlu0 %v7212_v28 }
0x20d5   :  { %v6804_v29 = vpop.xlane.xlu1 %6803 }
0x20d6   :  { %v6805_v31 = vsub.f32 %v6801_v8, %v6804_v29  ;;  %v7508_v29 = vld [vmem:[%s13035_s21] sm:$0xff] }
0x20d8   :  { %v6806_v32 = vmul.f32 1.442695, %v6805_v31  ;;  %v7509_v31 = vld [vmem:[%s13035_s21 + $0x8] sm:$0xff] }
0x20d9   :  { %v6891_v34 = vpop.xlane.xlu0 %6890 }
0x20da   :  { %9652 = vpow2.f32 %v6806_v32  ;;  %v6892_v23 = vsub.f32 %v6888_v11, %v6891_v34  ;;  %v9347_v32 = vpack.c.bf16 %v7509_v31, %v7508_v29  ;;  %v7510_v34 = vld [vmem:[%s13035_s21 + $0x10] sm:$0xff] }
0x20dc   :  { %v6893_v40 = vmul.f32 1.442695, %v6892_v23  ;;  %v7511_v23 = vld [vmem:[%s13035_s21 + $0x18] sm:$0xff] }
0x20dd   :  { %v7127_v43 = vpop.xlane.xlu1 %7126 }
0x20de   :  { %9654 = vpow2.f32 %v6893_v40  ;;  %v7128_v45 = vsub.f32 %v7124_v15, %v7127_v43  ;;  %v9351_v40 = vpack.c.bf16 %v7511_v23, %v7510_v34  ;;  %v7602_v43 = vld [vmem:[%s13036_s28] sm:$0xff]  ;;  %v8219_v34 = vld [vmem:[#allocation28] ss:$0 sm:$0xff] }
0x20e0   :  { %v7129_v46 = vmul.f32 1.442695, %v7128_v45  ;;  %v7603_v45 = vld [vmem:[%s13036_s28 + $0x8] sm:$0xff] }
0x20e1   :  { %v7214_v48 = vpop.xlane.xlu0 %7213 }
0x20e2   :  { %9656 = vpow2.f32 %v7129_v46  ;;  %v7215_v49 = vsub.f32 %v7211_v22, %v7214_v48  ;;  %v7604_v46 = vld [vmem:[%s13036_s28 + $0x10] sm:$0xff]  ;;  %v9355_v48 = vpack.c.bf16 %v7603_v45, %v7602_v43  ;;  %v8220_v43 = vld [vmem:[#allocation26] ss:$0 sm:$0xff] }
0x20e4   :  { %v9653_v50 = vpop.eup %9652  ;;  %v7216_v47 = vmul.f32 1.442695, %v7215_v49  ;;  %v7605_v49 = vld [vmem:[%s13036_s28 + $0x18] sm:$0xff]  ;;  %9356 = vmatprep.subr.bf16.mxu1 %v9355_v48 }
0x20e5   :  { %v6808_v57 = vsel %vm1865_vm12, %v9653_v50, 0.0 }
0x20e6   :  { %9658 = vpow2.f32 %v7216_v47  ;;  %6809 = vadd.xlane.f32.xlu1 %v6808_v57  ;;  %v7606_v47 = vld [vmem:[%s13036_s28 + $0x20] sm:$0xff]  ;;  %v7607_v57 = vld [vmem:[%s13036_s28 + $0x28] sm:$0xff] }
0x20e8   :  { %v9655_v56 = vpop.eup %9654 }
0x20e9   :  { %v6895_v21 = vsel %vm1865_vm12, %v9655_v56, 0.0 }
0x20ea   :  { %6896 = vadd.xlane.f32.xlu0 %v6895_v21 }
0x20ec   :  { %v9657_v2 = vpop.eup %9656 }
0x20ed   :  { %v7131_v27 = vsel %vm1865_vm12, %v9657_v2, 0.0 }
0x20ee   :  { %7132 = vadd.xlane.f32.xlu1 %v7131_v27 }
0x20f0   :  { %v9659_v26 = vpop.eup %9658 }
0x20f1   :  { %v7218_v41 = vsel %vm1865_vm12, %v9659_v26, 0.0 }
0x20f2   :  { %7219 = vadd.xlane.f32.xlu0 %v7218_v41 }
0x2173   :  { %v6810_v39 = vpop.xlane.xlu1 %6809 }
0x2177   :  { %v6897_v20 = vpop.xlane.xlu0 %6896 }
0x2178   :  { %9660 = vrcp.f32 %v6897_v20 }
0x2179   :  { %9662 = vrcp.f32 %v6810_v39 }
0x217b   :  { %v7133_v36 = vpop.xlane.xlu1 %7132 }
0x217f   :  { %v7220_v33 = vpop.xlane.xlu0 %7219 }
0x2180   :  { %9664 = vrcp.f32 %v7220_v33  ;;  %v8211_v33 = vld [vmem:[#allocation25] ss:$0 sm:$0xff] }
0x2181   :  { %9666 = vrcp.f32 %v7133_v36 }
0x2182   :  { %v9661_v3 = vpop.eup %9660 }
0x2183   :  { %v6899_v5 = vmul.f32 %v9661_v3, %v9655_v56  ;;  %v9663_v25 = vpop.eup %9662  ;;  %v9363_v56 = vpack.c.bf16 %v7607_v57, %v7606_v47 }
0x2184   :  { %v6812_v59 = vmul.f32 %v9663_v25, %v9653_v50  ;;  %v9359_v50 = vpack.c.bf16 %v7605_v49, %v7604_v46  ;;  %v8212_v25 = vld [vmem:[#allocation23] ss:$0 sm:$0xff] }
0x2185   :  { %9018 = vmatmul.mubr.msk.f32.vlgmr.msra.gmra.mrb[52].mxu0 %vm1865_vm12, %v6899_v5 }
0x2186   :  { %9021 = vmatpush3.msra.mxu0 %v6813_v54  ;;  %9022 = vmatprep.mubr.msk.f32.mxu0 %vm11321_vm7, %v11320_v37 }
0x2187   :  { %9035 = vmatprep.subr.mxu0 %v11320_v37 }
0x218a   :  { %v9665_v60 = vpop.eup %9664 }
0x218b   :  { %v7222_v55 = vmul.f32 %v9665_v60, %v9659_v26  ;;  %v9667_v18 = vpop.eup %9666 }
0x218c   :  { %v7135_v61 = vmul.f32 %v9667_v18, %v9657_v2 }
0x218d   :  { %9023 = vmatmul.mubr.msk.f32.vlgmr.msra.gmra.mrb[52].mxu0 %vm1865_vm12, %v6812_v59 }
0x218e   :  { %9036 = vmatpush3.msra.mxu0 %v7223_v52  ;;  %9037 = vmatprep.mubr.msk.f32.mxu0 %vm11321_vm7, %v11320_v37 }
0x218f   :  { %9040 = vmatprep.subr.mxu0 %v11320_v37 }
0x2191   :  { %9038 = vmatmul.mubr.msk.f32.vlgmr.msra.gmra.mrb[54].mxu0 %vm1865_vm12, %v7222_v55  ;;  %v7608_v55 = vld [vmem:[%s13036_s28 + $0x30] sm:$0xff] }
0x2192   :  { %9041 = vmatpush3.msra.mxu0 %v7136_v38  ;;  %9042 = vmatprep.mubr.msk.f32.mxu0 %vm11321_vm7, %v11320_v37  ;;  %v7609_v38 = vld [vmem:[%s13036_s28 + $0x38] sm:$0xff] }
0x2193   :  { %9348 = vmatprep.subr.bf16.mxu0 %v9347_v32  ;;  %v9367_v18 = vpack.c.bf16 %v7609_v38, %v7608_v55 }
0x2199   :  { %9043 = vmatmul.mubr.msk.f32.vlgmr.msra.gmra.mrb[54].mxu0 %vm1865_vm12, %v7135_v61  ;;  %v8213_v61 = vld [vmem:[#allocation17] ss:$0 sm:$0xff] }
0x219a   :  { %9350 = vmatpush3.bf16.msra.mxu0 %v9347_v32 }
0x219b   :  { %9352 = vmatprep.subr.bf16.mxu0 %v9351_v40 }
0x219e   :  { %9354 = vmatpush3.bf16.msra.mxu0 %v9351_v40 }
0x2260   :  { %v7043_v12 = vpop.f32.mrb[52].mxu0 }
0x2261   :  { %v9024_v30 = vpop.f32.mrb[53].mxu0  ;;  %9053 = vmatprep.mubr.msk.f32.mxu1 %vm1533_vm6, %v7043_v12  ;;  %v8216_v12 = vld [vmem:[#allocation19] ss:$0 sm:$0xff] }
0x226c   :  { %v7366_v6 = vpop.f32.mrb[54].mxu0 }
0x226d   :  { %v9044_v37 = vpop.f32.mrb[55].mxu0  ;;  %9054 = vmatmul.mubr.msk.f32.vlgmr.msra.gmra.mrb[62].mxu1 %vm1533_vm6, %v7366_v6 }
0x226e   :  { %9358 = vmatpush3.bf16.msra.mxu1 %v9355_v48 }
0x226f   :  { %9360 = vmatprep.subr.bf16.mxu1 %v9359_v50 }
0x2272   :  { %9362 = vmatpush3.bf16.msra.mxu1 %v9359_v50 }
0x2273   :  { %9364 = vmatprep.subr.bf16.mxu1 %v9363_v56 }
0x2276   :  { %9366 = vmatpush3.bf16.msra.mxu1 %v9363_v56 }
0x2277   :  { %9368 = vmatprep.subr.bf16.mxu1 %v9367_v18 }
0x227a   :  { %9370 = vmatpush3.bf16.msra.mxu1 %v9367_v18 }
0x2340   :  { %v9055_v4 = vpop.f32.mrb[62].mxu1 }
0x2341   :  { %v7459_v8 = vadd.f32 %v9055_v4, %v8208_v7  ;;  %v7453_v9 = vpop.f32.mrb[63].mxu1 }
0x2342   :  { %v7454_v10 = vadd.f32 %v8208_v7, %v7453_v9 }
0x2343   :  { %v7463_v53 = vadd.f32 %v7459_v8, %v12696_v51 }
0x2344   :  { %v7462_v11 = vadd.f32 %v7454_v10, %v12694_v42 }
0x2345   :  { %v7467_v44 = vsel %vm1533_vm6, %v7463_v53, 0.0 }
0x2346   :  { %7468 = vadd.xlane.f32.xlu1 %v7467_v44  ;;  %v7464_v13 = vsel %vm1533_vm6, %v7462_v11, 0.0 }
0x2347   :  { %7465 = vadd.xlane.f32.xlu0 %v7464_v13 }
0x23d3   :  { %v7469_v14 = vpop.xlane.xlu1 %7468 }
0x23d4   :  { %v7471_v15 = vmul.f32 0.03125, %v7469_v14  ;;  %v7466_v16 = vpop.xlane.xlu0 %7465 }
0x23d5   :  { %v7470_v17 = vmul.f32 0.03125, %v7466_v16 }
0x23d6   :  { %v7473_v19 = vsub.f32 %v7463_v53, %v7471_v15 }
0x23d7   :  { %v7472_v22 = vsub.f32 %v7462_v11, %v7470_v17 }
0x23d8   :  { %v7475_v24 = vmul.f32 %v7473_v19, %v7473_v19 }
0x23d9   :  { %v7474_v51 = vmul.f32 %v7472_v22, %v7472_v22 }
0x23da   :  { %v7479_v42 = vsel %vm1533_vm6, %v7475_v24, 0.0 }
0x23db   :  { %7480 = vadd.xlane.f32.xlu1 %v7479_v42  ;;  %v7476_v28 = vsel %vm1533_vm6, %v7474_v51, 0.0 }
0x23dc   :  { %7477 = vadd.xlane.f32.xlu0 %v7476_v28 }
0x2468   :  { %v7481_v21 = vpop.xlane.xlu1 %7480 }
0x2469   :  { %v7483_v2 = vmul.f32 0.03125, %v7481_v21  ;;  %v7478_v27 = vpop.xlane.xlu0 %7477 }
0x246a   :  { %v7482_v26 = vmul.f32 0.03125, %v7478_v27 }
0x246b   :  { %v7485_v41 = vadd.f32 1e-05, %v7483_v2 }
0x246c   :  { %v7484_v20 = vadd.f32 1e-05, %v7482_v26 }
0x246d   :  { %9668 = vrsqrt.f32 %v7485_v41 }
0x246e   :  { %9670 = vrsqrt.f32 %v7484_v20 }
0x2477   :  { %v9669_v39 = vpop.eup %9668 }
0x2478   :  { %v9671_v3 = vpop.eup %9670  ;;  %v7489_v5 = vmul.f32 %v9669_v39, %v7473_v19 }
0x2479   :  { %v7488_v54 = vmul.f32 %v9671_v3, %v7472_v22 }
0x247a   :  { %v7498_v36 = vmul.f32 %v8211_v33, %v7489_v5  ;;  %v7788_v5 = vld [vmem:[%s13037_s6] sm:$0xff] }
0x247b   :  { %v7497_v59 = vmul.f32 %v8211_v33, %v7488_v54  ;;  %v7789_v54 = vld [vmem:[%s13037_s6 + $0x8] sm:$0xff] }
0x247c   :  { %v7507_v52 = vadd.f32 %v8212_v25, %v7498_v36  ;;  %v9371_v36 = vpack.c.bf16 %v7789_v54, %v7788_v5 }
0x247d   :  { %v7506_v60 = vadd.f32 %v8212_v25, %v7497_v59  ;;  %v7790_v25 = vld [vmem:[%s13037_s6 + $0x10] sm:$0xff]  ;;  %v7791_v59 = vld [vmem:[%s13037_s6 + $0x18] sm:$0xff] }
0x247e   :  { %9372 = vmatprep.subr.bf16.mxu0 %v9371_v36 }
0x247f   :  { %9064 = vmatprep.mubr.msk.f32.mxu0 %vm1533_vm6, %v7506_v60 }
0x2480   :  { %9065 = vmatmul.mubr.msk.f32.vlgmr.msra.gmra.mrb[56].mxu0 %vm1533_vm6, %v7507_v52 }
0x2481   :  { %9374 = vmatpush3.bf16.msra.mxu0 %v9371_v36 }
0x2553   :  { %v9066_v62 = vpop.f32.mrb[56].mxu0 }
0x2554   :  { %v7597_v63 = vadd.f32 %v9066_v62, %v8213_v61  ;;  %v7591_v0 = vpop.f32.mrb[57].mxu0 }
0x2555   :  { %v7592_v35 = vadd.f32 %v8213_v61, %v7591_v0  ;;  %v8221_v0 = vld [vmem:[#allocation85] ss:$0 sm:$0xff] }
0x2556   :  { %v7601_v1 = vmax.f32 %v7597_v63, 0.0 }
0x2557   :  { %v7600_v58 = vmax.f32 %v7592_v35, 0.0 }
0x2559   :  { %9083 = vmatprep.mubr.msk.f32.mxu1 %vm2682_vm13, %v7600_v58 }
0x255a   :  { %9084 = vmatmul.mubr.msk.f32.vlgmr.msra.gmra.mrb[64].mxu1 %vm2682_vm13, %v7601_v1 }
0x262d   :  { %v9085_v30 = vpop.f32.mrb[64].mxu1 }
0x262e   :  { %v7695_v6 = vadd.f32 %v9085_v30, %v8216_v12  ;;  %v7689_v37 = vpop.f32.mrb[65].mxu1  ;;  %v8222_v30 = vld [vmem:[#allocation83] ss:$0 sm:$0xff] }
0x262f   :  { %v7690_v7 = vadd.f32 %v8216_v12, %v7689_v37 }
0x2630   :  { %v7699_v4 = vadd.f32 %v7695_v6, %v7507_v52 }
0x2631   :  { %v7698_v8 = vadd.f32 %v7690_v7, %v7506_v60  ;;  %v9375_v60 = vpack.c.bf16 %v7791_v59, %v7790_v25 }
0x2632   :  { %v7703_v9 = vsel %vm1533_vm6, %v7699_v4, 0.0 }
0x2633   :  { %7704 = vadd.xlane.f32.xlu1 %v7703_v9  ;;  %v7700_v10 = vsel %vm1533_vm6, %v7698_v8, 0.0  ;;  %9376 = vmatprep.subr.bf16.mxu0 %v9375_v60 }
0x2634   :  { %7701 = vadd.xlane.f32.xlu0 %v7700_v10  ;;  %9378 = vmatpush3.bf16.msra.mxu0 %v9375_v60 }
0x26c0   :  { %v7705_v53 = vpop.xlane.xlu1 %7704 }
0x26c1   :  { %v7707_v11 = vmul.f32 0.03125, %v7705_v53  ;;  %v7702_v44 = vpop.xlane.xlu0 %7701 }
0x26c2   :  { %v7706_v13 = vmul.f32 0.03125, %v7702_v44 }
0x26c3   :  { %v7709_v14 = vsub.f32 %v7699_v4, %v7707_v11  ;;  %v8223_v4 = vld [vmem:[#allocation86] ss:$0 sm:$0xff] }
0x26c4   :  { %v7708_v15 = vsub.f32 %v7698_v8, %v7706_v13 }
0x26c5   :  { %v7711_v16 = vmul.f32 %v7709_v14, %v7709_v14 }
0x26c6   :  { %v7710_v17 = vmul.f32 %v7708_v15, %v7708_v15 }
0x26c7   :  { %v7715_v19 = vsel %vm1533_vm6, %v7711_v16, 0.0 }
0x26c8   :  { %7716 = vadd.xlane.f32.xlu1 %v7715_v19  ;;  %v7712_v22 = vsel %vm1533_vm6, %v7710_v17, 0.0 }
0x26c9   :  { %7713 = vadd.xlane.f32.xlu0 %v7712_v22 }
0x2755   :  { %v7717_v24 = vpop.xlane.xlu1 %7716 }
0x2756   :  { %v7719_v51 = vmul.f32 0.03125, %v7717_v24  ;;  %v7714_v42 = vpop.xlane.xlu0 %7713 }
0x2757   :  { %v7718_v28 = vmul.f32 0.03125, %v7714_v42 }
0x2758   :  { %v7721_v29 = vadd.f32 1e-05, %v7719_v51 }
0x2759   :  { %v7720_v31 = vadd.f32 1e-05, %v7718_v28 }
0x275a   :  { %9672 = vrsqrt.f32 %v7721_v29 }
0x275b   :  { %9674 = vrsqrt.f32 %v7720_v31 }
0x2764   :  { %v9673_v32 = vpop.eup %9672 }
0x2765   :  { %v9675_v23 = vpop.eup %9674  ;;  %v7725_v40 = vmul.f32 %v9673_v32, %v7709_v14 }
0x2766   :  { %v7724_v45 = vmul.f32 %v9675_v23, %v7708_v15 }
0x2767   :  { %v7734_v46 = vmul.f32 %v8219_v34, %v7725_v40 }
0x2768   :  { %v7733_v48 = vmul.f32 %v8219_v34, %v7724_v45 }
0x2769   :  { %v7743_v49 = vadd.f32 %v8220_v43, %v7734_v46 }
0x276a   :  { %v7742_v50 = vadd.f32 %v8220_v43, %v7733_v48 }
0x276b   :  { %v7747_v47 = vsel %vm1533_vm6, %v7743_v49, 0.0 }
0x276c   :  { %7748 = vadd.xlane.f32.xlu1 %v7747_v47  ;;  %v7744_v57 = vsel %vm1533_vm6, %v7742_v50, 0.0 }
0x276d   :  { %7745 = vadd.xlane.f32.xlu0 %v7744_v57 }
0x27f9   :  { %v7749_v56 = vpop.xlane.xlu1 %7748 }
0x27fa   :  { %v7751_v21 = vmul.f32 0.03125, %v7749_v56  ;;  %v7746_v2 = vpop.xlane.xlu0 %7745 }
0x27fb   :  { %v7750_v27 = vmul.f32 0.03125, %v7746_v2 }
0x27fc   :  { %v7753_v26 = vsub.f32 %v7743_v49, %v7751_v21 }
0x27fd   :  { %v7752_v41 = vsub.f32 %v7742_v50, %v7750_v27 }
0x27fe   :  { %v7755_v20 = vmul.f32 %v7753_v26, %v7753_v26 }
0x27ff   :  { %v7754_v39 = vmul.f32 %v7752_v41, %v7752_v41 }
0x2800   :  { %v7759_v33 = vsel %vm1533_vm6, %v7755_v20, 0.0 }
0x2801   :  { %7760 = vadd.xlane.f32.xlu1 %v7759_v33  ;;  %v7756_v3 = vsel %vm1533_vm6, %v7754_v39, 0.0 }
0x2802   :  { %7757 = vadd.xlane.f32.xlu0 %v7756_v3 }
0x288e   :  { %v7761_v52 = vpop.xlane.xlu1 %7760 }
0x288f   :  { %v7763_v55 = vmul.f32 0.03125, %v7761_v52  ;;  %v7758_v38 = vpop.xlane.xlu0 %7757 }
0x2890   :  { %v7762_v18 = vmul.f32 0.03125, %v7758_v38 }
0x2891   :  { %v7765_v61 = vadd.f32 1e-05, %v7763_v55 }
0x2892   :  { %v7764_v62 = vadd.f32 1e-05, %v7762_v18 }
0x2893   :  { %9676 = vrsqrt.f32 %v7765_v61 }
0x2894   :  { %9678 = vrsqrt.f32 %v7764_v62 }
0x289d   :  { %v9677_v63 = vpop.eup %9676 }
0x289e   :  { %v9679_v35 = vpop.eup %9678  ;;  %v7769_v58 = vmul.f32 %v9677_v63, %v7753_v26 }
0x289f   :  { %v7768_v1 = vmul.f32 %v9679_v35, %v7752_v41 }
0x28a0   :  { %v7778_v12 = vmul.f32 %v8221_v0, %v7769_v58 }
0x28a1   :  { %v7777_v6 = vmul.f32 %v8221_v0, %v7768_v1 }
0x28a2   :  { %v7787_v7 = vadd.f32 %v8222_v30, %v7778_v12 }
0x28a3   :  { %v7786_v37 = vadd.f32 %v8222_v30, %v7777_v6 }
0x28a5   :  { %9094 = vmatprep.mubr.msk.f32.mxu0 %vm1533_vm6, %v7786_v37 }
0x28a6   :  { %9095 = vmatmul.mubr.msk.f32.vlgmr.msra.gmra.mrb[58].mxu0 %vm1533_vm6, %v7787_v7 }
0x2979   :  { %v9096_v8 = vpop.f32.mrb[58].mxu0 }
0x297a   :  { %v7877_v9 = vadd.f32 %v9096_v8, %v8223_v4  ;;  %v7871_v10 = vpop.f32.mrb[59].mxu0 }
0x297b   :  { %v7872_v53 = vadd.f32 %v8223_v4, %v7871_v10 }
0x297c   :  { %v7883_v11 = vsel %vm1343_vm5, %v7877_v9, -inf }
0x297d   :  { %7884 = vmax.xlane.f32.xlu1 %v7883_v11  ;;  %v7880_v44 = vsel %vm1343_vm5, %v7872_v53, -inf }
0x297e   :  { %7881 = vmax.xlane.f32.xlu0 %v7880_v44 }
0x2a0a   :  { %v7885_v13 = vpop.xlane.xlu1 %7884 }
0x2a0b   :  { %v7887_v14 = vsub.f32 %v7877_v9, %v7885_v13  ;;  %v7882_v15 = vpop.xlane.xlu0 %7881 }
0x2a0c   :  { %v7886_v16 = vsub.f32 %v7872_v53, %v7882_v15 }
0x2a0d   :  { %v7890_v17 = vmul.f32 1.442695, %v7887_v14 }
0x2a0e   :  { %v7888_v19 = vmul.f32 1.442695, %v7886_v16 }
0x2a0f   :  { %9680 = vpow2.f32 %v7890_v17 }
0x2a10   :  { %9682 = vpow2.f32 %v7888_v19 }
0x2a19   :  { %v9681_v22 = vpop.eup %9680 }
0x2a1a   :  { %v9683_v24 = vpop.eup %9682  ;;  %v7895_v51 = vsel %vm1343_vm5, %v9681_v22, 0.0 }
0x2a1b   :  { %7896 = vadd.xlane.f32.xlu1 %v7895_v51  ;;  %v7892_v42 = vsel %vm1343_vm5, %v9683_v24, 0.0 }
0x2a1c   :  { %7893 = vadd.xlane.f32.xlu0 %v7892_v42 }
0x2aa8   :  { %v7897_v28 = vpop.xlane.xlu1 %7896 }
0x2aa9   :  { %9684 = vrcp.f32 %v7897_v28  ;;  %v7894_v29 = vpop.xlane.xlu0 %7893 }
0x2aaa   :  { %9686 = vrcp.f32 %v7894_v29 }
0x2ab3   :  { %v9685_v31 = vpop.eup %9684 }
0x2ab4   :  { %v9687_v32 = vpop.eup %9686  ;;  %v7901_v34 = vmul.f32 %v9685_v31, %v9681_v22 }
0x2ab5   :  { %v7899_v23 = vmul.f32 %v9687_v32, %v9683_v24 }
0x2ab6   :  { %7903 = vst.msk [vmem:[#allocation98 + $0x8] sm:$0xff] %vm1343_vm5, %v7901_v34 }
0x2ab7   :  { %7902 = vst.msk [vmem:[#allocation98] sm:$0xff] %vm1343_vm5, %v7899_v23 }
0x2ab8   :  { %11085 = shalt.err (!%p11082_p4)
}
0x2ab9   :  { %s11086_s5 = scalar_lea.hbm %s11791_s27, 256 }
0x2aba   :  { %p11087_p5 = scmp.ne.s32.totalorder %s11791_s27, %s11086_s5  ;;  %p11090_p6 = scmp.lt.u32.totalorder %s11086_s5, %s11791_s27 }
0x2abc   :  { %p11092_p7 = pnand %p11090_p6, %p11087_p5 }
0x2abe   :  { %11095 = shalt.err (!%p11092_p7)
}
0x2abf   :  { %7915 = dma.vmem_to_hbm [thread:$0]  %s7910_s19, 256, %s11791_s27, [#allocation4], %s11256_s11, %s11256_s11, %s11257_s15  }
0x2ac0   :  { %11160 = dma.done.wait [#allocation4], 256  }
0x2ac1   :  { %11161 = vsyncadd [#allocation4], 4294967040 }
0x2ac2   :  { %7919 = vsyncpa [#allocation3], 1 }
0x2ac3   :  { %7920 = vsyncpa [#allocation6], 1 }
0x2ac4   :  { %7921 = vsyncpa [#allocation9], 1 }
0x2ac5   :  { %7922 = vsyncpa [#allocation12], 1 }
0x2ac6   :  { %7923 = vsyncpa [#allocation15], 1 }
0x2ac7   :  { %7924 = vsyncpa [#allocation18], 1 }
0x2ac8   :  { %7925 = vsyncpa [#allocation21], 1 }
0x2ac9   :  { %7926 = vsyncpa [#allocation24], 1 }
0x2aca   :  { %7927 = vsyncpa [#allocation27], 1 }
0x2acb   :  { %7928 = vsyncpa [#allocation30], 1 }
0x2acc   :  { %7929 = vsyncpa [#allocation33], 1 }
0x2acd   :  { %7930 = vsyncpa [#allocation36], 1 }
0x2ace   :  { %7931 = vsyncpa [#allocation39], 1 }
0x2acf   :  { %7932 = vsyncpa [#allocation42], 1 }
0x2ad0   :  { %7933 = vsyncpa [#allocation45], 1 }
0x2ad1   :  { %7934 = vsyncpa [#allocation48], 1 }
0x2ad2   :  { %7935 = vsyncpa [#allocation51], 1 }
0x2ad3   :  { %7936 = vsyncpa [#allocation54], 1 }
0x2ad4   :  { %7937 = vsyncpa [#allocation57], 1 }
0x2ad5   :  { %7938 = vsyncpa [#allocation60], 1 }
0x2ad6   :  { %7939 = vsyncpa [#allocation63], 1 }
0x2ad7   :  { %7940 = vsyncpa [#allocation66], 1 }
0x2ad8   :  { %7941 = vsyncpa [#allocation69], 1 }
0x2ad9   :  { %7942 = vsyncpa [#allocation72], 1 }
0x2ada   :  { %7943 = vsyncpa [#allocation75], 1 }
0x2adb   :  { %7944 = vsyncpa [#allocation78], 1 }
0x2adc   :  { %7945 = vsyncpa [#allocation81], 1 }
0x2add   :  { %7946 = vsyncpa [#allocation84], 1 }
0x2ade   :  { %7947 = vsyncpa [#allocation87], 1 }
0x2adf   :  { %7948 = vsyncpa [#allocation90], 1 }
0x2ae0   :  { %7949 = vsyncpa [#allocation93], 1 }
0x2ae1   :  { %7950 = vsyncpa [#allocation96], 1 }
0x2ae2   :  { %7951 = vsyncpa [#allocation4], 1 }

</bundles_post_ra>
